<compile_context>
chip_gen: v6e
topology: v6e:2x2x1
jax: 0.10.0
libtpu: 0.0.40
codegen_flags: <defaults>
</compile_context>

<pallas_src>
import jax
import jax.numpy as jnp
from jax.experimental import pallas as pl
from jax.experimental.pallas import tpu as pltpu


# ----------------------------------------------------------------------------
# Kernel
# ----------------------------------------------------------------------------
def _pool2x2(x):
    """2x2 max pool over the two LEADING (untiled) spatial dims."""
    H, W, NO, F = x.shape
    x = jnp.max(x.reshape(H // 2, 2, W, NO, F), axis=1)
    x = jnp.max(x.reshape(H // 2, W // 2, 2, NO, F), axis=2)
    return x


def _make_kernel(H, W, n_obj, n_blocks, F):
    """Returns the fused forward kernel for one batch element (grid step)."""

    def kernel(col1_ref, tmask_ref, w1_ref, wrest_ref, shift_ref, o_ref):
        NO = n_obj  # NO == 8 keeps every reshape sublane-tile aligned.

        # ---- Block 1: single dense matmul on the wrapper-packed im2col. ----
        col1 = col1_ref[0]                                    # (H*W*NO, K1) bf16
        y = jnp.dot(col1, w1_ref[...], preferred_element_type=jnp.float32)
        y = jnp.maximum(y + shift_ref[0:1, :], 0.0)           # folded-BN + ReLU
        x = _pool2x2(y.reshape(H, W, NO, F))                  # (H/2, W/2, NO, F)

        # ---- Blocks 2..n: 9 tile-aligned K=F dots, f32 accumulation. ----
        for blk in range(1, n_blocks):
            Hc, Wc = x.shape[0], x.shape[1]
            # Halo via thin zero slabs on the leading dims (no scratch, no
            # interior re-zeroing, no store/reload round trip).
            zcol = jnp.zeros((Hc, 1, NO, F), jnp.float32)
            zrow = jnp.zeros((1, Wc + 2, NO, F), jnp.float32)
            xp = jnp.concatenate([zcol, x, zcol], axis=1)
            xp = jnp.concatenate([zrow, xp, zrow], axis=0)    # (Hc+2, Wc+2, NO, F)

            wblk = wrest_ref[blk - 1]                         # (9, F, F) bf16
            acc = None
            for kh in range(3):
                for kw in range(3):
                    p = xp[kh:kh + Hc, kw:kw + Wc]            # (Hc, Wc, NO, F)
                    p = p.reshape(Hc * Wc * NO, F).astype(jnp.bfloat16)
                    d = jnp.dot(p, wblk[kh * 3 + kw],
                                preferred_element_type=jnp.float32)
                    acc = d if acc is None else acc + d
            yb = jnp.maximum(acc + shift_ref[blk:blk + 1, :], 0.0)
            x = _pool2x2(yb.reshape(Hc, Wc, NO, F))

        # ---- Prototypes: one (2, NO) x (NO, F) dot, mask pre-normalised. ----
        emb = x.reshape(NO, F)                                # final spatial is 1x1
        proto = jnp.dot(tmask_ref[0], emb, preferred_element_type=jnp.float32)
        o_ref[0] = proto                                      # rows = [pos, neg]

    return kernel


# ----------------------------------------------------------------------------
# Wrapper
# ----------------------------------------------------------------------------
def ecg_copy_speaker_forward(feats, targets, params):
    """feats: (B, n_obj, C, H, W); targets: (B, n_obj) in {0, 1}."""
    B, n_obj, C, H, W = feats.shape
    assert H == W, "square spatial assumed"
    n_blocks = len(params)
    F = params[0][0].shape[-1]
    assert n_blocks >= 2

    # Spatial must stay even at every block and end at exactly 1x1 so the
    # flatten matches PyTorch's NCHW .view(NB, -1).
    s = H
    for _ in range(n_blocks):
        assert s % 2 == 0, "spatial size must stay even at every block"
        s //= 2
    assert s == 1, "final spatial must be 1x1"

    x = feats.astype(jnp.float32)

    # ---- Block-1 im2col, packed once in the wrapper (layout plumbing). ----
    xpad = jnp.pad(x, ((0, 0), (0, 0), (0, 0), (1, 1), (1, 1)))
    taps = [xpad[:, :, :, kh:kh + H, kw:kw + W]
            for kh in range(3) for kw in range(3)]            # 9 x (B,NO,C,H,W)
    col = jnp.stack(taps, axis=2)                             # (B, NO, 9, C, H, W)
    col = col.transpose(0, 4, 5, 1, 2, 3)                     # (B, H, W, NO, 9, C)
    col = col.reshape(B, H * W * n_obj, 9 * C)                # rows = (h, w, obj)
    K1 = ((9 * C + 7) // 8) * 8                               # pad K for clean DMA
    col1 = jnp.pad(col, ((0, 0), (0, 0), (0, K1 - 9 * C))).astype(jnp.bfloat16)

    # ---- Weights: fold BN scale, im2col (kh, kw, cin) order, bf16. ----------
    w1 = (params[0][0] * params[0][1][0]).reshape(9 * C, F)
    w1 = jnp.pad(w1, ((0, K1 - 9 * C), (0, 0))).astype(jnp.bfloat16)   # (K1, F)
    wrest = jnp.stack(
        [(p[0] * p[1][0]).reshape(9, F, F) for p in params[1:]],
        axis=0).astype(jnp.bfloat16)                          # (n_blocks-1, 9, F, F)
    shift = jnp.concatenate([p[2] for p in params], axis=0)   # (n_blocks, F) f32

    # ---- Pre-normalised prototype mask: row0 = pos mean, row1 = neg mean. ---
    t = targets.astype(jnp.float32)
    n_pos = jnp.maximum(t.sum(axis=1, keepdims=True), 1.0)
    n_neg = jnp.maximum((1.0 - t).sum(axis=1, keepdims=True), 1.0)
    tmask = jnp.stack([t / n_pos, (1.0 - t) / n_neg], axis=1)  # (B, 2, n_obj)

    kernel = _make_kernel(H, W, n_obj, n_blocks, F)
    M1 = H * W * n_obj

    out = pl.pallas_call(
        kernel,
        out_shape=jax.ShapeDtypeStruct((B, 2, F), jnp.float32),
        grid=(B,),
        in_specs=[
            pl.BlockSpec((1, M1, K1), lambda b: (b, 0, 0)),               # col1
            pl.BlockSpec((1, 2, n_obj), lambda b: (b, 0, 0)),             # tmask
            pl.BlockSpec((K1, F), lambda b: (0, 0)),                      # w1
            pl.BlockSpec((n_blocks - 1, 9, F, F), lambda b: (0, 0, 0, 0)),  # wrest
            pl.BlockSpec((n_blocks, F), lambda b: (0, 0)),                # shift
        ],
        out_specs=pl.BlockSpec((1, 2, F), lambda b: (b, 0, 0)),
        compiler_params=pltpu.CompilerParams(dimension_semantics=("parallel",)),
    )(col1, tmask, w1, wrest, shift)

    # dropout (eval mode) == identity.
    return out.reshape(B, 2 * F)


def init_params(key, in_ch=3, hidden=32, n_blocks=4):
    """Deterministic synthetic conv + folded-BN parameters."""
    params = []
    ch = in_ch
    for _ in range(n_blocks):
        key, k1, k2, k3, k4, k5 = jax.random.split(key, 6)
        w = jax.random.normal(k1, (3, 3, ch, hidden), jnp.float32) / jnp.sqrt(9.0 * ch)
        b = 0.1 * jax.random.normal(k2, (hidden,), jnp.float32)
        gamma = 1.0 + 0.1 * jax.random.normal(k3, (hidden,), jnp.float32)
        beta = 0.1 * jax.random.normal(k4, (hidden,), jnp.float32)
        r_mean = 0.1 * jax.random.normal(k5, (hidden,), jnp.float32)
        r_var = jnp.ones((hidden,), jnp.float32)
        scale = gamma / jnp.sqrt(r_var + 1e-5)
        shift = beta - r_mean * scale + b * scale
        params.append((w, scale.reshape(1, hidden), shift.reshape(1, hidden)))
        ch = hidden
    return params


# ----------------------------------------------------------------------------
# Pure-JAX f32 reference (same math as the PyTorch module, eval mode)
# ----------------------------------------------------------------------------
def _reference(feats, targets, params):
    B, n_obj, C, H, W = feats.shape
    NB = B * n_obj
    x = feats.reshape(NB, C, H, W).transpose(2, 3, 0, 1).astype(jnp.float32)
    for (w, scale, shift) in params:
        Hc, Wc, _, Cin = x.shape
        xpad = jnp.pad(x, ((1, 1), (1, 1), (0, 0), (0, 0)))
        Cout = w.shape[-1]
        acc = jnp.zeros((Hc, Wc, NB, Cout), jnp.float32)
        for kh in range(3):
            for kw in range(3):
                patch = xpad[kh:kh + Hc, kw:kw + Wc]
                acc = acc + jnp.einsum("hwnc,co->hwno", patch, w[kh, kw],
                                       precision=jax.lax.Precision.HIGHEST,
                                       preferred_element_type=jnp.float32)
        y = jnp.maximum(acc * scale[0] + shift[0], 0.0)
        y = y.reshape(Hc // 2, 2, Wc, NB, Cout).max(axis=1)
        y = y.reshape(Hc // 2, Wc // 2, 2, NB, Cout).max(axis=2)
        x = y
    emb = x.reshape(NB, -1).reshape(B, n_obj, -1)
    tgt = targets.astype(jnp.float32)
    rev = 1.0 - tgt
    pos = (emb * tgt[:, :, None]).sum(1)
    neg = (emb * rev[:, :, None]).sum(1)
    n_pos = jnp.maximum(tgt.sum(1, keepdims=True), 1.0)
    n_neg = jnp.maximum(rev.sum(1, keepdims=True), 1.0)
    return jnp.concatenate([pos / n_pos, neg / n_neg], axis=1)


if __name__ == "__main__":
    key = jax.random.PRNGKey(0)
    k_feat, k_tgt, k_par = jax.random.split(key, 3)

    batch, n_obj, C, H, W = 2, 8, 3, 16, 16        # n_obj = 8 -> sublane aligned
    hidden, n_blocks = 32, 4
    feats = jax.random.normal(k_feat, (batch, n_obj, C, H, W), jnp.float32)
    targets = jax.random.bernoulli(k_tgt, 0.5, (batch, n_obj)).astype(jnp.float32)

    params = init_params(k_par, in_ch=C, hidden=hidden, n_blocks=n_blocks)

    out = jax.block_until_ready(ecg_copy_speaker_forward(feats, targets, params))
    ref = jax.block_until_ready(_reference(feats, targets, params))

    assert out.shape == (batch, 2 * hidden), out.shape
    assert bool(jnp.all(jnp.isfinite(out)))
    # Kernel uses bf16 MXU operands (f32 accumulate); reference is pure f32,
    # so the tolerance is bf16-level rather than the previous 1e-3.
    assert jnp.allclose(out, ref, rtol=3e-2, atol=3e-2), (
        float(jnp.max(jnp.abs(out - ref))))

    print("KERNEL_OK")
</pallas_src>

<mosaic_0001>
module attributes {stable_mosaic.version = 11 : i64} {
  func.func @kernel(%arg0: i32, %arg1: memref<1x2048x32xbf16, #tpu.memory_space<vmem>>, %arg2: memref<1x2x8xf32, #tpu.memory_space<vmem>>, %arg3: memref<32x32xbf16, #tpu.memory_space<vmem>>, %arg4: memref<3x9x32x32xbf16, #tpu.memory_space<vmem>>, %arg5: memref<4x32xf32, #tpu.memory_space<vmem>>, %arg6: memref<1x2x32xf32, #tpu.memory_space<vmem>>) attributes {dimension_semantics = [#tpu.dimension_semantics<parallel>], iteration_bounds = array<i64: 2>, scalar_prefetch = 0 : i64, scratch_operands = 0 : i64, tpu.core_type = #tpu.core_type<tc>, window_params = [{transform_indices = @transform_0, window_bounds = array<i64: 1, 2048, 32>}, {transform_indices = @transform_1, window_bounds = array<i64: 1, 2, 8>}, {pipeline_mode = #tpu.pipeline_mode<synchronous>, transform_indices = @transform_2, window_bounds = array<i64: 32, 32>}, {pipeline_mode = #tpu.pipeline_mode<synchronous>, transform_indices = @transform_3, window_bounds = array<i64: 3, 9, 32, 32>}, {pipeline_mode = #tpu.pipeline_mode<synchronous>, transform_indices = @transform_4, window_bounds = array<i64: 4, 32>}, {transform_indices = @transform_5, window_bounds = array<i64: 1, 2, 32>}]} {
    %c0 = arith.constant 0 : index
    %c0_0 = arith.constant 0 : index
    %c0_1 = arith.constant 0 : index
    %0 = vector.load %arg1[%c0, %c0_0, %c0_1] : memref<1x2048x32xbf16, #tpu.memory_space<vmem>>, vector<1x2048x32xbf16>
    %1 = vector.shape_cast %0 : vector<1x2048x32xbf16> to vector<2048x32xbf16>
    %c0_2 = arith.constant 0 : index
    %c0_3 = arith.constant 0 : index
    %2 = vector.load %arg3[%c0_2, %c0_3] : memref<32x32xbf16, #tpu.memory_space<vmem>>, vector<32x32xbf16>
    %cst = arith.constant dense<0.000000e+00> : vector<2048x32xf32>
    %3 = tpu.matmul %1, %2, %cst {dimension_numbers = #tpu.dot_dimension_numbers<[1], [0], [0], [1], [0, 0, 1, 1], [], []>} : vector<2048x32xbf16>, vector<32x32xbf16>, vector<2048x32xf32> -> vector<2048x32xf32>
    %c0_4 = arith.constant 0 : index
    %c0_5 = arith.constant 0 : index
    %4 = vector.load %arg5[%c0_4, %c0_5] : memref<4x32xf32, #tpu.memory_space<vmem>>, vector<1x32xf32>
    %5 = vector.broadcast %4 : vector<1x32xf32> to vector<2048x32xf32>
    %6 = arith.addf %3, %5 : vector<2048x32xf32>
    %cst_6 = arith.constant 0.000000e+00 : f32
    %7 = vector.broadcast %cst_6 : f32 to vector<2048x32xf32>
    %8 = arith.maximumf %6, %7 : vector<2048x32xf32>
    %9 = vector.shape_cast %8 : vector<2048x32xf32> to vector<16x16x8x32xf32>
    %10 = vector.shape_cast %9 : vector<16x16x8x32xf32> to vector<8x2x16x8x32xf32>
    %cst_7 = arith.constant dense<0xFF800000> : vector<8x16x8x32xf32>
    %11 = vector.multi_reduction <maximumf>, %10, %cst_7 [1] : vector<8x2x16x8x32xf32> to vector<8x16x8x32xf32>
    %12 = vector.shape_cast %11 : vector<8x16x8x32xf32> to vector<8x8x2x8x32xf32>
    %cst_8 = arith.constant dense<0xFF800000> : vector<8x8x8x32xf32>
    %13 = vector.multi_reduction <maximumf>, %12, %cst_8 [2] : vector<8x8x2x8x32xf32> to vector<8x8x8x32xf32>
    %cst_9 = arith.constant 0.000000e+00 : f32
    %14 = vector.broadcast %cst_9 : f32 to vector<8x1x8x32xf32>
    %cst_10 = arith.constant 0.000000e+00 : f32
    %15 = vector.broadcast %cst_10 : f32 to vector<1x10x8x32xf32>
    %16 = tpu.concatenate %14, %13, %14 in 1 : vector<8x1x8x32xf32>, vector<8x8x8x32xf32>, vector<8x1x8x32xf32> -> vector<8x10x8x32xf32>
    %17 = tpu.concatenate %15, %16, %15 in 0 : vector<1x10x8x32xf32>, vector<8x10x8x32xf32>, vector<1x10x8x32xf32> -> vector<10x10x8x32xf32>
    %c0_11 = arith.constant 0 : index
    %c0_12 = arith.constant 0 : index
    %c0_13 = arith.constant 0 : index
    %c0_14 = arith.constant 0 : index
    %18 = vector.load %arg4[%c0_11, %c0_12, %c0_13, %c0_14] : memref<3x9x32x32xbf16, #tpu.memory_space<vmem>>, vector<1x9x32x32xbf16>
    %19 = vector.shape_cast %18 : vector<1x9x32x32xbf16> to vector<9x32x32xbf16>
    %20 = vector.extract_strided_slice %17 {offsets = [0, 0, 0, 0], sizes = [8, 8, 8, 32], strides = [1, 1, 1, 1]} : vector<10x10x8x32xf32> to vector<8x8x8x32xf32>
    %21 = vector.shape_cast %20 : vector<8x8x8x32xf32> to vector<512x32xf32>
    %22 = arith.truncf %21 : vector<512x32xf32> to vector<512x32xbf16>
    %23 = vector.extract_strided_slice %19 {offsets = [0, 0, 0], sizes = [1, 32, 32], strides = [1, 1, 1]} : vector<9x32x32xbf16> to vector<1x32x32xbf16>
    %24 = vector.shape_cast %23 : vector<1x32x32xbf16> to vector<32x32xbf16>
    %cst_15 = arith.constant dense<0.000000e+00> : vector<512x32xf32>
    %25 = tpu.matmul %22, %24, %cst_15 {dimension_numbers = #tpu.dot_dimension_numbers<[1], [0], [0], [1], [0, 0, 1, 1], [], []>} : vector<512x32xbf16>, vector<32x32xbf16>, vector<512x32xf32> -> vector<512x32xf32>
    %26 = vector.extract_strided_slice %17 {offsets = [0, 1, 0, 0], sizes = [8, 8, 8, 32], strides = [1, 1, 1, 1]} : vector<10x10x8x32xf32> to vector<8x8x8x32xf32>
    %27 = vector.shape_cast %26 : vector<8x8x8x32xf32> to vector<512x32xf32>
    %28 = arith.truncf %27 : vector<512x32xf32> to vector<512x32xbf16>
    %29 = vector.extract_strided_slice %19 {offsets = [1, 0, 0], sizes = [1, 32, 32], strides = [1, 1, 1]} : vector<9x32x32xbf16> to vector<1x32x32xbf16>
    %30 = vector.shape_cast %29 : vector<1x32x32xbf16> to vector<32x32xbf16>
    %cst_16 = arith.constant dense<0.000000e+00> : vector<512x32xf32>
    %31 = tpu.matmul %28, %30, %cst_16 {dimension_numbers = #tpu.dot_dimension_numbers<[1], [0], [0], [1], [0, 0, 1, 1], [], []>} : vector<512x32xbf16>, vector<32x32xbf16>, vector<512x32xf32> -> vector<512x32xf32>
    %32 = arith.addf %25, %31 : vector<512x32xf32>
    %33 = vector.extract_strided_slice %17 {offsets = [0, 2, 0, 0], sizes = [8, 8, 8, 32], strides = [1, 1, 1, 1]} : vector<10x10x8x32xf32> to vector<8x8x8x32xf32>
    %34 = vector.shape_cast %33 : vector<8x8x8x32xf32> to vector<512x32xf32>
    %35 = arith.truncf %34 : vector<512x32xf32> to vector<512x32xbf16>
    %36 = vector.extract_strided_slice %19 {offsets = [2, 0, 0], sizes = [1, 32, 32], strides = [1, 1, 1]} : vector<9x32x32xbf16> to vector<1x32x32xbf16>
    %37 = vector.shape_cast %36 : vector<1x32x32xbf16> to vector<32x32xbf16>
    %cst_17 = arith.constant dense<0.000000e+00> : vector<512x32xf32>
    %38 = tpu.matmul %35, %37, %cst_17 {dimension_numbers = #tpu.dot_dimension_numbers<[1], [0], [0], [1], [0, 0, 1, 1], [], []>} : vector<512x32xbf16>, vector<32x32xbf16>, vector<512x32xf32> -> vector<512x32xf32>
    %39 = arith.addf %32, %38 : vector<512x32xf32>
    %40 = vector.extract_strided_slice %17 {offsets = [1, 0, 0, 0], sizes = [8, 8, 8, 32], strides = [1, 1, 1, 1]} : vector<10x10x8x32xf32> to vector<8x8x8x32xf32>
    %41 = vector.shape_cast %40 : vector<8x8x8x32xf32> to vector<512x32xf32>
    %42 = arith.truncf %41 : vector<512x32xf32> to vector<512x32xbf16>
    %43 = vector.extract_strided_slice %19 {offsets = [3, 0, 0], sizes = [1, 32, 32], strides = [1, 1, 1]} : vector<9x32x32xbf16> to vector<1x32x32xbf16>
    %44 = vector.shape_cast %43 : vector<1x32x32xbf16> to vector<32x32xbf16>
    %cst_18 = arith.constant dense<0.000000e+00> : vector<512x32xf32>
    %45 = tpu.matmul %42, %44, %cst_18 {dimension_numbers = #tpu.dot_dimension_numbers<[1], [0], [0], [1], [0, 0, 1, 1], [], []>} : vector<512x32xbf16>, vector<32x32xbf16>, vector<512x32xf32> -> vector<512x32xf32>
    %46 = arith.addf %39, %45 : vector<512x32xf32>
    %47 = vector.extract_strided_slice %17 {offsets = [1, 1, 0, 0], sizes = [8, 8, 8, 32], strides = [1, 1, 1, 1]} : vector<10x10x8x32xf32> to vector<8x8x8x32xf32>
    %48 = vector.shape_cast %47 : vector<8x8x8x32xf32> to vector<512x32xf32>
    %49 = arith.truncf %48 : vector<512x32xf32> to vector<512x32xbf16>
    %50 = vector.extract_strided_slice %19 {offsets = [4, 0, 0], sizes = [1, 32, 32], strides = [1, 1, 1]} : vector<9x32x32xbf16> to vector<1x32x32xbf16>
    %51 = vector.shape_cast %50 : vector<1x32x32xbf16> to vector<32x32xbf16>
    %cst_19 = arith.constant dense<0.000000e+00> : vector<512x32xf32>
    %52 = tpu.matmul %49, %51, %cst_19 {dimension_numbers = #tpu.dot_dimension_numbers<[1], [0], [0], [1], [0, 0, 1, 1], [], []>} : vector<512x32xbf16>, vector<32x32xbf16>, vector<512x32xf32> -> vector<512x32xf32>
    %53 = arith.addf %46, %52 : vector<512x32xf32>
    %54 = vector.extract_strided_slice %17 {offsets = [1, 2, 0, 0], sizes = [8, 8, 8, 32], strides = [1, 1, 1, 1]} : vector<10x10x8x32xf32> to vector<8x8x8x32xf32>
    %55 = vector.shape_cast %54 : vector<8x8x8x32xf32> to vector<512x32xf32>
    %56 = arith.truncf %55 : vector<512x32xf32> to vector<512x32xbf16>
    %57 = vector.extract_strided_slice %19 {offsets = [5, 0, 0], sizes = [1, 32, 32], strides = [1, 1, 1]} : vector<9x32x32xbf16> to vector<1x32x32xbf16>
    %58 = vector.shape_cast %57 : vector<1x32x32xbf16> to vector<32x32xbf16>
    %cst_20 = arith.constant dense<0.000000e+00> : vector<512x32xf32>
    %59 = tpu.matmul %56, %58, %cst_20 {dimension_numbers = #tpu.dot_dimension_numbers<[1], [0], [0], [1], [0, 0, 1, 1], [], []>} : vector<512x32xbf16>, vector<32x32xbf16>, vector<512x32xf32> -> vector<512x32xf32>
    %60 = arith.addf %53, %59 : vector<512x32xf32>
    %61 = vector.extract_strided_slice %17 {offsets = [2, 0, 0, 0], sizes = [8, 8, 8, 32], strides = [1, 1, 1, 1]} : vector<10x10x8x32xf32> to vector<8x8x8x32xf32>
    %62 = vector.shape_cast %61 : vector<8x8x8x32xf32> to vector<512x32xf32>
    %63 = arith.truncf %62 : vector<512x32xf32> to vector<512x32xbf16>
    %64 = vector.extract_strided_slice %19 {offsets = [6, 0, 0], sizes = [1, 32, 32], strides = [1, 1, 1]} : vector<9x32x32xbf16> to vector<1x32x32xbf16>
    %65 = vector.shape_cast %64 : vector<1x32x32xbf16> to vector<32x32xbf16>
    %cst_21 = arith.constant dense<0.000000e+00> : vector<512x32xf32>
    %66 = tpu.matmul %63, %65, %cst_21 {dimension_numbers = #tpu.dot_dimension_numbers<[1], [0], [0], [1], [0, 0, 1, 1], [], []>} : vector<512x32xbf16>, vector<32x32xbf16>, vector<512x32xf32> -> vector<512x32xf32>
    %67 = arith.addf %60, %66 : vector<512x32xf32>
    %68 = vector.extract_strided_slice %17 {offsets = [2, 1, 0, 0], sizes = [8, 8, 8, 32], strides = [1, 1, 1, 1]} : vector<10x10x8x32xf32> to vector<8x8x8x32xf32>
    %69 = vector.shape_cast %68 : vector<8x8x8x32xf32> to vector<512x32xf32>
    %70 = arith.truncf %69 : vector<512x32xf32> to vector<512x32xbf16>
    %71 = vector.extract_strided_slice %19 {offsets = [7, 0, 0], sizes = [1, 32, 32], strides = [1, 1, 1]} : vector<9x32x32xbf16> to vector<1x32x32xbf16>
    %72 = vector.shape_cast %71 : vector<1x32x32xbf16> to vector<32x32xbf16>
    %cst_22 = arith.constant dense<0.000000e+00> : vector<512x32xf32>
    %73 = tpu.matmul %70, %72, %cst_22 {dimension_numbers = #tpu.dot_dimension_numbers<[1], [0], [0], [1], [0, 0, 1, 1], [], []>} : vector<512x32xbf16>, vector<32x32xbf16>, vector<512x32xf32> -> vector<512x32xf32>
    %74 = arith.addf %67, %73 : vector<512x32xf32>
    %75 = vector.extract_strided_slice %17 {offsets = [2, 2, 0, 0], sizes = [8, 8, 8, 32], strides = [1, 1, 1, 1]} : vector<10x10x8x32xf32> to vector<8x8x8x32xf32>
    %76 = vector.shape_cast %75 : vector<8x8x8x32xf32> to vector<512x32xf32>
    %77 = arith.truncf %76 : vector<512x32xf32> to vector<512x32xbf16>
    %78 = vector.extract_strided_slice %19 {offsets = [8, 0, 0], sizes = [1, 32, 32], strides = [1, 1, 1]} : vector<9x32x32xbf16> to vector<1x32x32xbf16>
    %79 = vector.shape_cast %78 : vector<1x32x32xbf16> to vector<32x32xbf16>
    %cst_23 = arith.constant dense<0.000000e+00> : vector<512x32xf32>
    %80 = tpu.matmul %77, %79, %cst_23 {dimension_numbers = #tpu.dot_dimension_numbers<[1], [0], [0], [1], [0, 0, 1, 1], [], []>} : vector<512x32xbf16>, vector<32x32xbf16>, vector<512x32xf32> -> vector<512x32xf32>
    %81 = arith.addf %74, %80 : vector<512x32xf32>
    %c1 = arith.constant 1 : index
    %c0_24 = arith.constant 0 : index
    %82 = vector.load %arg5[%c1, %c0_24] : memref<4x32xf32, #tpu.memory_space<vmem>>, vector<1x32xf32>
    %83 = vector.broadcast %82 : vector<1x32xf32> to vector<512x32xf32>
    %84 = arith.addf %81, %83 : vector<512x32xf32>
    %cst_25 = arith.constant 0.000000e+00 : f32
    %85 = vector.broadcast %cst_25 : f32 to vector<512x32xf32>
    %86 = arith.maximumf %84, %85 : vector<512x32xf32>
    %87 = vector.shape_cast %86 : vector<512x32xf32> to vector<8x8x8x32xf32>
    %88 = vector.shape_cast %87 : vector<8x8x8x32xf32> to vector<4x2x8x8x32xf32>
    %cst_26 = arith.constant dense<0xFF800000> : vector<4x8x8x32xf32>
    %89 = vector.multi_reduction <maximumf>, %88, %cst_26 [1] : vector<4x2x8x8x32xf32> to vector<4x8x8x32xf32>
    %90 = vector.shape_cast %89 : vector<4x8x8x32xf32> to vector<4x4x2x8x32xf32>
    %cst_27 = arith.constant dense<0xFF800000> : vector<4x4x8x32xf32>
    %91 = vector.multi_reduction <maximumf>, %90, %cst_27 [2] : vector<4x4x2x8x32xf32> to vector<4x4x8x32xf32>
    %cst_28 = arith.constant 0.000000e+00 : f32
    %92 = vector.broadcast %cst_28 : f32 to vector<4x1x8x32xf32>
    %cst_29 = arith.constant 0.000000e+00 : f32
    %93 = vector.broadcast %cst_29 : f32 to vector<1x6x8x32xf32>
    %94 = tpu.concatenate %92, %91, %92 in 1 : vector<4x1x8x32xf32>, vector<4x4x8x32xf32>, vector<4x1x8x32xf32> -> vector<4x6x8x32xf32>
    %95 = tpu.concatenate %93, %94, %93 in 0 : vector<1x6x8x32xf32>, vector<4x6x8x32xf32>, vector<1x6x8x32xf32> -> vector<6x6x8x32xf32>
    %c1_30 = arith.constant 1 : index
    %c0_31 = arith.constant 0 : index
    %c0_32 = arith.constant 0 : index
    %c0_33 = arith.constant 0 : index
    %96 = vector.load %arg4[%c1_30, %c0_31, %c0_32, %c0_33] : memref<3x9x32x32xbf16, #tpu.memory_space<vmem>>, vector<1x9x32x32xbf16>
    %97 = vector.shape_cast %96 : vector<1x9x32x32xbf16> to vector<9x32x32xbf16>
    %98 = vector.extract_strided_slice %95 {offsets = [0, 0, 0, 0], sizes = [4, 4, 8, 32], strides = [1, 1, 1, 1]} : vector<6x6x8x32xf32> to vector<4x4x8x32xf32>
    %99 = vector.shape_cast %98 : vector<4x4x8x32xf32> to vector<128x32xf32>
    %100 = arith.truncf %99 : vector<128x32xf32> to vector<128x32xbf16>
    %101 = vector.extract_strided_slice %97 {offsets = [0, 0, 0], sizes = [1, 32, 32], strides = [1, 1, 1]} : vector<9x32x32xbf16> to vector<1x32x32xbf16>
    %102 = vector.shape_cast %101 : vector<1x32x32xbf16> to vector<32x32xbf16>
    %cst_34 = arith.constant dense<0.000000e+00> : vector<128x32xf32>
    %103 = tpu.matmul %100, %102, %cst_34 {dimension_numbers = #tpu.dot_dimension_numbers<[1], [0], [0], [1], [0, 0, 1, 1], [], []>} : vector<128x32xbf16>, vector<32x32xbf16>, vector<128x32xf32> -> vector<128x32xf32>
    %104 = vector.extract_strided_slice %95 {offsets = [0, 1, 0, 0], sizes = [4, 4, 8, 32], strides = [1, 1, 1, 1]} : vector<6x6x8x32xf32> to vector<4x4x8x32xf32>
    %105 = vector.shape_cast %104 : vector<4x4x8x32xf32> to vector<128x32xf32>
    %106 = arith.truncf %105 : vector<128x32xf32> to vector<128x32xbf16>
    %107 = vector.extract_strided_slice %97 {offsets = [1, 0, 0], sizes = [1, 32, 32], strides = [1, 1, 1]} : vector<9x32x32xbf16> to vector<1x32x32xbf16>
    %108 = vector.shape_cast %107 : vector<1x32x32xbf16> to vector<32x32xbf16>
    %cst_35 = arith.constant dense<0.000000e+00> : vector<128x32xf32>
    %109 = tpu.matmul %106, %108, %cst_35 {dimension_numbers = #tpu.dot_dimension_numbers<[1], [0], [0], [1], [0, 0, 1, 1], [], []>} : vector<128x32xbf16>, vector<32x32xbf16>, vector<128x32xf32> -> vector<128x32xf32>
    %110 = arith.addf %103, %109 : vector<128x32xf32>
    %111 = vector.extract_strided_slice %95 {offsets = [0, 2, 0, 0], sizes = [4, 4, 8, 32], strides = [1, 1, 1, 1]} : vector<6x6x8x32xf32> to vector<4x4x8x32xf32>
    %112 = vector.shape_cast %111 : vector<4x4x8x32xf32> to vector<128x32xf32>
    %113 = arith.truncf %112 : vector<128x32xf32> to vector<128x32xbf16>
    %114 = vector.extract_strided_slice %97 {offsets = [2, 0, 0], sizes = [1, 32, 32], strides = [1, 1, 1]} : vector<9x32x32xbf16> to vector<1x32x32xbf16>
    %115 = vector.shape_cast %114 : vector<1x32x32xbf16> to vector<32x32xbf16>
    %cst_36 = arith.constant dense<0.000000e+00> : vector<128x32xf32>
    %116 = tpu.matmul %113, %115, %cst_36 {dimension_numbers = #tpu.dot_dimension_numbers<[1], [0], [0], [1], [0, 0, 1, 1], [], []>} : vector<128x32xbf16>, vector<32x32xbf16>, vector<128x32xf32> -> vector<128x32xf32>
    %117 = arith.addf %110, %116 : vector<128x32xf32>
    %118 = vector.extract_strided_slice %95 {offsets = [1, 0, 0, 0], sizes = [4, 4, 8, 32], strides = [1, 1, 1, 1]} : vector<6x6x8x32xf32> to vector<4x4x8x32xf32>
    %119 = vector.shape_cast %118 : vector<4x4x8x32xf32> to vector<128x32xf32>
    %120 = arith.truncf %119 : vector<128x32xf32> to vector<128x32xbf16>
    %121 = vector.extract_strided_slice %97 {offsets = [3, 0, 0], sizes = [1, 32, 32], strides = [1, 1, 1]} : vector<9x32x32xbf16> to vector<1x32x32xbf16>
    %122 = vector.shape_cast %121 : vector<1x32x32xbf16> to vector<32x32xbf16>
    %cst_37 = arith.constant dense<0.000000e+00> : vector<128x32xf32>
    %123 = tpu.matmul %120, %122, %cst_37 {dimension_numbers = #tpu.dot_dimension_numbers<[1], [0], [0], [1], [0, 0, 1, 1], [], []>} : vector<128x32xbf16>, vector<32x32xbf16>, vector<128x32xf32> -> vector<128x32xf32>
    %124 = arith.addf %117, %123 : vector<128x32xf32>
    %125 = vector.extract_strided_slice %95 {offsets = [1, 1, 0, 0], sizes = [4, 4, 8, 32], strides = [1, 1, 1, 1]} : vector<6x6x8x32xf32> to vector<4x4x8x32xf32>
    %126 = vector.shape_cast %125 : vector<4x4x8x32xf32> to vector<128x32xf32>
    %127 = arith.truncf %126 : vector<128x32xf32> to vector<128x32xbf16>
    %128 = vector.extract_strided_slice %97 {offsets = [4, 0, 0], sizes = [1, 32, 32], strides = [1, 1, 1]} : vector<9x32x32xbf16> to vector<1x32x32xbf16>
    %129 = vector.shape_cast %128 : vector<1x32x32xbf16> to vector<32x32xbf16>
    %cst_38 = arith.constant dense<0.000000e+00> : vector<128x32xf32>
    %130 = tpu.matmul %127, %129, %cst_38 {dimension_numbers = #tpu.dot_dimension_numbers<[1], [0], [0], [1], [0, 0, 1, 1], [], []>} : vector<128x32xbf16>, vector<32x32xbf16>, vector<128x32xf32> -> vector<128x32xf32>
    %131 = arith.addf %124, %130 : vector<128x32xf32>
    %132 = vector.extract_strided_slice %95 {offsets = [1, 2, 0, 0], sizes = [4, 4, 8, 32], strides = [1, 1, 1, 1]} : vector<6x6x8x32xf32> to vector<4x4x8x32xf32>
    %133 = vector.shape_cast %132 : vector<4x4x8x32xf32> to vector<128x32xf32>
    %134 = arith.truncf %133 : vector<128x32xf32> to vector<128x32xbf16>
    %135 = vector.extract_strided_slice %97 {offsets = [5, 0, 0], sizes = [1, 32, 32], strides = [1, 1, 1]} : vector<9x32x32xbf16> to vector<1x32x32xbf16>
    %136 = vector.shape_cast %135 : vector<1x32x32xbf16> to vector<32x32xbf16>
    %cst_39 = arith.constant dense<0.000000e+00> : vector<128x32xf32>
    %137 = tpu.matmul %134, %136, %cst_39 {dimension_numbers = #tpu.dot_dimension_numbers<[1], [0], [0], [1], [0, 0, 1, 1], [], []>} : vector<128x32xbf16>, vector<32x32xbf16>, vector<128x32xf32> -> vector<128x32xf32>
    %138 = arith.addf %131, %137 : vector<128x32xf32>
    %139 = vector.extract_strided_slice %95 {offsets = [2, 0, 0, 0], sizes = [4, 4, 8, 32], strides = [1, 1, 1, 1]} : vector<6x6x8x32xf32> to vector<4x4x8x32xf32>
    %140 = vector.shape_cast %139 : vector<4x4x8x32xf32> to vector<128x32xf32>
    %141 = arith.truncf %140 : vector<128x32xf32> to vector<128x32xbf16>
    %142 = vector.extract_strided_slice %97 {offsets = [6, 0, 0], sizes = [1, 32, 32], strides = [1, 1, 1]} : vector<9x32x32xbf16> to vector<1x32x32xbf16>
    %143 = vector.shape_cast %142 : vector<1x32x32xbf16> to vector<32x32xbf16>
    %cst_40 = arith.constant dense<0.000000e+00> : vector<128x32xf32>
    %144 = tpu.matmul %141, %143, %cst_40 {dimension_numbers = #tpu.dot_dimension_numbers<[1], [0], [0], [1], [0, 0, 1, 1], [], []>} : vector<128x32xbf16>, vector<32x32xbf16>, vector<128x32xf32> -> vector<128x32xf32>
    %145 = arith.addf %138, %144 : vector<128x32xf32>
    %146 = vector.extract_strided_slice %95 {offsets = [2, 1, 0, 0], sizes = [4, 4, 8, 32], strides = [1, 1, 1, 1]} : vector<6x6x8x32xf32> to vector<4x4x8x32xf32>
    %147 = vector.shape_cast %146 : vector<4x4x8x32xf32> to vector<128x32xf32>
    %148 = arith.truncf %147 : vector<128x32xf32> to vector<128x32xbf16>
    %149 = vector.extract_strided_slice %97 {offsets = [7, 0, 0], sizes = [1, 32, 32], strides = [1, 1, 1]} : vector<9x32x32xbf16> to vector<1x32x32xbf16>
    %150 = vector.shape_cast %149 : vector<1x32x32xbf16> to vector<32x32xbf16>
    %cst_41 = arith.constant dense<0.000000e+00> : vector<128x32xf32>
    %151 = tpu.matmul %148, %150, %cst_41 {dimension_numbers = #tpu.dot_dimension_numbers<[1], [0], [0], [1], [0, 0, 1, 1], [], []>} : vector<128x32xbf16>, vector<32x32xbf16>, vector<128x32xf32> -> vector<128x32xf32>
    %152 = arith.addf %145, %151 : vector<128x32xf32>
    %153 = vector.extract_strided_slice %95 {offsets = [2, 2, 0, 0], sizes = [4, 4, 8, 32], strides = [1, 1, 1, 1]} : vector<6x6x8x32xf32> to vector<4x4x8x32xf32>
    %154 = vector.shape_cast %153 : vector<4x4x8x32xf32> to vector<128x32xf32>
    %155 = arith.truncf %154 : vector<128x32xf32> to vector<128x32xbf16>
    %156 = vector.extract_strided_slice %97 {offsets = [8, 0, 0], sizes = [1, 32, 32], strides = [1, 1, 1]} : vector<9x32x32xbf16> to vector<1x32x32xbf16>
    %157 = vector.shape_cast %156 : vector<1x32x32xbf16> to vector<32x32xbf16>
    %cst_42 = arith.constant dense<0.000000e+00> : vector<128x32xf32>
    %158 = tpu.matmul %155, %157, %cst_42 {dimension_numbers = #tpu.dot_dimension_numbers<[1], [0], [0], [1], [0, 0, 1, 1], [], []>} : vector<128x32xbf16>, vector<32x32xbf16>, vector<128x32xf32> -> vector<128x32xf32>
    %159 = arith.addf %152, %158 : vector<128x32xf32>
    %c2 = arith.constant 2 : index
    %c0_43 = arith.constant 0 : index
    %160 = vector.load %arg5[%c2, %c0_43] : memref<4x32xf32, #tpu.memory_space<vmem>>, vector<1x32xf32>
    %161 = vector.broadcast %160 : vector<1x32xf32> to vector<128x32xf32>
    %162 = arith.addf %159, %161 : vector<128x32xf32>
    %cst_44 = arith.constant 0.000000e+00 : f32
    %163 = vector.broadcast %cst_44 : f32 to vector<128x32xf32>
    %164 = arith.maximumf %162, %163 : vector<128x32xf32>
    %165 = vector.shape_cast %164 : vector<128x32xf32> to vector<4x4x8x32xf32>
    %166 = vector.shape_cast %165 : vector<4x4x8x32xf32> to vector<2x2x4x8x32xf32>
    %cst_45 = arith.constant dense<0xFF800000> : vector<2x4x8x32xf32>
    %167 = vector.multi_reduction <maximumf>, %166, %cst_45 [1] : vector<2x2x4x8x32xf32> to vector<2x4x8x32xf32>
    %168 = vector.shape_cast %167 : vector<2x4x8x32xf32> to vector<2x2x2x8x32xf32>
    %cst_46 = arith.constant dense<0xFF800000> : vector<2x2x8x32xf32>
    %169 = vector.multi_reduction <maximumf>, %168, %cst_46 [2] : vector<2x2x2x8x32xf32> to vector<2x2x8x32xf32>
    %cst_47 = arith.constant 0.000000e+00 : f32
    %170 = vector.broadcast %cst_47 : f32 to vector<2x1x8x32xf32>
    %cst_48 = arith.constant 0.000000e+00 : f32
    %171 = vector.broadcast %cst_48 : f32 to vector<1x4x8x32xf32>
    %172 = tpu.concatenate %170, %169, %170 in 1 : vector<2x1x8x32xf32>, vector<2x2x8x32xf32>, vector<2x1x8x32xf32> -> vector<2x4x8x32xf32>
    %173 = tpu.concatenate %171, %172, %171 in 0 : vector<1x4x8x32xf32>, vector<2x4x8x32xf32>, vector<1x4x8x32xf32> -> vector<4x4x8x32xf32>
    %c2_49 = arith.constant 2 : index
    %c0_50 = arith.constant 0 : index
    %c0_51 = arith.constant 0 : index
    %c0_52 = arith.constant 0 : index
    %174 = vector.load %arg4[%c2_49, %c0_50, %c0_51, %c0_52] : memref<3x9x32x32xbf16, #tpu.memory_space<vmem>>, vector<1x9x32x32xbf16>
    %175 = vector.shape_cast %174 : vector<1x9x32x32xbf16> to vector<9x32x32xbf16>
    %176 = vector.extract_strided_slice %173 {offsets = [0, 0, 0, 0], sizes = [2, 2, 8, 32], strides = [1, 1, 1, 1]} : vector<4x4x8x32xf32> to vector<2x2x8x32xf32>
    %177 = vector.shape_cast %176 : vector<2x2x8x32xf32> to vector<32x32xf32>
    %178 = arith.truncf %177 : vector<32x32xf32> to vector<32x32xbf16>
    %179 = vector.extract_strided_slice %175 {offsets = [0, 0, 0], sizes = [1, 32, 32], strides = [1, 1, 1]} : vector<9x32x32xbf16> to vector<1x32x32xbf16>
    %180 = vector.shape_cast %179 : vector<1x32x32xbf16> to vector<32x32xbf16>
    %cst_53 = arith.constant dense<0.000000e+00> : vector<32x32xf32>
    %181 = tpu.matmul %178, %180, %cst_53 {dimension_numbers = #tpu.dot_dimension_numbers<[1], [0], [0], [1], [0, 0, 1, 1], [], []>} : vector<32x32xbf16>, vector<32x32xbf16>, vector<32x32xf32> -> vector<32x32xf32>
    %182 = vector.extract_strided_slice %173 {offsets = [0, 1, 0, 0], sizes = [2, 2, 8, 32], strides = [1, 1, 1, 1]} : vector<4x4x8x32xf32> to vector<2x2x8x32xf32>
    %183 = vector.shape_cast %182 : vector<2x2x8x32xf32> to vector<32x32xf32>
    %184 = arith.truncf %183 : vector<32x32xf32> to vector<32x32xbf16>
    %185 = vector.extract_strided_slice %175 {offsets = [1, 0, 0], sizes = [1, 32, 32], strides = [1, 1, 1]} : vector<9x32x32xbf16> to vector<1x32x32xbf16>
    %186 = vector.shape_cast %185 : vector<1x32x32xbf16> to vector<32x32xbf16>
    %cst_54 = arith.constant dense<0.000000e+00> : vector<32x32xf32>
    %187 = tpu.matmul %184, %186, %cst_54 {dimension_numbers = #tpu.dot_dimension_numbers<[1], [0], [0], [1], [0, 0, 1, 1], [], []>} : vector<32x32xbf16>, vector<32x32xbf16>, vector<32x32xf32> -> vector<32x32xf32>
    %188 = arith.addf %181, %187 : vector<32x32xf32>
    %189 = vector.extract_strided_slice %173 {offsets = [0, 2, 0, 0], sizes = [2, 2, 8, 32], strides = [1, 1, 1, 1]} : vector<4x4x8x32xf32> to vector<2x2x8x32xf32>
    %190 = vector.shape_cast %189 : vector<2x2x8x32xf32> to vector<32x32xf32>
    %191 = arith.truncf %190 : vector<32x32xf32> to vector<32x32xbf16>
    %192 = vector.extract_strided_slice %175 {offsets = [2, 0, 0], sizes = [1, 32, 32], strides = [1, 1, 1]} : vector<9x32x32xbf16> to vector<1x32x32xbf16>
    %193 = vector.shape_cast %192 : vector<1x32x32xbf16> to vector<32x32xbf16>
    %cst_55 = arith.constant dense<0.000000e+00> : vector<32x32xf32>
    %194 = tpu.matmul %191, %193, %cst_55 {dimension_numbers = #tpu.dot_dimension_numbers<[1], [0], [0], [1], [0, 0, 1, 1], [], []>} : vector<32x32xbf16>, vector<32x32xbf16>, vector<32x32xf32> -> vector<32x32xf32>
    %195 = arith.addf %188, %194 : vector<32x32xf32>
    %196 = vector.extract_strided_slice %173 {offsets = [1, 0, 0, 0], sizes = [2, 2, 8, 32], strides = [1, 1, 1, 1]} : vector<4x4x8x32xf32> to vector<2x2x8x32xf32>
    %197 = vector.shape_cast %196 : vector<2x2x8x32xf32> to vector<32x32xf32>
    %198 = arith.truncf %197 : vector<32x32xf32> to vector<32x32xbf16>
    %199 = vector.extract_strided_slice %175 {offsets = [3, 0, 0], sizes = [1, 32, 32], strides = [1, 1, 1]} : vector<9x32x32xbf16> to vector<1x32x32xbf16>
    %200 = vector.shape_cast %199 : vector<1x32x32xbf16> to vector<32x32xbf16>
    %cst_56 = arith.constant dense<0.000000e+00> : vector<32x32xf32>
    %201 = tpu.matmul %198, %200, %cst_56 {dimension_numbers = #tpu.dot_dimension_numbers<[1], [0], [0], [1], [0, 0, 1, 1], [], []>} : vector<32x32xbf16>, vector<32x32xbf16>, vector<32x32xf32> -> vector<32x32xf32>
    %202 = arith.addf %195, %201 : vector<32x32xf32>
    %203 = vector.extract_strided_slice %173 {offsets = [1, 1, 0, 0], sizes = [2, 2, 8, 32], strides = [1, 1, 1, 1]} : vector<4x4x8x32xf32> to vector<2x2x8x32xf32>
    %204 = vector.shape_cast %203 : vector<2x2x8x32xf32> to vector<32x32xf32>
    %205 = arith.truncf %204 : vector<32x32xf32> to vector<32x32xbf16>
    %206 = vector.extract_strided_slice %175 {offsets = [4, 0, 0], sizes = [1, 32, 32], strides = [1, 1, 1]} : vector<9x32x32xbf16> to vector<1x32x32xbf16>
    %207 = vector.shape_cast %206 : vector<1x32x32xbf16> to vector<32x32xbf16>
    %cst_57 = arith.constant dense<0.000000e+00> : vector<32x32xf32>
    %208 = tpu.matmul %205, %207, %cst_57 {dimension_numbers = #tpu.dot_dimension_numbers<[1], [0], [0], [1], [0, 0, 1, 1], [], []>} : vector<32x32xbf16>, vector<32x32xbf16>, vector<32x32xf32> -> vector<32x32xf32>
    %209 = arith.addf %202, %208 : vector<32x32xf32>
    %210 = vector.extract_strided_slice %173 {offsets = [1, 2, 0, 0], sizes = [2, 2, 8, 32], strides = [1, 1, 1, 1]} : vector<4x4x8x32xf32> to vector<2x2x8x32xf32>
    %211 = vector.shape_cast %210 : vector<2x2x8x32xf32> to vector<32x32xf32>
    %212 = arith.truncf %211 : vector<32x32xf32> to vector<32x32xbf16>
    %213 = vector.extract_strided_slice %175 {offsets = [5, 0, 0], sizes = [1, 32, 32], strides = [1, 1, 1]} : vector<9x32x32xbf16> to vector<1x32x32xbf16>
    %214 = vector.shape_cast %213 : vector<1x32x32xbf16> to vector<32x32xbf16>
    %cst_58 = arith.constant dense<0.000000e+00> : vector<32x32xf32>
    %215 = tpu.matmul %212, %214, %cst_58 {dimension_numbers = #tpu.dot_dimension_numbers<[1], [0], [0], [1], [0, 0, 1, 1], [], []>} : vector<32x32xbf16>, vector<32x32xbf16>, vector<32x32xf32> -> vector<32x32xf32>
    %216 = arith.addf %209, %215 : vector<32x32xf32>
    %217 = vector.extract_strided_slice %173 {offsets = [2, 0, 0, 0], sizes = [2, 2, 8, 32], strides = [1, 1, 1, 1]} : vector<4x4x8x32xf32> to vector<2x2x8x32xf32>
    %218 = vector.shape_cast %217 : vector<2x2x8x32xf32> to vector<32x32xf32>
    %219 = arith.truncf %218 : vector<32x32xf32> to vector<32x32xbf16>
    %220 = vector.extract_strided_slice %175 {offsets = [6, 0, 0], sizes = [1, 32, 32], strides = [1, 1, 1]} : vector<9x32x32xbf16> to vector<1x32x32xbf16>
    %221 = vector.shape_cast %220 : vector<1x32x32xbf16> to vector<32x32xbf16>
    %cst_59 = arith.constant dense<0.000000e+00> : vector<32x32xf32>
    %222 = tpu.matmul %219, %221, %cst_59 {dimension_numbers = #tpu.dot_dimension_numbers<[1], [0], [0], [1], [0, 0, 1, 1], [], []>} : vector<32x32xbf16>, vector<32x32xbf16>, vector<32x32xf32> -> vector<32x32xf32>
    %223 = arith.addf %216, %222 : vector<32x32xf32>
    %224 = vector.extract_strided_slice %173 {offsets = [2, 1, 0, 0], sizes = [2, 2, 8, 32], strides = [1, 1, 1, 1]} : vector<4x4x8x32xf32> to vector<2x2x8x32xf32>
    %225 = vector.shape_cast %224 : vector<2x2x8x32xf32> to vector<32x32xf32>
    %226 = arith.truncf %225 : vector<32x32xf32> to vector<32x32xbf16>
    %227 = vector.extract_strided_slice %175 {offsets = [7, 0, 0], sizes = [1, 32, 32], strides = [1, 1, 1]} : vector<9x32x32xbf16> to vector<1x32x32xbf16>
    %228 = vector.shape_cast %227 : vector<1x32x32xbf16> to vector<32x32xbf16>
    %cst_60 = arith.constant dense<0.000000e+00> : vector<32x32xf32>
    %229 = tpu.matmul %226, %228, %cst_60 {dimension_numbers = #tpu.dot_dimension_numbers<[1], [0], [0], [1], [0, 0, 1, 1], [], []>} : vector<32x32xbf16>, vector<32x32xbf16>, vector<32x32xf32> -> vector<32x32xf32>
    %230 = arith.addf %223, %229 : vector<32x32xf32>
    %231 = vector.extract_strided_slice %173 {offsets = [2, 2, 0, 0], sizes = [2, 2, 8, 32], strides = [1, 1, 1, 1]} : vector<4x4x8x32xf32> to vector<2x2x8x32xf32>
    %232 = vector.shape_cast %231 : vector<2x2x8x32xf32> to vector<32x32xf32>
    %233 = arith.truncf %232 : vector<32x32xf32> to vector<32x32xbf16>
    %234 = vector.extract_strided_slice %175 {offsets = [8, 0, 0], sizes = [1, 32, 32], strides = [1, 1, 1]} : vector<9x32x32xbf16> to vector<1x32x32xbf16>
    %235 = vector.shape_cast %234 : vector<1x32x32xbf16> to vector<32x32xbf16>
    %cst_61 = arith.constant dense<0.000000e+00> : vector<32x32xf32>
    %236 = tpu.matmul %233, %235, %cst_61 {dimension_numbers = #tpu.dot_dimension_numbers<[1], [0], [0], [1], [0, 0, 1, 1], [], []>} : vector<32x32xbf16>, vector<32x32xbf16>, vector<32x32xf32> -> vector<32x32xf32>
    %237 = arith.addf %230, %236 : vector<32x32xf32>
    %c3 = arith.constant 3 : index
    %c0_62 = arith.constant 0 : index
    %238 = vector.load %arg5[%c3, %c0_62] : memref<4x32xf32, #tpu.memory_space<vmem>>, vector<1x32xf32>
    %239 = vector.broadcast %238 : vector<1x32xf32> to vector<32x32xf32>
    %240 = arith.addf %237, %239 : vector<32x32xf32>
    %cst_63 = arith.constant 0.000000e+00 : f32
    %241 = vector.broadcast %cst_63 : f32 to vector<32x32xf32>
    %242 = arith.maximumf %240, %241 : vector<32x32xf32>
    %243 = vector.shape_cast %242 : vector<32x32xf32> to vector<2x2x8x32xf32>
    %244 = vector.shape_cast %243 : vector<2x2x8x32xf32> to vector<1x2x2x8x32xf32>
    %cst_64 = arith.constant dense<0xFF800000> : vector<1x2x8x32xf32>
    %245 = vector.multi_reduction <maximumf>, %244, %cst_64 [1] : vector<1x2x2x8x32xf32> to vector<1x2x8x32xf32>
    %246 = vector.shape_cast %245 : vector<1x2x8x32xf32> to vector<1x1x2x8x32xf32>
    %cst_65 = arith.constant dense<0xFF800000> : vector<1x1x8x32xf32>
    %247 = vector.multi_reduction <maximumf>, %246, %cst_65 [2] : vector<1x1x2x8x32xf32> to vector<1x1x8x32xf32>
    %248 = vector.shape_cast %247 : vector<1x1x8x32xf32> to vector<8x32xf32>
    %c0_66 = arith.constant 0 : index
    %c0_67 = arith.constant 0 : index
    %c0_68 = arith.constant 0 : index
    %249 = vector.load %arg2[%c0_66, %c0_67, %c0_68] : memref<1x2x8xf32, #tpu.memory_space<vmem>>, vector<1x2x8xf32>
    %250 = vector.shape_cast %249 : vector<1x2x8xf32> to vector<2x8xf32>
    %cst_69 = arith.constant dense<0.000000e+00> : vector<2x32xf32>
    %251 = tpu.matmul %250, %248, %cst_69 {dimension_numbers = #tpu.dot_dimension_numbers<[1], [0], [0], [1], [0, 0, 1, 1], [], []>} : vector<2x8xf32>, vector<8x32xf32>, vector<2x32xf32> -> vector<2x32xf32>
    %c0_70 = arith.constant 0 : index
    %c0_71 = arith.constant 0 : index
    %c0_72 = arith.constant 0 : index
    %252 = vector.load %arg6[%c0_70, %c0_71, %c0_72] : memref<1x2x32xf32, #tpu.memory_space<vmem>>, vector<1x2x32xf32>
    %253 = vector.shape_cast %252 : vector<1x2x32xf32> to vector<2x32xf32>
    %254 = vector.shape_cast %251 : vector<2x32xf32> to vector<1x2x32xf32>
    tpu.vector_store %arg6[%c0_70, %c0_71, %c0_72], %254 {strides = array<i32>} : memref<1x2x32xf32, #tpu.memory_space<vmem>>, vector<1x2x32xf32>,
    return
  }
  func.func @transform_0(%arg0: i32) -> (i32, i32, i32) {
    %c0_i32 = arith.constant 0 : i32
    %c0_i32_0 = arith.constant 0 : i32
    %c0_i32_1 = arith.constant 0 : i32
    return %arg0, %c0_i32, %c0_i32_0 : i32, i32, i32
  }
  func.func @transform_1(%arg0: i32) -> (i32, i32, i32) {
    %c0_i32 = arith.constant 0 : i32
    %c0_i32_0 = arith.constant 0 : i32
    %c0_i32_1 = arith.constant 0 : i32
    return %arg0, %c0_i32, %c0_i32_0 : i32, i32, i32
  }
  func.func @transform_2(%arg0: i32) -> (i32, i32) {
    %c0_i32 = arith.constant 0 : i32
    %c0_i32_0 = arith.constant 0 : i32
    %c0_i32_1 = arith.constant 0 : i32
    return %c0_i32, %c0_i32_0 : i32, i32
  }
  func.func @transform_3(%arg0: i32) -> (i32, i32, i32, i32) {
    %c0_i32 = arith.constant 0 : i32
    %c0_i32_0 = arith.constant 0 : i32
    %c0_i32_1 = arith.constant 0 : i32
    %c0_i32_2 = arith.constant 0 : i32
    %c0_i32_3 = arith.constant 0 : i32
    return %c0_i32, %c0_i32_0, %c0_i32_1, %c0_i32_2 : i32, i32, i32, i32
  }
  func.func @transform_4(%arg0: i32) -> (i32, i32) {
    %c0_i32 = arith.constant 0 : i32
    %c0_i32_0 = arith.constant 0 : i32
    %c0_i32_1 = arith.constant 0 : i32
    return %c0_i32, %c0_i32_0 : i32, i32
  }
  func.func @transform_5(%arg0: i32) -> (i32, i32, i32) {
    %c0_i32 = arith.constant 0 : i32
    %c0_i32_0 = arith.constant 0 : i32
    %c0_i32_1 = arith.constant 0 : i32
    return %arg0, %c0_i32, %c0_i32_0 : i32, i32, i32
  }
}

</mosaic_0001>

<bundles_post_ra>
// kernel: tpu_custom_call.1
= control target key start
LH: loop header
LB: loop body
LE: loop exit
PB: predicated region body
PF: predicated region fallthrough
CT: control target
= control target key end

     0   :  { %10 = vsyncpa [#allocation3], 0  ;;  %s16459_s0 = inlined_call_operand.vmem [shape: bf16[2,2048,32], index: 0, kind: input, shape index: {}]   ;;  %s16460_s1 = inlined_call_operand.vmem [shape: f32[2,2,8], index: 1, kind: input, shape index: {}]   ;;  %s16461_s2 = inlined_call_operand.vmem [shape: bf16[32,32], index: 2, kind: input, shape index: {}]   ;;  %s16462_s3 = inlined_call_operand.vmem [shape: bf16[3,9,32,32], index: 3, kind: input, shape index: {}]   ;;  %s16463_s4 = inlined_call_operand.vmem [shape: f32[4,32], index: 4, kind: input, shape index: {}]   ;;  %s16464_s5 = inlined_call_operand.hbm [shape: f32[2,2,32], index: 5, kind: output, shape index: {}]  }
   0x1   :  { %12 = vsyncpa [#allocation3 + $0x1], 0  ;;  %s12057_s18 = smov 0   ;;  %s12059_s19 = smov 0  }
   0x2   :  { %s12061_s20 = smov 0   ;;  %s12063_s21 = smov 0  }
   0x3 LB: > { %s12078_s22 = sadd.s32 4294967295, %s12021_s21   ;;  %s9299_s23 = sadd.s32 4294967294, %s12021_s21   ;;  %s12021_s21 = sphi %s12063_s21, %s17324_s21   ;;  %s12017_s20 = sphi %s12061_s20, %s17323_s20   ;;  %s12013_s19 = sphi %s12059_s19, %s17322_s19   ;;  %s12009_s18 = sphi %s12057_s18, %s17321_s18  }
   0x4   : > { %s12082_s24 = sadd.s32 1, %s12021_s21   ;;  %s140_s25 = sadd.s32 1, %s12017_s20 }
   0x5   : > { %s137_s26 = ssub.s32 %s12021_s21, %s12082_s24  ;;  %p150_p0 = scmp.ne.s32.totalorder %s12017_s20, %s12013_s19 }
   0x6   : > { %p138_p1 = scmp.eq.s32.totalorder %s137_s26, 0  ;;  %p151_p2 = scmp.eq.s32.totalorder %s12078_s22, 1 }
   0x7   : > { %p156_p3 = scmp.ne.s32.totalorder %s12013_s19, %s12009_s18  ;;  %p157_p4 = scmp.eq.s32.totalorder %s9299_s23, 1 }
   0x8   : > { %s12093_s27 = scalar_select %p138_p1, %s12017_s20, %s140_s25  }
   0x9   : > { %p12095_p5 = por %p151_p2, %p150_p0  ;;  %p12099_p6 = por %p157_p4, %p156_p3 }
   0xa   : > { %p9302_p7 = scmp.ge.s32.totalorder %s12021_s21, 1  ;;  %p199_p8 = scmp.lt.s32.totalorder %s12021_s21, 3 }
   0xc   : > { %p200_p9 = pnand %p9302_p7, %p199_p8 }
   0xe   : > { %203 = sbr.rel (%p200_p9) target bundleno = 2323 (0x913), region = 40 }
  0x13   : > { %v11772_v0 = vld [vmem:[%s16461_s2 + $0x8] sm:$0xff]   ;;  %p231_p10 = scmp.lt.s32.totalorder %s12078_s22, 1  ;;  %v11773_v1 = vld [vmem:[%s16461_s2] sm:$0xff]   ;;  %vm1158_vm0 = vcmask 261120   ;;  %v11832_v29 = vld [vmem:[%s16462_s3 + $0x18] sm:$0xff]   ;;  %v16465_v33 = vmov 0.0|0.0  }
  0x14   : > { %10601 = vmatprep.subr.bf16.mxu0 %v11772_v0  ;;  %10861 = vmatprep.subr.bf16.mxu1 %v11832_v29  ;;  %v11833_v31 = vld [vmem:[%s16462_s3 + $0x10] sm:$0xff]   ;;  %vm12025_vm1 = vmmov 0   ;;  %vm9138_vm2 = vcmask 64512   ;;  %vm9212_vm3 = vcmask 254976  }
  0x15   : > { %s12113_s9 = scalar_select %p231_p10, %s12078_s22, 1  ;;  %10602 = vmatpush3.bf16.msra.mxu0 %v11772_v0  ;;  %10862 = vmatpush3.bf16.msra.mxu1 %v11832_v29 }
  0x16   : > { %10603 = vmatprep.subr.bf16.mxu0 %v11773_v1  ;;  %10863 = vmatprep.subr.bf16.mxu1 %v11833_v31 }
  0x17   : > { %s10036_s10 = sshll.u32 %s12113_s9, 10  ;;  %10865 = vmatprep.mubr.bf16.mxu1 %v16465_v33  ;;  %s9306_s26 = sshll.u32 %s12113_s9, 1 }
  0x18   : > { %s12119_s13 = scalar_lea.vmem %s16459_s0, %s10036_s10  ;;  %s239_s7 = scalar_lea.vmem %s16460_s1, %s9306_s26 }
  0x19   : > { %v11774_v2 = vld [vmem:[%s12119_s13] sm:$0xff]   ;;  %10604 = vmatpush3.bf16.msra.mxu0 %v11773_v1  ;;  %v11775_v3 = vld [vmem:[%s12119_s13 + $0x8] sm:$0xff]   ;;  %v11776_v4 = vld [vmem:[%s12119_s13 + $0x10] sm:$0xff]   ;;  %10864 = vmatpush3.bf16.msra.mxu1 %v11833_v31  ;;  %s228_s9 = sand.u32 1, %s12013_s19   ;;  %s10033_s10 = sshll.u32 %s12078_s22, 5 }
  0x1a   : > { %10605 = vmatprep.mubr.msk.bf16.mxu0 %vm1158_vm0, %v11774_v2  ;;  %v11777_v5 = vld [vmem:[%s12119_s13 + $0x18] sm:$0xff]   ;;  %v11778_v6 = vld [vmem:[%s12119_s13 + $0x20] sm:$0xff]   ;;  %v11779_v7 = vld [vmem:[%s12119_s13 + $0x28] sm:$0xff]   ;;  %s9303_s8 = sshll.u32 %s228_s9, 1  ;;  %s9215_s16 = scalar_lea.sflag [#allocation3], %s228_s9 }
  0x1b   : > { %v11780_v8 = vld [vmem:[%s12119_s13 + $0x30] sm:$0xff]   ;;  %v11781_v9 = vld [vmem:[%s12119_s13 + $0x38] sm:$0xff]   ;;  %v11782_v10 = vld [vmem:[%s12119_s13 + $0x40] sm:$0xff]   ;;  %s230_s11 = scalar_lea.vmem [#allocation2], %s9303_s8  ;;  %s12026_s22 = smov [#allocation2]  }
  0x1c   : > { %10606 = vmatmul.mubr.msk.bf16.vlgmr.msra.gmra.mxu0 %vm1158_vm0, %v11775_v3  ;;  %v11783_v11 = vld [vmem:[%s12119_s13 + $0x48] sm:$0xff]   ;;  %v11784_v12 = vld [vmem:[%s12119_s13 + $0x50] sm:$0xff]   ;;  %v11785_v13 = vld [vmem:[%s12119_s13 + $0x58] sm:$0xff]   ;;  %10866 = vmatmul.mubr.bf16.vlgmr.msra.gmra.mxu1 %v16465_v33  ;;  %s9228_s12 = sshll.u32 %s230_s11, 4  ;;  %s11965_s23 = sshll.u32 %s12026_s22, 4  ;;  %s16420_s12 = int_to_ptr.vmem [resolvable:$true] %s9228_s12  ;;  %s11966_s23 = int_to_ptr.vmem [resolvable:$false] %s11965_s23 }
  0x1d   : > { %10609 = vmatprep.mubr.msk.bf16.mxu0 %vm1158_vm0, %v11776_v4  ;;  %v11786_v14 = vld [vmem:[%s12119_s13 + $0x60] sm:$0xff]   ;;  %v11787_v15 = vld [vmem:[%s12119_s13 + $0x68] sm:$0xff]   ;;  %v11788_v16 = vld [vmem:[%s12119_s13 + $0x70] sm:$0xff]   ;;  %10869 = vmatprep.mubr.bf16.mxu1 %v16465_v33  ;;  %s11961_s17 = scalar_lea.vmem %s16420_s12, 32  ;;  %s11967_s25 = scalar_lea.vmem %s11966_s23, 64 }
  0x1e   : > { %v11789_v17 = vld [vmem:[%s12119_s13 + $0x78] sm:$0xff]   ;;  %v11790_v18 = vld [vmem:[%s12119_s13 + $0x80] sm:$0xff]   ;;  %v11791_v19 = vld [vmem:[%s12119_s13 + $0x88] sm:$0xff]   ;;  %p11962_p11 = scmp.ne.s32.totalorder %s16420_s12, %s11961_s17  ;;  %p11968_p0 = scmp.lt.s32.totalorder %s16420_s12, %s11966_s23 }
  0x1f   : > { %v11792_v20 = vld [vmem:[%s12119_s13 + $0x90] sm:$0xff]   ;;  %v11793_v21 = vld [vmem:[%s12119_s13 + $0x98] sm:$0xff]   ;;  %v11794_v22 = vld [vmem:[%s12119_s13 + $0xa0] sm:$0xff]   ;;  %p11969_p1 = scmp.lt.s32.totalorder %s11967_s25, %s11961_s17 }
  0x20   : > { %v11795_v23 = vld [vmem:[%s12119_s13 + $0xa8] sm:$0xff]   ;;  %v11796_v24 = vld [vmem:[%s12119_s13 + $0xb0] sm:$0xff]   ;;  %v11797_v25 = vld [vmem:[%s12119_s13 + $0xb8] sm:$0xff]   ;;  %p11963_p12 = pnand %p11962_p11, %p12095_p5 }
  0x21   : > { %v11798_v26 = vld [vmem:[%s12119_s13 + $0xc0] sm:$0xff]   ;;  %v11799_v27 = vld [vmem:[%s12119_s13 + $0xc8] sm:$0xff]   ;;  %v11800_v28 = vld [vmem:[%s12119_s13 + $0xd0] sm:$0xff]   ;;  %p11970_p2 = por %p11969_p1, %p11968_p0 }
  0x22   : > { %v11801_v30 = vld [vmem:[%s12119_s13 + $0xd8] sm:$0xff]   ;;  %v11802_v32 = vld [vmem:[%s12119_s13 + $0xe0] sm:$0xff]   ;;  %v11803_v34 = vld [vmem:[%s12119_s13 + $0xe8] sm:$0xff]   ;;  %p11964_p13 = pneg %p11963_p12 }
  0x23   : > { %v11804_v35 = vld [vmem:[%s12119_s13 + $0xf0] sm:$0xff]   ;;  %v11805_v36 = vld [vmem:[%s12119_s13 + $0xf8] sm:$0xff]   ;;  %v11806_v37 = vld [vmem:[%s12119_s13 + $0x100] sm:$0xff]  }
  0x24   : > { %10610 = vmatmul.mubr.msk.bf16.gmra.mxu0 %vm1158_vm0, %v11777_v5  ;;  %10870 = vmatmul.mubr.bf16.gmra.mxu1 %v16465_v33  ;;  %v11807_v38 = vld [vmem:[%s12119_s13 + $0x108] sm:$0xff]   ;;  %v11808_v39 = vld [vmem:[%s12119_s13 + $0x110] sm:$0xff]   ;;  %v11809_v40 = vld [vmem:[%s12119_s13 + $0x118] sm:$0xff]   ;;  %p11971_p3 = pnand %p11970_p2, %p11964_p13 }
  0x25   : > { %10613 = vmatprep.mubr.msk.bf16.mxu0 %vm1158_vm0, %v11778_v6  ;;  %v11810_v41 = vld [vmem:[%s12119_s13 + $0x120] sm:$0xff]   ;;  %v11811_v42 = vld [vmem:[%s12119_s13 + $0x128] sm:$0xff]   ;;  %v11812_v43 = vld [vmem:[%s12119_s13 + $0x130] sm:$0xff]  }
  0x26   : > { %v11813_v44 = vld [vmem:[%s12119_s13 + $0x138] sm:$0xff]   ;;  %v11814_v45 = vld [vmem:[%s12119_s13 + $0x140] sm:$0xff]   ;;  %v11815_v46 = vld [vmem:[%s12119_s13 + $0x148] sm:$0xff]  }
  0x27   : > { %v11816_v47 = vld [vmem:[%s12119_s13 + $0x150] sm:$0xff]   ;;  %v11817_v48 = vld [vmem:[%s12119_s13 + $0x158] sm:$0xff]   ;;  %v11818_v49 = vld [vmem:[%s12119_s13 + $0x160] sm:$0xff]  }
  0x28   : > { %v11819_v50 = vld [vmem:[%s12119_s13 + $0x168] sm:$0xff]   ;;  %v11820_v51 = vld [vmem:[%s12119_s13 + $0x170] sm:$0xff]   ;;  %v11821_v52 = vld [vmem:[%s12119_s13 + $0x178] sm:$0xff]  }
  0x29   : > { %v11822_v53 = vld [vmem:[%s12119_s13 + $0x180] sm:$0xff]   ;;  %v11823_v54 = vld [vmem:[%s12119_s13 + $0x188] sm:$0xff]   ;;  %v11824_v55 = vld [vmem:[%s12119_s13 + $0x190] sm:$0xff]  }
  0x2a   : > { %v11825_v59 = vld [vmem:[%s12119_s13 + $0x198] sm:$0xff]   ;;  %v11826_v60 = vld [vmem:[%s12119_s13 + $0x1a0] sm:$0xff]   ;;  %v11827_v1 = vld [vmem:[%s12119_s13 + $0x1a8] sm:$0xff]  }
  0x2b   : > { %v11828_v2 = vld [vmem:[%s12119_s13 + $0x1b0] sm:$0xff]  }
  0x2c   : > { %10614 = vmatmul.mubr.msk.bf16.gmra.mxu0 %vm1158_vm0, %v11779_v7  ;;  %v11829_v7 = vld [vmem:[%s12119_s13 + $0x1b8] sm:$0xff]  }
  0x2d   : > { %10617 = vmatprep.mubr.msk.bf16.mxu0 %vm1158_vm0, %v11780_v8  ;;  %v11830_v8 = vld [vmem:[%s12119_s13 + $0x1c0] sm:$0xff]  }
  0x34   : > { %10618 = vmatmul.mubr.msk.bf16.gmra.mxu0 %vm1158_vm0, %v11781_v9 }
  0x35   : > { %10621 = vmatprep.mubr.msk.bf16.mxu0 %vm1158_vm0, %v11782_v10 }
  0x3c   : > { %10622 = vmatmul.mubr.msk.bf16.gmra.mxu0 %vm1158_vm0, %v11783_v11  ;;  %v12254_v11 = vld [vmem:[%s16463_s4] ss:$0 sm:$0xff] }
  0x3d   : > { %10625 = vmatprep.mubr.msk.bf16.mxu0 %vm1158_vm0, %v11784_v12 }
  0x44   : > { %10626 = vmatmul.mubr.msk.bf16.gmra.mxu0 %vm1158_vm0, %v11785_v13 }
  0x45   : > { %10629 = vmatprep.mubr.msk.bf16.mxu0 %vm1158_vm0, %v11786_v14  ;;  %v11831_v14 = vld [vmem:[%s12119_s13 + $0x1c8] sm:$0xff]  }
  0x4c   : > { %10630 = vmatmul.mubr.msk.bf16.gmra.mxu0 %vm1158_vm0, %v11787_v15 }
  0x4d   : > { %10633 = vmatprep.mubr.msk.bf16.mxu0 %vm1158_vm0, %v11788_v16  ;;  %v11834_v16 = vld [vmem:[%s12119_s13 + $0x1d0] sm:$0xff]  }
  0x54   : > { %10634 = vmatmul.mubr.msk.bf16.gmra.mxu0 %vm1158_vm0, %v11789_v17 }
  0x55   : > { %10637 = vmatprep.mubr.msk.bf16.mxu0 %vm1158_vm0, %v11790_v18 }
  0x5c   : > { %10638 = vmatmul.mubr.msk.bf16.gmra.mxu0 %vm1158_vm0, %v11791_v19 }
  0x5d   : > { %10641 = vmatprep.mubr.msk.bf16.mxu0 %vm1158_vm0, %v11792_v20 }
  0x64   : > { %10642 = vmatmul.mubr.msk.bf16.gmra.mxu0 %vm1158_vm0, %v11793_v21 }
  0x65   : > { %10645 = vmatprep.mubr.msk.bf16.mxu0 %vm1158_vm0, %v11794_v22 }
  0x6c   : > { %10646 = vmatmul.mubr.msk.bf16.gmra.mxu0 %vm1158_vm0, %v11795_v23 }
  0x6d   : > { %10649 = vmatprep.mubr.msk.bf16.mxu0 %vm1158_vm0, %v11796_v24 }
  0x74   : > { %10650 = vmatmul.mubr.msk.bf16.gmra.mxu0 %vm1158_vm0, %v11797_v25 }
  0x75   : > { %10653 = vmatprep.mubr.msk.bf16.mxu0 %vm1158_vm0, %v11798_v26 }
  0x7c   : > { %10654 = vmatmul.mubr.msk.bf16.gmra.mxu0 %vm1158_vm0, %v11799_v27 }
  0x7d   : > { %10657 = vmatprep.mubr.msk.bf16.mxu0 %vm1158_vm0, %v11800_v28 }
  0x84   : > { %10658 = vmatmul.mubr.msk.bf16.gmra.mxu0 %vm1158_vm0, %v11801_v30 }
  0x85   : > { %10661 = vmatprep.mubr.msk.bf16.mxu0 %vm1158_vm0, %v11802_v32 }
  0x8c   : > { %10662 = vmatmul.mubr.msk.bf16.gmra.mxu0 %vm1158_vm0, %v11803_v34 }
  0x8d   : > { %10665 = vmatprep.mubr.msk.bf16.mxu0 %vm1158_vm0, %v11804_v35 }
  0x94   : > { %10666 = vmatmul.mubr.msk.bf16.gmra.mxu0 %vm1158_vm0, %v11805_v36  ;;  %v11835_v36 = vld [vmem:[%s12119_s13 + $0x1d8] sm:$0xff]  }
  0x95   : > { %10669 = vmatprep.mubr.msk.bf16.mxu0 %vm1158_vm0, %v11806_v37 }
  0x9c   : > { %10670 = vmatmul.mubr.msk.bf16.gmra.mxu0 %vm1158_vm0, %v11807_v38 }
  0x9d   : > { %10673 = vmatprep.mubr.msk.bf16.mxu0 %vm1158_vm0, %v11808_v39 }
  0xa4   : > { %10674 = vmatmul.mubr.msk.bf16.gmra.mxu0 %vm1158_vm0, %v11809_v40  ;;  %v11836_v40 = vld [vmem:[%s12119_s13 + $0x1e0] sm:$0xff]  }
  0xa5   : > { %10677 = vmatprep.mubr.msk.bf16.mxu0 %vm1158_vm0, %v11810_v41 }
  0xac   : > { %10678 = vmatmul.mubr.msk.bf16.gmra.mxu0 %vm1158_vm0, %v11811_v42 }
  0xad   : > { %10681 = vmatprep.mubr.msk.bf16.mxu0 %vm1158_vm0, %v11812_v43 }
  0xb4   : > { %10682 = vmatmul.mubr.msk.bf16.gmra.mxu0 %vm1158_vm0, %v11813_v44 }
  0xb5   : > { %10685 = vmatprep.mubr.msk.bf16.mxu0 %vm1158_vm0, %v11814_v45 }
  0xbc   : > { %10686 = vmatmul.mubr.msk.bf16.gmra.mxu0 %vm1158_vm0, %v11815_v46 }
  0xbd   : > { %10689 = vmatprep.mubr.msk.bf16.mxu0 %vm1158_vm0, %v11816_v47 }
  0xc4   : > { %10690 = vmatmul.mubr.msk.bf16.gmra.mxu0 %vm1158_vm0, %v11817_v48 }
  0xc5   : > { %10693 = vmatprep.mubr.msk.bf16.mxu0 %vm1158_vm0, %v11818_v49 }
  0xcc   : > { %10694 = vmatmul.mubr.msk.bf16.gmra.mxu0 %vm1158_vm0, %v11819_v50 }
  0xcd   : > { %10697 = vmatprep.mubr.msk.bf16.mxu0 %vm1158_vm0, %v11820_v51 }
  0xd4   : > { %10698 = vmatmul.mubr.msk.bf16.gmra.mxu0 %vm1158_vm0, %v11821_v52 }
  0xd5   : > { %10701 = vmatprep.mubr.msk.bf16.mxu0 %vm1158_vm0, %v11822_v53 }
  0xdc   : > { %v10607_v56 = vpop.f32.mrf.mxu0  ;;  %10702 = vmatmul.mubr.msk.bf16.gmra.mxu0 %vm1158_vm0, %v11823_v54 }
  0xdd   : > { %10705 = vmatprep.mubr.msk.bf16.mxu0 %vm1158_vm0, %v11824_v55  ;;  %v1586_v15 = vadd.f32 %v10607_v56, %v12254_v11 }
  0xde   : > { %v1577_v57 = vpop.f32.mrf.mxu0 }
  0xdf   : > { %v1578_v17 = vadd.f32 %v12254_v11, %v1577_v57  ;;  %v2602_v24 = vmax.f32 %v1586_v15, 0.0 }
  0xe0   : > { %v10608_v58 = vpop.f32.mrf.mxu0 }
  0xe1   : > { %v1589_v18 = vadd.f32 %v10608_v58, %v12254_v11  ;;  %v2600_v26 = vmax.f32 %v1578_v17, 0.0  ;;  %v2862_v37 = vsel %vm1158_vm0, %v2602_v24, -inf }
  0xe2   : > { %v1580_v61 = vpop.f32.mrf.mxu0 }
  0xe3   : > { %v1581_v20 = vadd.f32 %v12254_v11, %v1580_v61  ;;  %v2603_v27 = vmax.f32 %v1589_v18, 0.0  ;;  %v2856_v41 = vsel %vm1158_vm0, %v2600_v26, -inf }
  0xe4   : > { %v10611_v62 = vpop.f32.mrf.mxu0  ;;  %10706 = vmatmul.mubr.msk.bf16.gmra.mxu0 %vm1158_vm0, %v11825_v59 }
  0xe5   : > { %10709 = vmatprep.mubr.msk.bf16.mxu0 %vm1158_vm0, %v11826_v60  ;;  %v1602_v21 = vadd.f32 %v10611_v62, %v12254_v11  ;;  %v2601_v31 = vmax.f32 %v1581_v20, 0.0  ;;  %v2865_v42 = vsel %vm1158_vm0, %v2603_v27, -inf }
  0xe6   : > { %v1593_v63 = vpop.f32.mrf.mxu0 }
  0xe7   : > { %v1594_v22 = vadd.f32 %v12254_v11, %v1593_v63  ;;  %v2606_v32 = vmax.f32 %v1602_v21, 0.0  ;;  %v2859_v50 = vsel %vm1158_vm0, %v2601_v31, -inf  ;;  %v11838_v21 = vld [vmem:[%s12119_s13 + $0x1f0] sm:$0xff]  }
  0xe8   : > { %v10612_v0 = vpop.f32.mrf.mxu0 }
  0xe9   : > { %v2604_v34 = vmax.f32 %v1594_v22, 0.0  ;;  %v1605_v43 = vadd.f32 %v10612_v0, %v12254_v11  ;;  %v12287_v51 = vsel %vm1158_vm0, %v2606_v32, -inf }
  0xea   : > { %v1596_v3 = vpop.f32.mrf.mxu0 }
  0xeb   : > { %v1597_v46 = vadd.f32 %v12254_v11, %v1596_v3  ;;  %v12290_v52 = vsel %vm1158_vm0, %v2604_v34, -inf  ;;  %v2607_v59 = vmax.f32 %v1605_v43, 0.0 }
  0xec   : > { %v10615_v4 = vpop.f32.mrf.mxu0  ;;  %10710 = vmatmul.mubr.msk.bf16.gmra.mxu0 %vm1158_vm0, %v11827_v1 }
  0xed   : > { %10713 = vmatprep.mubr.msk.bf16.mxu0 %vm1158_vm0, %v11828_v2  ;;  %v1618_v53 = vadd.f32 %v10615_v4, %v12254_v11  ;;  %v2605_v0 = vmax.f32 %v1597_v46, 0.0 }
  0xee   : > { %v1609_v5 = vpop.f32.mrf.mxu0 }
  0xef   : > { %v1610_v60 = vadd.f32 %v12254_v11, %v1609_v5  ;;  %v2610_v4 = vmax.f32 %v1618_v53, 0.0  ;;  %v11839_v53 = vld [vmem:[%s12119_s13 + $0x1f8] sm:$0xff]  }
  0xf0   : > { %v12241_v6 = vpop.f32.mrf.mxu0 }
  0xf1   : > { %v2608_v22 = vmax.f32 %v1610_v60, 0.0 }
  0xf2   : > { %v12245_v9 = vpop.f32.mrf.mxu0 }
  0xf3   : > { %v1613_v32 = vadd.f32 %v12254_v11, %v12245_v9  ;;  %v2886_v9 = vsel %vm1158_vm0, %v2610_v4, -inf }
  0xf4   : > { %v12247_v10 = vpop.f32.mrf.mxu0  ;;  %10714 = vmatmul.mubr.msk.bf16.gmra.mxu0 %vm1158_vm0, %v11829_v7  ;;  %v1621_v7 = vadd.f32 %v12241_v6, %v12254_v11 }
  0xf5   : > { %10717 = vmatprep.mubr.msk.bf16.mxu0 %vm1158_vm0, %v11830_v8 }
  0xf6   : > { %v12256_v12 = vpop.f32.mrf.mxu0  ;;  %v2611_v31 = vmax.f32 %v1621_v7, 0.0 }
  0xf7   : > { %v1626_v4 = vadd.f32 %v12254_v11, %v12256_v12 }
  0xf8   : > { %v12258_v13 = vpop.f32.mrf.mxu0 }
  0xf9   : > { %v1637_v7 = vadd.f32 %v12258_v13, %v12254_v11 }
  0xfa   : > { %v12265_v19 = vpop.f32.mrf.mxu0 }
  0xfc   : > { %v10623_v23 = vpop.f32.mrf.mxu0  ;;  %10718 = vmatmul.mubr.msk.bf16.gmra.mxu0 %vm1158_vm0, %v11831_v14 }
  0xfd   : > { %v1650_v25 = vadd.f32 %v10623_v23, %v12254_v11  ;;  %10721 = vmatprep.mubr.msk.bf16.mxu0 %vm1158_vm0, %v11834_v16  ;;  %v11837_v16 = vld [vmem:[%s12119_s13 + $0x1e8] sm:$0xff]  }
  0xfe   : > { %v1641_v28 = vpop.f32.mrf.mxu0 }
  0xff   : > { %v2618_v29 = vmax.f32 %v1650_v25, 0.0  ;;  %v1642_v30 = vadd.f32 %v12254_v11, %v1641_v28 }
 0x100   : > { %v10624_v35 = vpop.f32.mrf.mxu0 }
 0x101   : > { %v2616_v38 = vmax.f32 %v1642_v30, 0.0  ;;  %v1653_v39 = vadd.f32 %v10624_v35, %v12254_v11  ;;  %v2863_v44 = vsel %vm1158_vm0, %v2618_v29, -inf  ;;  %v2877_v30 = vsel %vm1158_vm0, %v2607_v59, -inf }
 0x102   : > { %v1644_v45 = vpop.f32.mrf.mxu0  ;;  %v2864_v55 = vmax.f32 %v2862_v37, %v2863_v44  ;;  %v2880_v44 = vsel %vm1158_vm0, %v2608_v22, -inf  ;;  %v1634_v59 = vadd.f32 %v12247_v10, %v12254_v11  ;;  %v1629_v10 = vadd.f32 %v12254_v11, %v12265_v19 }
 0x103   : > { %v2857_v47 = vsel %vm1158_vm0, %v2616_v38, -inf  ;;  %v2619_v48 = vmax.f32 %v1653_v39, 0.0  ;;  %v1645_v49 = vadd.f32 %v12254_v11, %v1644_v45 }
 0x104   : > { %v10627_v54 = vpop.f32.mrf.mxu0  ;;  %10722 = vmatmul.mubr.msk.bf16.gmra.mxu0 %vm1158_vm0, %v11835_v36  ;;  %v2858_v61 = vmax.f32 %v2856_v41, %v2857_v47  ;;  %v3243_v5 = vsel %vm1158_vm0, %v2864_v55, -inf }
 0x105   : > { %v2866_v56 = vsel %vm1158_vm0, %v2619_v48, -inf  ;;  %v2617_v57 = vmax.f32 %v1645_v49, 0.0  ;;  %v1666_v58 = vadd.f32 %v10627_v54, %v12254_v11  ;;  %10725 = vmatprep.mubr.msk.bf16.mxu0 %vm1158_vm0, %v11836_v40  ;;  %v2871_v40 = vsel %vm1158_vm0, %v2605_v0, -inf }
 0x106   : > { %v2867_v62 = vmax.f32 %v2865_v42, %v2866_v56  ;;  %v1657_v63 = vpop.f32.mrf.mxu0  ;;  %v3240_v23 = vsel %vm1158_vm0, %v2858_v61, -inf  ;;  %v2889_v48 = vsel %vm1158_vm0, %v2611_v31, -inf  ;;  %v2609_v49 = vmax.f32 %v1613_v32, 0.0  ;;  %v11841_v31 = vld [vmem:[%s12119_s13 + $0x208] sm:$0xff]  }
 0x107   : > { %v2860_v1 = vsel %vm1158_vm0, %v2617_v57, -inf  ;;  %v2622_v2 = vmax.f32 %v1666_v58, 0.0  ;;  %v1658_v3 = vadd.f32 %v12254_v11, %v1657_v63  ;;  %v11840_v58 = vld [vmem:[%s12119_s13 + $0x200] sm:$0xff]   ;;  %v2613_v32 = vmax.f32 %v1629_v10, 0.0 }
 0x108   : > { %v3244_v8 = vsel %vm1158_vm0, %v2867_v62, -inf  ;;  %v2861_v14 = vmax.f32 %v2859_v50, %v2860_v1  ;;  %v10628_v15 = vpop.f32.mrf.mxu0  ;;  %v2883_v12 = vsel %vm1158_vm0, %v2609_v49, -inf }
 0x109   : > { %v2875_v17 = vsel %vm1158_vm0, %v2622_v2, -inf  ;;  %v2620_v18 = vmax.f32 %v1658_v3, 0.0  ;;  %v1669_v20 = vadd.f32 %v10628_v15, %v12254_v11  ;;  %v12309_v24 = vmax.f32 %v3243_v5, %v3244_v8 }
 0x10a   : > { %v3241_v6 = vsel %vm1158_vm0, %v2861_v14, -inf  ;;  %v1660_v25 = vpop.f32.mrf.mxu0  ;;  %v2876_v34 = vmax.f32 %v12287_v51, %v2875_v17 }
 0x10b   : > { %v12312_v26 = vmax.f32 %v3240_v23, %v3241_v6  ;;  %v2869_v27 = vsel %vm1158_vm0, %v2620_v18, -inf  ;;  %v2623_v28 = vmax.f32 %v1669_v20, 0.0  ;;  %v1661_v29 = vadd.f32 %v12254_v11, %v1660_v25 }
 0x10c   : > { %v10631_v35 = vpop.f32.mrf.mxu0  ;;  %10726 = vmatmul.mubr.msk.bf16.gmra.mxu0 %vm1158_vm0, %v11837_v16  ;;  %v2870_v41 = vmax.f32 %v12290_v52, %v2869_v27  ;;  %v3249_v54 = vsel %vm1158_vm0, %v2876_v34, -inf  ;;  %v2612_v25 = vmax.f32 %v1626_v4, 0.0  ;;  %v2615_v27 = vmax.f32 %v1637_v7, 0.0 }
 0x10d   : > { %v2878_v36 = vsel %vm1158_vm0, %v2623_v28, -inf  ;;  %v2621_v37 = vmax.f32 %v1661_v29, 0.0  ;;  %v1682_v38 = vadd.f32 %v10631_v35, %v12254_v11  ;;  %v12325_v39 = vpack.c.bf16 %v12309_v24, %v12312_v26  ;;  %10729 = vmatprep.mubr.msk.bf16.mxu0 %vm1158_vm0, %v11838_v21 }
 0x10e   : > { %v2879_v42 = vmax.f32 %v2877_v30, %v2878_v36  ;;  %v1673_v43 = vpop.f32.mrf.mxu0  ;;  %v3246_v60 = vsel %vm1158_vm0, %v2870_v41, -inf  ;;  %v2614_v21 = vmax.f32 %v1634_v59, 0.0  ;;  %v11842_v36 = vld [vmem:[%s12119_s13 + $0x210] sm:$0xff]   ;;  %v2901_v49 = vsel %vm1158_vm0, %v2615_v27, -inf }
 0x10f   : > { %v2872_v45 = vsel %vm1158_vm0, %v2621_v37, -inf  ;;  %v2626_v46 = vmax.f32 %v1682_v38, 0.0  ;;  %v1674_v47 = vadd.f32 %v12254_v11, %v1673_v43  ;;  %10873 = vmatprep.mubr.msk.bf16.mxu1 %vm1158_vm0, %v12325_v39 }
 0x110   : > { %v3250_v50 = vsel %vm1158_vm0, %v2879_v42, -inf  ;;  %v2873_v51 = vmax.f32 %v2871_v40, %v2872_v45  ;;  %v10632_v52 = vpop.f32.mrf.mxu0 }
 0x111   : > { %v2887_v55 = vsel %vm1158_vm0, %v2626_v46, -inf  ;;  %v2624_v56 = vmax.f32 %v1674_v47, 0.0  ;;  %v1685_v57 = vadd.f32 %v10632_v52, %v12254_v11  ;;  %v3251_v61 = vmax.f32 %v3249_v54, %v3250_v50 }
 0x112   : > { %v3247_v62 = vsel %vm1158_vm0, %v2873_v51, -inf  ;;  %v1676_v63 = vpop.f32.mrf.mxu0  ;;  %v2888_v8 = vmax.f32 %v2886_v9, %v2887_v55  ;;  %v2898_v46 = vsel %vm1158_vm0, %v2614_v21, -inf  ;;  %v2892_v47 = vsel %vm1158_vm0, %v2612_v25, -inf }
 0x113   : > { %v3248_v0 = vmax.f32 %v3246_v60, %v3247_v62  ;;  %v2881_v1 = vsel %vm1158_vm0, %v2624_v56, -inf  ;;  %v2627_v2 = vmax.f32 %v1685_v57, 0.0  ;;  %v1677_v3 = vadd.f32 %v12254_v11, %v1676_v63 }
 0x114   : > { %v10635_v14 = vpop.f32.mrf.mxu0  ;;  %10730 = vmatmul.mubr.msk.bf16.gmra.mxu0 %vm1158_vm0, %v11839_v53  ;;  %v2882_v13 = vmax.f32 %v2880_v44, %v2881_v1  ;;  %v11844_v1 = vld [vmem:[%s12119_s13 + $0x220] sm:$0xff]  }
 0x115   : > { %v2890_v15 = vsel %vm1158_vm0, %v2627_v2, -inf  ;;  %v2625_v16 = vmax.f32 %v1677_v3, 0.0  ;;  %v1698_v5 = vadd.f32 %v10635_v14, %v12254_v11  ;;  %v12358_v17 = vpack.c.bf16 %v3251_v61, %v3248_v0  ;;  %10733 = vmatprep.mubr.msk.bf16.mxu0 %vm1158_vm0, %v11840_v58 }
 0x116   : > { %v2891_v18 = vmax.f32 %v2889_v48, %v2890_v15  ;;  %v1689_v20 = vpop.f32.mrf.mxu0  ;;  %v12363_v19 = vpack.c.bf16 %v3248_v0, %v12309_v24  ;;  %v3255_v24 = vsel %vm1158_vm0, %v2888_v8, -inf  ;;  %v3252_v37 = vsel %vm1158_vm0, %v2882_v13, -inf  ;;  %v11843_v0 = vld [vmem:[%s12119_s13 + $0x218] sm:$0xff]   ;;  %v11846_v13 = vld [vmem:[%s12119_s13 + $0x230] sm:$0xff]  }
 0x117   : > { %v2884_v22 = vsel %vm1158_vm0, %v2625_v16, -inf  ;;  %v2630_v23 = vmax.f32 %v1698_v5, 0.0  ;;  %v1690_v6 = vadd.f32 %v12254_v11, %v1689_v20  ;;  %10874 = vmatmul.mubr.msk.bf16.gmra.mxu1 %vm1158_vm0, %v12358_v17  ;;  %v2895_v58 = vsel %vm1158_vm0, %v2613_v32, -inf  ;;  %v11850_v32 = vld [vmem:[%s12119_s13 + $0x250] sm:$0xff]  }
 0x118   : > { %v3256_v28 = vsel %vm1158_vm0, %v2891_v18, -inf  ;;  %v2885_v29 = vmax.f32 %v2883_v12, %v2884_v22  ;;  %v10636_v30 = vpop.f32.mrf.mxu0  ;;  %v11845_v12 = vld [vmem:[%s12119_s13 + $0x228] sm:$0xff]  }
 0x119   : > { %v2628_v34 = vmax.f32 %v1690_v6, 0.0  ;;  %v1701_v35 = vadd.f32 %v10636_v30, %v12254_v11  ;;  %v3257_v38 = vmax.f32 %v3255_v24, %v3256_v28  ;;  %v2899_v9 = vsel %vm1158_vm0, %v2630_v23, -inf  ;;  %v11847_v23 = vld [vmem:[%s12119_s13 + $0x238] sm:$0xff]   ;;  %v11848_v6 = vld [vmem:[%s12119_s13 + $0x240] sm:$0xff]   ;;  %v11849_v30 = vld [vmem:[%s12119_s13 + $0x248] sm:$0xff]  }
 0x11a   : > { %v3253_v40 = vsel %vm1158_vm0, %v2885_v29, -inf  ;;  %v1692_v41 = vpop.f32.mrf.mxu0  ;;  %v2900_v53 = vmax.f32 %v2898_v46, %v2899_v9 }
 0x11b   : > { %v3254_v42 = vmax.f32 %v3252_v37, %v3253_v40  ;;  %v2893_v43 = vsel %vm1158_vm0, %v2628_v34, -inf  ;;  %v2631_v44 = vmax.f32 %v1701_v35, 0.0  ;;  %v1693_v45 = vadd.f32 %v12254_v11, %v1692_v41  ;;  %v11880_v35 = vld [vmem:[%s16462_s3 + $0x48] sm:$0xff]  }
 0x11c   : > { %v10639_v48 = vpop.f32.mrf.mxu0  ;;  %10734 = vmatmul.mubr.msk.bf16.gmra.mxu0 %vm1158_vm0, %v11841_v31  ;;  %v2894_v54 = vmax.f32 %v2892_v47, %v2893_v43  ;;  %v3261_v2 = vsel %vm1158_vm0, %v2900_v53, -inf  ;;  %11133 = vmatprep.subr.bf16.mxu0 %v11880_v35 }
 0x11d   : > { %v2902_v50 = vsel %vm1158_vm0, %v2631_v44, -inf  ;;  %v2629_v51 = vmax.f32 %v1693_v45, 0.0  ;;  %v12384_v52 = vpack.c.bf16 %v3257_v38, %v3254_v42  ;;  %10737 = vmatprep.mubr.msk.bf16.mxu0 %vm1158_vm0, %v11842_v36  ;;  %v12387_v57 = vpack.c.bf16 %v3254_v42, %v3251_v61  ;;  %11134 = vmatpush3.bf16.msra.mxu0 %v11880_v35 }
 0x11e   : > { %v2903_v55 = vmax.f32 %v2901_v49, %v2902_v50  ;;  %v1705_v56 = vpop.f32.mrf.mxu0  ;;  %v3258_v61 = vsel %vm1158_vm0, %v2894_v54, -inf  ;;  %v1714_v31 = vadd.f32 %v10639_v48, %v12254_v11 }
 0x11f   : > { %16529 = vst [vmem:[#allocation5_spill] sm:$0xff] %v12387_v57  ;;  %v2896_v59 = vsel %vm1158_vm0, %v2629_v51, -inf  ;;  %10877 = vmatprep.mubr.msk.bf16.mxu1 %vm1158_vm0, %v12384_v52  ;;  %v1706_v24 = vadd.f32 %v12254_v11, %v1705_v56  ;;  %v11851_v51 = vld [vmem:[%s12119_s13 + $0x258] sm:$0xff]   ;;  %v11852_v56 = vld [vmem:[%s12119_s13 + $0x260] sm:$0xff]  }
 0x120   : > { %v3262_v60 = vsel %vm1158_vm0, %v2903_v55, -inf  ;;  %v2897_v62 = vmax.f32 %v2895_v58, %v2896_v59  ;;  %v10640_v63 = vpop.f32.mrf.mxu0  ;;  %v2634_v9 = vmax.f32 %v1714_v31, 0.0 }
 0x121   : > { %v12399_v7 = vmax.f32 %v3261_v2, %v3262_v60  ;;  %v1717_v36 = vadd.f32 %v10640_v63, %v12254_v11  ;;  %v2632_v42 = vmax.f32 %v1706_v24, 0.0 }
 0x122   : > { %v3259_v3 = vsel %vm1158_vm0, %v2897_v62, -inf  ;;  %v1708_v4 = vpop.f32.mrf.mxu0  ;;  %v2910_v53 = vsel %vm1158_vm0, %v2634_v9, -inf }
 0x123   : > { %16530 = vst [vmem:[#allocation6_spill] sm:$0xff] %v12399_v7  ;;  %v3260_v10 = vmax.f32 %v3258_v61, %v3259_v3  ;;  %v1709_v37 = vadd.f32 %v12254_v11, %v1708_v4  ;;  %v2635_v47 = vmax.f32 %v1717_v36, 0.0  ;;  %v2904_v58 = vsel %vm1158_vm0, %v2632_v42, -inf  ;;  %v11853_v42 = vld [vmem:[%s12119_s13 + $0x268] sm:$0xff]  }
 0x124   : > { %v10643_v8 = vpop.f32.mrf.mxu0  ;;  %10738 = vmatmul.mubr.msk.bf16.gmra.mxu0 %vm1158_vm0, %v11843_v0 }
 0x125   : > { %v12403_v14 = vpack.c.bf16 %v12399_v7, %v3260_v10  ;;  %10741 = vmatprep.mubr.msk.bf16.mxu0 %vm1158_vm0, %v11844_v1  ;;  %v12406_v15 = vpack.c.bf16 %v3260_v10, %v3257_v38  ;;  %v1730_v38 = vadd.f32 %v10643_v8, %v12254_v11  ;;  %v2633_v48 = vmax.f32 %v1709_v37, 0.0 }
 0x126   : > { %v1721_v16 = vpop.f32.mrf.mxu0  ;;  %v2913_v3 = vsel %vm1158_vm0, %v2635_v47, -inf  ;;  %v11854_v47 = vld [vmem:[%s12119_s13 + $0x270] sm:$0xff]  }
 0x127   : > { %10878 = vmatmul.mubr.msk.bf16.gmra.mxu1 %vm1158_vm0, %v12403_v14  ;;  %v1722_v43 = vadd.f32 %v12254_v11, %v1721_v16  ;;  %v2638_v49 = vmax.f32 %v1730_v38, 0.0  ;;  %v2907_v4 = vsel %vm1158_vm0, %v2633_v48, -inf }
 0x128   : > { %v10644_v5 = vpop.f32.mrf.mxu0 }
 0x129   : > { %v2636_v59 = vmax.f32 %v1722_v43, 0.0  ;;  %v1733_v60 = vadd.f32 %v10644_v5, %v12254_v11  ;;  %v12460_v10 = vsel %vm1158_vm0, %v2638_v49, -inf }
 0x12a   : > { %v1724_v18 = vpop.f32.mrf.mxu0 }
 0x12b   : > { %v1725_v0 = vadd.f32 %v12254_v11, %v1724_v18 }
 0x12c   : > { %v10647_v20 = vpop.f32.mrf.mxu0  ;;  %10742 = vmatmul.mubr.msk.bf16.gmra.mxu0 %vm1158_vm0, %v11845_v12 }
 0x12d   : > { %10745 = vmatprep.mubr.msk.bf16.mxu0 %vm1158_vm0, %v11846_v13  ;;  %v1746_v8 = vadd.f32 %v10647_v20, %v12254_v11 }
 0x12e   : > { %v12414_v21 = vpop.f32.mrf.mxu0 }
 0x12f   : > { %v1738_v37 = vadd.f32 %v12254_v11, %v12414_v21  ;;  %v2642_v43 = vmax.f32 %v1746_v8, 0.0 }
 0x130   : > { %v12416_v22 = vpop.f32.mrf.mxu0 }
 0x131   : > { %v1749_v38 = vadd.f32 %v12416_v22, %v12254_v11 }
 0x132   : > { %v12420_v25 = vpop.f32.mrf.mxu0 }
 0x134   : > { %v12422_v27 = vpop.f32.mrf.mxu0  ;;  %10746 = vmatmul.mubr.msk.bf16.gmra.mxu0 %vm1158_vm0, %v11847_v23  ;;  %v12468_v23 = vsel %vm1158_vm0, %v2636_v59, -inf  ;;  %v2643_v59 = vmax.f32 %v1749_v38, 0.0 }
 0x135   : > { %10749 = vmatprep.mubr.msk.bf16.mxu0 %vm1158_vm0, %v11848_v6  ;;  %v2639_v6 = vmax.f32 %v1733_v60, 0.0  ;;  %v1741_v60 = vadd.f32 %v12254_v11, %v12420_v25 }
 0x136   : > { %v12426_v28 = vpop.f32.mrf.mxu0 }
 0x138   : > { %v12428_v29 = vpop.f32.mrf.mxu0 }
 0x13a   : > { %v12434_v34 = vpop.f32.mrf.mxu0 }
 0x13c   : > { %v10655_v40 = vpop.f32.mrf.mxu0  ;;  %10750 = vmatmul.mubr.msk.bf16.gmra.mxu0 %vm1158_vm0, %v11849_v30 }
 0x13d   : > { %v1778_v41 = vadd.f32 %v10655_v40, %v12254_v11  ;;  %10753 = vmatprep.mubr.msk.bf16.mxu0 %vm1158_vm0, %v11850_v32  ;;  %v2637_v32 = vmax.f32 %v1725_v0, 0.0 }
 0x13e   : > { %v1769_v44 = vpop.f32.mrf.mxu0 }
 0x13f   : > { %v2650_v45 = vmax.f32 %v1778_v41, 0.0  ;;  %v1770_v46 = vadd.f32 %v12254_v11, %v1769_v44 }
 0x140   : > { %v10656_v50 = vpop.f32.mrf.mxu0 }
 0x141   : > { %v2648_v54 = vmax.f32 %v1770_v46, 0.0  ;;  %v1781_v55 = vadd.f32 %v10656_v50, %v12254_v11  ;;  %v2911_v62 = vsel %vm1158_vm0, %v2650_v45, -inf }
 0x142   : > { %v1772_v63 = vpop.f32.mrf.mxu0  ;;  %v2912_v5 = vmax.f32 %v2910_v53, %v2911_v62 }
 0x143   : > { %v2905_v1 = vsel %vm1158_vm0, %v2648_v54, -inf  ;;  %v2651_v2 = vmax.f32 %v1781_v55, 0.0  ;;  %v1773_v61 = vadd.f32 %v12254_v11, %v1772_v63 }
 0x144   : > { %v10659_v16 = vpop.f32.mrf.mxu0  ;;  %10754 = vmatmul.mubr.msk.bf16.gmra.mxu0 %vm1158_vm0, %v11851_v51  ;;  %v2906_v30 = vmax.f32 %v2904_v58, %v2905_v1  ;;  %v3267_v44 = vsel %vm1158_vm0, %v2912_v5, -inf  ;;  %v2640_v58 = vmax.f32 %v1738_v37, 0.0 }
 0x145   : > { %v2914_v12 = vsel %vm1158_vm0, %v2651_v2, -inf  ;;  %v2649_v13 = vmax.f32 %v1773_v61, 0.0  ;;  %v1794_v18 = vadd.f32 %v10659_v16, %v12254_v11  ;;  %10757 = vmatprep.mubr.msk.bf16.mxu0 %vm1158_vm0, %v11852_v56  ;;  %v2925_v56 = vsel %vm1158_vm0, %v2639_v6, -inf }
 0x146   : > { %v2915_v31 = vmax.f32 %v2913_v3, %v2914_v12  ;;  %v1785_v20 = vpop.f32.mrf.mxu0  ;;  %v3264_v48 = vsel %vm1158_vm0, %v2906_v30, -inf  ;;  %v2919_v61 = vsel %vm1158_vm0, %v2637_v32, -inf  ;;  %v2934_v16 = vsel %vm1158_vm0, %v2642_v43, -inf }
 0x147   : > { %v2908_v24 = vsel %vm1158_vm0, %v2649_v13, -inf  ;;  %v2654_v35 = vmax.f32 %v1794_v18, 0.0  ;;  %v1786_v36 = vadd.f32 %v12254_v11, %v1785_v20  ;;  %v2928_v18 = vsel %vm1158_vm0, %v2640_v58, -inf }
 0x148   : > { %v3268_v40 = vsel %vm1158_vm0, %v2915_v31, -inf  ;;  %v2909_v9 = vmax.f32 %v2907_v4, %v2908_v24  ;;  %v10660_v41 = vpop.f32.mrf.mxu0  ;;  %v2937_v6 = vsel %vm1158_vm0, %v2643_v59, -inf  ;;  %v11855_v31 = vld [vmem:[%s12119_s13 + $0x278] sm:$0xff]   ;;  %v1762_v20 = vadd.f32 %v12422_v27, %v12254_v11 }
 0x149   : > { %v2652_v45 = vmax.f32 %v1786_v36, 0.0  ;;  %v1797_v46 = vadd.f32 %v10660_v41, %v12254_v11  ;;  %v3269_v49 = vmax.f32 %v3267_v44, %v3268_v40  ;;  %v2923_v50 = vsel %vm1158_vm0, %v2654_v35, -inf  ;;  %v11856_v36 = vld [vmem:[%s12119_s13 + $0x280] sm:$0xff]  }
 0x14a   : > { %v3265_v21 = vsel %vm1158_vm0, %v2909_v9, -inf  ;;  %v1788_v22 = vpop.f32.mrf.mxu0  ;;  %v2924_v3 = vmax.f32 %v12460_v10, %v2923_v50  ;;  %v2641_v10 = vmax.f32 %v1741_v60, 0.0 }
 0x14b   : > { %v12484_v51 = vmax.f32 %v3264_v48, %v3265_v21  ;;  %v2917_v53 = vsel %vm1158_vm0, %v2652_v45, -inf  ;;  %v2655_v54 = vmax.f32 %v1797_v46, 0.0  ;;  %v1789_v55 = vadd.f32 %v12254_v11, %v1788_v22 }
 0x14c   : > { %v10663_v62 = vpop.f32.mrf.mxu0  ;;  %10758 = vmatmul.mubr.msk.bf16.gmra.mxu0 %vm1158_vm0, %v11853_v42  ;;  %v2918_v25 = vmax.f32 %v12468_v23, %v2917_v53  ;;  %v3273_v37 = vsel %vm1158_vm0, %v2924_v3, -inf  ;;  %v1754_v45 = vadd.f32 %v12254_v11, %v12426_v28  ;;  %v1765_v46 = vadd.f32 %v12428_v29, %v12254_v11  ;;  %v11857_v3 = vld [vmem:[%s12119_s13 + $0x288] sm:$0xff]  }
 0x14d   : > { %v2926_v63 = vsel %vm1158_vm0, %v2655_v54, -inf  ;;  %v2653_v0 = vmax.f32 %v1789_v55, 0.0  ;;  %v1810_v1 = vadd.f32 %v10663_v62, %v12254_v11  ;;  %v12495_v2 = vpack.c.bf16 %v3269_v49, %v12484_v51  ;;  %10761 = vmatprep.mubr.msk.bf16.mxu0 %vm1158_vm0, %v11854_v47 }
 0x14e   : > { %v2927_v4 = vmax.f32 %v2925_v56, %v2926_v63  ;;  %v1801_v8 = vpop.f32.mrf.mxu0  ;;  %v3270_v38 = vsel %vm1158_vm0, %v2918_v25, -inf  ;;  %v1757_v47 = vadd.f32 %v12254_v11, %v12434_v34  ;;  %v2931_v34 = vsel %vm1158_vm0, %v2641_v10, -inf }
 0x14f   : > { %16531 = vst [vmem:[#allocation7_spill] sm:$0xff] %v12495_v2  ;;  %v2920_v5 = vsel %vm1158_vm0, %v2653_v0, -inf  ;;  %v2658_v12 = vmax.f32 %v1810_v1, 0.0  ;;  %v1802_v13 = vadd.f32 %v12254_v11, %v1801_v8  ;;  %10881 = vmatprep.mubr.msk.bf16.mxu1 %vm1158_vm0, %v12495_v2  ;;  %v2646_v62 = vmax.f32 %v1762_v20, 0.0 }
 0x150   : > { %v2921_v30 = vmax.f32 %v2919_v61, %v2920_v5  ;;  %v10664_v23 = vpop.f32.mrf.mxu0  ;;  %v3274_v32 = vsel %vm1158_vm0, %v2927_v4, -inf  ;;  %v2644_v63 = vmax.f32 %v1754_v45, 0.0  ;;  %v2647_v0 = vmax.f32 %v1765_v46, 0.0  ;;  %v11858_v5 = vld [vmem:[%s12119_s13 + $0x290] sm:$0xff]  }
 0x151   : > { %v2656_v24 = vmax.f32 %v1802_v13, 0.0  ;;  %v1813_v35 = vadd.f32 %v10664_v23, %v12254_v11  ;;  %v2935_v9 = vsel %vm1158_vm0, %v2658_v12, -inf  ;;  %v3275_v48 = vmax.f32 %v3273_v37, %v3274_v32 }
 0x152   : > { %v3271_v40 = vsel %vm1158_vm0, %v2921_v30, -inf  ;;  %v1804_v41 = vpop.f32.mrf.mxu0  ;;  %v2936_v28 = vmax.f32 %v2934_v16, %v2935_v9  ;;  %v2645_v25 = vmax.f32 %v1757_v47, 0.0  ;;  %v2946_v32 = vsel %vm1158_vm0, %v2646_v62, -inf }
 0x153   : > { %v3272_v42 = vmax.f32 %v3270_v38, %v3271_v40  ;;  %v2929_v43 = vsel %vm1158_vm0, %v2656_v24, -inf  ;;  %v2659_v44 = vmax.f32 %v1813_v35, 0.0  ;;  %v1805_v27 = vadd.f32 %v12254_v11, %v1804_v41 }
 0x154   : > { %v10667_v21 = vpop.f32.mrf.mxu0  ;;  %10762 = vmatmul.mubr.msk.bf16.gmra.mxu0 %vm1158_vm0, %v11855_v31  ;;  %v2930_v55 = vmax.f32 %v2928_v18, %v2929_v43  ;;  %v3279_v12 = vsel %vm1158_vm0, %v2936_v28, -inf  ;;  %v2940_v24 = vsel %vm1158_vm0, %v2644_v63, -inf  ;;  %v2949_v37 = vsel %vm1158_vm0, %v2647_v0, -inf  ;;  %v11861_v0 = vld [vmem:[%s12119_s13 + $0x2a8] sm:$0xff]  }
 0x155   : > { %v12527_v50 = vpack.c.bf16 %v3272_v42, %v3269_v49  ;;  %v2938_v22 = vsel %vm1158_vm0, %v2659_v44, -inf  ;;  %v2657_v53 = vmax.f32 %v1805_v27, 0.0  ;;  %v1826_v54 = vadd.f32 %v10667_v21, %v12254_v11  ;;  %10765 = vmatprep.mubr.msk.bf16.mxu0 %vm1158_vm0, %v11856_v36 }
 0x156   : > { %v2939_v29 = vmax.f32 %v2937_v6, %v2938_v22  ;;  %v1817_v56 = vpop.f32.mrf.mxu0  ;;  %v12532_v58 = vpack.c.bf16 %v3275_v48, %v3272_v42  ;;  %v3276_v13 = vsel %vm1158_vm0, %v2930_v55, -inf  ;;  %v2943_v45 = vsel %vm1158_vm0, %v2645_v25, -inf  ;;  %v11859_v22 = vld [vmem:[%s12119_s13 + $0x298] sm:$0xff]  }
 0x157   : > { %v2932_v49 = vsel %vm1158_vm0, %v2657_v53, -inf  ;;  %v2662_v59 = vmax.f32 %v1826_v54, 0.0  ;;  %v1818_v60 = vadd.f32 %v12254_v11, %v1817_v56  ;;  %v11860_v53 = vld [vmem:[%s12119_s13 + $0x2a0] sm:$0xff]  }
 0x158   : > { %16532 = vst [vmem:[#allocation8_spill] sm:$0xff] %v12532_v58  ;;  %v2933_v1 = vmax.f32 %v2931_v34, %v2932_v49  ;;  %10882 = vmatmul.mubr.msk.bf16.gmra.mxu1 %vm1158_vm0, %v12532_v58  ;;  %v10668_v61 = vpop.f32.mrf.mxu0  ;;  %v3280_v4 = vsel %vm1158_vm0, %v2939_v29, -inf }
 0x159   : > { %v2660_v8 = vmax.f32 %v1818_v60, 0.0  ;;  %v1829_v16 = vadd.f32 %v10668_v61, %v12254_v11  ;;  %v2947_v6 = vsel %vm1158_vm0, %v2662_v59, -inf  ;;  %v3281_v35 = vmax.f32 %v3279_v12, %v3280_v4 }
 0x15a   : > { %v3277_v18 = vsel %vm1158_vm0, %v2933_v1, -inf  ;;  %v1820_v10 = vpop.f32.mrf.mxu0  ;;  %v2948_v41 = vmax.f32 %v2946_v32, %v2947_v6  ;;  %v11862_v1 = vld [vmem:[%s12119_s13 + $0x2b0] sm:$0xff]   ;;  %v11865_v6 = vld [vmem:[%s12119_s13 + $0x2c8] sm:$0xff]  }
 0x15b   : > { %v3278_v30 = vmax.f32 %v3276_v13, %v3277_v18  ;;  %v2941_v23 = vsel %vm1158_vm0, %v2660_v8, -inf  ;;  %v2663_v31 = vmax.f32 %v1829_v16, 0.0  ;;  %v1821_v20 = vadd.f32 %v12254_v11, %v1820_v10  ;;  %v11863_v8 = vld [vmem:[%s12119_s13 + $0x2b8] sm:$0xff]   ;;  %v11864_v16 = vld [vmem:[%s12119_s13 + $0x2c0] sm:$0xff]  }
 0x15c   : > { %v10671_v36 = vpop.f32.mrf.mxu0  ;;  %10766 = vmatmul.mubr.msk.bf16.gmra.mxu0 %vm1158_vm0, %v11857_v3  ;;  %v2942_v42 = vmax.f32 %v2940_v24, %v2941_v23  ;;  %v3285_v54 = vsel %vm1158_vm0, %v2948_v41, -inf }
 0x15d   : > { %v12553_v38 = vpack.c.bf16 %v3278_v30, %v3275_v48  ;;  %v2950_v40 = vsel %vm1158_vm0, %v2663_v31, -inf  ;;  %v2661_v9 = vmax.f32 %v1821_v20, 0.0  ;;  %10769 = vmatprep.mubr.msk.bf16.mxu0 %vm1158_vm0, %v11858_v5  ;;  %v12557_v27 = vpack.c.bf16 %v3281_v35, %v3278_v30  ;;  %v11866_v30 = vld [vmem:[%s12119_s13 + $0x2d0] sm:$0xff]  }
 0x15e   : > { %v2951_v43 = vmax.f32 %v2949_v37, %v2950_v40  ;;  %v1833_v44 = vpop.f32.mrf.mxu0  ;;  %v3282_v28 = vsel %vm1158_vm0, %v2942_v42, -inf  ;;  %v1842_v10 = vadd.f32 %v10671_v36, %v12254_v11 }
 0x15f   : > { %16533 = vst [vmem:[#allocation9_spill] sm:$0xff] %v12557_v27  ;;  %v2944_v46 = vsel %vm1158_vm0, %v2661_v9, -inf  ;;  %10885 = vmatprep.mubr.msk.bf16.mxu1 %vm1158_vm0, %v12557_v27  ;;  %v1834_v23 = vadd.f32 %v12254_v11, %v1833_v44 }
 0x160   : > { %v3286_v47 = vsel %vm1158_vm0, %v2951_v43, -inf  ;;  %v2945_v48 = vmax.f32 %v2943_v45, %v2944_v46  ;;  %v10672_v21 = vpop.f32.mrf.mxu0  ;;  %v2666_v37 = vmax.f32 %v1842_v10, 0.0 }
 0x161   : > { %v12569_v56 = vmax.f32 %v3285_v54, %v3286_v47  ;;  %v1845_v20 = vadd.f32 %v10672_v21, %v12254_v11  ;;  %v2664_v36 = vmax.f32 %v1834_v23, 0.0  ;;  %v11868_v54 = vld [vmem:[%s12119_s13 + $0x2e0] sm:$0xff]  }
 0x162   : > { %v3283_v55 = vsel %vm1158_vm0, %v2945_v48, -inf  ;;  %v1836_v29 = vpop.f32.mrf.mxu0  ;;  %v11867_v48 = vld [vmem:[%s12119_s13 + $0x2d8] sm:$0xff]   ;;  %v2958_v21 = vsel %vm1158_vm0, %v2666_v37, -inf }
 0x163   : > { %16534 = vst [vmem:[#allocation10_spill] sm:$0xff] %v12569_v56  ;;  %v3284_v34 = vmax.f32 %v3282_v28, %v3283_v55  ;;  %v1837_v32 = vadd.f32 %v12254_v11, %v1836_v29  ;;  %v2667_v44 = vmax.f32 %v1845_v20, 0.0  ;;  %v2952_v28 = vsel %vm1158_vm0, %v2664_v36, -inf }
 0x164   : > { %v10675_v49 = vpop.f32.mrf.mxu0  ;;  %10770 = vmatmul.mubr.msk.bf16.gmra.mxu0 %vm1158_vm0, %v11859_v22 }
 0x165   : > { %v12572_v59 = vpack.c.bf16 %v3284_v34, %v3281_v35  ;;  %v12575_v60 = vpack.c.bf16 %v12569_v56, %v3284_v34  ;;  %10773 = vmatprep.mubr.msk.bf16.mxu0 %vm1158_vm0, %v11860_v53  ;;  %v1858_v24 = vadd.f32 %v10675_v49, %v12254_v11  ;;  %v2665_v45 = vmax.f32 %v1837_v32, 0.0 }
 0x166   : > { %v1849_v62 = vpop.f32.mrf.mxu0 }
 0x167   : > { %16535 = vst [vmem:[#allocation11_spill] sm:$0xff] %v12575_v60  ;;  %10886 = vmatmul.mubr.msk.bf16.gmra.mxu1 %vm1158_vm0, %v12575_v60  ;;  %v1850_v9 = vadd.f32 %v12254_v11, %v1849_v62  ;;  %v2670_v46 = vmax.f32 %v1858_v24, 0.0 }
 0x168   : > { %v10676_v63 = vpop.f32.mrf.mxu0 }
 0x169   : > { %v2668_v55 = vmax.f32 %v1850_v9, 0.0  ;;  %v1861_v29 = vadd.f32 %v10676_v63, %v12254_v11  ;;  %v12627_v10 = vsel %vm1158_vm0, %v2670_v46, -inf }
 0x16a   : > { %v1852_v61 = vpop.f32.mrf.mxu0 }
 0x16b   : > { %v1853_v62 = vadd.f32 %v12254_v11, %v1852_v61  ;;  %v12635_v24 = vsel %vm1158_vm0, %v2668_v55, -inf }
 0x16c   : > { %v10679_v3 = vpop.f32.mrf.mxu0  ;;  %10774 = vmatmul.mubr.msk.bf16.gmra.mxu0 %vm1158_vm0, %v11861_v0 }
 0x16d   : > { %10777 = vmatprep.mubr.msk.bf16.mxu0 %vm1158_vm0, %v11862_v1  ;;  %v2669_v36 = vmax.f32 %v1853_v62, 0.0 }
 0x16e   : > { %v12584_v25 = vpop.f32.mrf.mxu0 }
 0x170   : > { %v12586_v4 = vpop.f32.mrf.mxu0 }
 0x172   : > { %v12590_v5 = vpop.f32.mrf.mxu0 }
 0x174   : > { %v12592_v12 = vpop.f32.mrf.mxu0  ;;  %10778 = vmatmul.mubr.msk.bf16.gmra.mxu0 %vm1158_vm0, %v11863_v8 }
 0x175   : > { %10781 = vmatprep.mubr.msk.bf16.mxu0 %vm1158_vm0, %v11864_v16  ;;  %v2961_v16 = vsel %vm1158_vm0, %v2667_v44, -inf  ;;  %v1877_v44 = vadd.f32 %v12586_v4, %v12254_v11 }
 0x176   : > { %v12596_v13 = vpop.f32.mrf.mxu0 }
 0x178   : > { %v12598_v18 = vpop.f32.mrf.mxu0 }
 0x17a   : > { %v12604_v31 = vpop.f32.mrf.mxu0 }
 0x17c   : > { %v10687_v35 = vpop.f32.mrf.mxu0  ;;  %10782 = vmatmul.mubr.msk.bf16.gmra.mxu0 %vm1158_vm0, %v11865_v6  ;;  %v2955_v6 = vsel %vm1158_vm0, %v2665_v45, -inf }
 0x17d   : > { %v1906_v40 = vadd.f32 %v10687_v35, %v12254_v11  ;;  %10785 = vmatprep.mubr.msk.bf16.mxu0 %vm1158_vm0, %v11866_v30  ;;  %v1874_v30 = vadd.f32 %v10679_v3, %v12254_v11  ;;  %v2671_v35 = vmax.f32 %v1861_v29, 0.0 }
 0x17e   : > { %v1897_v41 = vpop.f32.mrf.mxu0 }
 0x17f   : > { %v2682_v42 = vmax.f32 %v1906_v40, 0.0  ;;  %v1898_v43 = vadd.f32 %v12254_v11, %v1897_v41 }
 0x180   : > { %v10688_v47 = vpop.f32.mrf.mxu0 }
 0x181   : > { %v2680_v22 = vmax.f32 %v1898_v43, 0.0  ;;  %v1909_v53 = vadd.f32 %v10688_v47, %v12254_v11  ;;  %v2959_v34 = vsel %vm1158_vm0, %v2682_v42, -inf  ;;  %v1866_v43 = vadd.f32 %v12254_v11, %v12584_v25 }
 0x182   : > { %v1900_v49 = vpop.f32.mrf.mxu0  ;;  %v2960_v23 = vmax.f32 %v2958_v21, %v2959_v34  ;;  %v2674_v21 = vmax.f32 %v1874_v30, 0.0  ;;  %v1869_v30 = vadd.f32 %v12254_v11, %v12590_v5 }
 0x183   : > { %v2953_v0 = vsel %vm1158_vm0, %v2680_v22, -inf  ;;  %v2683_v1 = vmax.f32 %v1909_v53, 0.0  ;;  %v1901_v8 = vadd.f32 %v12254_v11, %v1900_v49 }
 0x184   : > { %v10691_v63 = vpop.f32.mrf.mxu0  ;;  %10786 = vmatmul.mubr.msk.bf16.gmra.mxu0 %vm1158_vm0, %v11867_v48  ;;  %v2954_v37 = vmax.f32 %v2952_v28, %v2953_v0  ;;  %v11869_v48 = vld [vmem:[%s12119_s13 + $0x2e8] sm:$0xff]   ;;  %v3291_v22 = vsel %vm1158_vm0, %v2960_v23, -inf  ;;  %v11870_v28 = vld [vmem:[%s12119_s13 + $0x2f0] sm:$0xff]  }
 0x185   : > { %v2962_v61 = vsel %vm1158_vm0, %v2683_v1, -inf  ;;  %v2681_v20 = vmax.f32 %v1901_v8, 0.0  ;;  %v1922_v32 = vadd.f32 %v10691_v63, %v12254_v11  ;;  %10789 = vmatprep.mubr.msk.bf16.mxu0 %vm1158_vm0, %v11868_v54  ;;  %v2973_v8 = vsel %vm1158_vm0, %v2671_v35, -inf }
 0x186   : > { %v2963_v40 = vmax.f32 %v2961_v16, %v2962_v61  ;;  %v1913_v3 = vpop.f32.mrf.mxu0  ;;  %v3288_v55 = vsel %vm1158_vm0, %v2954_v37, -inf  ;;  %v2672_v16 = vmax.f32 %v1866_v43, 0.0 }
 0x187   : > { %v2956_v9 = vsel %vm1158_vm0, %v2681_v20, -inf  ;;  %v2686_v41 = vmax.f32 %v1922_v32, 0.0  ;;  %v1914_v42 = vadd.f32 %v12254_v11, %v1913_v3  ;;  %v12663_v20 = vld [vmem:[%s16463_s4] ss:$0 sm:$0xff] }
 0x188   : > { %v3292_v45 = vsel %vm1158_vm0, %v2963_v40, -inf  ;;  %v2957_v46 = vmax.f32 %v2955_v6, %v2956_v9  ;;  %v10692_v47 = vpop.f32.mrf.mxu0  ;;  %v2675_v6 = vmax.f32 %v1877_v44, 0.0  ;;  %v2982_v9 = vsel %vm1158_vm0, %v2674_v21, -inf }
 0x189   : > { %v2684_v53 = vmax.f32 %v1914_v42, 0.0  ;;  %v1925_v54 = vadd.f32 %v10692_v47, %v12254_v11  ;;  %v3293_v29 = vmax.f32 %v3291_v22, %v3292_v45  ;;  %v2971_v34 = vsel %vm1158_vm0, %v2686_v41, -inf }
 0x18a   : > { %v3289_v25 = vsel %vm1158_vm0, %v2957_v46, -inf  ;;  %v1916_v4 = vpop.f32.mrf.mxu0  ;;  %v2972_v5 = vmax.f32 %v12627_v10, %v2971_v34  ;;  %v2976_v44 = vsel %vm1158_vm0, %v2672_v16, -inf  ;;  %v2673_v10 = vmax.f32 %v1869_v30, 0.0  ;;  %v11871_v46 = vld [vmem:[%s12119_s13 + $0x2f8] sm:$0xff]  }
 0x18b   : > { %v12651_v49 = vmax.f32 %v3288_v55, %v3289_v25  ;;  %v2965_v62 = vsel %vm1158_vm0, %v2684_v53, -inf  ;;  %v2687_v0 = vmax.f32 %v1925_v54, 0.0  ;;  %v1917_v1 = vadd.f32 %v12254_v11, %v1916_v4  ;;  %v11872_v53 = vld [vmem:[%s12119_s13 + $0x300] sm:$0xff]  }
 0x18c   : > { %v10695_v63 = vpop.f32.mrf.mxu0  ;;  %10790 = vmatmul.mubr.msk.bf16.gmra.mxu0 %vm1158_vm0, %v11869_v48  ;;  %v2967_v11 = vsel %vm1158_vm0, %v2669_v36, -inf  ;;  %v2966_v37 = vmax.f32 %v12635_v24, %v2965_v62  ;;  %v2985_v36 = vsel %vm1158_vm0, %v2675_v6, -inf  ;;  %v1890_v47 = vadd.f32 %v12663_v20, %v12592_v12 }
 0x18d   : > { %v2974_v23 = vsel %vm1158_vm0, %v2687_v0, -inf  ;;  %v2685_v61 = vmax.f32 %v1917_v1, 0.0  ;;  %v1938_v32 = vadd.f32 %v12663_v20, %v10695_v63  ;;  %v12667_v35 = vpack.c.bf16 %v3293_v29, %v12651_v49  ;;  %10793 = vmatprep.mubr.msk.bf16.mxu0 %vm1158_vm0, %v11870_v28 }
 0x18e   : > { %v2975_v40 = vmax.f32 %v2973_v8, %v2974_v23  ;;  %v1929_v3 = vpop.f32.mrf.mxu0  ;;  %v3297_v54 = vsel %vm1158_vm0, %v2972_v5, -inf  ;;  %v3294_v28 = vsel %vm1158_vm0, %v2966_v37, -inf  ;;  %v1882_v1 = vadd.f32 %v12663_v20, %v12596_v13 }
 0x18f   : > { %16536 = vst [vmem:[#allocation12_spill] sm:$0xff] %v12667_v35  ;;  %v2968_v41 = vsel %vm1158_vm0, %v2685_v61, -inf  ;;  %v2690_v42 = vmax.f32 %v1938_v32, 0.0  ;;  %v1930_v43 = vadd.f32 %v12663_v20, %v1929_v3  ;;  %10889 = vmatprep.mubr.msk.bf16.mxu1 %vm1158_vm0, %v12667_v35  ;;  %v1893_v8 = vadd.f32 %v12663_v20, %v12598_v18 }
 0x190   : > { %v2969_v45 = vmax.f32 %v2967_v11, %v2968_v41  ;;  %v10696_v24 = vpop.f32.mrf.mxu0  ;;  %v3298_v48 = vsel %vm1158_vm0, %v2975_v40, -inf  ;;  %v1885_v16 = vadd.f32 %v12663_v20, %v12604_v31  ;;  %v2979_v31 = vsel %vm1158_vm0, %v2673_v10, -inf  ;;  %v11905_v41 = vld [vmem:[%s16462_s3 + $0x40] sm:$0xff]  }
 0x191   : > { %v2688_v21 = vmax.f32 %v1930_v43, 0.0  ;;  %v1941_v22 = vadd.f32 %v12663_v20, %v10696_v24  ;;  %v2983_v25 = vsel %vm1158_vm0, %v2690_v42, -inf  ;;  %v3299_v6 = vmax.f32 %v3297_v54, %v3298_v48  ;;  %11135 = vmatprep.subr.bf16.mxu0 %v11905_v41 }
 0x192   : > { %v3295_v55 = vsel %vm1158_vm0, %v2969_v45, -inf  ;;  %v1932_v34 = vpop.f32.mrf.mxu0  ;;  %v2984_v13 = vmax.f32 %v2982_v9, %v2983_v25  ;;  %v2678_v42 = vmax.f32 %v1890_v47, 0.0  ;;  %v2676_v9 = vmax.f32 %v1882_v1, 0.0  ;;  %v11873_v45 = vld [vmem:[%s12119_s13 + $0x308] sm:$0xff]   ;;  %11136 = vmatpush3.bf16.msra.mxu0 %v11905_v41  ;;  %v11876_v41 = vld [vmem:[%s12119_s13 + $0x320] sm:$0xff]  }
 0x193   : > { %v3296_v4 = vmax.f32 %v3294_v28, %v3295_v55  ;;  %v2977_v62 = vsel %vm1158_vm0, %v2688_v21, -inf  ;;  %v2691_v0 = vmax.f32 %v1941_v22, 0.0  ;;  %v1933_v12 = vadd.f32 %v12663_v20, %v1932_v34  ;;  %v11874_v21 = vld [vmem:[%s12119_s13 + $0x310] sm:$0xff]  }
 0x194   : > { %v10699_v30 = vpop.f32.mrf.mxu0  ;;  %10794 = vmatmul.mubr.msk.bf16.gmra.mxu0 %vm1158_vm0, %v11871_v46  ;;  %v2978_v11 = vmax.f32 %v2976_v44, %v2977_v62  ;;  %v2679_v43 = vmax.f32 %v1893_v8, 0.0  ;;  %v2677_v10 = vmax.f32 %v1885_v16, 0.0  ;;  %v3303_v22 = vsel %vm1158_vm0, %v2984_v13, -inf }
 0x195   : > { %v12699_v63 = vpack.c.bf16 %v3296_v4, %v3293_v29  ;;  %v2986_v23 = vsel %vm1158_vm0, %v2691_v0, -inf  ;;  %v2689_v61 = vmax.f32 %v1933_v12, 0.0  ;;  %v1954_v32 = vadd.f32 %v12663_v20, %v10699_v30  ;;  %10797 = vmatprep.mubr.msk.bf16.mxu0 %vm1158_vm0, %v11872_v53 }
 0x196   : > { %v2987_v18 = vmax.f32 %v2985_v36, %v2986_v23  ;;  %v1945_v5 = vpop.f32.mrf.mxu0  ;;  %v12704_v37 = vpack.c.bf16 %v3299_v6, %v3296_v4  ;;  %v3300_v47 = vsel %vm1158_vm0, %v2978_v11, -inf  ;;  %v2994_v62 = vsel %vm1158_vm0, %v2678_v42, -inf }
 0x197   : > { %v2980_v29 = vsel %vm1158_vm0, %v2689_v61, -inf  ;;  %v2694_v40 = vmax.f32 %v1954_v32, 0.0  ;;  %v1946_v3 = vadd.f32 %v12663_v20, %v1945_v5  ;;  %v2988_v0 = vsel %vm1158_vm0, %v2676_v9, -inf }
 0x198   : > { %16537 = vst [vmem:[#allocation13_spill] sm:$0xff] %v12704_v37  ;;  %v2981_v44 = vmax.f32 %v2979_v31, %v2980_v29  ;;  %10890 = vmatmul.mubr.msk.bf16.gmra.mxu1 %vm1158_vm0, %v12704_v37  ;;  %v10700_v36 = vpop.f32.mrf.mxu0  ;;  %v3304_v24 = vsel %vm1158_vm0, %v2987_v18, -inf  ;;  %v2997_v8 = vsel %vm1158_vm0, %v2679_v43, -inf  ;;  %v2991_v5 = vsel %vm1158_vm0, %v2677_v10, -inf }
 0x199   : > { %v2692_v46 = vmax.f32 %v1946_v3, 0.0  ;;  %v1957_v48 = vadd.f32 %v12663_v20, %v10700_v36  ;;  %v2995_v54 = vsel %vm1158_vm0, %v2694_v40, -inf  ;;  %v3305_v12 = vmax.f32 %v3303_v22, %v3304_v24  ;;  %v11875_v3 = vld [vmem:[%s12119_s13 + $0x318] sm:$0xff]   ;;  %v11877_v22 = vld [vmem:[%s12119_s13 + $0x328] sm:$0xff]  }
 0x19a   : > { %v3301_v53 = vsel %vm1158_vm0, %v2981_v44, -inf  ;;  %v1948_v28 = vpop.f32.mrf.mxu0  ;;  %v2996_v61 = vmax.f32 %v2994_v62, %v2995_v54 }
 0x19b   : > { %v3302_v55 = vmax.f32 %v3300_v47, %v3301_v53  ;;  %v2989_v25 = vsel %vm1158_vm0, %v2692_v46, -inf  ;;  %v2695_v34 = vmax.f32 %v1957_v48, 0.0  ;;  %v1949_v4 = vadd.f32 %v12663_v20, %v1948_v28  ;;  %v11878_v47 = vld [vmem:[%s12119_s13 + $0x330] sm:$0xff]  }
 0x19c   : > { %v10703_v1 = vpop.f32.mrf.mxu0  ;;  %10798 = vmatmul.mubr.msk.bf16.gmra.mxu0 %vm1158_vm0, %v11873_v45  ;;  %v2990_v32 = vmax.f32 %v2988_v0, %v2989_v25  ;;  %v3309_v42 = vsel %vm1158_vm0, %v2996_v61, -inf  ;;  %v11879_v25 = vld [vmem:[%s12119_s13 + $0x338] sm:$0xff]   ;;  %v11906_v61 = vld [vmem:[%s16462_s3 + $0x8] sm:$0xff]  }
 0x19d   : > { %v12728_v16 = vpack.c.bf16 %v3302_v55, %v3299_v6  ;;  %v2998_v30 = vsel %vm1158_vm0, %v2695_v34, -inf  ;;  %v2693_v23 = vmax.f32 %v1949_v4, 0.0  ;;  %10801 = vmatprep.mubr.msk.bf16.mxu0 %vm1158_vm0, %v11874_v21  ;;  %v12732_v18 = vpack.c.bf16 %v3305_v12, %v3302_v55  ;;  %v11881_v34 = vld [vmem:[%s12119_s13 + $0x340] sm:$0xff]   ;;  %10929 = vmatprep.subr.bf16.mxu1 %v11906_v61 }
 0x19e   : > { %v2999_v13 = vmax.f32 %v2997_v8, %v2998_v30  ;;  %v1961_v11 = vpop.f32.mrf.mxu0  ;;  %v3306_v9 = vsel %vm1158_vm0, %v2990_v32, -inf  ;;  %v11882_v8 = vld [vmem:[%s12119_s13 + $0x348] sm:$0xff]   ;;  %v1970_v30 = vadd.f32 %v12663_v20, %v10703_v1  ;;  %10930 = vmatpush3.bf16.msra.mxu1 %v11906_v61 }
 0x19f   : > { %16538 = vst [vmem:[#allocation14_spill] sm:$0xff] %v12728_v16  ;;  %16539 = vst [vmem:[#allocation15_spill] sm:$0xff] %v12732_v18  ;;  %v2992_v31 = vsel %vm1158_vm0, %v2693_v23, -inf  ;;  %10893 = vmatprep.mubr.msk.bf16.mxu1 %vm1158_vm0, %v12732_v18  ;;  %v11883_v23 = vld [vmem:[%s12119_s13 + $0x350] sm:$0xff]   ;;  %v1962_v32 = vadd.f32 %v12663_v20, %v1961_v11 }
 0x1a0   : > { %v3310_v29 = vsel %vm1158_vm0, %v2999_v13, -inf  ;;  %v2993_v6 = vmax.f32 %v2991_v5, %v2992_v31  ;;  %v10704_v40 = vpop.f32.mrf.mxu0  ;;  %v2698_v1 = vmax.f32 %v1970_v30, 0.0 }
 0x1a1   : > { %v12744_v36 = vmax.f32 %v3309_v42, %v3310_v29  ;;  %v1973_v5 = vadd.f32 %v12663_v20, %v10704_v40  ;;  %v2696_v11 = vmax.f32 %v1962_v32, 0.0 }
 0x1a2   : > { %v3307_v43 = vsel %vm1158_vm0, %v2993_v6, -inf  ;;  %v1964_v44 = vpop.f32.mrf.mxu0 }
 0x1a3   : > { %16540 = vst [vmem:[#allocation16_spill] sm:$0xff] %v12744_v36  ;;  %v3308_v45 = vmax.f32 %v3306_v9, %v3307_v43  ;;  %v1965_v31 = vadd.f32 %v12663_v20, %v1964_v44  ;;  %v2699_v43 = vmax.f32 %v1973_v5, 0.0  ;;  %v3000_v30 = vsel %vm1158_vm0, %v2696_v11, -inf }
 0x1a4   : > { %v10707_v10 = vpop.f32.mrf.mxu0  ;;  %10802 = vmatmul.mubr.msk.bf16.gmra.mxu0 %vm1158_vm0, %v11875_v3 }
 0x1a5   : > { %v12747_v24 = vpack.c.bf16 %v3308_v45, %v3305_v12  ;;  %v12750_v46 = vpack.c.bf16 %v12744_v36, %v3308_v45  ;;  %10805 = vmatprep.mubr.msk.bf16.mxu0 %vm1158_vm0, %v11876_v41  ;;  %v1986_v29 = vadd.f32 %v12663_v20, %v10707_v10  ;;  %v2697_v44 = vmax.f32 %v1965_v31, 0.0 }
 0x1a6   : > { %v1977_v48 = vpop.f32.mrf.mxu0 }
 0x1a7   : > { %16541 = vst [vmem:[#allocation17_spill] sm:$0xff] %v12750_v46  ;;  %10894 = vmatmul.mubr.msk.bf16.gmra.mxu1 %vm1158_vm0, %v12750_v46  ;;  %v1978_v41 = vadd.f32 %v12663_v20, %v1977_v48  ;;  %v2702_v45 = vmax.f32 %v1986_v29, 0.0 }
 0x1a8   : > { %v10708_v21 = vpop.f32.mrf.mxu0 }
 0x1a9   : > { %v1989_v48 = vadd.f32 %v12663_v20, %v10708_v21 }
 0x1aa   : > { %v1980_v53 = vpop.f32.mrf.mxu0 }
 0x1ab   : > { %v1981_v5 = vadd.f32 %v12663_v20, %v1980_v53 }
 0x1ac   : > { %v10711_v54 = vpop.f32.mrf.mxu0  ;;  %10806 = vmatmul.mubr.msk.bf16.gmra.mxu0 %vm1158_vm0, %v11877_v22  ;;  %v11884_v22 = vld [vmem:[%s12119_s13 + $0x358] sm:$0xff]  }
 0x1ad   : > { %10809 = vmatprep.mubr.msk.bf16.mxu0 %vm1158_vm0, %v11878_v47  ;;  %v3006_v47 = vsel %vm1158_vm0, %v2698_v1, -inf  ;;  %v3009_v1 = vsel %vm1158_vm0, %v2699_v43, -inf  ;;  %v2002_v11 = vadd.f32 %v12663_v20, %v10711_v54 }
 0x1ae   : > { %v12759_v28 = vpop.f32.mrf.mxu0 }
 0x1b0   : > { %v12761_v55 = vpop.f32.mrf.mxu0 }
 0x1b2   : > { %v12765_v4 = vpop.f32.mrf.mxu0 }
 0x1b4   : > { %v12767_v62 = vpop.f32.mrf.mxu0  ;;  %10810 = vmatmul.mubr.msk.bf16.gmra.mxu0 %vm1158_vm0, %v11879_v25 }
 0x1b5   : > { %10813 = vmatprep.mubr.msk.bf16.mxu0 %vm1158_vm0, %v11881_v34 }
 0x1b6   : > { %v12771_v0 = vpop.f32.mrf.mxu0 }
 0x1b8   : > { %v12773_v12 = vpop.f32.mrf.mxu0 }
 0x1ba   : > { %v12782_v13 = vpop.f32.mrf.mxu0 }
 0x1bc   : > { %v10719_v6 = vpop.f32.mrf.mxu0  ;;  %10814 = vmatmul.mubr.msk.bf16.gmra.mxu0 %vm1158_vm0, %v11882_v8  ;;  %v11885_v8 = vld [vmem:[%s12119_s13 + $0x360] sm:$0xff]  }
 0x1bd   : > { %v2034_v3 = vadd.f32 %v12663_v20, %v10719_v6  ;;  %10817 = vmatprep.mubr.msk.bf16.mxu0 %vm1158_vm0, %v11883_v23  ;;  %v2700_v23 = vmax.f32 %v1978_v41, 0.0 }
 0x1be   : > { %v2025_v42 = vpop.f32.mrf.mxu0 }
 0x1bf   : > { %v2714_v40 = vmax.f32 %v2034_v3, 0.0  ;;  %v2026_v9 = vadd.f32 %v12663_v20, %v2025_v42  ;;  %v3003_v3 = vsel %vm1158_vm0, %v2697_v44, -inf  ;;  %v12805_v42 = vsel %vm1158_vm0, %v2702_v45, -inf }
 0x1c0   : > { %v10720_v10 = vpop.f32.mrf.mxu0  ;;  %v12813_v43 = vsel %vm1158_vm0, %v2700_v23, -inf  ;;  %v2703_v44 = vmax.f32 %v1989_v48, 0.0 }
 0x1c1   : > { %v2712_v25 = vmax.f32 %v2026_v9, 0.0  ;;  %v2037_v34 = vadd.f32 %v12663_v20, %v10720_v10  ;;  %v3007_v61 = vsel %vm1158_vm0, %v2714_v40, -inf }
 0x1c2   : > { %v2028_v32 = vpop.f32.mrf.mxu0  ;;  %v3008_v41 = vmax.f32 %v3006_v47, %v3007_v61  ;;  %v1994_v61 = vadd.f32 %v12663_v20, %v12759_v28 }
 0x1c3   : > { %v3001_v31 = vsel %vm1158_vm0, %v2712_v25, -inf  ;;  %v2715_v29 = vmax.f32 %v2037_v34, 0.0  ;;  %v2029_v6 = vadd.f32 %v12663_v20, %v2028_v32  ;;  %v2701_v25 = vmax.f32 %v1981_v5, 0.0 }
 0x1c4   : > { %v10723_v21 = vpop.f32.mrf.mxu0  ;;  %10818 = vmatmul.mubr.msk.bf16.gmra.mxu0 %vm1158_vm0, %v11884_v22  ;;  %v3002_v45 = vmax.f32 %v3000_v30, %v3001_v31  ;;  %v11886_v30 = vld [vmem:[%s12119_s13 + $0x368] sm:$0xff]   ;;  %v2706_v31 = vmax.f32 %v2002_v11, 0.0 }
 0x1c5   : > { %v3010_v53 = vsel %vm1158_vm0, %v2715_v29, -inf  ;;  %v2713_v40 = vmax.f32 %v2029_v6, 0.0  ;;  %v2050_v9 = vadd.f32 %v12663_v20, %v10723_v21  ;;  %10821 = vmatprep.mubr.msk.bf16.mxu0 %vm1158_vm0, %v11885_v8  ;;  %v2005_v8 = vadd.f32 %v12663_v20, %v12761_v55 }
 0x1c6   : > { %v3011_v10 = vmax.f32 %v3009_v1, %v3010_v53  ;;  %v2041_v54 = vpop.f32.mrf.mxu0  ;;  %v3315_v29 = vsel %vm1158_vm0, %v3008_v41, -inf  ;;  %v11887_v1 = vld [vmem:[%s12119_s13 + $0x370] sm:$0xff]   ;;  %v3312_v21 = vsel %vm1158_vm0, %v3002_v45, -inf  ;;  %v3021_v41 = vsel %vm1158_vm0, %v2703_v44, -inf }
 0x1c7   : > { %v3004_v22 = vsel %vm1158_vm0, %v2713_v40, -inf  ;;  %v2718_v47 = vmax.f32 %v2050_v9, 0.0  ;;  %v2042_v34 = vadd.f32 %v12663_v20, %v2041_v54  ;;  %v2704_v54 = vmax.f32 %v1994_v61, 0.0 }
 0x1c8   : > { %v3316_v23 = vsel %vm1158_vm0, %v3011_v10, -inf  ;;  %v3005_v32 = vmax.f32 %v3003_v3, %v3004_v22  ;;  %v10724_v48 = vpop.f32.mrf.mxu0  ;;  %v2707_v22 = vmax.f32 %v2005_v8, 0.0  ;;  %v1997_v45 = vadd.f32 %v12663_v20, %v12765_v4 }
 0x1c9   : > { %v2716_v5 = vmax.f32 %v2042_v34, 0.0  ;;  %v2053_v6 = vadd.f32 %v12663_v20, %v10724_v48  ;;  %v3317_v53 = vmax.f32 %v3315_v29, %v3316_v23  ;;  %v3019_v40 = vsel %vm1158_vm0, %v2718_v47, -inf }
 0x1ca   : > { %v3313_v28 = vsel %vm1158_vm0, %v3005_v32, -inf  ;;  %v2044_v55 = vpop.f32.mrf.mxu0  ;;  %v3015_v44 = vsel %vm1158_vm0, %v2701_v25, -inf  ;;  %v3020_v61 = vmax.f32 %v12805_v42, %v3019_v40  ;;  %v3033_v25 = vsel %vm1158_vm0, %v2707_v22, -inf  ;;  %v11888_v40 = vld [vmem:[%s12119_s13 + $0x378] sm:$0xff]  }
 0x1cb   : > { %v12829_v9 = vmax.f32 %v3312_v21, %v3313_v28  ;;  %v3013_v3 = vsel %vm1158_vm0, %v2716_v5, -inf  ;;  %v2719_v10 = vmax.f32 %v2053_v6, 0.0  ;;  %v2045_v11 = vadd.f32 %v12663_v20, %v2044_v55 }
 0x1cc   : > { %v10727_v34 = vpop.f32.mrf.mxu0  ;;  %10822 = vmatmul.mubr.msk.bf16.gmra.mxu0 %vm1158_vm0, %v11886_v30  ;;  %v3014_v4 = vmax.f32 %v12813_v43, %v3013_v3  ;;  %v3030_v30 = vsel %vm1158_vm0, %v2706_v31, -inf  ;;  %v2705_v42 = vmax.f32 %v1997_v45, 0.0  ;;  %v2018_v55 = vadd.f32 %v12663_v20, %v12767_v62 }
 0x1cd   : > { %v3022_v47 = vsel %vm1158_vm0, %v2719_v10, -inf  ;;  %v2717_v23 = vmax.f32 %v2045_v11, 0.0  ;;  %v2066_v32 = vadd.f32 %v12663_v20, %v10727_v34  ;;  %v12840_v48 = vpack.c.bf16 %v3317_v53, %v12829_v9  ;;  %10825 = vmatprep.mubr.msk.bf16.mxu0 %vm1158_vm0, %v11887_v1  ;;  %v11889_v11 = vld [vmem:[%s12119_s13 + $0x380] sm:$0xff]  }
 0x1ce   : > { %v3023_v8 = vmax.f32 %v3021_v41, %v3022_v47  ;;  %v2057_v29 = vpop.f32.mrf.mxu0  ;;  %v3024_v1 = vsel %vm1158_vm0, %v2704_v54, -inf  ;;  %v3321_v41 = vsel %vm1158_vm0, %v3020_v61, -inf  ;;  %v3318_v34 = vsel %vm1158_vm0, %v3014_v4, -inf }
 0x1cf   : > { %16542 = vst [vmem:[#allocation18_spill] sm:$0xff] %v12840_v48  ;;  %v3016_v5 = vsel %vm1158_vm0, %v2717_v23, -inf  ;;  %v2722_v6 = vmax.f32 %v2066_v32, 0.0  ;;  %v2058_v21 = vadd.f32 %v12663_v20, %v2057_v29  ;;  %10897 = vmatprep.mubr.msk.bf16.mxu1 %vm1158_vm0, %v12840_v48  ;;  %v2013_v61 = vadd.f32 %v12663_v20, %v12782_v13 }
 0x1d0   : > { %v3017_v28 = vmax.f32 %v3015_v44, %v3016_v5  ;;  %v10728_v43 = vpop.f32.mrf.mxu0  ;;  %v3322_v31 = vsel %vm1158_vm0, %v3023_v8, -inf  ;;  %v2010_v44 = vadd.f32 %v12663_v20, %v12771_v0  ;;  %v2021_v8 = vadd.f32 %v12663_v20, %v12773_v12 }
 0x1d1   : > { %v2720_v3 = vmax.f32 %v2058_v21, 0.0  ;;  %v2069_v10 = vadd.f32 %v12663_v20, %v10728_v43  ;;  %v3031_v22 = vsel %vm1158_vm0, %v2722_v6, -inf  ;;  %v3323_v4 = vmax.f32 %v3321_v41, %v3322_v31 }
 0x1d2   : > { %v3319_v54 = vsel %vm1158_vm0, %v3017_v28, -inf  ;;  %v2060_v45 = vpop.f32.mrf.mxu0  ;;  %v3032_v0 = vmax.f32 %v3030_v30, %v3031_v22  ;;  %v3027_v13 = vsel %vm1158_vm0, %v2705_v42, -inf  ;;  %v2710_v41 = vmax.f32 %v2018_v55, 0.0 }
 0x1d3   : > { %v3320_v47 = vmax.f32 %v3318_v34, %v3319_v54  ;;  %v3025_v23 = vsel %vm1158_vm0, %v2720_v3, -inf  ;;  %v2723_v32 = vmax.f32 %v2069_v10, 0.0  ;;  %v2061_v62 = vadd.f32 %v12663_v20, %v2060_v45 }
 0x1d4   : > { %v10731_v29 = vpop.f32.mrf.mxu0  ;;  %10826 = vmatmul.mubr.msk.bf16.gmra.mxu0 %vm1158_vm0, %v11888_v40  ;;  %v3026_v43 = vmax.f32 %v3024_v1, %v3025_v23  ;;  %v2708_v34 = vmax.f32 %v2010_v44, 0.0  ;;  %v2711_v54 = vmax.f32 %v2021_v8, 0.0  ;;  %v11890_v1 = vld [vmem:[%s12119_s13 + $0x388] sm:$0xff]   ;;  %v3327_v23 = vsel %vm1158_vm0, %v3032_v0, -inf }
 0x1d5   : > { %v12872_v5 = vpack.c.bf16 %v3320_v47, %v3317_v53  ;;  %v3034_v6 = vsel %vm1158_vm0, %v2723_v32, -inf  ;;  %v2721_v21 = vmax.f32 %v2061_v62, 0.0  ;;  %v2082_v28 = vadd.f32 %v12663_v20, %v10731_v29  ;;  %10829 = vmatprep.mubr.msk.bf16.mxu0 %vm1158_vm0, %v11889_v11 }
 0x1d6   : > { %v3035_v12 = vmax.f32 %v3033_v25, %v3034_v6  ;;  %v2073_v3 = vpop.f32.mrf.mxu0  ;;  %v12877_v10 = vpack.c.bf16 %v3323_v4, %v3320_v47  ;;  %v2709_v25 = vmax.f32 %v2013_v61, 0.0  ;;  %v11891_v47 = vld [vmem:[%s12119_s13 + $0x390] sm:$0xff]   ;;  %v3324_v32 = vsel %vm1158_vm0, %v3026_v43, -inf }
 0x1d7   : > { %16543 = vst [vmem:[#allocation19_spill] sm:$0xff] %v12872_v5  ;;  %v3028_v53 = vsel %vm1158_vm0, %v2721_v21, -inf  ;;  %v2726_v40 = vmax.f32 %v2082_v28, 0.0  ;;  %v2074_v31 = vadd.f32 %v12663_v20, %v2073_v3  ;;  %v3042_v21 = vsel %vm1158_vm0, %v2710_v41, -inf }
 0x1d8   : > { %16544 = vst [vmem:[#allocation20_spill] sm:$0xff] %v12877_v10  ;;  %v3029_v45 = vmax.f32 %v3027_v13, %v3028_v53  ;;  %10898 = vmatmul.mubr.msk.bf16.gmra.mxu1 %vm1158_vm0, %v12877_v10  ;;  %v10732_v30 = vpop.f32.mrf.mxu0  ;;  %v3328_v11 = vsel %vm1158_vm0, %v3035_v12, -inf  ;;  %v3036_v28 = vsel %vm1158_vm0, %v2708_v34, -inf  ;;  %v3045_v0 = vsel %vm1158_vm0, %v2711_v54, -inf }
 0x1d9   : > { %v2724_v22 = vmax.f32 %v2074_v31, 0.0  ;;  %v2085_v42 = vadd.f32 %v12663_v20, %v10732_v30  ;;  %v3043_v62 = vsel %vm1158_vm0, %v2726_v40, -inf  ;;  %v3329_v12 = vmax.f32 %v3327_v23, %v3328_v11 }
 0x1da   : > { %v3325_v55 = vsel %vm1158_vm0, %v3029_v45, -inf  ;;  %v2076_v44 = vpop.f32.mrf.mxu0  ;;  %v3044_v40 = vmax.f32 %v3042_v21, %v3043_v62  ;;  %v3039_v30 = vsel %vm1158_vm0, %v2709_v25, -inf  ;;  %v11894_v21 = vld [vmem:[%s12119_s13 + $0x3a8] sm:$0xff]  }
 0x1db   : > { %v3326_v8 = vmax.f32 %v3324_v32, %v3325_v55  ;;  %v3037_v29 = vsel %vm1158_vm0, %v2724_v22, -inf  ;;  %v2727_v6 = vmax.f32 %v2085_v42, 0.0  ;;  %v2077_v61 = vadd.f32 %v12663_v20, %v2076_v44  ;;  %v11892_v22 = vld [vmem:[%s12119_s13 + $0x398] sm:$0xff]   ;;  %v11893_v42 = vld [vmem:[%s12119_s13 + $0x3a0] sm:$0xff]  }
 0x1dc   : > { %v10735_v3 = vpop.f32.mrf.mxu0  ;;  %10830 = vmatmul.mubr.msk.bf16.gmra.mxu0 %vm1158_vm0, %v11890_v1  ;;  %v3038_v31 = vmax.f32 %v3036_v28, %v3037_v29  ;;  %v11895_v28 = vld [vmem:[%s12119_s13 + $0x3b0] sm:$0xff]  }
 0x1dd   : > { %v12898_v43 = vpack.c.bf16 %v3326_v8, %v3323_v4  ;;  %v3046_v13 = vsel %vm1158_vm0, %v2727_v6, -inf  ;;  %v2725_v53 = vmax.f32 %v2077_v61, 0.0  ;;  %10833 = vmatprep.mubr.msk.bf16.mxu0 %vm1158_vm0, %v11891_v47  ;;  %v12902_v34 = vpack.c.bf16 %v3329_v12, %v3326_v8 }
 0x1de   : > { %v3047_v41 = vmax.f32 %v3045_v0, %v3046_v13  ;;  %v2089_v45 = vpop.f32.mrf.mxu0  ;;  %v3333_v47 = vsel %vm1158_vm0, %v3044_v40, -inf  ;;  %v3330_v23 = vsel %vm1158_vm0, %v3038_v31, -inf  ;;  %v11896_v40 = vld [vmem:[%s12119_s13 + $0x3b8] sm:$0xff]   ;;  %v11897_v31 = vld [vmem:[%s12119_s13 + $0x3c0] sm:$0xff]  }
 0x1df   : > { %16545 = vst [vmem:[#allocation21_spill] sm:$0xff] %v12898_v43  ;;  %16546 = vst [vmem:[#allocation22_spill] sm:$0xff] %v12902_v34  ;;  %v3040_v1 = vsel %vm1158_vm0, %v2725_v53, -inf  ;;  %10901 = vmatprep.mubr.msk.bf16.mxu1 %vm1158_vm0, %v12902_v34 }
 0x1e0   : > { %v3334_v54 = vsel %vm1158_vm0, %v3047_v41, -inf  ;;  %v3041_v4 = vmax.f32 %v3039_v30, %v3040_v1  ;;  %v10736_v11 = vpop.f32.mrf.mxu0 }
 0x1e1   : > { %v12914_v55 = vmax.f32 %v3333_v47, %v3334_v54  ;;  %v11907_v47 = vld [vmem:[%s16462_s3] sm:$0xff]  }
 0x1e2   : > { %v3331_v32 = vsel %vm1158_vm0, %v3041_v4, -inf  ;;  %v2092_v25 = vpop.f32.mrf.mxu0  ;;  %v11898_v4 = vld [vmem:[%s12119_s13 + $0x3c8] sm:$0xff]   ;;  %10931 = vmatprep.subr.bf16.mxu1 %v11907_v47 }
 0x1e3   : > { %16547 = vst [vmem:[#allocation23_spill] sm:$0xff] %v12914_v55  ;;  %v3332_v62 = vmax.f32 %v3330_v23, %v3331_v32  ;;  %v2090_v23 = vadd.f32 %v12663_v20, %v2089_v45  ;;  %10932 = vmatpush3.bf16.msra.mxu1 %v11907_v47 }
 0x1e4   : > { %v10739_v44 = vpop.f32.mrf.mxu0  ;;  %10834 = vmatmul.mubr.msk.bf16.gmra.mxu0 %vm1158_vm0, %v11892_v22  ;;  %v2098_v22 = vadd.f32 %v12663_v20, %v10735_v3 }
 0x1e5   : > { %v12917_v8 = vpack.c.bf16 %v3332_v62, %v3329_v12  ;;  %v12920_v29 = vpack.c.bf16 %v12914_v55, %v3332_v62  ;;  %10837 = vmatprep.mubr.msk.bf16.mxu0 %vm1158_vm0, %v11893_v42  ;;  %v11899_v42 = vld [vmem:[%s12119_s13 + $0x3d0] sm:$0xff]   ;;  %v2101_v62 = vadd.f32 %v12663_v20, %v10736_v11  ;;  %v2728_v45 = vmax.f32 %v2090_v23, 0.0 }
 0x1e6   : > { %v2105_v6 = vpop.f32.mrf.mxu0  ;;  %v2730_v3 = vmax.f32 %v2098_v22, 0.0 }
 0x1e7   : > { %16548 = vst [vmem:[#allocation24_spill] sm:$0xff] %v12917_v8  ;;  %16549 = vst [vmem:[#allocation25_spill] sm:$0xff] %v12920_v29  ;;  %10902 = vmatmul.mubr.msk.bf16.gmra.mxu1 %vm1158_vm0, %v12920_v29  ;;  %v2106_v33 = vadd.f32 %v12663_v20, %v2105_v6  ;;  %v2731_v36 = vmax.f32 %v2101_v62, 0.0  ;;  %v11900_v8 = vld [vmem:[%s12119_s13 + $0x3d8] sm:$0xff]  }
 0x1e8   : > { %v10740_v61 = vpop.f32.mrf.mxu0 }
 0x1e9   : > { %v2732_v23 = vmax.f32 %v2106_v33, 0.0  ;;  %v2117_v6 = vadd.f32 %v12663_v20, %v10740_v61 }
 0x1ea   : > { %v2108_v0 = vpop.f32.mrf.mxu0 }
 0x1ec   : > { %v10743_v13 = vpop.f32.mrf.mxu0  ;;  %10838 = vmatmul.mubr.msk.bf16.gmra.mxu0 %vm1158_vm0, %v11894_v21  ;;  %v2093_v21 = vadd.f32 %v12663_v20, %v2092_v25 }
 0x1ed   : > { %10841 = vmatprep.mubr.msk.bf16.mxu0 %vm1158_vm0, %v11895_v28  ;;  %v2114_v28 = vadd.f32 %v12663_v20, %v10739_v44  ;;  %v2130_v33 = vadd.f32 %v12663_v20, %v10743_v13 }
 0x1ee   : > { %v12929_v12 = vpop.f32.mrf.mxu0  ;;  %v2729_v44 = vmax.f32 %v2093_v21, 0.0 }
 0x1ef   : > { %v2734_v56 = vmax.f32 %v2114_v28, 0.0 }
 0x1f0   : > { %v12931_v53 = vpop.f32.mrf.mxu0 }
 0x1f2   : > { %v12935_v41 = vpop.f32.mrf.mxu0 }
 0x1f4   : > { %v12937_v30 = vpop.f32.mrf.mxu0  ;;  %10842 = vmatmul.mubr.msk.bf16.gmra.mxu0 %vm1158_vm0, %v11896_v40 }
 0x1f5   : > { %10845 = vmatprep.mubr.msk.bf16.mxu0 %vm1158_vm0, %v11897_v31 }
 0x1f6   : > { %v12941_v1 = vpop.f32.mrf.mxu0 }
 0x1f8   : > { %v12943_v54 = vpop.f32.mrf.mxu0 }
 0x1fa   : > { %v12952_v32 = vpop.f32.mrf.mxu0 }
 0x1fc   : > { %v10751_v40 = vpop.f32.mrf.mxu0  ;;  %10846 = vmatmul.mubr.msk.bf16.gmra.mxu0 %vm1158_vm0, %v11898_v4  ;;  %v3054_v4 = vsel %vm1158_vm0, %v2730_v3, -inf  ;;  %v3057_v3 = vsel %vm1158_vm0, %v2731_v36, -inf  ;;  %v3060_v36 = vsel %vm1158_vm0, %v2732_v23, -inf }
 0x1fd   : > { %v2162_v31 = vadd.f32 %v12663_v20, %v10751_v40  ;;  %10849 = vmatprep.mubr.msk.bf16.mxu0 %vm1158_vm0, %v11899_v42  ;;  %v11901_v40 = vld [vmem:[%s12119_s13 + $0x3e0] sm:$0xff]   ;;  %v3048_v42 = vsel %vm1158_vm0, %v2728_v45, -inf }
 0x1fe   : > { %v2153_v55 = vpop.f32.mrf.mxu0 }
 0x1ff   : > { %v2746_v11 = vmax.f32 %v2162_v31, 0.0  ;;  %v2154_v25 = vadd.f32 %v12663_v20, %v2153_v55  ;;  %v2109_v55 = vadd.f32 %v12663_v20, %v2108_v0 }
 0x200   : > { %v10752_v7 = vpop.f32.mrf.mxu0 }
 0x201   : > { %v2744_v22 = vmax.f32 %v2154_v25, 0.0  ;;  %v2165_v47 = vadd.f32 %v12663_v20, %v10752_v7  ;;  %v3055_v31 = vsel %vm1158_vm0, %v2746_v11, -inf  ;;  %v3051_v7 = vsel %vm1158_vm0, %v2729_v44, -inf }
 0x202   : > { %v2156_v43 = vpop.f32.mrf.mxu0  ;;  %v12975_v25 = vsel %vm1158_vm0, %v2734_v56, -inf  ;;  %v3056_v45 = vmax.f32 %v3054_v4, %v3055_v31  ;;  %v2733_v13 = vmax.f32 %v2109_v55, 0.0  ;;  %v2122_v31 = vadd.f32 %v12663_v20, %v12929_v12 }
 0x203   : > { %v3049_v62 = vsel %vm1158_vm0, %v2744_v22, -inf  ;;  %v2747_v21 = vmax.f32 %v2165_v47, 0.0  ;;  %v2157_v28 = vadd.f32 %v12663_v20, %v2156_v43  ;;  %v2735_v43 = vmax.f32 %v2117_v6, 0.0 }
 0x204   : > { %v10755_v61 = vpop.f32.mrf.mxu0  ;;  %10850 = vmatmul.mubr.msk.bf16.gmra.mxu0 %vm1158_vm0, %v11900_v8  ;;  %v3050_v44 = vmax.f32 %v3048_v42, %v3049_v62  ;;  %v11902_v42 = vld [vmem:[%s12119_s13 + $0x3e8] sm:$0xff]   ;;  %v2738_v62 = vmax.f32 %v2130_v33, 0.0 }
 0x205   : > { %v3058_v0 = vsel %vm1158_vm0, %v2747_v21, -inf  ;;  %v2745_v11 = vmax.f32 %v2157_v28, 0.0  ;;  %v2178_v22 = vadd.f32 %v12663_v20, %v10755_v61  ;;  %10853 = vmatprep.mubr.msk.bf16.mxu0 %vm1158_vm0, %v11901_v40  ;;  %v2133_v21 = vadd.f32 %v12663_v20, %v12931_v53  ;;  %v11903_v61 = vld [vmem:[%s12119_s13 + $0x3f0] sm:$0xff]  }
 0x206   : > { %v3059_v56 = vmax.f32 %v3057_v3, %v3058_v0  ;;  %v2169_v47 = vpop.f32.mrf.mxu0  ;;  %v3339_v28 = vsel %vm1158_vm0, %v3056_v45, -inf  ;;  %v3336_v0 = vsel %vm1158_vm0, %v3050_v44, -inf  ;;  %v3069_v45 = vsel %vm1158_vm0, %v2735_v43, -inf }
 0x207   : > { %v3052_v5 = vsel %vm1158_vm0, %v2745_v11, -inf  ;;  %v2750_v8 = vmax.f32 %v2178_v22, 0.0  ;;  %v2170_v4 = vadd.f32 %v12663_v20, %v2169_v47  ;;  %v2125_v44 = vadd.f32 %v12663_v20, %v12935_v41 }
 0x208   : > { %v3340_v40 = vsel %vm1158_vm0, %v3059_v56, -inf  ;;  %v3053_v23 = vmax.f32 %v3051_v7, %v3052_v5  ;;  %v10756_v6 = vpop.f32.mrf.mxu0  ;;  %v2736_v56 = vmax.f32 %v2122_v31, 0.0  ;;  %v3063_v43 = vsel %vm1158_vm0, %v2733_v13, -inf }
 0x209   : > { %v2748_v55 = vmax.f32 %v2170_v4, 0.0  ;;  %v2181_v3 = vadd.f32 %v12663_v20, %v10756_v6  ;;  %v3341_v11 = vmax.f32 %v3339_v28, %v3340_v40  ;;  %v3067_v22 = vsel %vm1158_vm0, %v2750_v8, -inf }
 0x20a   : > { %v3337_v12 = vsel %vm1158_vm0, %v3053_v23, -inf  ;;  %v2172_v53 = vpop.f32.mrf.mxu0  ;;  %v2739_v4 = vmax.f32 %v2133_v21, 0.0  ;;  %v3068_v31 = vmax.f32 %v12975_v25, %v3067_v22  ;;  %v2737_v13 = vmax.f32 %v2125_v44, 0.0 }
 0x20b   : > { %v12997_v47 = vmax.f32 %v3336_v0, %v3337_v12  ;;  %v3061_v5 = vsel %vm1158_vm0, %v2748_v55, -inf  ;;  %v2751_v7 = vmax.f32 %v2181_v3, 0.0  ;;  %v2173_v33 = vadd.f32 %v12663_v20, %v2172_v53 }
 0x20c   : > { %v10759_v40 = vpop.f32.mrf.mxu0  ;;  %10854 = vmatmul.mubr.msk.bf16.gmra.mxu0 %vm1158_vm0, %v11902_v42  ;;  %v3062_v21 = vmax.f32 %v3060_v36, %v3061_v5  ;;  %v3078_v42 = vsel %vm1158_vm0, %v2738_v62, -inf  ;;  %v3081_v53 = vsel %vm1158_vm0, %v2739_v4, -inf  ;;  %v11904_v36 = vld [vmem:[%s12119_s13 + $0x3f8] sm:$0xff]   ;;  %v2146_v22 = vadd.f32 %v12663_v20, %v12937_v30  ;;  %s16418_s13 = scalar_lea.hbm %s16464_s5, %s10033_s10 }
 0x20d   : > { %v3070_v8 = vsel %vm1158_vm0, %v2751_v7, -inf  ;;  %v2749_v23 = vmax.f32 %v2173_v33, 0.0  ;;  %v2194_v6 = vadd.f32 %v12663_v20, %v10759_v40  ;;  %v13008_v28 = vpack.c.bf16 %v3341_v11, %v12997_v47  ;;  %10857 = vmatprep.mubr.msk.bf16.mxu0 %vm1158_vm0, %v11903_v61 }
 0x20e   : > { %v3071_v41 = vmax.f32 %v3069_v45, %v3070_v8  ;;  %v2185_v55 = vpop.f32.mrf.mxu0  ;;  %v3072_v61 = vsel %vm1158_vm0, %v2736_v56, -inf  ;;  %v3345_v45 = vsel %vm1158_vm0, %v3068_v31, -inf  ;;  %v3342_v40 = vsel %vm1158_vm0, %v3062_v21, -inf }
 0x20f   : > { %16550 = vst [vmem:[#allocation26_spill] sm:$0xff] %v13008_v28  ;;  %v3064_v3 = vsel %vm1158_vm0, %v2749_v23, -inf  ;;  %v2754_v0 = vmax.f32 %v2194_v6, 0.0  ;;  %v2186_v12 = vadd.f32 %v12663_v20, %v2185_v55  ;;  %10905 = vmatprep.mubr.msk.bf16.mxu1 %vm1158_vm0, %v13008_v28  ;;  %v2141_v31 = vadd.f32 %v12663_v20, %v12952_v32 }
 0x210   : > { %v3065_v7 = vmax.f32 %v3063_v43, %v3064_v3  ;;  %v10760_v25 = vpop.f32.mrf.mxu0  ;;  %v3346_v62 = vsel %vm1158_vm0, %v3071_v41, -inf  ;;  %v2138_v43 = vadd.f32 %v12663_v20, %v12941_v1  ;;  %v2149_v41 = vadd.f32 %v12663_v20, %v12943_v54 }
 0x211   : > { %v2752_v5 = vmax.f32 %v2186_v12, 0.0  ;;  %v2197_v33 = vadd.f32 %v12663_v20, %v10760_v25  ;;  %v3079_v4 = vsel %vm1158_vm0, %v2754_v0, -inf  ;;  %v3347_v21 = vmax.f32 %v3345_v45, %v3346_v62 }
 0x212   : > { %v3343_v56 = vsel %vm1158_vm0, %v3065_v7, -inf  ;;  %v2188_v44 = vpop.f32.mrf.mxu0  ;;  %v3080_v1 = vmax.f32 %v3078_v42, %v3079_v4  ;;  %v3075_v32 = vsel %vm1158_vm0, %v2737_v13, -inf  ;;  %v2742_v45 = vmax.f32 %v2146_v22, 0.0 }
 0x213   : > { %v3344_v8 = vmax.f32 %v3342_v40, %v3343_v56  ;;  %v3073_v23 = vsel %vm1158_vm0, %v2752_v5, -inf  ;;  %v2755_v6 = vmax.f32 %v2197_v33, 0.0  ;;  %v2189_v30 = vadd.f32 %v12663_v20, %v2188_v44 }
 0x214   : > { %v10763_v55 = vpop.f32.mrf.mxu0  ;;  %10858 = vmatmul.mubr.msk.bf16.gmra.mxu0 %vm1158_vm0, %v11904_v36  ;;  %v3074_v25 = vmax.f32 %v3072_v61, %v3073_v23  ;;  %v2740_v40 = vmax.f32 %v2138_v43, 0.0  ;;  %v2743_v56 = vmax.f32 %v2149_v41, 0.0  ;;  %v2741_v42 = vmax.f32 %v2141_v31, 0.0 }
 0x215   : > { %v13038_v3 = vpack.c.bf16 %v3344_v8, %v3341_v11  ;;  %v3082_v0 = vsel %vm1158_vm0, %v2755_v6, -inf  ;;  %v2753_v12 = vmax.f32 %v2189_v30, 0.0  ;;  %v2210_v7 = vadd.f32 %v12663_v20, %v10763_v55  ;;  %11137 = vmatprep.mubr.msk.bf16.mxu0 %vm1158_vm0, %v12325_v39 }
 0x216   : > { %v3083_v54 = vmax.f32 %v3081_v53, %v3082_v0  ;;  %v2201_v5 = vpop.f32.mrf.mxu0  ;;  %v13044_v33 = vpack.c.bf16 %v3347_v21, %v3344_v8  ;;  %v3351_v13 = vsel %vm1158_vm0, %v3080_v1, -inf  ;;  %v3348_v8 = vsel %vm1158_vm0, %v3074_v25, -inf }
 0x217   : > { %16551 = vst [vmem:[#allocation27_spill] sm:$0xff] %v13038_v3  ;;  %v3076_v36 = vsel %vm1158_vm0, %v2753_v12, -inf  ;;  %v2758_v11 = vmax.f32 %v2210_v7, 0.0  ;;  %v2202_v62 = vadd.f32 %v12663_v20, %v2201_v5  ;;  %v3090_v55 = vsel %vm1158_vm0, %v2742_v45, -inf }
 0x218   : > { %16552 = vst [vmem:[#allocation28_spill] sm:$0xff] %v13044_v33  ;;  %v3077_v44 = vmax.f32 %v3075_v32, %v3076_v36  ;;  %10906 = vmatmul.mubr.msk.bf16.gmra.mxu1 %vm1158_vm0, %v13044_v33  ;;  %v10764_v39 = vpop.f32.mrf.mxu0  ;;  %v3352_v61 = vsel %vm1158_vm0, %v3083_v54, -inf  ;;  %v3084_v0 = vsel %vm1158_vm0, %v2740_v40, -inf  ;;  %v3093_v1 = vsel %vm1158_vm0, %v2743_v56, -inf }
 0x219   : > { %v2756_v53 = vmax.f32 %v2202_v62, 0.0  ;;  %v2213_v4 = vadd.f32 %v12663_v20, %v10764_v39  ;;  %v3091_v22 = vsel %vm1158_vm0, %v2758_v11, -inf  ;;  %v3353_v12 = vmax.f32 %v3351_v13, %v3352_v61 }
 0x21a   : > { %v3349_v23 = vsel %vm1158_vm0, %v3077_v44, -inf  ;;  %v2204_v6 = vpop.f32.mrf.mxu0  ;;  %v3087_v45 = vsel %vm1158_vm0, %v2741_v42, -inf }
 0x21b   : > { %v3350_v30 = vmax.f32 %v3348_v8, %v3349_v23  ;;  %v3085_v43 = vsel %vm1158_vm0, %v2756_v53, -inf  ;;  %v2759_v41 = vmax.f32 %v2213_v4, 0.0  ;;  %v2205_v31 = vadd.f32 %v12663_v20, %v2204_v6 }
 0x21c   : > { %v10767_v7 = vpop.f32.mrf.mxu0  ;;  %11138 = vmatmul.mubr.msk.bf16.vlgmr.msra.gmra.mxu0 %vm1158_vm0, %v12358_v17  ;;  %v3092_v20 = vmax.f32 %v3090_v55, %v3091_v22  ;;  %v3086_v32 = vmax.f32 %v3084_v0, %v3085_v43 }
 0x21d   : > { %v13064_v25 = vpack.c.bf16 %v3350_v30, %v3347_v21  ;;  %v3094_v54 = vsel %vm1158_vm0, %v2759_v41, -inf  ;;  %v2757_v5 = vmax.f32 %v2205_v31, 0.0  ;;  %11141 = vmatprep.mubr.msk.bf16.mxu0 %vm1158_vm0, %v12384_v52  ;;  %v13069_v62 = vpack.c.bf16 %v3353_v12, %v3350_v30 }
 0x21e   : > { %v3095_v36 = vmax.f32 %v3093_v1, %v3094_v54  ;;  %v2217_v11 = vpop.f32.mrf.mxu0  ;;  %v3357_v44 = vsel %vm1158_vm0, %v3092_v20, -inf  ;;  %v3354_v52 = vsel %vm1158_vm0, %v3086_v32, -inf  ;;  %v13121_v54 = vld [vmem:[%s16462_s3 + $0x28] sm:$0xff]  }
 0x21f   : > { %16553 = vst [vmem:[#allocation29_spill] sm:$0xff] %v13069_v62  ;;  %v3088_v17 = vsel %vm1158_vm0, %v2757_v5, -inf  ;;  %10909 = vmatprep.mubr.msk.bf16.mxu1 %vm1158_vm0, %v13069_v62  ;;  %10997 = vmatprep.subr.bf16.mxu1 %v13121_v54 }
 0x220   : > { %v3358_v40 = vsel %vm1158_vm0, %v3095_v36, -inf  ;;  %v3089_v21 = vmax.f32 %v3087_v45, %v3088_v17  ;;  %v10768_v56 = vpop.f32.mrf.mxu0 }
 0x221   : > { %v13079_v53 = vmax.f32 %v3357_v44, %v3358_v40 }
 0x222   : > { %v3355_v39 = vsel %vm1158_vm0, %v3089_v21, -inf  ;;  %v2220_v61 = vpop.f32.mrf.mxu0 }
 0x223   : > { %v3356_v4 = vmax.f32 %v3354_v52, %v3355_v39 }
 0x224   : > { %v10771_v42 = vpop.f32.mrf.mxu0  ;;  %11142 = vmatmul.mubr.msk.bf16.gmra.mxu0 %vm1158_vm0, %v12403_v14 }
 0x225   : > { %v13083_v13 = vpack.c.bf16 %v3356_v4, %v3353_v12  ;;  %11145 = vmatprep.mubr.msk.bf16.mxu0 %vm1158_vm0, %v12495_v2  ;;  %v13088_v8 = vpack.c.bf16 %v13079_v53, %v3356_v4  ;;  %v13115_v12 = vld [vmem:[%s16463_s4] ss:$0 sm:$0xff] }
 0x226   : > { %v2233_v23 = vpop.f32.mrf.mxu0  ;;  %v2226_v1 = vadd.f32 %v13115_v12, %v10767_v7  ;;  %v2218_v5 = vadd.f32 %v13115_v12, %v2217_v11  ;;  %v2229_v32 = vadd.f32 %v13115_v12, %v10768_v56  ;;  %v2221_v36 = vadd.f32 %v13115_v12, %v2220_v61 }
 0x227   : > { %16554 = vst [vmem:[#allocation30_spill] sm:$0xff] %v13088_v8  ;;  %10910 = vmatmul.mubr.msk.bf16.gmra.mxu1 %vm1158_vm0, %v13088_v8  ;;  %v2242_v45 = vadd.f32 %v13115_v12, %v10771_v42  ;;  %v2234_v21 = vadd.f32 %v13115_v12, %v2233_v23 }
 0x228   : > { %v10772_v22 = vpop.f32.mrf.mxu0  ;;  %v2762_v7 = vmax.f32 %v2226_v1, 0.0  ;;  %v2760_v11 = vmax.f32 %v2218_v5, 0.0  ;;  %v2763_v39 = vmax.f32 %v2229_v32, 0.0  ;;  %v2761_v61 = vmax.f32 %v2221_v36, 0.0 }
 0x229   : > { %v2766_v4 = vmax.f32 %v2242_v45, 0.0  ;;  %v2245_v5 = vadd.f32 %v13115_v12, %v10772_v22 }
 0x22a   : > { %v2236_v6 = vpop.f32.mrf.mxu0 }
 0x22c   : > { %v10775_v30 = vpop.f32.mrf.mxu0  ;;  %11146 = vmatmul.mubr.msk.bf16.gmra.mxu0 %vm1158_vm0, %v12532_v58 }
 0x22d   : > { %11149 = vmatprep.mubr.msk.bf16.mxu0 %vm1158_vm0, %v12557_v27 }
 0x22e   : > { %v13096_v14 = vpop.f32.mrf.mxu0 }
 0x230   : > { %v13098_v43 = vpop.f32.mrf.mxu0 }
 0x232   : > { %v13100_v41 = vpop.f32.mrf.mxu0 }
 0x234   : > { %v13102_v31 = vpop.f32.mrf.mxu0  ;;  %11150 = vmatmul.mubr.msk.bf16.gmra.mxu0 %vm1158_vm0, %v12575_v60  ;;  %v2764_v60 = vmax.f32 %v2234_v21, 0.0 }
 0x235   : > { %11153 = vmatprep.mubr.msk.bf16.mxu0 %vm1158_vm0, %v12667_v35  ;;  %v3102_v35 = vsel %vm1158_vm0, %v2762_v7, -inf  ;;  %v3105_v7 = vsel %vm1158_vm0, %v2763_v39, -inf  ;;  %v2767_v39 = vmax.f32 %v2245_v5, 0.0 }
 0x236   : > { %v13108_v55 = vpop.f32.mrf.mxu0 }
 0x238   : > { %v13110_v0 = vpop.f32.mrf.mxu0 }
 0x23a   : > { %v13124_v20 = vpop.f32.mrf.mxu0 }
 0x23c   : > { %v10783_v17 = vpop.f32.mrf.mxu0  ;;  %11154 = vmatmul.mubr.msk.bf16.gmra.mxu0 %vm1158_vm0, %v12704_v37 }
 0x23d   : > { %v2290_v40 = vadd.f32 %v13115_v12, %v10783_v17  ;;  %11157 = vmatprep.mubr.msk.bf16.mxu0 %vm1158_vm0, %v12732_v18  ;;  %v3096_v17 = vsel %vm1158_vm0, %v2760_v11, -inf  ;;  %v2258_v11 = vadd.f32 %v13115_v12, %v10775_v30 }
 0x23e   : > { %v2281_v44 = vpop.f32.mrf.mxu0 }
 0x23f   : > { %v2778_v52 = vmax.f32 %v2290_v40, 0.0  ;;  %v2282_v56 = vadd.f32 %v13115_v12, %v2281_v44  ;;  %v2237_v40 = vadd.f32 %v13115_v12, %v2236_v6  ;;  %v3099_v44 = vsel %vm1158_vm0, %v2761_v61, -inf }
 0x240   : > { %v10784_v42 = vpop.f32.mrf.mxu0  ;;  %v2770_v5 = vmax.f32 %v2258_v11, 0.0 }
 0x241   : > { %v2776_v37 = vmax.f32 %v2282_v56, 0.0  ;;  %v2293_v1 = vadd.f32 %v13115_v12, %v10784_v42  ;;  %v3103_v23 = vsel %vm1158_vm0, %v2778_v52, -inf  ;;  %v13148_v56 = vsel %vm1158_vm0, %v2766_v4, -inf }
 0x242   : > { %v2284_v18 = vpop.f32.mrf.mxu0  ;;  %v3104_v21 = vmax.f32 %v3102_v35, %v3103_v23  ;;  %v2765_v30 = vmax.f32 %v2237_v40, 0.0  ;;  %v2250_v23 = vadd.f32 %v13115_v12, %v13096_v14 }
 0x243   : > { %v3097_v32 = vsel %vm1158_vm0, %v2776_v37, -inf  ;;  %v2779_v36 = vmax.f32 %v2293_v1, 0.0  ;;  %v2285_v45 = vadd.f32 %v13115_v12, %v2284_v18  ;;  %v3108_v18 = vsel %vm1158_vm0, %v2764_v60, -inf }
 0x244   : > { %v10787_v22 = vpop.f32.mrf.mxu0  ;;  %11158 = vmatmul.mubr.msk.bf16.gmra.mxu0 %vm1158_vm0, %v12750_v46  ;;  %v3098_v61 = vmax.f32 %v3096_v17, %v3097_v32  ;;  %v3363_v17 = vsel %vm1158_vm0, %v3104_v21, -inf  ;;  %v3117_v21 = vsel %vm1158_vm0, %v2767_v39, -inf  ;;  %v3111_v39 = vsel %vm1158_vm0, %v2765_v30, -inf }
 0x245   : > { %v3106_v6 = vsel %vm1158_vm0, %v2779_v36, -inf  ;;  %v2777_v37 = vmax.f32 %v2285_v45, 0.0  ;;  %v2306_v52 = vadd.f32 %v13115_v12, %v10787_v22  ;;  %11161 = vmatprep.mubr.msk.bf16.mxu0 %vm1158_vm0, %v12840_v48  ;;  %v2261_v36 = vadd.f32 %v13115_v12, %v13098_v43 }
 0x246   : > { %v3107_v4 = vmax.f32 %v3105_v7, %v3106_v6  ;;  %v2297_v42 = vpop.f32.mrf.mxu0  ;;  %v3360_v7 = vsel %vm1158_vm0, %v3098_v61, -inf  ;;  %v2253_v61 = vadd.f32 %v13115_v12, %v13100_v41 }
 0x247   : > { %v3100_v1 = vsel %vm1158_vm0, %v2777_v37, -inf  ;;  %v2782_v27 = vmax.f32 %v2306_v52, 0.0  ;;  %v2298_v35 = vadd.f32 %v13115_v12, %v2297_v42 }
 0x248   : > { %v3364_v45 = vsel %vm1158_vm0, %v3107_v4, -inf  ;;  %v3101_v22 = vmax.f32 %v3099_v44, %v3100_v1  ;;  %v10788_v60 = vpop.f32.mrf.mxu0  ;;  %v2768_v4 = vmax.f32 %v2250_v23, 0.0  ;;  %v2771_v1 = vmax.f32 %v2261_v36, 0.0 }
 0x249   : > { %v2780_v32 = vmax.f32 %v2298_v35, 0.0  ;;  %v2309_v40 = vadd.f32 %v13115_v12, %v10788_v60  ;;  %v3365_v6 = vmax.f32 %v3363_v17, %v3364_v45  ;;  %v3115_v14 = vsel %vm1158_vm0, %v2782_v27, -inf }
 0x24a   : > { %v3361_v37 = vsel %vm1158_vm0, %v3101_v22, -inf  ;;  %v2300_v52 = vpop.f32.mrf.mxu0  ;;  %v3116_v23 = vmax.f32 %v13148_v56, %v3115_v14  ;;  %v2769_v30 = vmax.f32 %v2253_v61, 0.0 }
 0x24b   : > { %v13170_v42 = vmax.f32 %v3360_v7, %v3361_v37  ;;  %v3109_v43 = vsel %vm1158_vm0, %v2780_v32, -inf  ;;  %v2783_v44 = vmax.f32 %v2309_v40, 0.0  ;;  %v2301_v11 = vadd.f32 %v13115_v12, %v2300_v52 }
 0x24c   : > { %v10791_v35 = vpop.f32.mrf.mxu0  ;;  %11162 = vmatmul.mubr.msk.bf16.gmra.mxu0 %vm1158_vm0, %v12877_v10  ;;  %v3110_v41 = vmax.f32 %v3108_v18, %v3109_v43  ;;  %v3126_v32 = vsel %vm1158_vm0, %v2770_v5, -inf  ;;  %v3120_v52 = vsel %vm1158_vm0, %v2768_v4, -inf  ;;  %v2274_v18 = vadd.f32 %v13115_v12, %v13102_v31 }
 0x24d   : > { %v3118_v27 = vsel %vm1158_vm0, %v2783_v44, -inf  ;;  %v2781_v45 = vmax.f32 %v2301_v11, 0.0  ;;  %v2322_v22 = vadd.f32 %v13115_v12, %v10791_v35  ;;  %11165 = vmatprep.mubr.msk.bf16.mxu0 %vm1158_vm0, %v12902_v34  ;;  %v13184_v60 = vpack.c.bf16 %v3365_v6, %v13170_v42 }
 0x24e   : > { %v3119_v36 = vmax.f32 %v3117_v21, %v3118_v27  ;;  %v2313_v17 = vpop.f32.mrf.mxu0  ;;  %v3129_v44 = vsel %vm1158_vm0, %v2771_v1, -inf  ;;  %v3369_v21 = vsel %vm1158_vm0, %v3116_v23, -inf  ;;  %v3366_v35 = vsel %vm1158_vm0, %v3110_v41, -inf }
 0x24f   : > { %16555 = vst [vmem:[#allocation31_spill] sm:$0xff] %v13184_v60  ;;  %v3112_v40 = vsel %vm1158_vm0, %v2781_v45, -inf  ;;  %v2786_v7 = vmax.f32 %v2322_v22, 0.0  ;;  %v2314_v37 = vadd.f32 %v13115_v12, %v2313_v17  ;;  %10913 = vmatprep.mubr.msk.bf16.mxu1 %vm1158_vm0, %v13184_v60  ;;  %v2269_v23 = vadd.f32 %v13115_v12, %v13124_v20 }
 0x250   : > { %v3113_v11 = vmax.f32 %v3111_v39, %v3112_v40  ;;  %v10792_v56 = vpop.f32.mrf.mxu0  ;;  %v3370_v5 = vsel %vm1158_vm0, %v3119_v36, -inf  ;;  %v2266_v39 = vadd.f32 %v13115_v12, %v13108_v55  ;;  %v2277_v36 = vadd.f32 %v13115_v12, %v13110_v0 }
 0x251   : > { %v2784_v14 = vmax.f32 %v2314_v37, 0.0  ;;  %v2325_v43 = vadd.f32 %v13115_v12, %v10792_v56  ;;  %v3127_v4 = vsel %vm1158_vm0, %v2786_v7, -inf  ;;  %v3371_v41 = vmax.f32 %v3369_v21, %v3370_v5 }
 0x252   : > { %v3367_v27 = vsel %vm1158_vm0, %v3113_v11, -inf  ;;  %v2316_v1 = vpop.f32.mrf.mxu0  ;;  %v3128_v55 = vmax.f32 %v3126_v32, %v3127_v4  ;;  %v3123_v5 = vsel %vm1158_vm0, %v2769_v30, -inf }
 0x253   : > { %v3368_v61 = vmax.f32 %v3366_v35, %v3367_v27  ;;  %v3121_v45 = vsel %vm1158_vm0, %v2784_v14, -inf  ;;  %v2787_v22 = vmax.f32 %v2325_v43, 0.0  ;;  %v2317_v31 = vadd.f32 %v13115_v12, %v2316_v1 }
 0x254   : > { %v10795_v17 = vpop.f32.mrf.mxu0  ;;  %11166 = vmatmul.mubr.msk.bf16.gmra.mxu0 %vm1158_vm0, %v12920_v29  ;;  %v3122_v0 = vmax.f32 %v3120_v52, %v3121_v45  ;;  %v2774_v35 = vmax.f32 %v2274_v18, 0.0  ;;  %v2772_v27 = vmax.f32 %v2266_v39, 0.0  ;;  %v2775_v1 = vmax.f32 %v2277_v36, 0.0 }
 0x255   : > { %v13213_v40 = vpack.c.bf16 %v3368_v61, %v3365_v6  ;;  %v3130_v7 = vsel %vm1158_vm0, %v2787_v22, -inf  ;;  %v2785_v37 = vmax.f32 %v2317_v31, 0.0  ;;  %v2338_v11 = vadd.f32 %v13115_v12, %v10795_v17  ;;  %11169 = vmatprep.mubr.msk.bf16.mxu0 %vm1158_vm0, %v13008_v28 }
 0x256   : > { %v3131_v56 = vmax.f32 %v3129_v44, %v3130_v7  ;;  %v2329_v14 = vpop.f32.mrf.mxu0  ;;  %v13219_v20 = vpack.c.bf16 %v3371_v41, %v3368_v61  ;;  %v2773_v52 = vmax.f32 %v2269_v23, 0.0  ;;  %v3375_v30 = vsel %vm1158_vm0, %v3128_v55, -inf }
 0x257   : > { %v3124_v43 = vsel %vm1158_vm0, %v2785_v37, -inf  ;;  %v2790_v6 = vmax.f32 %v2338_v11, 0.0  ;;  %v2330_v21 = vadd.f32 %v13115_v12, %v2329_v14  ;;  %v3372_v45 = vsel %vm1158_vm0, %v3122_v0, -inf }
 0x258   : > { %16556 = vst [vmem:[#allocation32_spill] sm:$0xff] %v13219_v20  ;;  %v3125_v22 = vmax.f32 %v3123_v5, %v3124_v43  ;;  %10914 = vmatmul.mubr.msk.bf16.gmra.mxu1 %vm1158_vm0, %v13219_v20  ;;  %v10796_v32 = vpop.f32.mrf.mxu0  ;;  %v3376_v44 = vsel %vm1158_vm0, %v3131_v56, -inf  ;;  %v3138_v37 = vsel %vm1158_vm0, %v2774_v35, -inf  ;;  %v3132_v11 = vsel %vm1158_vm0, %v2772_v27, -inf }
 0x259   : > { %v2788_v4 = vmax.f32 %v2330_v21, 0.0  ;;  %v2341_v61 = vadd.f32 %v13115_v12, %v10796_v32  ;;  %v3139_v18 = vsel %vm1158_vm0, %v2790_v6, -inf  ;;  %v3377_v56 = vmax.f32 %v3375_v30, %v3376_v44 }
 0x25a   : > { %v3373_v31 = vsel %vm1158_vm0, %v3125_v22, -inf  ;;  %v2332_v39 = vpop.f32.mrf.mxu0  ;;  %v3141_v55 = vsel %vm1158_vm0, %v2775_v1, -inf  ;;  %v3140_v6 = vmax.f32 %v3138_v37, %v3139_v18  ;;  %v3135_v32 = vsel %vm1158_vm0, %v2773_v52, -inf }
 0x25b   : > { %v3374_v36 = vmax.f32 %v3372_v45, %v3373_v31  ;;  %v3133_v17 = vsel %vm1158_vm0, %v2788_v4, -inf  ;;  %v2791_v7 = vmax.f32 %v2341_v61, 0.0  ;;  %v2333_v23 = vadd.f32 %v13115_v12, %v2332_v39 }
 0x25c   : > { %v10799_v14 = vpop.f32.mrf.mxu0  ;;  %11170 = vmatmul.mubr.msk.bf16.gmra.mxu0 %vm1158_vm0, %v13044_v33  ;;  %v3134_v21 = vmax.f32 %v3132_v11, %v3133_v17  ;;  %v3381_v61 = vsel %vm1158_vm0, %v3140_v6, -inf }
 0x25d   : > { %v13239_v0 = vpack.c.bf16 %v3374_v36, %v3371_v41  ;;  %v3142_v5 = vsel %vm1158_vm0, %v2791_v7, -inf  ;;  %v2789_v43 = vmax.f32 %v2333_v23, 0.0  ;;  %11173 = vmatprep.mubr.msk.bf16.mxu0 %vm1158_vm0, %v13069_v62  ;;  %v13244_v27 = vpack.c.bf16 %v3377_v56, %v3374_v36  ;;  %v11909_v23 = vld [vmem:[%s16462_s3 + $0x68] sm:$0xff]  }
 0x25e   : > { %v3143_v35 = vmax.f32 %v3141_v55, %v3142_v5  ;;  %v2345_v22 = vpop.f32.mrf.mxu0  ;;  %v3378_v30 = vsel %vm1158_vm0, %v3134_v21, -inf  ;;  %11269 = vmatprep.subr.bf16.mxu0 %v11909_v23 }
 0x25f   : > { %16557 = vst [vmem:[#allocation33_spill] sm:$0xff] %v13244_v27  ;;  %v3136_v44 = vsel %vm1158_vm0, %v2789_v43, -inf  ;;  %10917 = vmatprep.mubr.msk.bf16.mxu1 %vm1158_vm0, %v13244_v27  ;;  %11270 = vmatpush3.bf16.msra.mxu0 %v11909_v23 }
 0x260   : > { %v3382_v1 = vsel %vm1158_vm0, %v3143_v35, -inf  ;;  %v3137_v41 = vmax.f32 %v3135_v32, %v3136_v44  ;;  %v10800_v4 = vpop.f32.mrf.mxu0  ;;  %v2354_v44 = vadd.f32 %v13115_v12, %v10799_v14 }
 0x261   : > { %v13254_v18 = vmax.f32 %v3381_v61, %v3382_v1  ;;  %v2346_v1 = vadd.f32 %v13115_v12, %v2345_v22  ;;  %v2357_v61 = vadd.f32 %v13115_v12, %v10800_v4 }
 0x262   : > { %v3379_v45 = vsel %vm1158_vm0, %v3137_v41, -inf  ;;  %v2348_v31 = vpop.f32.mrf.mxu0  ;;  %v2794_v23 = vmax.f32 %v2354_v44, 0.0 }
 0x263   : > { %v3380_v39 = vmax.f32 %v3378_v30, %v3379_v45  ;;  %v2349_v30 = vadd.f32 %v13115_v12, %v2348_v31  ;;  %v2795_v22 = vmax.f32 %v2357_v61, 0.0 }
 0x264   : > { %v10803_v52 = vpop.f32.mrf.mxu0  ;;  %11174 = vmatmul.mubr.msk.bf16.gmra.mxu0 %vm1158_vm0, %v13088_v8  ;;  %v3150_v4 = vsel %vm1158_vm0, %v2794_v23, -inf }
 0x265   : > { %v13258_v36 = vpack.c.bf16 %v3380_v39, %v3377_v56  ;;  %11177 = vmatprep.mubr.msk.bf16.mxu0 %vm1158_vm0, %v13184_v60  ;;  %v13263_v17 = vpack.c.bf16 %v13254_v18, %v3380_v39  ;;  %v11910_v56 = vld [vmem:[%s16462_s3 + $0x60] sm:$0xff]   ;;  %v2370_v45 = vadd.f32 %v13115_v12, %v10803_v52  ;;  %v2793_v8 = vmax.f32 %v2349_v30, 0.0 }
 0x266   : > { %v2361_v7 = vpop.f32.mrf.mxu0  ;;  %11271 = vmatprep.subr.bf16.mxu0 %v11910_v56 }
 0x267   : > { %16558 = vst [vmem:[#allocation34_spill] sm:$0xff] %v13263_v17  ;;  %10918 = vmatmul.mubr.msk.bf16.gmra.mxu1 %vm1158_vm0, %v13263_v17  ;;  %11272 = vmatpush3.bf16.msra.mxu0 %v11910_v56  ;;  %v2798_v62 = vmax.f32 %v2370_v45, 0.0  ;;  %v3153_v45 = vsel %vm1158_vm0, %v2795_v22, -inf  ;;  %v3147_v23 = vsel %vm1158_vm0, %v2793_v8, -inf }
 0x268   : > { %v10804_v37 = vpop.f32.mrf.mxu0 }
 0x26a   : > { %v2364_v11 = vpop.f32.mrf.mxu0 }
 0x26c   : > { %v10807_v55 = vpop.f32.mrf.mxu0  ;;  %11178 = vmatmul.mubr.msk.bf16.gmra.mxu0 %vm1158_vm0, %v13219_v20 }
 0x26d   : > { %11181 = vmatprep.mubr.msk.bf16.mxu0 %vm1158_vm0, %v13244_v27  ;;  %v2362_v27 = vadd.f32 %v13115_v12, %v2361_v7 }
 0x26e   : > { %v2377_v5 = vpop.f32.mrf.mxu0 }
 0x26f   : > { %v2796_v28 = vmax.f32 %v2362_v27, 0.0  ;;  %v2386_v27 = vadd.f32 %v13115_v12, %v10807_v55  ;;  %v2378_v55 = vadd.f32 %v13115_v12, %v2377_v5 }
 0x270   : > { %v10808_v43 = vpop.f32.mrf.mxu0 }
 0x272   : > { %v13277_v6 = vpop.f32.mrf.mxu0 }
 0x274   : > { %v13279_v21 = vpop.f32.mrf.mxu0  ;;  %11182 = vmatmul.mubr.msk.bf16.gmra.mxu0 %vm1158_vm0, %v13263_v17  ;;  %v2792_v17 = vmax.f32 %v2346_v1, 0.0  ;;  %v2373_v1 = vadd.f32 %v13115_v12, %v10804_v37 }
 0x276   : > { %v13283_v35 = vpop.f32.mrf.mxu0  ;;  %v3144_v44 = vsel %vm1158_vm0, %v2792_v17, -inf }
 0x278   : > { %v13285_v32 = vpop.f32.mrf.mxu0 }
 0x27a   : > { %v13289_v41 = vpop.f32.mrf.mxu0 }
 0x27c   : > { %v10815_v39 = vpop.f32.mrf.mxu0 }
 0x27d   : > { %v2418_v56 = vadd.f32 %v13115_v12, %v10815_v39 }
 0x27e   : > { %v2409_v20 = vpop.f32.mrf.mxu0 }
 0x27f   : > { %v2810_v60 = vmax.f32 %v2418_v56, 0.0  ;;  %v2410_v14 = vadd.f32 %v13115_v12, %v2409_v20  ;;  %v2365_v56 = vadd.f32 %v13115_v12, %v2364_v11 }
 0x280   : > { %v10816_v33 = vpop.f32.mrf.mxu0 }
 0x281   : > { %v2808_v31 = vmax.f32 %v2410_v14, 0.0  ;;  %v2421_v52 = vadd.f32 %v13115_v12, %v10816_v33  ;;  %v3151_v7 = vsel %vm1158_vm0, %v2810_v60, -inf  ;;  %v13308_v33 = vsel %vm1158_vm0, %v2798_v62, -inf }
 0x282   : > { %v2412_v39 = vpop.f32.mrf.mxu0  ;;  %v3152_v37 = vmax.f32 %v3150_v4, %v3151_v7  ;;  %v2797_v34 = vmax.f32 %v2365_v56, 0.0  ;;  %v2389_v4 = vadd.f32 %v13115_v12, %v10808_v43 }
 0x283   : > { %v3145_v20 = vsel %vm1158_vm0, %v2808_v31, -inf  ;;  %v2811_v61 = vmax.f32 %v2421_v52, 0.0  ;;  %v2413_v30 = vadd.f32 %v13115_v12, %v2412_v39  ;;  %v3156_v31 = vsel %vm1158_vm0, %v2796_v28, -inf }
 0x284   : > { %v10819_v17 = vpop.f32.mrf.mxu0  ;;  %v2799_v52 = vmax.f32 %v2373_v1, 0.0  ;;  %v3146_v39 = vmax.f32 %v3144_v44, %v3145_v20  ;;  %v3387_v28 = vsel %vm1158_vm0, %v3152_v37, -inf  ;;  %v2803_v37 = vmax.f32 %v2389_v4, 0.0 }
 0x285   : > { %v3154_v60 = vsel %vm1158_vm0, %v2811_v61, -inf  ;;  %v2809_v14 = vmax.f32 %v2413_v30, 0.0  ;;  %v2434_v11 = vadd.f32 %v13115_v12, %v10819_v17  ;;  %v2802_v17 = vmax.f32 %v2386_v27, 0.0 }
 0x286   : > { %v3155_v29 = vmax.f32 %v3153_v45, %v3154_v60  ;;  %v2425_v22 = vpop.f32.mrf.mxu0  ;;  %v3384_v56 = vsel %vm1158_vm0, %v3146_v39, -inf  ;;  %v3165_v27 = vsel %vm1158_vm0, %v2799_v52, -inf }
 0x287   : > { %v3148_v8 = vsel %vm1158_vm0, %v2809_v14, -inf  ;;  %v2814_v62 = vmax.f32 %v2434_v11, 0.0  ;;  %v2426_v10 = vadd.f32 %v13115_v12, %v2425_v22  ;;  %v2381_v11 = vadd.f32 %v13115_v12, %v13277_v6 }
 0x288   : > { %v3388_v7 = vsel %vm1158_vm0, %v3155_v29, -inf  ;;  %v3149_v61 = vmax.f32 %v3147_v23, %v3148_v8  ;;  %v10820_v30 = vpop.f32.mrf.mxu0  ;;  %v3174_v4 = vsel %vm1158_vm0, %v2802_v17, -inf  ;;  %v2402_v17 = vadd.f32 %v13115_v12, %v13279_v21 }
 0x289   : > { %v2812_v44 = vmax.f32 %v2426_v10, 0.0  ;;  %v2437_v1 = vadd.f32 %v13115_v12, %v10820_v30  ;;  %v3389_v20 = vmax.f32 %v3387_v28, %v3388_v7  ;;  %v3163_v60 = vsel %vm1158_vm0, %v2814_v62, -inf }
 0x28a   : > { %v3385_v45 = vsel %vm1158_vm0, %v3149_v61, -inf  ;;  %v2428_v5 = vpop.f32.mrf.mxu0  ;;  %v2800_v10 = vmax.f32 %v2378_v55, 0.0  ;;  %v3159_v61 = vsel %vm1158_vm0, %v2797_v34, -inf  ;;  %v3164_v30 = vmax.f32 %v13308_v33, %v3163_v60  ;;  %v13347_v60 = vpop.f32.mrf.mxu1 }
 0x28b   : > { %v13324_v14 = vmax.f32 %v3384_v56, %v3385_v45  ;;  %v3157_v29 = vsel %vm1158_vm0, %v2812_v44, -inf  ;;  %v2815_v43 = vmax.f32 %v2437_v1, 0.0  ;;  %v2429_v23 = vadd.f32 %v13115_v12, %v2428_v5  ;;  %16560 = vst [vmem:[#allocation36_spill] sm:$0xff] %v13347_v60 }
 0x28c   : > { %v10823_v39 = vpop.f32.mrf.mxu0  ;;  %v3158_v28 = vmax.f32 %v3156_v31, %v3157_v29  ;;  %v3168_v34 = vsel %vm1158_vm0, %v2800_v10, -inf  ;;  %v3177_v33 = vsel %vm1158_vm0, %v2803_v37, -inf  ;;  %v2801_v31 = vmax.f32 %v2381_v11, 0.0 }
 0x28d   : > { %v3166_v22 = vsel %vm1158_vm0, %v2815_v43, -inf  ;;  %v2813_v8 = vmax.f32 %v2429_v23, 0.0  ;;  %v2450_v62 = vadd.f32 %v13115_v12, %v10823_v39  ;;  %v13334_v7 = vpack.c.bf16 %v3389_v20, %v13324_v14 }
 0x28e   : > { %v3167_v52 = vmax.f32 %v3165_v27, %v3166_v22  ;;  %v2441_v55 = vpop.f32.mrf.mxu0  ;;  %v3393_v23 = vsel %vm1158_vm0, %v3164_v30, -inf  ;;  %v3390_v27 = vsel %vm1158_vm0, %v3158_v28, -inf  ;;  %v2397_v30 = vadd.f32 %v13115_v12, %v13289_v41 }
 0x28f   : > { %16559 = vst [vmem:[#allocation35_spill] sm:$0xff] %v13334_v7  ;;  %v3160_v6 = vsel %vm1158_vm0, %v2813_v8, -inf  ;;  %v2818_v44 = vmax.f32 %v2450_v62, 0.0  ;;  %v2442_v1 = vadd.f32 %v13115_v12, %v2441_v55  ;;  %10921 = vmatprep.mubr.msk.bf16.mxu1 %vm1158_vm0, %v13334_v7  ;;  %11185 = vmatprep.mubr.msk.bf16.mxu0 %vm1158_vm0, %v13334_v7  ;;  %v2394_v62 = vadd.f32 %v13115_v12, %v13283_v35  ;;  %v13365_v55 = vpop.f32.mrf.mxu1 }
 0x290   : > { %v3161_v56 = vmax.f32 %v3159_v61, %v3160_v6  ;;  %v10824_v45 = vpop.f32.mrf.mxu0  ;;  %v3394_v5 = vsel %vm1158_vm0, %v3167_v52, -inf  ;;  %v2405_v61 = vadd.f32 %v13115_v12, %v13285_v32  ;;  %16561 = vst [vmem:[#allocation37_spill] sm:$0xff] %v13365_v55  ;;  %v3171_v32 = vsel %vm1158_vm0, %v2801_v31, -inf }
 0x291   : > { %v2816_v29 = vmax.f32 %v2442_v1, 0.0  ;;  %v2453_v43 = vadd.f32 %v13115_v12, %v10824_v45  ;;  %v3175_v37 = vsel %vm1158_vm0, %v2818_v44, -inf  ;;  %v3395_v28 = vmax.f32 %v3393_v23, %v3394_v5 }
 0x292   : > { %v3391_v10 = vsel %vm1158_vm0, %v3161_v56, -inf  ;;  %v2444_v11 = vpop.f32.mrf.mxu0  ;;  %v3176_v45 = vmax.f32 %v3174_v4, %v3175_v37 }
 0x293   : > { %v3392_v39 = vmax.f32 %v3390_v27, %v3391_v10  ;;  %v3169_v22 = vsel %vm1158_vm0, %v2816_v29, -inf  ;;  %v2819_v8 = vmax.f32 %v2453_v43, 0.0  ;;  %v2445_v21 = vadd.f32 %v13115_v12, %v2444_v11 }
 0x294   : > { %v10827_v52 = vpop.f32.mrf.mxu0  ;;  %v3170_v29 = vmax.f32 %v3168_v34, %v3169_v22  ;;  %v2804_v10 = vmax.f32 %v2394_v62, 0.0  ;;  %v2807_v11 = vmax.f32 %v2405_v61, 0.0  ;;  %v13380_v34 = vpop.f32.mrf.mxu1 }
 0x295   : > { %v13367_v6 = vpack.c.bf16 %v3392_v39, %v3389_v20  ;;  %v3178_v44 = vsel %vm1158_vm0, %v2819_v8, -inf  ;;  %v2817_v1 = vmax.f32 %v2445_v21, 0.0  ;;  %v2466_v56 = vadd.f32 %v13115_v12, %v10827_v52  ;;  %16563 = vst [vmem:[#allocation39_spill] sm:$0xff] %v13380_v34 }
 0x296   : > { %v3179_v35 = vmax.f32 %v3177_v33, %v3178_v44  ;;  %v2457_v43 = vpop.f32.mrf.mxu0  ;;  %v13371_v27 = vpack.c.bf16 %v3395_v28, %v3392_v39  ;;  %v2806_v20 = vmax.f32 %v2402_v17, 0.0  ;;  %v2805_v33 = vmax.f32 %v2397_v30, 0.0 }
 0x297   : > { %v3172_v41 = vsel %vm1158_vm0, %v2817_v1, -inf  ;;  %v2822_v5 = vmax.f32 %v2466_v56, 0.0  ;;  %v2458_v23 = vadd.f32 %v13115_v12, %v2457_v43  ;;  %v3399_v17 = vsel %vm1158_vm0, %v3176_v45, -inf  ;;  %v13392_v45 = vpop.f32.mrf.mxu1 }
 0x298   : > { %16562 = vst [vmem:[#allocation38_spill] sm:$0xff] %v13371_v27  ;;  %v3173_v8 = vmax.f32 %v3171_v32, %v3172_v41  ;;  %10922 = vmatmul.mubr.msk.bf16.gmra.mxu1 %vm1158_vm0, %v13371_v27  ;;  %11186 = vmatmul.mubr.msk.bf16.gmra.mxu0 %vm1158_vm0, %v13371_v27  ;;  %v10828_v4 = vpop.f32.mrf.mxu0  ;;  %v3400_v31 = vsel %vm1158_vm0, %v3179_v35, -inf  ;;  %v3396_v22 = vsel %vm1158_vm0, %v3170_v29, -inf  ;;  %v3186_v56 = vsel %vm1158_vm0, %v2806_v20, -inf  ;;  %16564 = vst [vmem:[#allocation40_spill] sm:$0xff] %v13392_v45 }
 0x299   : > { %v2820_v37 = vmax.f32 %v2458_v23, 0.0  ;;  %v2469_v39 = vadd.f32 %v13115_v12, %v10828_v4  ;;  %v3187_v62 = vsel %vm1158_vm0, %v2822_v5, -inf  ;;  %v3180_v35 = vsel %vm1158_vm0, %v2804_v10, -inf }
 0x29a   : > { %v3397_v21 = vsel %vm1158_vm0, %v3173_v8, -inf  ;;  %v2460_v61 = vpop.f32.mrf.mxu0  ;;  %v3401_v43 = vmax.f32 %v3399_v17, %v3400_v31  ;;  %v3189_v29 = vsel %vm1158_vm0, %v2807_v11, -inf  ;;  %v3188_v8 = vmax.f32 %v3186_v56, %v3187_v62  ;;  %v13407_v11 = vpop.f32.mrf.mxu1 }
 0x29b   : > { %v3398_v52 = vmax.f32 %v3396_v22, %v3397_v21  ;;  %v3181_v44 = vsel %vm1158_vm0, %v2820_v37, -inf  ;;  %v2823_v1 = vmax.f32 %v2469_v39, 0.0  ;;  %v2461_v30 = vadd.f32 %v13115_v12, %v2460_v61  ;;  %16566 = vst [vmem:[#allocation42_spill] sm:$0xff] %v13407_v11 }
 0x29c   : > { %v10831_v32 = vpop.f32.mrf.mxu0  ;;  %v3182_v4 = vmax.f32 %v3180_v35, %v3181_v44  ;;  %v3183_v20 = vsel %vm1158_vm0, %v2805_v33, -inf  ;;  %v3405_v21 = vsel %vm1158_vm0, %v3188_v8, -inf }
 0x29d   : > { %v13395_v41 = vpack.c.bf16 %v3398_v52, %v3395_v28  ;;  %v3190_v5 = vsel %vm1158_vm0, %v2823_v1, -inf  ;;  %v2821_v23 = vmax.f32 %v2461_v30, 0.0  ;;  %v13398_v22 = vpack.c.bf16 %v3401_v43, %v3398_v52  ;;  %v13414_v30 = vpop.f32.mrf.mxu1 }
 0x29e   : > { %v3191_v37 = vmax.f32 %v3189_v29, %v3190_v5  ;;  %v2473_v39 = vpop.f32.mrf.mxu0  ;;  %v3402_v62 = vsel %vm1158_vm0, %v3182_v4, -inf  ;;  %16567 = vst [vmem:[#allocation43_spill] sm:$0xff] %v13414_v30  ;;  %v2482_v27 = vadd.f32 %v13115_v12, %v10831_v32 }
 0x29f   : > { %16565 = vst [vmem:[#allocation41_spill] sm:$0xff] %v13398_v22  ;;  %v3184_v10 = vsel %vm1158_vm0, %v2821_v23, -inf  ;;  %10925 = vmatprep.mubr.msk.bf16.mxu1 %vm1158_vm0, %v13398_v22  ;;  %11189 = vmatprep.mubr.msk.bf16.mxu0 %vm1158_vm0, %v13398_v22  ;;  %v16569_v23 = vmov 0.0|0.0   ;;  %v13426_v8 = vpop.f32.mrf.mxu1  ;;  %v16497_v22 = vmov 0.0  }
 0x2a0   : > { %v3406_v31 = vsel %vm1158_vm0, %v3191_v37, -inf  ;;  %v3185_v17 = vmax.f32 %v3183_v20, %v3184_v10  ;;  %v10832_v28 = vpop.f32.mrf.mxu0  ;;  %16570 = vst [vmem:[#allocation45_spill] sm:$0xff] %v13426_v8 }
 0x2a1   : > { %v13412_v52 = vmax.f32 %v3405_v21, %v3406_v31  ;;  %v13428_v20 = vpop.f32.mrf.mxu1  ;;  %v2485_v46 = vadd.f32 %v13115_v12, %v10832_v28  ;;  %v16577_v28 = vmov 0.0  }
 0x2a2   : > { %v3403_v33 = vsel %vm1158_vm0, %v3185_v17, -inf  ;;  %v2476_v61 = vpop.f32.mrf.mxu0  ;;  %16571 = vst [vmem:[#allocation46_spill] sm:$0xff] %v13428_v20  ;;  %v13479_v11 = vpack.c.bf16 %v12484_v51, %v16577_v28 }
 0x2a3   : > { %v3404_v44 = vmax.f32 %v3402_v62, %v3403_v33  ;;  %v13438_v17 = vpop.f32.mrf.mxu1  ;;  %v13447_v33 = vld [vmem:[%s16462_s3 + $0x38] sm:$0xff]   ;;  %v2477_v2 = vadd.f32 %v13115_v12, %v2476_v61 }
 0x2a4   : > { %v10835_v1 = vpop.f32.mrf.mxu0  ;;  %16572 = vst [vmem:[#allocation47_spill] sm:$0xff] %v13438_v17 }
 0x2a5   : > { %v13416_v56 = vpack.c.bf16 %v3404_v44, %v3401_v43  ;;  %v13419_v35 = vpack.c.bf16 %v13412_v52, %v3404_v44  ;;  %v11911_v43 = vld [vmem:[%s16462_s3 + $0x20] sm:$0xff]   ;;  %v13449_v44 = vpop.f32.mrf.mxu1  ;;  %v2498_v32 = vadd.f32 %v13115_v12, %v10835_v1 }
 0x2a6   : > { %v2489_v29 = vpop.f32.mrf.mxu0  ;;  %16573 = vst [vmem:[#allocation48_spill] sm:$0xff] %v13449_v44 }
 0x2a7   : > { %16568 = vst [vmem:[#allocation44_spill] sm:$0xff] %v13419_v35  ;;  %10926 = vmatmul.mubr.msk.bf16.gmra.mxu1 %vm1158_vm0, %v13419_v35  ;;  %11190 = vmatmul.mubr.msk.bf16.gmra.mxu0 %vm1158_vm0, %v13419_v35  ;;  %v13465_v48 = vpop.f32.mrf.mxu1  ;;  %v2490_v44 = vadd.f32 %v13115_v12, %v2489_v29 }
 0x2a8   : > { %v10836_v5 = vpop.f32.mrf.mxu0  ;;  %10933 = vmatprep.mubr.bf16.mxu1 %v16569_v23  ;;  %16575 = vst [vmem:[#allocation50_spill] sm:$0xff] %v13465_v48  ;;  %v2827_v48 = vmax.f32 %v2485_v46, 0.0 }
 0x2a9   : > { %v13473_v17 = vpop.f32.mrf.mxu1  ;;  %v2501_v20 = vadd.f32 %v13115_v12, %v10836_v5  ;;  %v13489_v5 = vpack.c.bf16 %v12651_v49, %v16577_v28  ;;  %v2828_v51 = vmax.f32 %v2490_v44, 0.0 }
 0x2aa   : > { %v2492_v4 = vpop.f32.mrf.mxu0  ;;  %16576 = vst [vmem:[#allocation51_spill] sm:$0xff] %v13473_v17  ;;  %v3201_v45 = vsel %vm1158_vm0, %v2827_v48, -inf }
 0x2ab   : > { %v2493_v49 = vadd.f32 %v13115_v12, %v2492_v4  ;;  %v3204_v48 = vsel %vm1158_vm0, %v2828_v51, -inf }
 0x2ac   : > { %v10839_v37 = vpop.f32.mrf.mxu0 }
 0x2ad   : > { %v2514_v34 = vadd.f32 %v13115_v12, %v10839_v37 }
 0x2ae   : > { %v2505_v10 = vpop.f32.mrf.mxu0 }
 0x2af   : > { %10934 = vmatmul.mubr.bf16.vlgmr.msra.gmra.mxu1 %v16569_v23  ;;  %v2506_v44 = vadd.f32 %v13115_v12, %v2505_v10 }
 0x2b0   : > { %v13434_v31 = vpop.f32.mrf.mxu0  ;;  %10937 = vmatprep.mubr.bf16.mxu1 %v16569_v23  ;;  %10998 = vmatpush3.bf16.msra.mxu1 %v13121_v54  ;;  %v13455_v54 = vpack.c.bf16 %v12312_v26, %v16497_v22  ;;  %v2826_v26 = vmax.f32 %v2482_v27, 0.0  ;;  %v13481_v27 = vpop.f32.mrf.mxu1 }
 0x2b1   : > { %10999 = vmatprep.subr.bf16.mxu1 %v11911_v43  ;;  %16578 = vst [vmem:[#allocation52_spill] sm:$0xff] %v13481_v27 }
 0x2b2   : > { %v13440_v21 = vpop.f32.mrf.mxu0  ;;  %16574 = vst [vmem:[#allocation49_spill] sm:$0xff] %v13455_v54  ;;  %v3198_v61 = vsel %vm1158_vm0, %v2826_v26, -inf  ;;  %v2831_v26 = vmax.f32 %v2501_v20, 0.0 }
 0x2b4   : > { %v13442_v62 = vpop.f32.mrf.mxu0  ;;  %11000 = vmatpush3.bf16.msra.mxu1 %v11911_v43  ;;  %v2474_v43 = vadd.f32 %v13115_v12, %v2473_v39  ;;  %v3213_v37 = vsel %vm1158_vm0, %v2831_v26, -inf }
 0x2b5   : > { %11065 = vmatprep.subr.bf16.mxu1 %v13447_v33 }
 0x2b6   : > { %v13451_v35 = vpop.f32.mrf.mxu0  ;;  %v2824_v22 = vmax.f32 %v2474_v43, 0.0  ;;  %v2825_v43 = vmax.f32 %v2477_v2, 0.0 }
 0x2b7   : > { %10938 = vmatmul.mubr.bf16.gmra.mxu1 %v16569_v23 }
 0x2b8   : > { %v13461_v7 = vpop.f32.mrf.mxu0  ;;  %10941 = vmatprep.mubr.msk.bf16.mxu1 %vm1158_vm0, %v13455_v54  ;;  %v3192_v46 = vsel %vm1158_vm0, %v2824_v22, -inf }
 0x2ba   : > { %v13468_v58 = vpop.f32.mrf.mxu0 }
 0x2bc   : > { %v10847_v39 = vpop.f32.mrf.mxu0 }
 0x2bd   : > { %v2546_v8 = vadd.f32 %v13115_v12, %v10847_v39  ;;  %v2830_v39 = vmax.f32 %v2498_v32, 0.0  ;;  %v13499_v32 = vpop.f32.mrf.mxu1 }
 0x2be   : > { %v2537_v30 = vpop.f32.mrf.mxu0  ;;  %16579 = vst [vmem:[#allocation53_spill] sm:$0xff] %v13499_v32  ;;  %v2829_v32 = vmax.f32 %v2493_v49, 0.0 }
 0x2bf   : > { %v2842_v1 = vmax.f32 %v2546_v8, 0.0  ;;  %v2538_v29 = vadd.f32 %v13115_v12, %v2537_v30  ;;  %10942 = vmatmul.mubr.msk.bf16.gmra.mxu1 %vm1158_vm0, %v12363_v19 }
 0x2c0   : > { %v10848_v17 = vpop.f32.mrf.mxu0  ;;  %10945 = vmatprep.mubr.msk.bf16.mxu1 %vm1158_vm0, %v12387_v57 }
 0x2c1   : > { %v3199_v8 = vsel %vm1158_vm0, %v2842_v1, -inf  ;;  %v2840_v30 = vmax.f32 %v2538_v29, 0.0  ;;  %v2549_v27 = vadd.f32 %v13115_v12, %v10848_v17  ;;  %v3195_v29 = vsel %vm1158_vm0, %v2825_v43, -inf  ;;  %v13511_v43 = vpop.f32.mrf.mxu1 }
 0x2c2   : > { %v3200_v22 = vmax.f32 %v3198_v61, %v3199_v8  ;;  %v2540_v2 = vpop.f32.mrf.mxu0  ;;  %v3210_v17 = vsel %vm1158_vm0, %v2830_v39, -inf  ;;  %v2832_v39 = vmax.f32 %v2506_v44, 0.0 }
 0x2c3   : > { %v3193_v55 = vsel %vm1158_vm0, %v2840_v30, -inf  ;;  %v2843_v20 = vmax.f32 %v2549_v27, 0.0  ;;  %v2541_v1 = vadd.f32 %v13115_v12, %v2540_v2  ;;  %v2834_v30 = vmax.f32 %v2514_v34, 0.0 }
 0x2c4   : > { %v3194_v4 = vmax.f32 %v3192_v46, %v3193_v55  ;;  %v10851_v60 = vpop.f32.mrf.mxu0  ;;  %v3411_v27 = vsel %vm1158_vm0, %v3200_v22, -inf }
 0x2c5   : > { %v3202_v61 = vsel %vm1158_vm0, %v2843_v20, -inf  ;;  %v2841_v8 = vmax.f32 %v2541_v1, 0.0  ;;  %v2562_v10 = vadd.f32 %v13115_v12, %v10851_v60  ;;  %v2517_v60 = vadd.f32 %v13115_v12, %v13434_v31 }
 0x2c6   : > { %v3203_v2 = vmax.f32 %v3201_v45, %v3202_v61  ;;  %v2553_v54 = vpop.f32.mrf.mxu0  ;;  %v3408_v34 = vsel %vm1158_vm0, %v3194_v4, -inf  ;;  %v3207_v1 = vsel %vm1158_vm0, %v2829_v32, -inf  ;;  %v2509_v31 = vadd.f32 %v13115_v12, %v13440_v21 }
 0x2c7   : > { %v3196_v51 = vsel %vm1158_vm0, %v2841_v8, -inf  ;;  %v2846_v55 = vmax.f32 %v2562_v10, 0.0  ;;  %v2554_v46 = vadd.f32 %v13115_v12, %v2553_v54  ;;  %10946 = vmatmul.mubr.msk.bf16.gmra.mxu1 %vm1158_vm0, %v12406_v15  ;;  %v3216_v32 = vsel %vm1158_vm0, %v2832_v39, -inf }
 0x2c8   : > { %v3412_v26 = vsel %vm1158_vm0, %v3203_v2, -inf  ;;  %v3197_v45 = vmax.f32 %v3195_v29, %v3196_v51  ;;  %v10852_v49 = vpop.f32.mrf.mxu0  ;;  %10949 = vmatprep.mubr.msk.bf16.mxu1 %vm1158_vm0, %v13479_v11  ;;  %v13529_v29 = vpop.f32.mrf.mxu1 }
 0x2c9   : > { %v3413_v22 = vmax.f32 %v3411_v27, %v3412_v26  ;;  %v3211_v44 = vsel %vm1158_vm0, %v2846_v55, -inf  ;;  %v2844_v20 = vmax.f32 %v2554_v46, 0.0  ;;  %v2565_v54 = vadd.f32 %v13115_v12, %v10852_v49  ;;  %16580 = vst [vmem:[#allocation54_spill] sm:$0xff] %v13529_v29 }
 0x2ca   : > { %v3409_v4 = vsel %vm1158_vm0, %v3197_v45, -inf  ;;  %v3212_v61 = vmax.f32 %v3210_v17, %v3211_v44  ;;  %v2556_v8 = vpop.f32.mrf.mxu0  ;;  %v3222_v55 = vsel %vm1158_vm0, %v2834_v30, -inf  ;;  %v2835_v46 = vmax.f32 %v2517_v60, 0.0  ;;  %v13537_v49 = vpop.f32.mrf.mxu1 }
 0x2cb   : > { %v13531_v10 = vmax.f32 %v3408_v34, %v3409_v4  ;;  %v3205_v27 = vsel %vm1158_vm0, %v2844_v20, -inf  ;;  %v2847_v2 = vmax.f32 %v2565_v54, 0.0  ;;  %v2557_v51 = vadd.f32 %v13115_v12, %v2556_v8  ;;  %16581 = vst [vmem:[#allocation55_spill] sm:$0xff] %v13537_v49 }
 0x2cc   : > { %v3206_v26 = vmax.f32 %v3204_v48, %v3205_v27  ;;  %v10855_v21 = vpop.f32.mrf.mxu0  ;;  %v2833_v20 = vmax.f32 %v2509_v31, 0.0  ;;  %v2530_v54 = vadd.f32 %v13115_v12, %v13442_v62  ;;  %v3417_v30 = vsel %vm1158_vm0, %v3212_v61, -inf  ;;  %v11958_v62 = vld [vmem:[%s16463_s4] ss:$0 sm:$0xff] }
 0x2cd   : > { %v3214_v17 = vsel %vm1158_vm0, %v2847_v2, -inf  ;;  %v2845_v45 = vmax.f32 %v2557_v51, 0.0  ;;  %v2578_v34 = vadd.f32 %v13115_v12, %v10855_v21  ;;  %v13542_v44 = vpack.c.bf16 %v3413_v22, %v13531_v10 }
 0x2ce   : > { %v3215_v39 = vmax.f32 %v3213_v37, %v3214_v17  ;;  %v2569_v60 = vpop.f32.mrf.mxu0  ;;  %v2522_v48 = vadd.f32 %v13115_v12, %v13451_v35  ;;  %v2533_v37 = vadd.f32 %v11958_v62, %v13461_v7  ;;  %v3414_v31 = vsel %vm1158_vm0, %v3206_v26, -inf }
 0x2cf   : > { %16582 = vst [vmem:[#allocation56_spill] sm:$0xff] %v13542_v44  ;;  %v3208_v4 = vsel %vm1158_vm0, %v2845_v45, -inf  ;;  %v2850_v8 = vmax.f32 %v2578_v34, 0.0  ;;  %v2570_v27 = vadd.f32 %v13115_v12, %v2569_v60  ;;  %10950 = vmatmul.mubr.msk.bf16.gmra.mxu1 %vm1158_vm0, %v12527_v50  ;;  %11193 = vmatprep.mubr.msk.bf16.mxu0 %vm1158_vm0, %v13542_v44  ;;  %v13563_v12 = vpop.f32.mrf.mxu1  ;;  %v3225_v34 = vsel %vm1158_vm0, %v2835_v46, -inf }
 0x2d0   : > { %v3418_v35 = vsel %vm1158_vm0, %v3215_v39, -inf  ;;  %v3209_v61 = vmax.f32 %v3207_v1, %v3208_v4  ;;  %v10856_v2 = vpop.f32.mrf.mxu0  ;;  %10953 = vmatprep.mubr.msk.bf16.mxu1 %vm1158_vm0, %v12553_v38  ;;  %16583 = vst [vmem:[#allocation57_spill] sm:$0xff] %v13563_v12  ;;  %v2838_v60 = vmax.f32 %v2530_v54, 0.0  ;;  %v3219_v29 = vsel %vm1158_vm0, %v2833_v20, -inf }
 0x2d1   : > { %v3419_v51 = vmax.f32 %v3417_v30, %v3418_v35  ;;  %v3223_v21 = vsel %vm1158_vm0, %v2850_v8, -inf  ;;  %v2848_v17 = vmax.f32 %v2570_v27, 0.0  ;;  %v2581_v45 = vadd.f32 %v11958_v62, %v10856_v2  ;;  %v13570_v27 = vpop.f32.mrf.mxu1 }
 0x2d2   : > { %v3415_v7 = vsel %vm1158_vm0, %v3209_v61, -inf  ;;  %v3224_v26 = vmax.f32 %v3222_v55, %v3223_v21  ;;  %v2572_v44 = vpop.f32.mrf.mxu0  ;;  %v2836_v12 = vmax.f32 %v2522_v48, 0.0  ;;  %v2839_v30 = vmax.f32 %v2533_v37, 0.0 }
 0x2d3   : > { %v3416_v39 = vmax.f32 %v3414_v31, %v3415_v7  ;;  %v3217_v1 = vsel %vm1158_vm0, %v2848_v17, -inf  ;;  %v2851_v4 = vmax.f32 %v2581_v45, 0.0  ;;  %v2573_v49 = vadd.f32 %v11958_v62, %v2572_v44 }
 0x2d4   : > { %v3218_v35 = vmax.f32 %v3216_v32, %v3217_v1  ;;  %v10859_v8 = vpop.f32.mrf.mxu0  ;;  %v2525_v31 = vadd.f32 %v11958_v62, %v13468_v58  ;;  %v3423_v61 = vsel %vm1158_vm0, %v3224_v26, -inf  ;;  %v3234_v48 = vsel %vm1158_vm0, %v2838_v60, -inf }
 0x2d5   : > { %v13572_v2 = vpack.c.bf16 %v3416_v39, %v3413_v22  ;;  %v13574_v46 = vpack.c.bf16 %v3419_v51, %v3416_v39  ;;  %v3226_v55 = vsel %vm1158_vm0, %v2851_v4, -inf  ;;  %v2849_v54 = vmax.f32 %v2573_v49, 0.0 }
 0x2d6   : > { %v3227_v44 = vmax.f32 %v3225_v34, %v3226_v55  ;;  %v2594_v21 = vadd.f32 %v11958_v62, %v10859_v8  ;;  %v2585_v20 = vpop.f32.mrf.mxu0  ;;  %v3420_v22 = vsel %vm1158_vm0, %v3218_v35, -inf  ;;  %v13589_v34 = vpop.f32.mrf.mxu1  ;;  %v3228_v60 = vsel %vm1158_vm0, %v2836_v12, -inf }
 0x2d7   : > { %16584 = vst [vmem:[#allocation58_spill] sm:$0xff] %v13574_v46  ;;  %v3220_v32 = vsel %vm1158_vm0, %v2849_v54, -inf  ;;  %v2586_v37 = vadd.f32 %v11958_v62, %v2585_v20  ;;  %10954 = vmatmul.mubr.msk.bf16.gmra.mxu1 %vm1158_vm0, %v12572_v59  ;;  %11194 = vmatmul.mubr.msk.bf16.gmra.mxu0 %vm1158_vm0, %v13574_v46  ;;  %16585 = vst [vmem:[#allocation59_spill] sm:$0xff] %v13589_v34  ;;  %v3237_v1 = vsel %vm1158_vm0, %v2839_v30, -inf  ;;  %v2837_v4 = vmax.f32 %v2525_v31, 0.0 }
 0x2d8   : > { %v3424_v58 = vsel %vm1158_vm0, %v3227_v44, -inf  ;;  %v3221_v49 = vmax.f32 %v3219_v29, %v3220_v32  ;;  %v2854_v17 = vmax.f32 %v2594_v21, 0.0  ;;  %v10860_v45 = vpop.f32.mrf.mxu0  ;;  %10957 = vmatprep.mubr.msk.bf16.mxu1 %vm1158_vm0, %v13489_v5  ;;  %v13595_v55 = vpop.f32.mrf.mxu1 }
 0x2d9   : > { %v3425_v7 = vmax.f32 %v3423_v61, %v3424_v58  ;;  %v2852_v26 = vmax.f32 %v2586_v37, 0.0  ;;  %v2597_v39 = vadd.f32 %v11958_v62, %v10860_v45  ;;  %16586 = vst [vmem:[#allocation60_spill] sm:$0xff] %v13595_v55  ;;  %v3231_v58 = vsel %vm1158_vm0, %v2837_v4, -inf }
 0x2da   : > { %v3421_v35 = vsel %vm1158_vm0, %v3221_v49, -inf  ;;  %v3235_v8 = vsel %vm1158_vm0, %v2854_v17, -inf  ;;  %v2588_v29 = vpop.f32.mrf.mxu0 }
 0x2db   : > { %v3422_v54 = vmax.f32 %v3420_v22, %v3421_v35  ;;  %v3236_v44 = vmax.f32 %v3234_v48, %v3235_v8  ;;  %v3229_v21 = vsel %vm1158_vm0, %v2852_v26, -inf  ;;  %v2855_v20 = vmax.f32 %v2597_v39, 0.0  ;;  %v13608_v48 = vpop.f32.mrf.mxu1 }
 0x2dc   : > { %v2589_v32 = vadd.f32 %v11958_v62, %v2588_v29  ;;  %v13598_v12 = vpop.f32.mrf.mxu0  ;;  %v3230_v61 = vmax.f32 %v3228_v60, %v3229_v21  ;;  %16590 = vst [vmem:[#allocation64_spill] sm:$0xff] %v13608_v48 }
 0x2dd   : > { %16587 = vst [vmem:[#allocation61_spill] sm:$0xff] %v13598_v12  ;;  %v3238_v37 = vsel %vm1158_vm0, %v2855_v20, -inf  ;;  %v13601_v30 = vpack.c.bf16 %v3425_v7, %v3422_v54  ;;  %v13603_v31 = vpack.c.bf16 %v3422_v54, %v3419_v51  ;;  %v3429_v22 = vsel %vm1158_vm0, %v3236_v44, -inf  ;;  %v13626_v35 = vpop.f32.mrf.mxu1 }
 0x2de   : > { %v3239_v49 = vmax.f32 %v3237_v1, %v3238_v37  ;;  %v2853_v17 = vmax.f32 %v2589_v32, 0.0  ;;  %v13606_v45 = vpop.f32.mrf.mxu0  ;;  %v3426_v26 = vsel %vm1158_vm0, %v3230_v61, -inf  ;;  %16593 = vst [vmem:[#allocation67_spill] sm:$0xff] %v13626_v35  ;;  %v13640_v32 = vpack.c.bf16 %v12829_v9, %v16577_v28  ;;  %v11913_v61 = vld [vmem:[%s16462_s3 + $0x88] sm:$0xff]  }
 0x2df   : > { %16588 = vst [vmem:[#allocation62_spill] sm:$0xff] %v13601_v30  ;;  %16589 = vst [vmem:[#allocation63_spill] sm:$0xff] %v13606_v45  ;;  %10958 = vmatmul.mubr.msk.bf16.gmra.mxu1 %vm1158_vm0, %v12699_v63  ;;  %11197 = vmatprep.mubr.msk.bf16.mxu0 %vm1158_vm0, %v13601_v30  ;;  %v13645_v37 = vpop.f32.mrf.mxu1 }
 0x2e0   : > { %v3430_v62 = vsel %vm1158_vm0, %v3239_v49, -inf  ;;  %v3232_v51 = vsel %vm1158_vm0, %v2853_v17, -inf  ;;  %10961 = vmatprep.mubr.msk.bf16.mxu1 %vm1158_vm0, %v12728_v16  ;;  %v13619_v60 = vpop.f32.mrf.mxu0  ;;  %16597 = vst [vmem:[#allocation71_spill] sm:$0xff] %v13645_v37  ;;  %11405 = vmatprep.subr.bf16.mxu0 %v11913_v61 }
 0x2e1   : > { %16591 = vst [vmem:[#allocation65_spill] sm:$0xff] %v13619_v60  ;;  %v3233_v39 = vmax.f32 %v3231_v58, %v3232_v51  ;;  %v13622_v1 = vmax.f32 %v3429_v22, %v3430_v62  ;;  %v13655_v58 = vpop.f32.mrf.mxu1  ;;  %v11914_v62 = vld [vmem:[%s16462_s3 + $0x80] sm:$0xff]   ;;  %v16604_v51 = vld [vmem:[#allocation19_spill] sm:$0xff] }
 0x2e2   : > { %v13624_v4 = vpop.f32.mrf.mxu0  ;;  %16599 = vst [vmem:[#allocation73_spill] sm:$0xff] %v13655_v58 }
 0x2e3   : > { %16592 = vst [vmem:[#allocation66_spill] sm:$0xff] %v13624_v4  ;;  %v3427_v8 = vsel %vm1158_vm0, %v3233_v39, -inf  ;;  %v13663_v17 = vpop.f32.mrf.mxu1 }
 0x2e4   : > { %v3428_v29 = vmax.f32 %v3426_v26, %v3427_v8  ;;  %v13629_v54 = vpop.f32.mrf.mxu0  ;;  %16602 = vst [vmem:[#allocation76_spill] sm:$0xff] %v13663_v17  ;;  %v16605_v26 = vld [vmem:[#allocation21_spill] sm:$0xff] }
 0x2e5   : > { %16594 = vst [vmem:[#allocation68_spill] sm:$0xff] %v13629_v54  ;;  %v13678_v8 = vpop.f32.mrf.mxu1 }
 0x2e6   : > { %v13631_v44 = vpack.c.bf16 %v3428_v29, %v3425_v7  ;;  %v13634_v21 = vpack.c.bf16 %v13622_v1, %v3428_v29  ;;  %v13636_v20 = vpop.f32.mrf.mxu0  ;;  %16607 = vst [vmem:[#allocation79_spill] sm:$0xff] %v13678_v8 }
 0x2e7   : > { %16596 = vst [vmem:[#allocation70_spill] sm:$0xff] %v13636_v20  ;;  %10962 = vmatmul.mubr.msk.bf16.gmra.mxu1 %vm1158_vm0, %v12747_v24  ;;  %v13686_v30 = vpop.f32.mrf.mxu1 }
 0x2e8   : > { %16595 = vst [vmem:[#allocation69_spill] sm:$0xff] %v13634_v21  ;;  %11198 = vmatmul.mubr.msk.bf16.gmra.mxu0 %vm1158_vm0, %v13634_v21  ;;  %10965 = vmatprep.mubr.msk.bf16.mxu1 %vm1158_vm0, %v13640_v32  ;;  %v13653_v7 = vpop.f32.mrf.mxu0  ;;  %16610 = vst [vmem:[#allocation82_spill] sm:$0xff] %v13686_v30  ;;  %v14038_v30 = vpack.c.bf16 %v16577_v28, %v13079_v53 }
 0x2e9   : > { %16598 = vst [vmem:[#allocation72_spill] sm:$0xff] %v13653_v7  ;;  %11273 = vmatprep.mubr.msk.bf16.mxu0 %vm1158_vm0, %v13479_v11 }
 0x2ea   : > { %v13659_v9 = vpop.f32.mrf.mxu0  ;;  %16695 = vst [vmem:[#allocation158_spill] sm:$0xff] %v14038_v30 }
 0x2eb   : > { %16600 = vst [vmem:[#allocation74_spill] sm:$0xff] %v13659_v9  ;;  %v13732_v9 = vpack.c.bf16 %v13170_v42, %v16577_v28 }
 0x2ec   : > { %v13661_v49 = vpop.f32.mrf.mxu0 }
 0x2ed   : > { %16601 = vst [vmem:[#allocation75_spill] sm:$0xff] %v13661_v49  ;;  %v16613_v49 = vld [vmem:[#allocation24_spill] sm:$0xff] }
 0x2ee   : > { %v13665_v22 = vpop.f32.mrf.mxu0 }
 0x2ef   : > { %16603 = vst [vmem:[#allocation77_spill] sm:$0xff] %v13665_v22  ;;  %10966 = vmatmul.mubr.msk.bf16.gmra.mxu1 %vm1158_vm0, %v16604_v51  ;;  %v13692_v22 = vpack.c.bf16 %v12997_v47, %v16577_v28 }
 0x2f0   : > { %11274 = vmatmul.mubr.msk.bf16.vlgmr.msra.gmra.mxu0 %vm1158_vm0, %v12527_v50  ;;  %10969 = vmatprep.mubr.msk.bf16.mxu1 %vm1158_vm0, %v16605_v26  ;;  %v13676_v39 = vpop.f32.mrf.mxu0 }
 0x2f1   : > { %16606 = vst [vmem:[#allocation78_spill] sm:$0xff] %v13676_v39  ;;  %11277 = vmatprep.mubr.msk.bf16.mxu0 %vm1158_vm0, %v12553_v38  ;;  %11406 = vmatpush3.bf16.msra.mxu0 %v11913_v61  ;;  %v13694_v39 = vpop.f32.mrf.mxu1 }
 0x2f2   : > { %v13682_v29 = vpop.f32.mrf.mxu0  ;;  %11407 = vmatprep.subr.bf16.mxu0 %v11914_v62  ;;  %16612 = vst [vmem:[#allocation84_spill] sm:$0xff] %v13694_v39 }
 0x2f3   : > { %16608 = vst [vmem:[#allocation80_spill] sm:$0xff] %v13682_v29  ;;  %v13708_v47 = vpop.f32.mrf.mxu1 }
 0x2f4   : > { %v13684_v21 = vpop.f32.mrf.mxu0  ;;  %16616 = vst [vmem:[#allocation87_spill] sm:$0xff] %v13708_v47 }
 0x2f5   : > { %16609 = vst [vmem:[#allocation81_spill] sm:$0xff] %v13684_v21  ;;  %11408 = vmatpush3.bf16.msra.mxu0 %v11914_v62  ;;  %v13712_v21 = vpop.f32.mrf.mxu1 }
 0x2f6   : > { %v13688_v46 = vpop.f32.mrf.mxu0  ;;  %16618 = vst [vmem:[#allocation89_spill] sm:$0xff] %v13712_v21 }
 0x2f7   : > { %16611 = vst [vmem:[#allocation83_spill] sm:$0xff] %v13688_v46  ;;  %10970 = vmatmul.mubr.msk.bf16.gmra.mxu1 %vm1158_vm0, %v16613_v49 }
 0x2f8   : > { %11278 = vmatmul.mubr.msk.bf16.gmra.mxu0 %vm1158_vm0, %v12572_v59  ;;  %10973 = vmatprep.mubr.msk.bf16.mxu1 %vm1158_vm0, %v13692_v22  ;;  %v13702_v61 = vpop.f32.mrf.mxu0 }
 0x2f9   : > { %16614 = vst [vmem:[#allocation85_spill] sm:$0xff] %v13702_v61  ;;  %11281 = vmatprep.mubr.msk.bf16.mxu0 %vm1158_vm0, %v13489_v5 }
 0x2fa   : > { %v13706_v62 = vpop.f32.mrf.mxu0 }
 0x2fb   : > { %16615 = vst [vmem:[#allocation86_spill] sm:$0xff] %v13706_v62  ;;  %v13724_v62 = vpop.f32.mrf.mxu1 }
 0x2fc   : > { %v13710_v46 = vpop.f32.mrf.mxu0  ;;  %16620 = vst [vmem:[#allocation91_spill] sm:$0xff] %v13724_v62 }
 0x2fd   : > { %16617 = vst [vmem:[#allocation88_spill] sm:$0xff] %v13710_v46  ;;  %v13726_v29 = vpop.f32.mrf.mxu1 }
 0x2fe   : > { %v13722_v61 = vpop.f32.mrf.mxu0  ;;  %16621 = vst [vmem:[#allocation92_spill] sm:$0xff] %v13726_v29 }
 0x2ff   : > { %10974 = vmatmul.mubr.msk.bf16.gmra.mxu1 %vm1158_vm0, %v13038_v3  ;;  %16619 = vst [vmem:[#allocation90_spill] sm:$0xff] %v13722_v61  ;;  %v13740_v61 = vpop.f32.mrf.mxu1 }
 0x300   : > { %11282 = vmatmul.mubr.msk.bf16.gmra.mxu0 %vm1158_vm0, %v12699_v63  ;;  %10977 = vmatprep.mubr.msk.bf16.mxu1 %vm1158_vm0, %v13064_v25  ;;  %v13728_v46 = vpop.f32.mrf.mxu0  ;;  %16623 = vst [vmem:[#allocation94_spill] sm:$0xff] %v13740_v61 }
 0x301   : > { %11285 = vmatprep.mubr.msk.bf16.mxu0 %vm1158_vm0, %v12728_v16  ;;  %16622 = vst [vmem:[#allocation93_spill] sm:$0xff] %v13728_v46  ;;  %v13746_v46 = vpop.f32.mrf.mxu1 }
 0x302   : > { %v13744_v7 = vpop.f32.mrf.mxu0  ;;  %16625 = vst [vmem:[#allocation96_spill] sm:$0xff] %v13746_v46 }
 0x303   : > { %16624 = vst [vmem:[#allocation95_spill] sm:$0xff] %v13744_v7  ;;  %v13756_v20 = vpop.f32.mrf.mxu1 }
 0x304   : > { %v13748_v42 = vpop.f32.mrf.mxu0  ;;  %16627 = vst [vmem:[#allocation98_spill] sm:$0xff] %v13756_v20 }
 0x305   : > { %16626 = vst [vmem:[#allocation97_spill] sm:$0xff] %v13748_v42  ;;  %v13762_v7 = vpop.f32.mrf.mxu1  ;;  %v13768_v42 = vpack.c.bf16 %v13324_v14, %v16577_v28 }
 0x306   : > { %v13760_v54 = vpop.f32.mrf.mxu0  ;;  %16629 = vst [vmem:[#allocation100_spill] sm:$0xff] %v13762_v7 }
 0x307   : > { %10978 = vmatmul.mubr.msk.bf16.gmra.mxu1 %vm1158_vm0, %v13083_v13  ;;  %16628 = vst [vmem:[#allocation99_spill] sm:$0xff] %v13760_v54  ;;  %v13770_v60 = vpop.f32.mrf.mxu1 }
 0x308   : > { %11286 = vmatmul.mubr.msk.bf16.gmra.mxu0 %vm1158_vm0, %v12747_v24  ;;  %10981 = vmatprep.mubr.msk.bf16.mxu1 %vm1158_vm0, %v13732_v9  ;;  %v13764_v4 = vpop.f32.mrf.mxu0  ;;  %16631 = vst [vmem:[#allocation102_spill] sm:$0xff] %v13770_v60 }
 0x309   : > { %11289 = vmatprep.mubr.msk.bf16.mxu0 %vm1158_vm0, %v13640_v32  ;;  %16630 = vst [vmem:[#allocation101_spill] sm:$0xff] %v13764_v4  ;;  %v13782_v4 = vpop.f32.mrf.mxu1 }
 0x30a   : > { %v13780_v54 = vpop.f32.mrf.mxu0  ;;  %16633 = vst [vmem:[#allocation104_spill] sm:$0xff] %v13782_v4 }
 0x30b   : > { %16632 = vst [vmem:[#allocation103_spill] sm:$0xff] %v13780_v54  ;;  %v13786_v45 = vpop.f32.mrf.mxu1 }
 0x30c   : > { %v13784_v14 = vpop.f32.mrf.mxu0  ;;  %16635 = vst [vmem:[#allocation106_spill] sm:$0xff] %v13786_v45 }
 0x30d   : > { %16634 = vst [vmem:[#allocation105_spill] sm:$0xff] %v13784_v14  ;;  %v13794_v12 = vpop.f32.mrf.mxu1 }
 0x30e   : > { %16636 = vst [vmem:[#allocation107_spill] sm:$0xff] %v13794_v12  ;;  %v13798_v54 = vpop.f32.mrf.mxu0 }
 0x30f   : > { %10982 = vmatmul.mubr.msk.bf16.gmra.mxu1 %vm1158_vm0, %v13213_v40  ;;  %16637 = vst [vmem:[#allocation108_spill] sm:$0xff] %v13798_v54  ;;  %v13800_v4 = vpop.f32.mrf.mxu1 }
 0x310   : > { %11290 = vmatmul.mubr.msk.bf16.gmra.mxu0 %vm1158_vm0, %v16604_v51  ;;  %10985 = vmatprep.mubr.msk.bf16.mxu1 %vm1158_vm0, %v13239_v0  ;;  %16638 = vst [vmem:[#allocation109_spill] sm:$0xff] %v13800_v4  ;;  %v13802_v14 = vpop.f32.mrf.mxu0 }
 0x311   : > { %11293 = vmatprep.mubr.msk.bf16.mxu0 %vm1158_vm0, %v16605_v26  ;;  %16639 = vst [vmem:[#allocation110_spill] sm:$0xff] %v13802_v14  ;;  %v13809_v45 = vpop.f32.mrf.mxu1  ;;  %v11915_v14 = vld [vmem:[%s16462_s3 + $0x30] sm:$0xff]  }
 0x312   : > { %16640 = vst [vmem:[#allocation111_spill] sm:$0xff] %v13809_v45  ;;  %v13813_v12 = vpop.f32.mrf.mxu0 }
 0x313   : > { %16641 = vst [vmem:[#allocation112_spill] sm:$0xff] %v13813_v12  ;;  %v13815_v54 = vpop.f32.mrf.mxu1 }
 0x314   : > { %16642 = vst [vmem:[#allocation113_spill] sm:$0xff] %v13815_v54  ;;  %v13817_v4 = vpop.f32.mrf.mxu0 }
 0x315   : > { %16643 = vst [vmem:[#allocation114_spill] sm:$0xff] %v13817_v4  ;;  %v13822_v60 = vpop.f32.mrf.mxu1 }
 0x316   : > { %16644 = vst [vmem:[#allocation115_spill] sm:$0xff] %v13822_v60  ;;  %v13831_v12 = vpop.f32.mrf.mxu0  ;;  %v13840_v60 = vld [vmem:[%s16462_s3 + $0x58] sm:$0xff]  }
 0x317   : > { %10986 = vmatmul.mubr.msk.bf16.gmra.mxu1 %vm1158_vm0, %v13258_v36  ;;  %16645 = vst [vmem:[#allocation116_spill] sm:$0xff] %v13831_v12  ;;  %v13833_v4 = vpop.f32.mrf.mxu1 }
 0x318   : > { %11294 = vmatmul.mubr.msk.bf16.gmra.mxu0 %vm1158_vm0, %v16613_v49  ;;  %10989 = vmatprep.mubr.msk.bf16.mxu1 %vm1158_vm0, %v13768_v42  ;;  %16646 = vst [vmem:[#allocation117_spill] sm:$0xff] %v13833_v4  ;;  %v13835_v54 = vpop.f32.mrf.mxu0  ;;  %v13880_v4 = vpack.c.bf16 %v13531_v10, %v16577_v28 }
 0x319   : > { %11297 = vmatprep.mubr.msk.bf16.mxu0 %vm1158_vm0, %v13692_v22  ;;  %16647 = vst [vmem:[#allocation118_spill] sm:$0xff] %v13835_v54  ;;  %v13842_v45 = vpop.f32.mrf.mxu1 }
 0x31a   : > { %16648 = vst [vmem:[#allocation119_spill] sm:$0xff] %v13842_v45  ;;  %16658 = vst [vmem:[#allocation127_spill] sm:$0xff] %v13880_v4 }
 0x31f   : > { %10990 = vmatmul.mubr.msk.bf16.gmra.mxu1 %vm1158_vm0, %v13367_v6 }
 0x320   : > { %11298 = vmatmul.mubr.msk.bf16.gmra.mxu0 %vm1158_vm0, %v13038_v3  ;;  %10993 = vmatprep.mubr.msk.bf16.mxu1 %vm1158_vm0, %v13395_v41 }
 0x321   : > { %11301 = vmatprep.mubr.msk.bf16.mxu0 %vm1158_vm0, %v13064_v25 }
 0x327   : > { %10994 = vmatmul.mubr.msk.bf16.gmra.mxu1 %vm1158_vm0, %v13416_v56 }
 0x328   : > { %11302 = vmatmul.mubr.msk.bf16.gmra.mxu0 %vm1158_vm0, %v13083_v13  ;;  %11001 = vmatprep.mubr.bf16.mxu1 %v16569_v23 }
 0x329   : > { %11305 = vmatprep.mubr.msk.bf16.mxu0 %vm1158_vm0, %v13732_v9 }
 0x32f   : > { %11002 = vmatmul.mubr.bf16.vlgmr.msra.gmra.mxu1 %v16569_v23 }
 0x330   : > { %11306 = vmatmul.mubr.msk.bf16.gmra.mxu0 %vm1158_vm0, %v13213_v40  ;;  %11005 = vmatprep.mubr.bf16.mxu1 %v16569_v23 }
 0x331   : > { %11309 = vmatprep.mubr.msk.bf16.mxu0 %vm1158_vm0, %v13239_v0  ;;  %11066 = vmatpush3.bf16.msra.mxu1 %v13447_v33  ;;  %v13852_v33 = vpop.f32.mrf.mxu0 }
 0x332   : > { %11067 = vmatprep.subr.bf16.mxu1 %v11915_v14  ;;  %16649 = vst [vmem:[#allocation120_spill] sm:$0xff] %v13852_v33 }
 0x333   : > { %v13858_v12 = vpop.f32.mrf.mxu0 }
 0x334   : > { %16652 = vst [vmem:[#allocation123_spill] sm:$0xff] %v13858_v12 }
 0x335   : > { %11068 = vmatpush3.bf16.msra.mxu1 %v11915_v14  ;;  %v13854_v14 = vpop.f32.mrf.mxu1  ;;  %v13870_v33 = vpop.f32.mrf.mxu0 }
 0x336   : > { %11201 = vmatprep.subr.bf16.mxu1 %v13840_v60  ;;  %16650 = vst [vmem:[#allocation121_spill] sm:$0xff] %v13854_v14  ;;  %16654 = vst [vmem:[#allocation125_spill] sm:$0xff] %v13870_v33  ;;  %v16655_v14 = vld [vmem:[#allocation6_spill] sm:$0xff] }
 0x337   : > { %11006 = vmatmul.mubr.bf16.gmra.mxu1 %v16569_v23  ;;  %v13856_v54 = vpop.f32.mrf.mxu1  ;;  %v13882_v7 = vpop.f32.mrf.mxu0 }
 0x338   : > { %11310 = vmatmul.mubr.msk.bf16.gmra.mxu0 %vm1158_vm0, %v13258_v36  ;;  %11009 = vmatprep.mubr.msk.bf16.mxu1 %vm1158_vm0, %v12363_v19  ;;  %16651 = vst [vmem:[#allocation122_spill] sm:$0xff] %v13856_v54  ;;  %v13874_v54 = vpack.c.bf16 %v16577_v28, %v16655_v14  ;;  %16659 = vst [vmem:[#allocation128_spill] sm:$0xff] %v13882_v7 }
 0x339   : > { %11313 = vmatprep.mubr.msk.bf16.mxu0 %vm1158_vm0, %v13768_v42  ;;  %v13866_v45 = vpop.f32.mrf.mxu1  ;;  %v13894_v14 = vpop.f32.mrf.mxu0 }
 0x33a   : > { %16653 = vst [vmem:[#allocation124_spill] sm:$0xff] %v13866_v45  ;;  %16656 = vst [vmem:[#allocation6_spill] sm:$0xff] %v13874_v54 }
 0x33b   : > { %v13876_v12 = vpop.f32.mrf.mxu1  ;;  %16661 = vst [vmem:[#allocation130_spill] sm:$0xff] %v13894_v14 }
 0x33c   : > { %16657 = vst [vmem:[#allocation126_spill] sm:$0xff] %v13876_v12  ;;  %v13898_v12 = vpop.f32.mrf.mxu0 }
 0x33d   : > { %v13890_v33 = vpop.f32.mrf.mxu1  ;;  %16663 = vst [vmem:[#allocation132_spill] sm:$0xff] %v13898_v12 }
 0x33e   : > { %16660 = vst [vmem:[#allocation129_spill] sm:$0xff] %v13890_v33  ;;  %v13910_v33 = vpop.f32.mrf.mxu0 }
 0x33f   : > { %11010 = vmatmul.mubr.msk.bf16.gmra.mxu1 %vm1158_vm0, %v12387_v57  ;;  %v13896_v10 = vpop.f32.mrf.mxu1  ;;  %16665 = vst [vmem:[#allocation134_spill] sm:$0xff] %v13910_v33 }
 0x340   : > { %11314 = vmatmul.mubr.msk.bf16.gmra.mxu0 %vm1158_vm0, %v13367_v6  ;;  %11013 = vmatprep.mubr.msk.bf16.mxu1 %vm1158_vm0, %v12406_v15  ;;  %16662 = vst [vmem:[#allocation131_spill] sm:$0xff] %v13896_v10  ;;  %v16667_v10 = vld [vmem:[#allocation10_spill] sm:$0xff] }
 0x341   : > { %11317 = vmatprep.mubr.msk.bf16.mxu0 %vm1158_vm0, %v13395_v41  ;;  %v13900_v7 = vpop.f32.mrf.mxu1  ;;  %v13916_v12 = vpack.c.bf16 %v16577_v28, %v16667_v10 }
 0x342   : > { %16664 = vst [vmem:[#allocation133_spill] sm:$0xff] %v13900_v7  ;;  %v13918_v7 = vpop.f32.mrf.mxu0 }
 0x343   : > { %v13912_v14 = vpop.f32.mrf.mxu1  ;;  %16668 = vst [vmem:[#allocation10_spill] sm:$0xff] %v13916_v12  ;;  %16669 = vst [vmem:[#allocation136_spill] sm:$0xff] %v13918_v7 }
 0x344   : > { %16666 = vst [vmem:[#allocation135_spill] sm:$0xff] %v13912_v14  ;;  %v13931_v14 = vpop.f32.mrf.mxu0 }
 0x345   : > { %v13920_v45 = vpop.f32.mrf.mxu1  ;;  %16672 = vst [vmem:[#allocation139_spill] sm:$0xff] %v13931_v14 }
 0x346   : > { %16670 = vst [vmem:[#allocation137_spill] sm:$0xff] %v13920_v45  ;;  %v13935_v7 = vpop.f32.mrf.mxu0 }
 0x347   : > { %11014 = vmatmul.mubr.msk.bf16.gmra.mxu1 %vm1158_vm0, %v13874_v54  ;;  %16674 = vst [vmem:[#allocation141_spill] sm:$0xff] %v13935_v7  ;;  %v16677_v54 = vld [vmem:[#allocation16_spill] sm:$0xff] }
 0x348   : > { %11318 = vmatmul.mubr.msk.bf16.gmra.mxu0 %vm1158_vm0, %v13416_v56  ;;  %11017 = vmatprep.mubr.msk.bf16.mxu1 %vm1158_vm0, %v12527_v50  ;;  %v13949_v14 = vpack.c.bf16 %v16577_v28, %v16677_v54 }
 0x349   : > { %11321 = vmatprep.mubr.msk.bf16.mxu0 %vm1158_vm0, %v13880_v4 }
 0x34a   : > { %16678 = vst [vmem:[#allocation16_spill] sm:$0xff] %v13949_v14 }
 0x34f   : > { %11018 = vmatmul.mubr.msk.bf16.gmra.mxu1 %vm1158_vm0, %v12553_v38 }
 0x350   : > { %11322 = vmatmul.mubr.msk.bf16.gmra.mxu0 %vm1158_vm0, %v13572_v2  ;;  %11021 = vmatprep.mubr.msk.bf16.mxu1 %vm1158_vm0, %v12572_v59 }
 0x351   : > { %11325 = vmatprep.mubr.msk.bf16.mxu0 %vm1158_vm0, %v13603_v31 }
 0x357   : > { %11022 = vmatmul.mubr.msk.bf16.gmra.mxu1 %vm1158_vm0, %v13916_v12 }
 0x358   : > { %11326 = vmatmul.mubr.msk.bf16.gmra.mxu0 %vm1158_vm0, %v13631_v44  ;;  %11025 = vmatprep.mubr.msk.bf16.mxu1 %vm1158_vm0, %v12699_v63  ;;  %v13928_v33 = vpop.f32.mrf.mxu1 }
 0x359   : > { %16671 = vst [vmem:[#allocation138_spill] sm:$0xff] %v13928_v33  ;;  %11329 = vmatprep.mubr.bf16.mxu0 %v16569_v23  ;;  %v13945_v33 = vpop.f32.mrf.mxu0 }
 0x35a   : > { %v13933_v10 = vpop.f32.mrf.mxu1  ;;  %16676 = vst [vmem:[#allocation143_spill] sm:$0xff] %v13945_v33 }
 0x35b   : > { %16673 = vst [vmem:[#allocation140_spill] sm:$0xff] %v13933_v10  ;;  %v13953_v7 = vpop.f32.mrf.mxu0 }
 0x35c   : > { %v13942_v45 = vpop.f32.mrf.mxu1  ;;  %16680 = vst [vmem:[#allocation145_spill] sm:$0xff] %v13953_v7 }
 0x35d   : > { %16675 = vst [vmem:[#allocation142_spill] sm:$0xff] %v13942_v45  ;;  %v13966_v54 = vpop.f32.mrf.mxu0 }
 0x35e   : > { %v13951_v10 = vpop.f32.mrf.mxu1  ;;  %16683 = vst [vmem:[#allocation148_spill] sm:$0xff] %v13966_v54 }
 0x35f   : > { %11026 = vmatmul.mubr.msk.bf16.gmra.mxu1 %vm1158_vm0, %v12728_v16  ;;  %16679 = vst [vmem:[#allocation144_spill] sm:$0xff] %v13951_v10 }
 0x360   : > { %11330 = vmatmul.mubr.bf16.gmra.mxu0 %v16569_v23  ;;  %11029 = vmatprep.mubr.msk.bf16.mxu1 %vm1158_vm0, %v12747_v24 }
 0x361   : > { %11333 = vmatprep.mubr.bf16.mxu0 %v16569_v23 }
 0x367   : > { %v13955_v20 = vpop.f32.mrf.mxu1  ;;  %11030 = vmatmul.mubr.msk.bf16.gmra.mxu1 %vm1158_vm0, %v13949_v14 }
 0x368   : > { %16681 = vst [vmem:[#allocation146_spill] sm:$0xff] %v13955_v20  ;;  %11334 = vmatmul.mubr.bf16.gmra.mxu0 %v16569_v23  ;;  %11033 = vmatprep.mubr.msk.bf16.mxu1 %vm1158_vm0, %v16604_v51  ;;  %v13972_v20 = vpop.f32.mrf.mxu0 }
 0x369   : > { %11409 = vmatprep.mubr.msk.bf16.mxu0 %vm1158_vm0, %v12527_v50  ;;  %v13964_v33 = vpop.f32.mrf.mxu1  ;;  %16686 = vst [vmem:[#allocation151_spill] sm:$0xff] %v13972_v20  ;;  %v16688_v20 = vld [vmem:[#allocation23_spill] sm:$0xff] }
 0x36a   : > { %16682 = vst [vmem:[#allocation147_spill] sm:$0xff] %v13964_v33  ;;  %v13992_v33 = vpack.c.bf16 %v16577_v28, %v16688_v20 }
 0x36b   : > { %v13968_v10 = vpop.f32.mrf.mxu1 }
 0x36c   : > { %16684 = vst [vmem:[#allocation149_spill] sm:$0xff] %v13968_v10  ;;  %v13986_v10 = vpop.f32.mrf.mxu0  ;;  %16689 = vst [vmem:[#allocation23_spill] sm:$0xff] %v13992_v33 }
 0x36d   : > { %v13970_v7 = vpop.f32.mrf.mxu1  ;;  %16687 = vst [vmem:[#allocation152_spill] sm:$0xff] %v13986_v10 }
 0x36e   : > { %16685 = vst [vmem:[#allocation150_spill] sm:$0xff] %v13970_v7  ;;  %v13996_v61 = vpop.f32.mrf.mxu0 }
 0x36f   : > { %v13974_v45 = vpop.f32.mrf.mxu1  ;;  %11034 = vmatmul.mubr.msk.bf16.gmra.mxu1 %vm1158_vm0, %v16605_v26  ;;  %16690 = vst [vmem:[#allocation153_spill] sm:$0xff] %v13996_v61 }
 0x370   : > { %11410 = vmatmul.mubr.msk.bf16.vlgmr.msra.gmra.mxu0 %vm1158_vm0, %v12553_v38  ;;  %11037 = vmatprep.mubr.msk.bf16.mxu1 %vm1158_vm0, %v16613_v49  ;;  %v14010_v10 = vpop.f32.mrf.mxu0 }
 0x371   : > { %11413 = vmatprep.mubr.msk.bf16.mxu0 %vm1158_vm0, %v12572_v59  ;;  %v13984_v54 = vpop.f32.mrf.mxu1  ;;  %16691 = vst [vmem:[#allocation154_spill] sm:$0xff] %v14010_v10 }
 0x372   : > { %v14014_v61 = vpop.f32.mrf.mxu0 }
 0x373   : > { %v13988_v7 = vpop.f32.mrf.mxu1  ;;  %16692 = vst [vmem:[#allocation155_spill] sm:$0xff] %v14014_v61 }
 0x375   : > { %v13994_v46 = vpop.f32.mrf.mxu1 }
 0x377   : > { %v13998_v29 = vpop.f32.mrf.mxu1  ;;  %11038 = vmatmul.mubr.msk.bf16.gmra.mxu1 %vm1158_vm0, %v13992_v33 }
 0x378   : > { %11414 = vmatmul.mubr.msk.bf16.gmra.mxu0 %vm1158_vm0, %v13916_v12  ;;  %11041 = vmatprep.mubr.msk.bf16.mxu1 %vm1158_vm0, %v13038_v3  ;;  %v14022_v12 = vpop.f32.mrf.mxu0 }
 0x379   : > { %11417 = vmatprep.mubr.msk.bf16.mxu0 %vm1158_vm0, %v12699_v63  ;;  %v14008_v20 = vpop.f32.mrf.mxu1  ;;  %16693 = vst [vmem:[#allocation156_spill] sm:$0xff] %v14022_v12 }
 0x37a   : > { %v14034_v39 = vpop.f32.mrf.mxu0 }
 0x37b   : > { %v14012_v62 = vpop.f32.mrf.mxu1  ;;  %16694 = vst [vmem:[#allocation157_spill] sm:$0xff] %v14034_v39 }
 0x37c   : > { %v14046_v17 = vpop.f32.mrf.mxu0 }
 0x37d   : > { %v14016_v21 = vpop.f32.mrf.mxu1  ;;  %16696 = vst [vmem:[#allocation159_spill] sm:$0xff] %v14046_v17 }
 0x37e   : > { %v14056_v39 = vpop.f32.mrf.mxu0 }
 0x37f   : > { %v14018_v47 = vpop.f32.mrf.mxu1  ;;  %11042 = vmatmul.mubr.msk.bf16.gmra.mxu1 %vm1158_vm0, %v13064_v25  ;;  %16697 = vst [vmem:[#allocation160_spill] sm:$0xff] %v14056_v39 }
 0x380   : > { %11418 = vmatmul.mubr.msk.bf16.gmra.mxu0 %vm1158_vm0, %v12728_v16  ;;  %11045 = vmatprep.mubr.msk.bf16.mxu1 %vm1158_vm0, %v13083_v13  ;;  %v14062_v35 = vpop.f32.mrf.mxu0 }
 0x381   : > { %11421 = vmatprep.mubr.msk.bf16.mxu0 %vm1158_vm0, %v12747_v24  ;;  %v14030_v10 = vpop.f32.mrf.mxu1  ;;  %16698 = vst [vmem:[#allocation161_spill] sm:$0xff] %v14062_v35  ;;  %v14082_v35 = vpack.c.bf16 %v16577_v28, %v13254_v18 }
 0x383   : > { %v14032_v61 = vpop.f32.mrf.mxu1  ;;  %16701 = vst [vmem:[#allocation164_spill] sm:$0xff] %v14082_v35 }
 0x385   : > { %v14040_v12 = vpop.f32.mrf.mxu1 }
 0x387   : > { %v14042_v8 = vpop.f32.mrf.mxu1  ;;  %11046 = vmatmul.mubr.msk.bf16.gmra.mxu1 %vm1158_vm0, %v14038_v30 }
 0x388   : > { %11422 = vmatmul.mubr.msk.bf16.gmra.mxu0 %vm1158_vm0, %v13949_v14  ;;  %11049 = vmatprep.mubr.msk.bf16.mxu1 %vm1158_vm0, %v13213_v40  ;;  %v14076_v14 = vpop.f32.mrf.mxu0 }
 0x389   : > { %11425 = vmatprep.mubr.msk.bf16.mxu0 %vm1158_vm0, %v16604_v51  ;;  %v14054_v53 = vpop.f32.mrf.mxu1  ;;  %16699 = vst [vmem:[#allocation162_spill] sm:$0xff] %v14076_v14 }
 0x38a   : > { %v14086_v55 = vpop.f32.mrf.mxu0 }
 0x38b   : > { %v14058_v58 = vpop.f32.mrf.mxu1  ;;  %16703 = vst [vmem:[#allocation166_spill] sm:$0xff] %v14086_v55 }
 0x38d   : > { %v14060_v37 = vpop.f32.mrf.mxu1 }
 0x38f   : > { %v14064_v17 = vpop.f32.mrf.mxu1  ;;  %11050 = vmatmul.mubr.msk.bf16.gmra.mxu1 %vm1158_vm0, %v13239_v0 }
 0x390   : > { %11426 = vmatmul.mubr.msk.bf16.gmra.mxu0 %vm1158_vm0, %v16605_v26  ;;  %11053 = vmatprep.mubr.msk.bf16.mxu1 %vm1158_vm0, %v13258_v36 }
 0x391   : > { %11429 = vmatprep.mubr.msk.bf16.mxu0 %vm1158_vm0, %v16613_v49  ;;  %v14074_v39 = vpop.f32.mrf.mxu1 }
 0x393   : > { %v14078_v4 = vpop.f32.mrf.mxu1 }
 0x394   : > { %16700 = vst [vmem:[#allocation163_spill] sm:$0xff] %v14078_v4 }
 0x395   : > { %v14084_v48 = vpop.f32.mrf.mxu1 }
 0x396   : > { %16702 = vst [vmem:[#allocation165_spill] sm:$0xff] %v14084_v48 }
 0x397   : > { %v14088_v34 = vpop.f32.mrf.mxu1  ;;  %11054 = vmatmul.mubr.msk.bf16.gmra.mxu1 %vm1158_vm0, %v14082_v35  ;;  %v14096_v14 = vpop.f32.mrf.mxu0 }
 0x398   : > { %16704 = vst [vmem:[#allocation167_spill] sm:$0xff] %v14088_v34  ;;  %11430 = vmatmul.mubr.msk.bf16.gmra.mxu0 %vm1158_vm0, %v13992_v33  ;;  %11057 = vmatprep.mubr.msk.bf16.mxu1 %vm1158_vm0, %v13367_v6  ;;  %16705 = vst [vmem:[#allocation168_spill] sm:$0xff] %v14096_v14 }
 0x399   : > { %11433 = vmatprep.mubr.msk.bf16.mxu0 %vm1158_vm0, %v13038_v3  ;;  %v14100_v18 = vpop.f32.mrf.mxu1  ;;  %v14104_v55 = vpop.f32.mrf.mxu0 }
 0x39a   : > { %16706 = vst [vmem:[#allocation169_spill] sm:$0xff] %v14100_v18  ;;  %16708 = vst [vmem:[#allocation171_spill] sm:$0xff] %v14104_v55 }
 0x39b   : > { %v14102_v48 = vpop.f32.mrf.mxu1  ;;  %v14116_v14 = vpop.f32.mrf.mxu0 }
 0x39c   : > { %16707 = vst [vmem:[#allocation170_spill] sm:$0xff] %v14102_v48  ;;  %16711 = vst [vmem:[#allocation174_spill] sm:$0xff] %v14116_v14 }
 0x39d   : > { %v14106_v34 = vpop.f32.mrf.mxu1 }
 0x39e   : > { %16709 = vst [vmem:[#allocation172_spill] sm:$0xff] %v14106_v34  ;;  %v14124_v34 = vpop.f32.mrf.mxu0 }
 0x39f   : > { %v14108_v4 = vpop.f32.mrf.mxu1  ;;  %11058 = vmatmul.mubr.msk.bf16.gmra.mxu1 %vm1158_vm0, %v13395_v41  ;;  %16714 = vst [vmem:[#allocation177_spill] sm:$0xff] %v14124_v34 }
 0x3a0   : > { %16710 = vst [vmem:[#allocation173_spill] sm:$0xff] %v14108_v4  ;;  %11434 = vmatmul.mubr.msk.bf16.gmra.mxu0 %vm1158_vm0, %v13064_v25  ;;  %11061 = vmatprep.mubr.msk.bf16.mxu1 %vm1158_vm0, %v13416_v56  ;;  %v14128_v4 = vpack.c.bf16 %v16577_v28, %v13412_v52 }
 0x3a1   : > { %11437 = vmatprep.mubr.msk.bf16.mxu0 %vm1158_vm0, %v13083_v13  ;;  %v14120_v33 = vpop.f32.mrf.mxu1 }
 0x3a2   : > { %16712 = vst [vmem:[#allocation175_spill] sm:$0xff] %v14120_v33  ;;  %16715 = vst [vmem:[#allocation178_spill] sm:$0xff] %v14128_v4  ;;  %v16719_v33 = vld [vmem:[#allocation49_spill] sm:$0xff] }
 0x3a3   : > { %v14122_v55 = vpop.f32.mrf.mxu1 }
 0x3a4   : > { %16713 = vst [vmem:[#allocation176_spill] sm:$0xff] %v14122_v55 }
 0x3a5   : > { %v14130_v48 = vpop.f32.mrf.mxu1 }
 0x3a6   : > { %16716 = vst [vmem:[#allocation179_spill] sm:$0xff] %v14130_v48 }
 0x3a7   : > { %v14132_v18 = vpop.f32.mrf.mxu1  ;;  %11062 = vmatmul.mubr.msk.bf16.gmra.mxu1 %vm1158_vm0, %v14128_v4 }
 0x3a8   : > { %16717 = vst [vmem:[#allocation180_spill] sm:$0xff] %v14132_v18  ;;  %v14136_v14 = vpop.f32.mrf.mxu0  ;;  %11438 = vmatmul.mubr.msk.bf16.gmra.mxu0 %vm1158_vm0, %v14038_v30  ;;  %11069 = vmatprep.mubr.msk.bf16.mxu1 %vm1158_vm0, %v16719_v33  ;;  %v11917_v30 = vld [vmem:[%s16462_s3 + $0x50] sm:$0xff]  }
 0x3a9   : > { %16718 = vst [vmem:[#allocation181_spill] sm:$0xff] %v14136_v14  ;;  %11441 = vmatprep.mubr.msk.bf16.mxu0 %vm1158_vm0, %v13213_v40  ;;  %v14144_v52 = vpop.f32.mrf.mxu1 }
 0x3aa   : > { %16720 = vst [vmem:[#allocation49_spill] sm:$0xff] %v14144_v52  ;;  %v14146_v34 = vpop.f32.mrf.mxu0 }
 0x3ab   : > { %16721 = vst [vmem:[#allocation182_spill] sm:$0xff] %v14146_v34  ;;  %v14148_v48 = vpop.f32.mrf.mxu1 }
 0x3ac   : > { %v14150_v18 = vpop.f32.mrf.mxu0 }
 0x3ad   : > { %16722 = vst [vmem:[#allocation183_spill] sm:$0xff] %v14150_v18  ;;  %v14152_v55 = vpop.f32.mrf.mxu1 }
 0x3ae   : > { %16723 = vst [vmem:[#allocation184_spill] sm:$0xff] %v14152_v55  ;;  %v14154_v14 = vpop.f32.mrf.mxu0 }
 0x3af   : > { %16724 = vst [vmem:[#allocation185_spill] sm:$0xff] %v14154_v14  ;;  %v14159_v33 = vpop.f32.mrf.mxu1  ;;  %11070 = vmatmul.mubr.msk.bf16.vlgmr.msra.gmra.mxu1 %vm1158_vm0, %v12363_v19 }
 0x3b0   : > { %16725 = vst [vmem:[#allocation186_spill] sm:$0xff] %v14159_v33  ;;  %v14163_v52 = vpop.f32.mrf.mxu0  ;;  %11442 = vmatmul.mubr.msk.bf16.gmra.mxu0 %vm1158_vm0, %v13239_v0  ;;  %11073 = vmatprep.mubr.msk.bf16.mxu1 %vm1158_vm0, %v12387_v57  ;;  %v14185_v57 = vld [vmem:[%s16462_s3 + $0x78] sm:$0xff]  }
 0x3b1   : > { %16726 = vst [vmem:[#allocation187_spill] sm:$0xff] %v14163_v52  ;;  %11445 = vmatprep.mubr.msk.bf16.mxu0 %vm1158_vm0, %v13258_v36  ;;  %v14171_v14 = vpop.f32.mrf.mxu1  ;;  %11202 = vmatpush3.bf16.msra.mxu1 %v13840_v60 }
 0x3b2   : > { %v14174_v18 = vpop.f32.mrf.mxu0  ;;  %11203 = vmatprep.subr.bf16.mxu1 %v11917_v30 }
 0x3b3   : > { %16727 = vst [vmem:[#allocation188_spill] sm:$0xff] %v14174_v18  ;;  %v14176_v34 = vpop.f32.mrf.mxu1 }
 0x3b4   : > { %v14178_v33 = vpop.f32.mrf.mxu0 }
 0x3b5   : > { %16728 = vst [vmem:[#allocation189_spill] sm:$0xff] %v14178_v33  ;;  %v14180_v52 = vpop.f32.mrf.mxu1  ;;  %11204 = vmatpush3.bf16.msra.mxu1 %v11917_v30 }
 0x3b6   : > { %v14191_v60 = vpop.f32.mrf.mxu0  ;;  %11337 = vmatprep.subr.bf16.mxu1 %v14185_v57 }
 0x3b7   : > { %v14187_v55 = vpop.f32.mrf.mxu1  ;;  %11074 = vmatmul.mubr.msk.bf16.gmra.mxu1 %vm1158_vm0, %v12406_v15  ;;  %16730 = vst [vmem:[#allocation191_spill] sm:$0xff] %v14191_v60 }
 0x3b8   : > { %16729 = vst [vmem:[#allocation190_spill] sm:$0xff] %v14187_v55  ;;  %11446 = vmatmul.mubr.msk.bf16.gmra.mxu0 %vm1158_vm0, %v14082_v35  ;;  %11077 = vmatprep.mubr.msk.bf16.mxu1 %vm1158_vm0, %v13479_v11  ;;  %v14204_v18 = vpop.f32.mrf.mxu0 }
 0x3b9   : > { %11449 = vmatprep.mubr.msk.bf16.mxu0 %vm1158_vm0, %v13367_v6  ;;  %v14199_v30 = vpop.f32.mrf.mxu1  ;;  %16732 = vst [vmem:[#allocation193_spill] sm:$0xff] %v14204_v18 }
 0x3ba   : > { %v14212_v35 = vpop.f32.mrf.mxu0 }
 0x3bb   : > { %v14202_v33 = vpop.f32.mrf.mxu1  ;;  %16735 = vst [vmem:[#allocation196_spill] sm:$0xff] %v14212_v35 }
 0x3bc   : > { %16731 = vst [vmem:[#allocation192_spill] sm:$0xff] %v14202_v33 }
 0x3bd   : > { %v14206_v55 = vpop.f32.mrf.mxu1 }
 0x3be   : > { %16733 = vst [vmem:[#allocation194_spill] sm:$0xff] %v14206_v55  ;;  %v14224_v55 = vpop.f32.mrf.mxu0 }
 0x3bf   : > { %v14208_v60 = vpop.f32.mrf.mxu1  ;;  %11078 = vmatmul.mubr.msk.bf16.gmra.mxu1 %vm1158_vm0, %v12527_v50  ;;  %16738 = vst [vmem:[#allocation199_spill] sm:$0xff] %v14224_v55 }
 0x3c0   : > { %16734 = vst [vmem:[#allocation195_spill] sm:$0xff] %v14208_v60  ;;  %11450 = vmatmul.mubr.msk.bf16.gmra.mxu0 %vm1158_vm0, %v13395_v41  ;;  %11081 = vmatprep.mubr.msk.bf16.mxu1 %vm1158_vm0, %v12553_v38  ;;  %v14232_v35 = vpop.f32.mrf.mxu0 }
 0x3c1   : > { %11453 = vmatprep.mubr.msk.bf16.mxu0 %vm1158_vm0, %v13416_v56  ;;  %v14220_v11 = vpop.f32.mrf.mxu1  ;;  %16741 = vst [vmem:[#allocation202_spill] sm:$0xff] %v14232_v35 }
 0x3c2   : > { %16736 = vst [vmem:[#allocation197_spill] sm:$0xff] %v14220_v11 }
 0x3c3   : > { %v14222_v18 = vpop.f32.mrf.mxu1 }
 0x3c4   : > { %16737 = vst [vmem:[#allocation198_spill] sm:$0xff] %v14222_v18 }
 0x3c5   : > { %v14226_v60 = vpop.f32.mrf.mxu1 }
 0x3c6   : > { %16739 = vst [vmem:[#allocation200_spill] sm:$0xff] %v14226_v60  ;;  %v14244_v60 = vpop.f32.mrf.mxu0 }
 0x3c7   : > { %v14228_v33 = vpop.f32.mrf.mxu1  ;;  %11082 = vmatmul.mubr.msk.bf16.gmra.mxu1 %vm1158_vm0, %v12572_v59  ;;  %16742 = vst [vmem:[#allocation203_spill] sm:$0xff] %v14244_v60 }
 0x3c8   : > { %16740 = vst [vmem:[#allocation201_spill] sm:$0xff] %v14228_v33  ;;  %11454 = vmatmul.mubr.msk.bf16.gmra.mxu0 %vm1158_vm0, %v14128_v4  ;;  %11085 = vmatprep.mubr.msk.bf16.mxu1 %vm1158_vm0, %v13489_v5  ;;  %v14252_v35 = vpop.f32.mrf.mxu0  ;;  %v14266_v4 = vpack.c.bf16 %v16577_v28, %v13622_v1 }
 0x3c9   : > { %v14238_v11 = vpop.f32.mrf.mxu1  ;;  %11457 = vmatprep.mubr.msk.bf16.mxu0 %vm1158_vm0, %v13572_v2  ;;  %16745 = vst [vmem:[#allocation206_spill] sm:$0xff] %v14252_v35 }
 0x3ca   : > { %16747 = vst [vmem:[#allocation208_spill] sm:$0xff] %v14266_v4 }
 0x3cb   : > { %v14242_v55 = vpop.f32.mrf.mxu1 }
 0x3cd   : > { %v14246_v33 = vpop.f32.mrf.mxu1 }
 0x3ce   : > { %16743 = vst [vmem:[#allocation204_spill] sm:$0xff] %v14246_v33 }
 0x3cf   : > { %v14248_v18 = vpop.f32.mrf.mxu1  ;;  %11086 = vmatmul.mubr.msk.bf16.gmra.mxu1 %vm1158_vm0, %v12699_v63 }
 0x3d0   : > { %16744 = vst [vmem:[#allocation205_spill] sm:$0xff] %v14248_v18  ;;  %11089 = vmatprep.mubr.msk.bf16.mxu1 %vm1158_vm0, %v12728_v16  ;;  %11458 = vmatmul.mubr.msk.bf16.gmra.mxu0 %vm1158_vm0, %v13603_v31  ;;  %v14268_v18 = vpop.f32.mrf.mxu0 }
 0x3d1   : > { %v14258_v5 = vpop.f32.mrf.mxu1  ;;  %11461 = vmatprep.mubr.msk.bf16.mxu0 %vm1158_vm0, %v13631_v44  ;;  %16748 = vst [vmem:[#allocation209_spill] sm:$0xff] %v14268_v18 }
 0x3d2   : > { %v14276_v16 = vpop.f32.mrf.mxu0 }
 0x3d3   : > { %v14262_v60 = vpop.f32.mrf.mxu1  ;;  %16750 = vst [vmem:[#allocation211_spill] sm:$0xff] %v14276_v16 }
 0x3d4   : > { %16746 = vst [vmem:[#allocation207_spill] sm:$0xff] %v14262_v60  ;;  %v14287_v28 = vpop.f32.mrf.mxu0 }
 0x3d5   : > { %v14270_v35 = vpop.f32.mrf.mxu1  ;;  %16753 = vst [vmem:[#allocation214_spill] sm:$0xff] %v14287_v28 }
 0x3d6   : > { %v14295_v16 = vpop.f32.mrf.mxu0 }
 0x3d7   : > { %v14272_v33 = vpop.f32.mrf.mxu1  ;;  %11090 = vmatmul.mubr.msk.bf16.gmra.mxu1 %vm1158_vm0, %v12747_v24  ;;  %16756 = vst [vmem:[#allocation217_spill] sm:$0xff] %v14295_v16 }
 0x3d8   : > { %16749 = vst [vmem:[#allocation210_spill] sm:$0xff] %v14272_v33  ;;  %11093 = vmatprep.mubr.msk.bf16.mxu1 %vm1158_vm0, %v13640_v32  ;;  %11462 = vmatmul.mubr.msk.bf16.gmra.mxu0 %vm1158_vm0, %v14266_v4  ;;  %v14305_v28 = vpop.f32.mrf.mxu0 }
 0x3d9   : > { %v14282_v60 = vpop.f32.mrf.mxu1  ;;  %11465 = vmatprep.mubr.bf16.mxu0 %v16569_v23  ;;  %16759 = vst [vmem:[#allocation220_spill] sm:$0xff] %v14305_v28  ;;  %v16766_v28 = vld [vmem:[#allocation36_spill] sm:$0xff] }
 0x3da   : > { %16751 = vst [vmem:[#allocation212_spill] sm:$0xff] %v14282_v60  ;;  %v14313_v16 = vpop.f32.mrf.mxu0  ;;  %v16770_v60 = vld [vmem:[#allocation42_spill] sm:$0xff] }
 0x3db   : > { %v14285_v1 = vpop.f32.mrf.mxu1  ;;  %16762 = vst [vmem:[#allocation223_spill] sm:$0xff] %v14313_v16 }
 0x3dc   : > { %16752 = vst [vmem:[#allocation213_spill] sm:$0xff] %v14285_v1 }
 0x3dd   : > { %v14289_v18 = vpop.f32.mrf.mxu1 }
 0x3de   : > { %16754 = vst [vmem:[#allocation215_spill] sm:$0xff] %v14289_v18 }
 0x3df   : > { %v14291_v33 = vpop.f32.mrf.mxu1  ;;  %11094 = vmatmul.mubr.msk.bf16.gmra.mxu1 %vm1158_vm0, %v16604_v51 }
 0x3e0   : > { %16755 = vst [vmem:[#allocation216_spill] sm:$0xff] %v14291_v33  ;;  %11097 = vmatprep.mubr.msk.bf16.mxu1 %vm1158_vm0, %v16605_v26  ;;  %11466 = vmatmul.mubr.bf16.gmra.mxu0 %v16569_v23 }
 0x3e1   : > { %v14300_v32 = vpop.f32.mrf.mxu1  ;;  %11469 = vmatprep.mubr.bf16.mxu0 %v16569_v23 }
 0x3e2   : > { %16757 = vst [vmem:[#allocation218_spill] sm:$0xff] %v14300_v32 }
 0x3e3   : > { %v14303_v4 = vpop.f32.mrf.mxu1 }
 0x3e4   : > { %16758 = vst [vmem:[#allocation219_spill] sm:$0xff] %v14303_v4 }
 0x3e5   : > { %v14307_v18 = vpop.f32.mrf.mxu1 }
 0x3e6   : > { %16760 = vst [vmem:[#allocation221_spill] sm:$0xff] %v14307_v18  ;;  %v4052_v18 = vadd.f32 %v13974_v45, %v16766_v28  ;;  %v16769_v28 = vld [vmem:[#allocation40_spill] sm:$0xff] }
 0x3e7   : > { %v14309_v33 = vpop.f32.mrf.mxu1  ;;  %11098 = vmatmul.mubr.msk.bf16.gmra.mxu1 %vm1158_vm0, %v16613_v49  ;;  %v16767_v49 = vld [vmem:[#allocation37_spill] sm:$0xff]  ;;  %v4047_v45 = vadd.f32 %v13994_v46, %v16769_v28 }
 0x3e8   : > { %16761 = vst [vmem:[#allocation222_spill] sm:$0xff] %v14309_v33  ;;  %11101 = vmatprep.mubr.msk.bf16.mxu1 %vm1158_vm0, %v13692_v22  ;;  %11470 = vmatmul.mubr.bf16.gmra.mxu0 %v16569_v23  ;;  %v4044_v16 = vadd.f32 %v13984_v54, %v16767_v49  ;;  %v16768_v23 = vld [vmem:[#allocation39_spill] sm:$0xff]  ;;  %v4068_v49 = vadd.f32 %v13998_v29, %v16770_v60  ;;  %v16773_v29 = vld [vmem:[#allocation46_spill] sm:$0xff] }
 0x3e9   : > { %v14318_v32 = vpop.f32.mrf.mxu1  ;;  %v4063_v60 = vadd.f32 %v14016_v21, %v16773_v29 }
 0x3ea   : > { %16763 = vst [vmem:[#allocation224_spill] sm:$0xff] %v14318_v32 }
 0x3eb   : > { %v14320_v26 = vpop.f32.mrf.mxu1 }
 0x3ec   : > { %16764 = vst [vmem:[#allocation225_spill] sm:$0xff] %v14320_v26  ;;  %v4055_v26 = vadd.f32 %v13988_v7, %v16768_v23  ;;  %v16772_v7 = vld [vmem:[#allocation45_spill] sm:$0xff] }
 0x3ed   : > { %v14322_v4 = vpop.f32.mrf.mxu1 }
 0x3ee   : > { %16765 = vst [vmem:[#allocation226_spill] sm:$0xff] %v14322_v4 }
 0x3ef   : > { %v11003_v33 = vpop.f32.mrf.mxu1  ;;  %11102 = vmatmul.mubr.msk.bf16.gmra.mxu1 %vm1158_vm0, %v13038_v3 }
 0x3f0   : > { %v14330_v1 = vadd.f32 %v11003_v33, %v4052_v18  ;;  %11105 = vmatprep.mubr.msk.bf16.mxu1 %vm1158_vm0, %v13064_v25  ;;  %v16771_v33 = vld [vmem:[#allocation43_spill] sm:$0xff] }
 0x3f1   : > { %v4372_v22 = vpop.f32.mrf.mxu1 }
 0x3f2   : > { %v14336_v4 = vadd.f32 %v4372_v22, %v4044_v16  ;;  %v4060_v16 = vadd.f32 %v14008_v20, %v16771_v33 }
 0x3f3   : > { %v11004_v32 = vpop.f32.mrf.mxu1 }
 0x3f4   : > { %v14340_v51 = vadd.f32 %v11004_v32, %v4055_v26  ;;  %v4071_v26 = vadd.f32 %v14012_v62, %v16772_v7 }
 0x3f5   : > { %v4375_v3 = vpop.f32.mrf.mxu1 }
 0x3f6   : > { %v14344_v54 = vadd.f32 %v4375_v3, %v4047_v45  ;;  %v16774_v45 = vld [vmem:[#allocation47_spill] sm:$0xff] }
 0x3f7   : > { %v11007_v18 = vpop.f32.mrf.mxu1  ;;  %11106 = vmatmul.mubr.msk.bf16.gmra.mxu1 %vm1158_vm0, %v13083_v13  ;;  %v4084_v20 = vadd.f32 %v14018_v47, %v16774_v45 }
 0x3f8   : > { %v14350_v23 = vadd.f32 %v11007_v18, %v4068_v49  ;;  %11109 = vmatprep.mubr.msk.bf16.mxu1 %vm1158_vm0, %v13732_v9  ;;  %v16775_v9 = vld [vmem:[#allocation48_spill] sm:$0xff] }
 0x3f9   : > { %v4388_v46 = vpop.f32.mrf.mxu1  ;;  %v4076_v62 = vadd.f32 %v14030_v10, %v16775_v9 }
 0x3fa   : > { %v14356_v32 = vadd.f32 %v4388_v46, %v4060_v16  ;;  %v16776_v16 = vld [vmem:[#allocation50_spill] sm:$0xff] }
 0x3fb   : > { %v11008_v3 = vpop.f32.mrf.mxu1  ;;  %v4087_v46 = vadd.f32 %v14032_v61, %v16776_v16  ;;  %v16780_v16 = vld [vmem:[#allocation54_spill] sm:$0xff] }
 0x3fc   : > { %v14360_v22 = vadd.f32 %v11008_v3, %v4071_v26  ;;  %v16777_v26 = vld [vmem:[#allocation51_spill] sm:$0xff] }
 0x3fd   : > { %v4391_v28 = vpop.f32.mrf.mxu1  ;;  %v4079_v3 = vadd.f32 %v14040_v12, %v16777_v26 }
 0x3fe   : > { %v14364_v49 = vadd.f32 %v4391_v28, %v4063_v60  ;;  %v16778_v28 = vld [vmem:[#allocation52_spill] sm:$0xff] }
 0x3ff   : > { %v11011_v18 = vpop.f32.mrf.mxu1  ;;  %11110 = vmatmul.mubr.msk.bf16.gmra.mxu1 %vm1158_vm0, %v13213_v40  ;;  %v4100_v10 = vadd.f32 %v14042_v8, %v16778_v28 }
 0x400   : > { %v14370_v33 = vadd.f32 %v11011_v18, %v4084_v20  ;;  %11113 = vmatprep.mubr.msk.bf16.mxu1 %vm1158_vm0, %v13239_v0  ;;  %v16779_v18 = vld [vmem:[#allocation53_spill] sm:$0xff] }
 0x401   : > { %v4404_v21 = vpop.f32.mrf.mxu1  ;;  %v4092_v61 = vadd.f32 %v14054_v53, %v16779_v18 }
 0x402   : > { %v14376_v7 = vadd.f32 %v4404_v21, %v4076_v62  ;;  %v4103_v62 = vadd.f32 %v14058_v58, %v13511_v43 }
 0x403   : > { %v11012_v47 = vpop.f32.mrf.mxu1 }
 0x404   : > { %v14380_v29 = vadd.f32 %v11012_v47, %v4087_v46  ;;  %v4095_v46 = vadd.f32 %v14060_v37, %v16780_v16 }
 0x405   : > { %v4407_v60 = vpop.f32.mrf.mxu1 }
 0x406   : > { %v14384_v45 = vadd.f32 %v4407_v60, %v4079_v3  ;;  %v16781_v3 = vld [vmem:[#allocation55_spill] sm:$0xff] }
 0x407   : > { %v11015_v20 = vpop.f32.mrf.mxu1  ;;  %11114 = vmatmul.mubr.msk.bf16.gmra.mxu1 %vm1158_vm0, %v13258_v36  ;;  %v4116_v53 = vadd.f32 %v14064_v17, %v16781_v3 }
 0x408   : > { %v14390_v9 = vadd.f32 %v11015_v20, %v4100_v10  ;;  %11117 = vmatprep.mubr.msk.bf16.mxu1 %vm1158_vm0, %v13768_v42  ;;  %v16782_v42 = vld [vmem:[#allocation57_spill] sm:$0xff]  ;;  %v16783_v10 = vld [vmem:[#allocation163_spill] sm:$0xff] }
 0x409   : > { %v4420_v12 = vpop.f32.mrf.mxu1  ;;  %v4108_v43 = vadd.f32 %v14074_v39, %v16782_v42  ;;  %v4119_v20 = vadd.f32 %v16783_v10, %v13570_v27  ;;  %v16789_v39 = vld [vmem:[#allocation167_spill] sm:$0xff]  ;;  %v16792_v27 = vld [vmem:[#allocation169_spill] sm:$0xff] }
 0x40a   : > { %v14396_v21 = vadd.f32 %v4420_v12, %v4092_v61  ;;  %v16785_v61 = vld [vmem:[#allocation59_spill] sm:$0xff]  ;;  %v16786_v12 = vld [vmem:[#allocation165_spill] sm:$0xff] }
 0x40b   : > { %v11016_v8 = vpop.f32.mrf.mxu1 }
 0x40c   : > { %v14400_v47 = vadd.f32 %v11016_v8, %v4103_v62  ;;  %v4111_v62 = vadd.f32 %v16786_v12, %v16785_v61 }
 0x40d   : > { %v4423_v26 = vpop.f32.mrf.mxu1 }
 0x40e   : > { %v14404_v60 = vadd.f32 %v4423_v26, %v4095_v46  ;;  %v16788_v46 = vld [vmem:[#allocation60_spill] sm:$0xff] }
 0x40f   : > { %v11019_v28 = vpop.f32.mrf.mxu1  ;;  %11118 = vmatmul.mubr.msk.bf16.gmra.mxu1 %vm1158_vm0, %v13367_v6  ;;  %v4132_v26 = vadd.f32 %v16789_v39, %v16788_v46  ;;  %v16798_v46 = vld [vmem:[#allocation172_spill] sm:$0xff] }
 0x410   : > { %v14410_v58 = vadd.f32 %v11019_v28, %v4116_v53  ;;  %11121 = vmatprep.mubr.msk.bf16.mxu1 %vm1158_vm0, %v13395_v41  ;;  %v16791_v28 = vld [vmem:[#allocation64_spill] sm:$0xff] }
 0x411   : > { %v4436_v37 = vpop.f32.mrf.mxu1  ;;  %v4124_v42 = vadd.f32 %v16792_v27, %v16791_v28  ;;  %v16801_v28 = vld [vmem:[#allocation173_spill] sm:$0xff] }
 0x412   : > { %v14416_v18 = vadd.f32 %v4436_v37, %v4108_v43  ;;  %v16793_v37 = vld [vmem:[#allocation127_spill] sm:$0xff] }
 0x413   : > { %v11020_v17 = vpop.f32.mrf.mxu1 }
 0x414   : > { %16784 = vst [vmem:[#allocation36_spill] sm:$0xff] %v14416_v18  ;;  %v14420_v8 = vadd.f32 %v11020_v17, %v4119_v20  ;;  %v16794_v20 = vld [vmem:[#allocation67_spill] sm:$0xff]  ;;  %v16795_v17 = vld [vmem:[#allocation170_spill] sm:$0xff]  ;;  %v16800_v18 = vld [vmem:[#allocation73_spill] sm:$0xff] }
 0x415   : > { %v4439_v16 = vpop.f32.mrf.mxu1  ;;  %v4135_v61 = vadd.f32 %v16795_v17, %v16794_v20  ;;  %v16804_v20 = vld [vmem:[#allocation175_spill] sm:$0xff] }
 0x416   : > { %16787 = vst [vmem:[#allocation37_spill] sm:$0xff] %v14420_v8  ;;  %v14424_v3 = vadd.f32 %v4439_v16, %v4111_v62  ;;  %v16797_v16 = vld [vmem:[#allocation71_spill] sm:$0xff] }
 0x417   : > { %v11023_v53 = vpop.f32.mrf.mxu1  ;;  %11122 = vmatmul.mubr.msk.bf16.gmra.mxu1 %vm1158_vm0, %v13416_v56  ;;  %v4127_v39 = vadd.f32 %v16798_v46, %v16797_v16 }
 0x418   : > { %16790 = vst [vmem:[#allocation39_spill] sm:$0xff] %v14424_v3  ;;  %v14430_v43 = vadd.f32 %v11023_v53, %v4132_v26  ;;  %11125 = vmatprep.mubr.msk.bf16.mxu1 %vm1158_vm0, %v16793_v37  ;;  %v4148_v26 = vadd.f32 %v16801_v28, %v16800_v18  ;;  %v16803_v37 = vld [vmem:[#allocation76_spill] sm:$0xff] }
 0x419   : > { %v4452_v10 = vpop.f32.mrf.mxu1 }
 0x41a   : > { %v14436_v12 = vadd.f32 %v4452_v10, %v4124_v42  ;;  %v4140_v42 = vadd.f32 %v16804_v20, %v16803_v37  ;;  %v16811_v37 = vld [vmem:[#allocation180_spill] sm:$0xff] }
 0x41b   : > { %v11024_v62 = vpop.f32.mrf.mxu1 }
 0x41c   : > { %16796 = vst [vmem:[#allocation40_spill] sm:$0xff] %v14436_v12  ;;  %v14440_v3 = vadd.f32 %v11024_v62, %v4135_v61  ;;  %v16806_v61 = vld [vmem:[#allocation79_spill] sm:$0xff]  ;;  %v16807_v62 = vld [vmem:[#allocation176_spill] sm:$0xff] }
 0x41d   : > { %v4455_v8 = vpop.f32.mrf.mxu1  ;;  %v4151_v16 = vadd.f32 %v16807_v62, %v16806_v61  ;;  %v16810_v12 = vld [vmem:[#allocation84_spill] sm:$0xff]  ;;  %v16814_v61 = vld [vmem:[#allocation49_spill] sm:$0xff] }
 0x41e   : > { %16799 = vst [vmem:[#allocation42_spill] sm:$0xff] %v14440_v3  ;;  %v14444_v53 = vadd.f32 %v4455_v8, %v4127_v39  ;;  %v16808_v8 = vld [vmem:[#allocation82_spill] sm:$0xff]  ;;  %v16809_v39 = vld [vmem:[#allocation179_spill] sm:$0xff] }
 0x41f   : > { %v11027_v27 = vpop.f32.mrf.mxu1  ;;  %11126 = vmatmul.mubr.msk.bf16.gmra.mxu1 %vm1158_vm0, %v13572_v2  ;;  %v4143_v28 = vadd.f32 %v16809_v39, %v16808_v8  ;;  %v16818_v39 = vld [vmem:[#allocation184_spill] sm:$0xff] }
 0x420   : > { %16802 = vst [vmem:[#allocation43_spill] sm:$0xff] %v14444_v53  ;;  %v14450_v10 = vadd.f32 %v11027_v27, %v4148_v26  ;;  %11129 = vmatprep.mubr.msk.bf16.mxu1 %vm1158_vm0, %v13603_v31  ;;  %v4164_v26 = vadd.f32 %v16811_v37, %v16810_v12  ;;  %v16817_v12 = vld [vmem:[#allocation91_spill] sm:$0xff] }
 0x421   : > { %v4468_v17 = vpop.f32.mrf.mxu1 }
 0x422   : > { %16805 = vst [vmem:[#allocation45_spill] sm:$0xff] %v14450_v10  ;;  %v14456_v46 = vadd.f32 %v4468_v17, %v4140_v42  ;;  %v16813_v10 = vld [vmem:[#allocation87_spill] sm:$0xff] }
 0x423   : > { %v11028_v18 = vpop.f32.mrf.mxu1  ;;  %v4156_v42 = vadd.f32 %v16814_v61, %v16813_v10  ;;  %v11919_v10 = vld [vmem:[%s16462_s3 + $0x70] sm:$0xff]  }
 0x424   : > { %v14460_v53 = vadd.f32 %v11028_v18, %v4151_v16  ;;  %v16816_v16 = vld [vmem:[#allocation89_spill] sm:$0xff] }
 0x425   : > { %v4471_v3 = vpop.f32.mrf.mxu1  ;;  %v4167_v18 = vadd.f32 %v14148_v48, %v16816_v16  ;;  %v16821_v48 = vld [vmem:[#allocation5_spill] sm:$0xff] }
 0x426   : > { %v14464_v27 = vadd.f32 %v4471_v3, %v4143_v28  ;;  %v4159_v28 = vadd.f32 %v16818_v39, %v16817_v12 }
 0x427   : > { %v11031_v20 = vpop.f32.mrf.mxu1  ;;  %11130 = vmatmul.mubr.msk.bf16.gmra.mxu1 %vm1158_vm0, %v13631_v44 }
 0x428   : > { %16812 = vst [vmem:[#allocation46_spill] sm:$0xff] %v14464_v27  ;;  %v14470_v17 = vadd.f32 %v11031_v20, %v4164_v26  ;;  %11205 = vmatprep.mubr.msk.bf16.mxu1 %vm1158_vm0, %v12363_v19  ;;  %v16819_v26 = vld [vmem:[#allocation92_spill] sm:$0xff]  ;;  %v16820_v20 = vld [vmem:[#allocation186_spill] sm:$0xff] }
 0x429   : > { %v4484_v62 = vpop.f32.mrf.mxu1  ;;  %v4180_v19 = vadd.f32 %v16820_v20, %v16819_v26 }
 0x42a   : > { %16815 = vst [vmem:[#allocation47_spill] sm:$0xff] %v14470_v17  ;;  %v14476_v8 = vadd.f32 %v4484_v62, %v4156_v42  ;;  %v16822_v42 = vld [vmem:[#allocation94_spill] sm:$0xff] }
 0x42b   : > { %v11032_v3 = vpop.f32.mrf.mxu1  ;;  %v4172_v62 = vadd.f32 %v14171_v14, %v16822_v42  ;;  %v16827_v42 = vld [vmem:[#allocation6_spill] sm:$0xff] }
 0x42c   : > { %v14480_v37 = vadd.f32 %v11032_v3, %v4167_v18  ;;  %v16823_v3 = vld [vmem:[#allocation96_spill] sm:$0xff] }
 0x42d   : > { %v4487_v27 = vpop.f32.mrf.mxu1 }
 0x42e   : > { %v14487_v61 = vadd.f32 %v4487_v27, %v4159_v28  ;;  %v4183_v27 = vadd.f32 %v14176_v34, %v16823_v3  ;;  %v16824_v28 = vld [vmem:[#allocation98_spill] sm:$0xff] }
 0x42f   : > { %v11035_v17 = vpop.f32.mrf.mxu1  ;;  %11206 = vmatmul.mubr.msk.bf16.vlgmr.msra.gmra.mxu1 %vm1158_vm0, %v16821_v48  ;;  %v4175_v26 = vadd.f32 %v14180_v52, %v16824_v28  ;;  %v16828_v34 = vld [vmem:[#allocation102_spill] sm:$0xff] }
 0x430   : > { %v14493_v16 = vadd.f32 %v11035_v17, %v4180_v19  ;;  %11209 = vmatprep.mubr.msk.bf16.mxu1 %vm1158_vm0, %v12406_v15  ;;  %11338 = vmatpush3.bf16.msra.mxu1 %v14185_v57  ;;  %v16825_v17 = vld [vmem:[#allocation100_spill] sm:$0xff]  ;;  %v16826_v19 = vld [vmem:[#allocation190_spill] sm:$0xff] }
 0x431   : > { %v4500_v18 = vpop.f32.mrf.mxu1  ;;  %11339 = vmatprep.subr.bf16.mxu1 %v11919_v10  ;;  %v4196_v15 = vadd.f32 %v16826_v19, %v16825_v17  ;;  %v16834_v17 = vld [vmem:[#allocation194_spill] sm:$0xff] }
 0x432   : > { %v14500_v12 = vadd.f32 %v4500_v18, %v4172_v62  ;;  %v4188_v62 = vadd.f32 %v14199_v30, %v16828_v34  ;;  %v14514_v18 = vpop.f32.mrf.mxu0 }
 0x433   : > { %v11036_v39 = vpop.f32.mrf.mxu1  ;;  %16829 = vst [vmem:[#allocation48_spill] sm:$0xff] %v14514_v18 }
 0x434   : > { %v14504_v20 = vadd.f32 %v11036_v39, %v4183_v27  ;;  %11340 = vmatpush3.bf16.msra.mxu1 %v11919_v10  ;;  %v16831_v10 = vld [vmem:[#allocation104_spill] sm:$0xff] }
 0x435   : > { %v4503_v14 = vpop.f32.mrf.mxu1  ;;  %v16832_v27 = vld [vmem:[#allocation192_spill] sm:$0xff] }
 0x436   : > { %v14508_v48 = vadd.f32 %v4503_v14, %v4175_v26  ;;  %v4199_v39 = vadd.f32 %v16832_v27, %v16831_v10  ;;  %v16833_v14 = vld [vmem:[#allocation106_spill] sm:$0xff] }
 0x437   : > { %v11039_v57 = vpop.f32.mrf.mxu1  ;;  %11210 = vmatmul.mubr.msk.bf16.gmra.mxu1 %vm1158_vm0, %v16827_v42  ;;  %v4191_v19 = vadd.f32 %v16834_v17, %v16833_v14  ;;  %v14526_v42 = vpop.f32.mrf.mxu0  ;;  %v16845_v17 = vld [vmem:[#allocation198_spill] sm:$0xff] }
 0x438   : > { %v14516_v3 = vadd.f32 %v11039_v57, %v4196_v15  ;;  %11213 = vmatprep.mubr.msk.bf16.mxu1 %vm1158_vm0, %v12527_v50  ;;  %16835 = vst [vmem:[#allocation51_spill] sm:$0xff] %v14526_v42  ;;  %v16837_v15 = vld [vmem:[#allocation107_spill] sm:$0xff]  ;;  %v16847_v42 = vld [vmem:[#allocation200_spill] sm:$0xff] }
 0x439   : > { %v4516_v52 = vpop.f32.mrf.mxu1  ;;  %v16838_v57 = vld [vmem:[#allocation195_spill] sm:$0xff]  ;;  %v14538_v27 = vpop.f32.mrf.mxu0 }
 0x43a   : > { %16830 = vst [vmem:[#allocation50_spill] sm:$0xff] %v14516_v3  ;;  %v14522_v28 = vadd.f32 %v4516_v52, %v4188_v62  ;;  %v4212_v18 = vadd.f32 %v16838_v57, %v16837_v15  ;;  %v16840_v62 = vld [vmem:[#allocation109_spill] sm:$0xff]  ;;  %16842 = vst [vmem:[#allocation54_spill] sm:$0xff] %v14538_v27 }
 0x43b   : > { %v11040_v26 = vpop.f32.mrf.mxu1  ;;  %v16841_v52 = vld [vmem:[#allocation197_spill] sm:$0xff] }
 0x43c   : > { %v14528_v30 = vadd.f32 %v11040_v26, %v4199_v39  ;;  %v4204_v10 = vadd.f32 %v16841_v52, %v16840_v62  ;;  %v16844_v26 = vld [vmem:[#allocation111_spill] sm:$0xff]  ;;  %v16846_v57 = vld [vmem:[#allocation113_spill] sm:$0xff] }
 0x43d   : > { %v4519_v34 = vpop.f32.mrf.mxu1  ;;  %v4215_v15 = vadd.f32 %v16845_v17, %v16844_v26 }
 0x43e   : > { %16836 = vst [vmem:[#allocation52_spill] sm:$0xff] %v14528_v30  ;;  %v14532_v3 = vadd.f32 %v4519_v34, %v4191_v19  ;;  %v16851_v30 = vld [vmem:[#allocation10_spill] sm:$0xff] }
 0x43f   : > { %v11043_v50 = vpop.f32.mrf.mxu1  ;;  %11214 = vmatmul.mubr.msk.bf16.gmra.mxu1 %vm1158_vm0, %v12553_v38  ;;  %v4207_v38 = vadd.f32 %v16847_v42, %v16846_v57 }
 0x440   : > { %16839 = vst [vmem:[#allocation53_spill] sm:$0xff] %v14532_v3  ;;  %v14540_v14 = vadd.f32 %v11043_v50, %v4212_v18  ;;  %11217 = vmatprep.mubr.msk.bf16.mxu1 %vm1158_vm0, %v12572_v59  ;;  %v14550_v3 = vpop.f32.mrf.mxu0  ;;  %v16849_v18 = vld [vmem:[#allocation115_spill] sm:$0xff]  ;;  %v16850_v50 = vld [vmem:[#allocation201_spill] sm:$0xff] }
 0x441   : > { %v4532_v39 = vpop.f32.mrf.mxu1  ;;  %16848 = vst [vmem:[#allocation57_spill] sm:$0xff] %v14550_v3  ;;  %v4228_v27 = vadd.f32 %v16850_v50, %v16849_v18  ;;  %v16857_v18 = vld [vmem:[#allocation204_spill] sm:$0xff] }
 0x442   : > { %16843 = vst [vmem:[#allocation55_spill] sm:$0xff] %v14540_v14  ;;  %v14546_v19 = vadd.f32 %v4532_v39, %v4204_v10  ;;  %v16852_v10 = vld [vmem:[#allocation117_spill] sm:$0xff]  ;;  %v14562_v26 = vpop.f32.mrf.mxu0 }
 0x443   : > { %v11044_v34 = vpop.f32.mrf.mxu1  ;;  %v4220_v39 = vadd.f32 %v14238_v11, %v16852_v10  ;;  %16853 = vst [vmem:[#allocation163_spill] sm:$0xff] %v14562_v26 }
 0x444   : > { %v14552_v62 = vadd.f32 %v11044_v34, %v4215_v15  ;;  %v16855_v15 = vld [vmem:[#allocation119_spill] sm:$0xff]  ;;  %v14574_v50 = vpop.f32.mrf.mxu0 }
 0x445   : > { %v4535_v52 = vpop.f32.mrf.mxu1  ;;  %v4231_v34 = vadd.f32 %v14242_v55, %v16855_v15  ;;  %16858 = vst [vmem:[#allocation165_spill] sm:$0xff] %v14574_v50  ;;  %v16862_v55 = vld [vmem:[#allocation124_spill] sm:$0xff] }
 0x446   : > { %v14556_v14 = vadd.f32 %v4535_v52, %v4207_v38  ;;  %v16856_v52 = vld [vmem:[#allocation121_spill] sm:$0xff] }
 0x447   : > { %v11047_v59 = vpop.f32.mrf.mxu1  ;;  %11218 = vmatmul.mubr.msk.bf16.gmra.mxu1 %vm1158_vm0, %v16851_v30  ;;  %v4223_v30 = vadd.f32 %v16857_v18, %v16856_v52  ;;  %v16866_v52 = vld [vmem:[#allocation207_spill] sm:$0xff] }
 0x448   : > { %v14564_v42 = vadd.f32 %v11047_v59, %v4228_v27  ;;  %11221 = vmatprep.mubr.msk.bf16.mxu1 %vm1158_vm0, %v12699_v63  ;;  %v16859_v27 = vld [vmem:[#allocation122_spill] sm:$0xff]  ;;  %v16860_v59 = vld [vmem:[#allocation205_spill] sm:$0xff] }
 0x449   : > { %v4548_v17 = vpop.f32.mrf.mxu1  ;;  %v4244_v26 = vadd.f32 %v16860_v59, %v16859_v27  ;;  %v16868_v27 = vld [vmem:[#allocation129_spill] sm:$0xff] }
 0x44a   : > { %16854 = vst [vmem:[#allocation59_spill] sm:$0xff] %v14564_v42  ;;  %v14570_v57 = vadd.f32 %v4548_v17, %v4220_v39  ;;  %v16861_v42 = vld [vmem:[#allocation14_spill] sm:$0xff]  ;;  %v4236_v39 = vadd.f32 %v14258_v5, %v16862_v55  ;;  %v14586_v17 = vpop.f32.mrf.mxu0 }
 0x44b   : > { %v11048_v38 = vpop.f32.mrf.mxu1  ;;  %16863 = vst [vmem:[#allocation60_spill] sm:$0xff] %v14586_v17 }
 0x44c   : > { %v14576_v11 = vadd.f32 %v11048_v38, %v4231_v34  ;;  %v16865_v38 = vld [vmem:[#allocation126_spill] sm:$0xff]  ;;  %v14598_v59 = vpop.f32.mrf.mxu0 }
 0x44d   : > { %v4551_v10 = vpop.f32.mrf.mxu1  ;;  %v4247_v18 = vadd.f32 %v16866_v52, %v16865_v38  ;;  %16869 = vst [vmem:[#allocation169_spill] sm:$0xff] %v14598_v59  ;;  %v16881_v59 = vld [vmem:[#allocation213_spill] sm:$0xff] }
 0x44e   : > { %v14580_v3 = vadd.f32 %v4551_v10, %v4223_v30  ;;  %v14610_v52 = vpop.f32.mrf.mxu0 }
 0x44f   : > { %v11051_v63 = vpop.f32.mrf.mxu1  ;;  %11222 = vmatmul.mubr.msk.bf16.gmra.mxu1 %vm1158_vm0, %v16861_v42  ;;  %v4239_v42 = vadd.f32 %v14270_v35, %v16868_v27  ;;  %16877 = vst [vmem:[#allocation170_spill] sm:$0xff] %v14610_v52  ;;  %v16879_v27 = vld [vmem:[#allocation19_spill] sm:$0xff] }
 0x450   : > { %v14588_v15 = vadd.f32 %v11051_v63, %v4244_v26  ;;  %11225 = vmatprep.mubr.msk.bf16.mxu1 %vm1158_vm0, %v12747_v24  ;;  %v16871_v26 = vld [vmem:[#allocation131_spill] sm:$0xff]  ;;  %v16872_v63 = vld [vmem:[#allocation210_spill] sm:$0xff] }
 0x451   : > { %v4564_v34 = vpop.f32.mrf.mxu1  ;;  %v4260_v17 = vadd.f32 %v16872_v63, %v16871_v26  ;;  %v16883_v63 = vld [vmem:[#allocation137_spill] sm:$0xff] }
 0x452   : > { %16864 = vst [vmem:[#allocation167_spill] sm:$0xff] %v14588_v15  ;;  %v14594_v30 = vadd.f32 %v4564_v34, %v4236_v39  ;;  %v16874_v15 = vld [vmem:[#allocation16_spill] sm:$0xff]  ;;  %v16875_v39 = vld [vmem:[#allocation133_spill] sm:$0xff] }
 0x453   : > { %v11052_v10 = vpop.f32.mrf.mxu1  ;;  %v16876_v34 = vld [vmem:[#allocation212_spill] sm:$0xff] }
 0x454   : > { %16867 = vst [vmem:[#allocation64_spill] sm:$0xff] %v14594_v30  ;;  %v14600_v5 = vadd.f32 %v11052_v10, %v4247_v18  ;;  %v4252_v38 = vadd.f32 %v16876_v34, %v16875_v39  ;;  %v16880_v10 = vld [vmem:[#allocation135_spill] sm:$0xff]  ;;  %v16890_v30 = vld [vmem:[#allocation21_spill] sm:$0xff] }
 0x455   : > { %v4567_v55 = vpop.f32.mrf.mxu1  ;;  %v4263_v26 = vadd.f32 %v16881_v59, %v16880_v10  ;;  %v16891_v59 = vld [vmem:[#allocation140_spill] sm:$0xff] }
 0x456   : > { %16870 = vst [vmem:[#allocation127_spill] sm:$0xff] %v14600_v5  ;;  %v14604_v50 = vadd.f32 %v4567_v55, %v4239_v42  ;;  %v14622_v5 = vpop.f32.mrf.mxu0 }
 0x457   : > { %v11055_v24 = vpop.f32.mrf.mxu1  ;;  %11226 = vmatmul.mubr.msk.bf16.gmra.mxu1 %vm1158_vm0, %v16874_v15  ;;  %16885 = vst [vmem:[#allocation73_spill] sm:$0xff] %v14622_v5  ;;  %v16897_v5 = vld [vmem:[#allocation219_spill] sm:$0xff] }
 0x458   : > { %16873 = vst [vmem:[#allocation67_spill] sm:$0xff] %v14604_v50  ;;  %v14612_v35 = vadd.f32 %v11055_v24, %v4260_v17  ;;  %11229 = vmatprep.mubr.msk.bf16.mxu1 %vm1158_vm0, %v16879_v27  ;;  %v16884_v50 = vld [vmem:[#allocation215_spill] sm:$0xff]  ;;  %v16887_v17 = vld [vmem:[#allocation138_spill] sm:$0xff]  ;;  %v16888_v24 = vld [vmem:[#allocation216_spill] sm:$0xff]  ;;  %v14634_v10 = vpop.f32.mrf.mxu0 }
 0x459   : > { %v4580_v18 = vpop.f32.mrf.mxu1  ;;  %v4255_v15 = vadd.f32 %v16884_v50, %v16883_v63  ;;  %v4276_v52 = vadd.f32 %v16888_v24, %v16887_v17  ;;  %16893 = vst [vmem:[#allocation175_spill] sm:$0xff] %v14634_v10  ;;  %v16895_v63 = vld [vmem:[#allocation24_spill] sm:$0xff] }
 0x45a   : > { %16878 = vst [vmem:[#allocation71_spill] sm:$0xff] %v14612_v35  ;;  %v14618_v42 = vadd.f32 %v4580_v18, %v4252_v38  ;;  %v16892_v38 = vld [vmem:[#allocation218_spill] sm:$0xff]  ;;  %v16898_v24 = vld [vmem:[#allocation144_spill] sm:$0xff] }
 0x45b   : > { %v11056_v55 = vpop.f32.mrf.mxu1  ;;  %v4268_v18 = vadd.f32 %v16892_v38, %v16891_v59 }
 0x45c   : > { %16882 = vst [vmem:[#allocation172_spill] sm:$0xff] %v14618_v42  ;;  %v14624_v39 = vadd.f32 %v11056_v55, %v4263_v26  ;;  %v16896_v55 = vld [vmem:[#allocation142_spill] sm:$0xff]  ;;  %v16905_v42 = vld [vmem:[#allocation23_spill] sm:$0xff] }
 0x45d   : > { %v4583_v34 = vpop.f32.mrf.mxu1  ;;  %v4279_v17 = vadd.f32 %v16897_v5, %v16896_v55 }
 0x45e   : > { %16886 = vst [vmem:[#allocation173_spill] sm:$0xff] %v14624_v39  ;;  %v14628_v35 = vadd.f32 %v4583_v34, %v4255_v15  ;;  %v14646_v39 = vpop.f32.mrf.mxu0 }
 0x45f   : > { %v11059_v27 = vpop.f32.mrf.mxu1  ;;  %11230 = vmatmul.mubr.msk.bf16.gmra.mxu1 %vm1158_vm0, %v16890_v30  ;;  %16900 = vst [vmem:[#allocation176_spill] sm:$0xff] %v14646_v39  ;;  %v16911_v39 = vld [vmem:[#allocation225_spill] sm:$0xff] }
 0x460   : > { %16889 = vst [vmem:[#allocation76_spill] sm:$0xff] %v14628_v35  ;;  %v14636_v50 = vadd.f32 %v11059_v27, %v4276_v52  ;;  %11233 = vmatprep.mubr.msk.bf16.mxu1 %vm1158_vm0, %v16895_v63  ;;  %v16899_v35 = vld [vmem:[#allocation221_spill] sm:$0xff]  ;;  %v16902_v52 = vld [vmem:[#allocation146_spill] sm:$0xff]  ;;  %v14656_v5 = vpop.f32.mrf.mxu0 }
 0x461   : > { %v4596_v26 = vpop.f32.mrf.mxu1  ;;  %v4271_v30 = vadd.f32 %v16899_v35, %v16898_v24  ;;  %v16903_v27 = vld [vmem:[#allocation222_spill] sm:$0xff]  ;;  %16906 = vst [vmem:[#allocation84_spill] sm:$0xff] %v14656_v5  ;;  %v16909_v24 = vld [vmem:[#allocation27_spill] sm:$0xff] }
 0x462   : > { %16894 = vst [vmem:[#allocation79_spill] sm:$0xff] %v14636_v50  ;;  %v14642_v15 = vadd.f32 %v4596_v26, %v4268_v18  ;;  %v4292_v10 = vadd.f32 %v16903_v27, %v16902_v52  ;;  %v16907_v18 = vld [vmem:[#allocation147_spill] sm:$0xff]  ;;  %v16908_v26 = vld [vmem:[#allocation224_spill] sm:$0xff]  ;;  %v14668_v27 = vpop.f32.mrf.mxu0 }
 0x463   : > { %v11060_v34 = vpop.f32.mrf.mxu1  ;;  %v4284_v55 = vadd.f32 %v16908_v26, %v16907_v18  ;;  %16912 = vst [vmem:[#allocation180_spill] sm:$0xff] %v14668_v27 }
 0x464   : > { %v14648_v59 = vadd.f32 %v11060_v34, %v4279_v17  ;;  %v16910_v34 = vld [vmem:[#allocation149_spill] sm:$0xff]  ;;  %v14678_v26 = vpop.f32.mrf.mxu0 }
 0x465   : > { %v4599_v38 = vpop.f32.mrf.mxu1  ;;  %v4295_v52 = vadd.f32 %v16911_v39, %v16910_v34  ;;  %16915 = vst [vmem:[#allocation87_spill] sm:$0xff] %v14678_v26 }
 0x466   : > { %16901 = vst [vmem:[#allocation82_spill] sm:$0xff] %v14648_v59  ;;  %v14652_v50 = vadd.f32 %v4599_v38, %v4271_v30 }
 0x467   : > { %v11063_v63 = vpop.f32.mrf.mxu1  ;;  %11234 = vmatmul.mubr.msk.bf16.gmra.mxu1 %vm1158_vm0, %v16905_v42  ;;  %v16913_v42 = vld [vmem:[#allocation150_spill] sm:$0xff] }
 0x468   : > { %16904 = vst [vmem:[#allocation179_spill] sm:$0xff] %v14652_v50  ;;  %v14660_v35 = vadd.f32 %v11063_v63, %v4292_v10  ;;  %11237 = vmatprep.mubr.msk.bf16.mxu1 %vm1158_vm0, %v16909_v24  ;;  %v16914_v50 = vld [vmem:[#allocation226_spill] sm:$0xff] }
 0x469   : > { %v4612_v17 = vpop.f32.mrf.mxu1  ;;  %v4287_v5 = vadd.f32 %v16914_v50, %v16913_v42 }
 0x46a   : > { %v14666_v30 = vadd.f32 %v4612_v17, %v4284_v55  ;;  %v14688_v17 = vpop.f32.mrf.mxu0 }
 0x46b   : > { %v11064_v38 = vpop.f32.mrf.mxu1  ;;  %16916 = vst [vmem:[#allocation49_spill] sm:$0xff] %v14688_v17 }
 0x46c   : > { %v14672_v59 = vadd.f32 %v11064_v38, %v4295_v52  ;;  %v14698_v38 = vpop.f32.mrf.mxu0 }
 0x46d   : > { %v4615_v18 = vpop.f32.mrf.mxu1  ;;  %16918 = vst [vmem:[#allocation89_spill] sm:$0xff] %v14698_v38 }
 0x46e   : > { %v14674_v10 = vadd.f32 %v4615_v18, %v4287_v5  ;;  %v14708_v18 = vpop.f32.mrf.mxu0 }
 0x46f   : > { %v11071_v63 = vpop.f32.mrf.mxu1  ;;  %11238 = vmatmul.mubr.msk.bf16.gmra.mxu1 %vm1158_vm0, %v13064_v25  ;;  %16919 = vst [vmem:[#allocation91_spill] sm:$0xff] %v14708_v18 }
 0x470   : > { %v14681_v39 = vadd.f32 %v11071_v63, %v14330_v1  ;;  %11241 = vmatprep.mubr.msk.bf16.mxu1 %vm1158_vm0, %v13083_v13  ;;  %v16917_v1 = vld [vmem:[#allocation158_spill] sm:$0xff] }
 0x471   : > { %v4753_v55 = vpop.f32.mrf.mxu1 }
 0x472   : > { %v14686_v50 = vadd.f32 %v4753_v55, %v14336_v4 }
 0x473   : > { %v11072_v24 = vpop.f32.mrf.mxu1 }
 0x474   : > { %v14691_v5 = vadd.f32 %v11072_v24, %v14340_v51 }
 0x475   : > { %v4756_v34 = vpop.f32.mrf.mxu1 }
 0x476   : > { %v14694_v25 = vadd.f32 %v4756_v34, %v14344_v54 }
 0x477   : > { %v11075_v52 = vpop.f32.mrf.mxu1  ;;  %11242 = vmatmul.mubr.msk.bf16.gmra.mxu1 %vm1158_vm0, %v16917_v1 }
 0x478   : > { %v14701_v13 = vadd.f32 %v11075_v52, %v14350_v23  ;;  %11245 = vmatprep.mubr.msk.bf16.mxu1 %vm1158_vm0, %v13213_v40  ;;  %v14718_v23 = vpop.f32.mrf.mxu0 }
 0x479   : > { %v4769_v4 = vpop.f32.mrf.mxu1  ;;  %16920 = vst [vmem:[#allocation184_spill] sm:$0xff] %v14718_v23 }
 0x47a   : > { %v14706_v51 = vadd.f32 %v4769_v4, %v14356_v32  ;;  %v14728_v52 = vpop.f32.mrf.mxu0 }
 0x47b   : > { %v11076_v42 = vpop.f32.mrf.mxu1  ;;  %16921 = vst [vmem:[#allocation92_spill] sm:$0xff] %v14728_v52 }
 0x47c   : > { %v14711_v54 = vadd.f32 %v11076_v42, %v14360_v22  ;;  %v14738_v42 = vpop.f32.mrf.mxu0 }
 0x47d   : > { %v4772_v63 = vpop.f32.mrf.mxu1  ;;  %16923 = vst [vmem:[#allocation186_spill] sm:$0xff] %v14738_v42 }
 0x47e   : > { %v14714_v55 = vadd.f32 %v4772_v63, %v14364_v49 }
 0x47f   : > { %v11079_v24 = vpop.f32.mrf.mxu1  ;;  %11246 = vmatmul.mubr.msk.bf16.gmra.mxu1 %vm1158_vm0, %v13239_v0 }
 0x480   : > { %v14721_v40 = vadd.f32 %v11079_v24, %v14370_v33  ;;  %11249 = vmatprep.mubr.msk.bf16.mxu1 %vm1158_vm0, %v13258_v36  ;;  %v16922_v33 = vld [vmem:[#allocation164_spill] sm:$0xff]  ;;  %v14748_v24 = vpop.f32.mrf.mxu0 }
 0x481   : > { %v4785_v32 = vpop.f32.mrf.mxu1  ;;  %16924 = vst [vmem:[#allocation5_spill] sm:$0xff] %v14748_v24 }
 0x482   : > { %v14726_v22 = vadd.f32 %v4785_v32, %v14376_v7 }
 0x483   : > { %v11080_v34 = vpop.f32.mrf.mxu1 }
 0x484   : > { %v14731_v49 = vadd.f32 %v11080_v34, %v14380_v29 }
 0x485   : > { %v4788_v1 = vpop.f32.mrf.mxu1 }
 0x486   : > { %v14734_v0 = vadd.f32 %v4788_v1, %v14384_v45 }
 0x487   : > { %v11083_v4 = vpop.f32.mrf.mxu1  ;;  %11250 = vmatmul.mubr.msk.bf16.gmra.mxu1 %vm1158_vm0, %v16922_v33 }
 0x488   : > { %v14741_v36 = vadd.f32 %v11083_v4, %v14390_v9  ;;  %11253 = vmatprep.mubr.msk.bf16.mxu1 %vm1158_vm0, %v13367_v6  ;;  %v14758_v9 = vpop.f32.mrf.mxu0  ;;  %v16926_v4 = vld [vmem:[#allocation36_spill] sm:$0xff] }
 0x489   : > { %v4801_v7 = vpop.f32.mrf.mxu1  ;;  %16925 = vst [vmem:[#allocation94_spill] sm:$0xff] %v14758_v9 }
 0x48a   : > { %v14746_v29 = vadd.f32 %v4801_v7, %v14396_v21  ;;  %v14768_v7 = vpop.f32.mrf.mxu0 }
 0x48b   : > { %v11084_v63 = vpop.f32.mrf.mxu1  ;;  %16927 = vst [vmem:[#allocation96_spill] sm:$0xff] %v14768_v7 }
 0x48c   : > { %v14751_v45 = vadd.f32 %v11084_v63, %v14400_v47 }
 0x48d   : > { %v4804_v32 = vpop.f32.mrf.mxu1 }
 0x48e   : > { %v14754_v34 = vadd.f32 %v4804_v32, %v14404_v60  ;;  %v16928_v60 = vld [vmem:[#allocation37_spill] sm:$0xff] }
 0x48f   : > { %v11087_v1 = vpop.f32.mrf.mxu1  ;;  %11254 = vmatmul.mubr.msk.bf16.gmra.mxu1 %vm1158_vm0, %v13395_v41  ;;  %v16929_v41 = vld [vmem:[#allocation39_spill] sm:$0xff] }
 0x490   : > { %v14761_v6 = vadd.f32 %v11087_v1, %v14410_v58  ;;  %11257 = vmatprep.mubr.msk.bf16.mxu1 %vm1158_vm0, %v13416_v56  ;;  %v16930_v58 = vld [vmem:[#allocation178_spill] sm:$0xff]  ;;  %v14778_v1 = vpop.f32.mrf.mxu0 }
 0x491   : > { %v4817_v21 = vpop.f32.mrf.mxu1  ;;  %16931 = vst [vmem:[#allocation98_spill] sm:$0xff] %v14778_v1 }
 0x492   : > { %v14766_v47 = vadd.f32 %v4817_v21, %v16926_v4  ;;  %v16932_v4 = vld [vmem:[#allocation40_spill] sm:$0xff]  ;;  %v14788_v7 = vpop.f32.mrf.mxu0 }
 0x493   : > { %v11088_v33 = vpop.f32.mrf.mxu1  ;;  %16933 = vst [vmem:[#allocation100_spill] sm:$0xff] %v14788_v7 }
 0x494   : > { %v14771_v63 = vadd.f32 %v11088_v33, %v16928_v60 }
 0x495   : > { %v4820_v32 = vpop.f32.mrf.mxu1 }
 0x496   : > { %v14774_v24 = vadd.f32 %v4820_v32, %v16929_v41  ;;  %v16934_v32 = vld [vmem:[#allocation42_spill] sm:$0xff] }
 0x497   : > { %v11091_v9 = vpop.f32.mrf.mxu1  ;;  %11258 = vmatmul.mubr.msk.bf16.gmra.mxu1 %vm1158_vm0, %v16930_v58  ;;  %v16935_v58 = vld [vmem:[#allocation43_spill] sm:$0xff] }
 0x498   : > { %v14781_v56 = vadd.f32 %v11091_v9, %v14430_v43  ;;  %11261 = vmatprep.mubr.msk.bf16.mxu1 %vm1158_vm0, %v13572_v2  ;;  %v14798_v43 = vpop.f32.mrf.mxu0  ;;  %v16938_v2 = vld [vmem:[#allocation45_spill] sm:$0xff] }
 0x499   : > { %v4833_v21 = vpop.f32.mrf.mxu1  ;;  %16937 = vst [vmem:[#allocation6_spill] sm:$0xff] %v14798_v43 }
 0x49a   : > { %v14786_v33 = vadd.f32 %v4833_v21, %v16932_v4 }
 0x49b   : > { %v11092_v60 = vpop.f32.mrf.mxu1 }
 0x49c   : > { %v14791_v41 = vadd.f32 %v11092_v60, %v16934_v32  ;;  %v14808_v32 = vpop.f32.mrf.mxu0 }
 0x49d   : > { %v4836_v42 = vpop.f32.mrf.mxu1  ;;  %16939 = vst [vmem:[#allocation102_spill] sm:$0xff] %v14808_v32 }
 0x49e   : > { %v14794_v52 = vadd.f32 %v4836_v42, %v16935_v58 }
 0x49f   : > { %v11095_v1 = vpop.f32.mrf.mxu1  ;;  %11262 = vmatmul.mubr.msk.bf16.gmra.mxu1 %vm1158_vm0, %v13603_v31  ;;  %v16940_v31 = vld [vmem:[#allocation46_spill] sm:$0xff] }
 0x4a0   : > { %16936 = vst [vmem:[#allocation190_spill] sm:$0xff] %v14794_v52  ;;  %v14801_v9 = vadd.f32 %v11095_v1, %v16938_v2  ;;  %11265 = vmatprep.mubr.msk.bf16.mxu1 %vm1158_vm0, %v13631_v44  ;;  %v16942_v1 = vld [vmem:[#allocation208_spill] sm:$0xff]  ;;  %v14818_v2 = vpop.f32.mrf.mxu0  ;;  %v16944_v44 = vld [vmem:[#allocation47_spill] sm:$0xff] }
 0x4a1   : > { %v4849_v21 = vpop.f32.mrf.mxu1  ;;  %16943 = vst [vmem:[#allocation192_spill] sm:$0xff] %v14818_v2 }
 0x4a2   : > { %v14806_v4 = vadd.f32 %v4849_v21, %v14456_v46  ;;  %v16945_v46 = vld [vmem:[#allocation7_spill] sm:$0xff]  ;;  %v14828_v32 = vpop.f32.mrf.mxu0 }
 0x4a3   : > { %v11096_v60 = vpop.f32.mrf.mxu1  ;;  %16946 = vst [vmem:[#allocation106_spill] sm:$0xff] %v14828_v32 }
 0x4a4   : > { %v14811_v42 = vadd.f32 %v11096_v60, %v14460_v53 }
 0x4a5   : > { %v4852_v58 = vpop.f32.mrf.mxu1 }
 0x4a6   : > { %v14814_v7 = vadd.f32 %v4852_v58, %v16940_v31 }
 0x4a7   : > { %v11099_v43 = vpop.f32.mrf.mxu1  ;;  %11266 = vmatmul.mubr.msk.bf16.gmra.mxu1 %vm1158_vm0, %v16942_v1 }
 0x4a8   : > { %16941 = vst [vmem:[#allocation104_spill] sm:$0xff] %v14814_v7  ;;  %v14821_v23 = vadd.f32 %v11099_v43, %v16944_v44  ;;  %11341 = vmatprep.mubr.msk.bf16.mxu1 %vm1158_vm0, %v16945_v46  ;;  %v16948_v43 = vld [vmem:[#allocation8_spill] sm:$0xff]  ;;  %v14838_v44 = vpop.f32.mrf.mxu0 }
 0x4a9   : > { %v4865_v21 = vpop.f32.mrf.mxu1  ;;  %16949 = vst [vmem:[#allocation107_spill] sm:$0xff] %v14838_v44 }
 0x4aa   : > { %v14826_v53 = vadd.f32 %v4865_v21, %v14476_v8  ;;  %v16950_v8 = vld [vmem:[#allocation9_spill] sm:$0xff]  ;;  %v14848_v32 = vpop.f32.mrf.mxu0 }
 0x4ab   : > { %v11100_v60 = vpop.f32.mrf.mxu1  ;;  %16951 = vst [vmem:[#allocation195_spill] sm:$0xff] %v14848_v32 }
 0x4ac   : > { %v14831_v58 = vadd.f32 %v11100_v60, %v14480_v37 }
 0x4ad   : > { %v4868_v31 = vpop.f32.mrf.mxu1 }
 0x4ae   : > { %v14834_v1 = vadd.f32 %v4868_v31, %v14487_v61 }
 0x4af   : > { %v11103_v2 = vpop.f32.mrf.mxu1  ;;  %11342 = vmatmul.mubr.msk.bf16.vlgmr.msra.gmra.mxu1 %vm1158_vm0, %v16948_v43 }
 0x4b0   : > { %16947 = vst [vmem:[#allocation194_spill] sm:$0xff] %v14834_v1  ;;  %v14841_v46 = vadd.f32 %v11103_v2, %v14493_v16  ;;  %11345 = vmatprep.mubr.msk.bf16.mxu1 %vm1158_vm0, %v16950_v8  ;;  %v16953_v16 = vld [vmem:[#allocation11_spill] sm:$0xff]  ;;  %v14858_v2 = vpop.f32.mrf.mxu0  ;;  %v16955_v8 = vld [vmem:[#allocation50_spill] sm:$0xff] }
 0x4b1   : > { %v4881_v21 = vpop.f32.mrf.mxu1  ;;  %16954 = vst [vmem:[#allocation197_spill] sm:$0xff] %v14858_v2 }
 0x4b2   : > { %v14846_v37 = vadd.f32 %v4881_v21, %v14500_v12  ;;  %v16956_v12 = vld [vmem:[#allocation12_spill] sm:$0xff]  ;;  %v14868_v32 = vpop.f32.mrf.mxu0 }
 0x4b3   : > { %v11104_v60 = vpop.f32.mrf.mxu1  ;;  %16957 = vst [vmem:[#allocation111_spill] sm:$0xff] %v14868_v32 }
 0x4b4   : > { %v14851_v61 = vadd.f32 %v11104_v60, %v14504_v20 }
 0x4b5   : > { %v4884_v31 = vpop.f32.mrf.mxu1 }
 0x4b6   : > { %v14854_v43 = vadd.f32 %v4884_v31, %v14508_v48  ;;  %v16958_v48 = vld [vmem:[#allocation52_spill] sm:$0xff] }
 0x4b7   : > { %v11107_v44 = vpop.f32.mrf.mxu1  ;;  %11346 = vmatmul.mubr.msk.bf16.gmra.mxu1 %vm1158_vm0, %v16953_v16  ;;  %v16959_v16 = vld [vmem:[#allocation53_spill] sm:$0xff] }
 0x4b8   : > { %16952 = vst [vmem:[#allocation109_spill] sm:$0xff] %v14854_v43  ;;  %v14861_v18 = vadd.f32 %v11107_v44, %v16955_v8  ;;  %11349 = vmatprep.mubr.msk.bf16.mxu1 %vm1158_vm0, %v16956_v12  ;;  %v16961_v44 = vld [vmem:[#allocation13_spill] sm:$0xff]  ;;  %v14878_v8 = vpop.f32.mrf.mxu0  ;;  %v16963_v12 = vld [vmem:[#allocation55_spill] sm:$0xff] }
 0x4b9   : > { %v4897_v21 = vpop.f32.mrf.mxu1  ;;  %16962 = vst [vmem:[#allocation113_spill] sm:$0xff] %v14878_v8  ;;  %v16980_v43 = vld [vmem:[#allocation67_spill] sm:$0xff] }
 0x4ba   : > { %v14866_v20 = vadd.f32 %v4897_v21, %v14522_v28  ;;  %v16964_v28 = vld [vmem:[#allocation15_spill] sm:$0xff]  ;;  %v14888_v32 = vpop.f32.mrf.mxu0 }
 0x4bb   : > { %v11108_v60 = vpop.f32.mrf.mxu1  ;;  %16965 = vst [vmem:[#allocation200_spill] sm:$0xff] %v14888_v32 }
 0x4bc   : > { %v14871_v31 = vadd.f32 %v11108_v60, %v16958_v48 }
 0x4bd   : > { %v4900_v38 = vpop.f32.mrf.mxu1 }
 0x4be   : > { %v14874_v17 = vadd.f32 %v4900_v38, %v16959_v16 }
 0x4bf   : > { %v11111_v2 = vpop.f32.mrf.mxu1  ;;  %11350 = vmatmul.mubr.msk.bf16.gmra.mxu1 %vm1158_vm0, %v16961_v44 }
 0x4c0   : > { %16960 = vst [vmem:[#allocation198_spill] sm:$0xff] %v14874_v17  ;;  %v14881_v26 = vadd.f32 %v11111_v2, %v16963_v12  ;;  %11353 = vmatprep.mubr.msk.bf16.mxu1 %vm1158_vm0, %v16964_v28  ;;  %v16967_v2 = vld [vmem:[#allocation17_spill] sm:$0xff]  ;;  %v14898_v12 = vpop.f32.mrf.mxu0  ;;  %v16969_v28 = vld [vmem:[#allocation59_spill] sm:$0xff] }
 0x4c1   : > { %v4913_v21 = vpop.f32.mrf.mxu1  ;;  %16968 = vst [vmem:[#allocation201_spill] sm:$0xff] %v14898_v12  ;;  %v16977_v12 = vld [vmem:[#allocation64_spill] sm:$0xff] }
 0x4c2   : > { %v14886_v60 = vadd.f32 %v4913_v21, %v14546_v19  ;;  %v16970_v19 = vld [vmem:[#allocation18_spill] sm:$0xff]  ;;  %v14908_v32 = vpop.f32.mrf.mxu0 }
 0x4c3   : > { %v11112_v48 = vpop.f32.mrf.mxu1  ;;  %16971 = vst [vmem:[#allocation10_spill] sm:$0xff] %v14908_v32 }
 0x4c4   : > { %v14891_v38 = vadd.f32 %v11112_v48, %v14552_v62 }
 0x4c5   : > { %v4916_v16 = vpop.f32.mrf.mxu1 }
 0x4c6   : > { %v14894_v44 = vadd.f32 %v4916_v16, %v14556_v14  ;;  %v11920_v16 = vld [vmem:[%s16462_s3 + $0xa8] sm:$0xff]  }
 0x4c7   : > { %v11115_v8 = vpop.f32.mrf.mxu1  ;;  %11354 = vmatmul.mubr.msk.bf16.gmra.mxu1 %vm1158_vm0, %v16967_v2  ;;  %11473 = vmatprep.subr.bf16.mxu1 %v11920_v16 }
 0x4c8   : > { %16966 = vst [vmem:[#allocation115_spill] sm:$0xff] %v14894_v44  ;;  %v14901_v27 = vadd.f32 %v11115_v8, %v16969_v28  ;;  %11357 = vmatprep.mubr.msk.bf16.mxu1 %vm1158_vm0, %v16970_v19  ;;  %v16973_v19 = vld [vmem:[#allocation20_spill] sm:$0xff]  ;;  %11474 = vmatpush3.bf16.msra.mxu1 %v11920_v16  ;;  %v16984_v16 = vld [vmem:[#allocation71_spill] sm:$0xff] }
 0x4c9   : > { %v4929_v21 = vpop.f32.mrf.mxu1 }
 0x4ca   : > { %v14906_v62 = vadd.f32 %v4929_v21, %v14570_v57  ;;  %v14921_v57 = vpop.f32.mrf.mxu0  ;;  %v16975_v21 = vld [vmem:[#allocation167_spill] sm:$0xff] }
 0x4cb   : > { %v11116_v48 = vpop.f32.mrf.mxu1  ;;  %16974 = vst [vmem:[#allocation119_spill] sm:$0xff] %v14921_v57 }
 0x4cc   : > { %v14911_v14 = vadd.f32 %v11116_v48, %v14576_v11  ;;  %v16976_v11 = vld [vmem:[#allocation22_spill] sm:$0xff] }
 0x4cd   : > { %v4932_v2 = vpop.f32.mrf.mxu1 }
 0x4ce   : > { %v14917_v8 = vadd.f32 %v4932_v2, %v14580_v3  ;;  %v14931_v2 = vpop.f32.mrf.mxu0 }
 0x4cf   : > { %v11119_v28 = vpop.f32.mrf.mxu1  ;;  %11358 = vmatmul.mubr.msk.bf16.gmra.mxu1 %vm1158_vm0, %v16973_v19  ;;  %16978 = vst [vmem:[#allocation121_spill] sm:$0xff] %v14931_v2  ;;  %v16987_v2 = vld [vmem:[#allocation172_spill] sm:$0xff] }
 0x4d0   : > { %16972 = vst [vmem:[#allocation117_spill] sm:$0xff] %v14917_v8  ;;  %v14924_v32 = vadd.f32 %v11119_v28, %v16975_v21  ;;  %11361 = vmatprep.mubr.msk.bf16.mxu1 %vm1158_vm0, %v16976_v11  ;;  %v16979_v8 = vld [vmem:[#allocation127_spill] sm:$0xff]  ;;  %v16982_v21 = vld [vmem:[#allocation25_spill] sm:$0xff]  ;;  %v14941_v11 = vpop.f32.mrf.mxu0 }
 0x4d1   : > { %v4945_v48 = vpop.f32.mrf.mxu1  ;;  %16983 = vst [vmem:[#allocation122_spill] sm:$0xff] %v14941_v11 }
 0x4d2   : > { %v14929_v44 = vadd.f32 %v4945_v48, %v16977_v12  ;;  %v16986_v12 = vld [vmem:[#allocation26_spill] sm:$0xff]  ;;  %v14951_v7 = vpop.f32.mrf.mxu0 }
 0x4d3   : > { %v11120_v3 = vpop.f32.mrf.mxu1  ;;  %16988 = vst [vmem:[#allocation14_spill] sm:$0xff] %v14951_v7 }
 0x4d4   : > { %v14934_v17 = vadd.f32 %v11120_v3, %v16979_v8 }
 0x4d5   : > { %v4948_v19 = vpop.f32.mrf.mxu1 }
 0x4d6   : > { %v14937_v57 = vadd.f32 %v4948_v19, %v16980_v43  ;;  %v16989_v43 = vld [vmem:[#allocation173_spill] sm:$0xff] }
 0x4d7   : > { %v11123_v28 = vpop.f32.mrf.mxu1  ;;  %11362 = vmatmul.mubr.msk.bf16.gmra.mxu1 %vm1158_vm0, %v16982_v21  ;;  %v16991_v21 = vld [vmem:[#allocation76_spill] sm:$0xff] }
 0x4d8   : > { %16981 = vst [vmem:[#allocation204_spill] sm:$0xff] %v14937_v57  ;;  %v14944_v1 = vadd.f32 %v11123_v28, %v16984_v16  ;;  %11365 = vmatprep.mubr.msk.bf16.mxu1 %vm1158_vm0, %v16986_v12  ;;  %v16993_v28 = vld [vmem:[#allocation28_spill] sm:$0xff]  ;;  %v14961_v16 = vpop.f32.mrf.mxu0  ;;  %v16995_v12 = vld [vmem:[#allocation79_spill] sm:$0xff] }
 0x4d9   : > { %v4961_v48 = vpop.f32.mrf.mxu1  ;;  %16994 = vst [vmem:[#allocation207_spill] sm:$0xff] %v14961_v16 }
 0x4da   : > { %16985 = vst [vmem:[#allocation205_spill] sm:$0xff] %v14944_v1  ;;  %v14949_v8 = vadd.f32 %v4961_v48, %v16987_v2  ;;  %v16996_v2 = vld [vmem:[#allocation29_spill] sm:$0xff]  ;;  %v14971_v7 = vpop.f32.mrf.mxu0 }
 0x4db   : > { %v11124_v3 = vpop.f32.mrf.mxu1  ;;  %16997 = vst [vmem:[#allocation129_spill] sm:$0xff] %v14971_v7 }
 0x4dc   : > { %v14954_v19 = vadd.f32 %v11124_v3, %v16989_v43 }
 0x4dd   : > { %v4964_v57 = vpop.f32.mrf.mxu1 }
 0x4de   : > { %16990 = vst [vmem:[#allocation124_spill] sm:$0xff] %v14954_v19  ;;  %v14957_v52 = vadd.f32 %v4964_v57, %v16991_v21  ;;  %v16998_v57 = vld [vmem:[#allocation82_spill] sm:$0xff] }
 0x4df   : > { %v11127_v11 = vpop.f32.mrf.mxu1  ;;  %11366 = vmatmul.mubr.msk.bf16.gmra.mxu1 %vm1158_vm0, %v16993_v28  ;;  %v16999_v28 = vld [vmem:[#allocation179_spill] sm:$0xff] }
 0x4e0   : > { %16992 = vst [vmem:[#allocation126_spill] sm:$0xff] %v14957_v52  ;;  %v14964_v1 = vadd.f32 %v11127_v11, %v16995_v12  ;;  %11369 = vmatprep.mubr.msk.bf16.mxu1 %vm1158_vm0, %v16996_v2  ;;  %v17001_v11 = vld [vmem:[#allocation30_spill] sm:$0xff]  ;;  %v14981_v12 = vpop.f32.mrf.mxu0 }
 0x4e1   : > { %v4977_v48 = vpop.f32.mrf.mxu1  ;;  %17002 = vst [vmem:[#allocation210_spill] sm:$0xff] %v14981_v12 }
 0x4e2   : > { %v14969_v3 = vadd.f32 %v4977_v48, %v14642_v15  ;;  %v17003_v15 = vld [vmem:[#allocation31_spill] sm:$0xff]  ;;  %v14991_v7 = vpop.f32.mrf.mxu0 }
 0x4e3   : > { %v11128_v43 = vpop.f32.mrf.mxu1  ;;  %17004 = vst [vmem:[#allocation16_spill] sm:$0xff] %v14991_v7 }
 0x4e4   : > { %v14974_v21 = vadd.f32 %v11128_v43, %v16998_v57 }
 0x4e5   : > { %v4980_v52 = vpop.f32.mrf.mxu1 }
 0x4e6   : > { %v14977_v19 = vadd.f32 %v4980_v52, %v16999_v28 }
 0x4e7   : > { %v11131_v16 = vpop.f32.mrf.mxu1  ;;  %11370 = vmatmul.mubr.msk.bf16.gmra.mxu1 %vm1158_vm0, %v17001_v11 }
 0x4e8   : > { %17000 = vst [vmem:[#allocation131_spill] sm:$0xff] %v14977_v19  ;;  %v14984_v2 = vadd.f32 %v11131_v16, %v14660_v35  ;;  %11373 = vmatprep.mubr.msk.bf16.mxu1 %vm1158_vm0, %v17003_v15  ;;  %v17006_v35 = vld [vmem:[#allocation61_spill] sm:$0xff]  ;;  %v17007_v19 = vld [vmem:[#allocation32_spill] sm:$0xff]  ;;  %v15003_v15 = vpop.f32.mrf.mxu0 }
 0x4e9   : > { %v4993_v48 = vpop.f32.mrf.mxu1  ;;  %v5391_v16 = vadd.f32 %v17006_v35, %v14681_v39  ;;  %17008 = vst [vmem:[#allocation212_spill] sm:$0xff] %v15003_v15 }
 0x4ea   : > { %v14989_v43 = vadd.f32 %v4993_v48, %v14666_v30  ;;  %v17010_v48 = vld [vmem:[#allocation33_spill] sm:$0xff] }
 0x4eb   : > { %v11132_v57 = vpop.f32.mrf.mxu1 }
 0x4ec   : > { %v14994_v52 = vadd.f32 %v11132_v57, %v14672_v59  ;;  %v17011_v59 = vld [vmem:[#allocation63_spill] sm:$0xff] }
 0x4ed   : > { %v4996_v28 = vpop.f32.mrf.mxu1  ;;  %v5389_v57 = vadd.f32 %v17011_v59, %v14686_v50 }
 0x4ee   : > { %v14997_v11 = vadd.f32 %v4996_v28, %v14674_v10  ;;  %v17012_v28 = vld [vmem:[#allocation65_spill] sm:$0xff] }
 0x4ef   : > { %v11207_v12 = vpop.f32.mrf.mxu1  ;;  %11374 = vmatmul.mubr.msk.bf16.gmra.mxu1 %vm1158_vm0, %v17007_v19  ;;  %v5392_v39 = vadd.f32 %v17012_v28, %v14691_v5  ;;  %v17018_v28 = vld [vmem:[#allocation35_spill] sm:$0xff] }
 0x4f0   : > { %17005 = vst [vmem:[#allocation133_spill] sm:$0xff] %v14997_v11  ;;  %v15005_v30 = vadd.f32 %v11207_v12, %v5391_v16  ;;  %11377 = vmatprep.mubr.msk.bf16.mxu1 %vm1158_vm0, %v17010_v48  ;;  %v15015_v11 = vpop.f32.mrf.mxu0  ;;  %v17014_v12 = vld [vmem:[#allocation66_spill] sm:$0xff]  ;;  %v17015_v48 = vld [vmem:[#allocation68_spill] sm:$0xff] }
 0x4f1   : > { %v5503_v7 = vpop.f32.mrf.mxu1  ;;  %17013 = vst [vmem:[#allocation135_spill] sm:$0xff] %v15015_v11  ;;  %v5390_v16 = vadd.f32 %v17014_v12, %v14694_v25  ;;  %v5395_v50 = vadd.f32 %v17015_v48, %v14701_v13  ;;  %v17020_v12 = vld [vmem:[#allocation72_spill] sm:$0xff] }
 0x4f2   : > { %17009 = vst [vmem:[#allocation19_spill] sm:$0xff] %v15005_v30  ;;  %v15011_v10 = vadd.f32 %v5503_v7, %v5389_v57  ;;  %v17016_v7 = vld [vmem:[#allocation34_spill] sm:$0xff]  ;;  %v15027_v57 = vpop.f32.mrf.mxu0  ;;  %v5396_v13 = vadd.f32 %v17020_v12, %v14711_v54  ;;  %v17026_v12 = vld [vmem:[#allocation41_spill] sm:$0xff] }
 0x4f3   : > { %v11208_v35 = vpop.f32.mrf.mxu1 }
 0x4f4   : > { %v15017_v19 = vadd.f32 %v11208_v35, %v5392_v39  ;;  %v17019_v39 = vld [vmem:[#allocation70_spill] sm:$0xff]  ;;  %v15039_v48 = vpop.f32.mrf.mxu0 }
 0x4f5   : > { %v5506_v15 = vpop.f32.mrf.mxu1  ;;  %v5393_v25 = vadd.f32 %v17019_v39, %v14706_v51 }
 0x4f6   : > { %v15021_v30 = vadd.f32 %v5506_v15, %v5390_v16 }
 0x4f7   : > { %v11211_v59 = vpop.f32.mrf.mxu1  ;;  %11378 = vmatmul.mubr.msk.bf16.gmra.mxu1 %vm1158_vm0, %v17016_v7 }
 0x4f8   : > { %v15029_v5 = vadd.f32 %v11211_v59, %v5395_v50  ;;  %11381 = vmatprep.mubr.msk.bf16.mxu1 %vm1158_vm0, %v17018_v28  ;;  %v17021_v50 = vld [vmem:[#allocation74_spill] sm:$0xff]  ;;  %v17023_v28 = vld [vmem:[#allocation75_spill] sm:$0xff] }
 0x4f9   : > { %v5519_v35 = vpop.f32.mrf.mxu1  ;;  %v5394_v59 = vadd.f32 %v17021_v50, %v14714_v55  ;;  %v5399_v51 = vadd.f32 %v17023_v28, %v14721_v40  ;;  %v17028_v50 = vld [vmem:[#allocation78_spill] sm:$0xff] }
 0x4fa   : > { %17017 = vst [vmem:[#allocation213_spill] sm:$0xff] %v15029_v5  ;;  %v15035_v15 = vadd.f32 %v5519_v35, %v5393_v25  ;;  %v17024_v25 = vld [vmem:[#allocation38_spill] sm:$0xff]  ;;  %v15051_v35 = vpop.f32.mrf.mxu0  ;;  %v5400_v40 = vadd.f32 %v17028_v50, %v14731_v49  ;;  %v17034_v50 = vld [vmem:[#allocation56_spill] sm:$0xff] }
 0x4fb   : > { %v11212_v16 = vpop.f32.mrf.mxu1 }
 0x4fc   : > { %v15041_v7 = vadd.f32 %v11212_v16, %v5396_v13  ;;  %v17027_v13 = vld [vmem:[#allocation77_spill] sm:$0xff]  ;;  %v15063_v28 = vpop.f32.mrf.mxu0 }
 0x4fd   : > { %v5522_v11 = vpop.f32.mrf.mxu1  ;;  %v5397_v55 = vadd.f32 %v17027_v13, %v14726_v22 }
 0x4fe   : > { %v15045_v5 = vadd.f32 %v5522_v11, %v5394_v59 }
 0x4ff   : > { %v11215_v39 = vpop.f32.mrf.mxu1  ;;  %11382 = vmatmul.mubr.msk.bf16.gmra.mxu1 %vm1158_vm0, %v17024_v25 }
 0x500   : > { %17022 = vst [vmem:[#allocation137_spill] sm:$0xff] %v15045_v5  ;;  %v15053_v54 = vadd.f32 %v11215_v39, %v5399_v51  ;;  %11385 = vmatprep.mubr.msk.bf16.mxu1 %vm1158_vm0, %v17026_v12  ;;  %v17029_v51 = vld [vmem:[#allocation80_spill] sm:$0xff]  ;;  %v17031_v12 = vld [vmem:[#allocation81_spill] sm:$0xff] }
 0x501   : > { %v5535_v16 = vpop.f32.mrf.mxu1  ;;  %v5398_v39 = vadd.f32 %v17029_v51, %v14734_v0  ;;  %v5403_v22 = vadd.f32 %v17031_v12, %v14741_v36  ;;  %v17036_v51 = vld [vmem:[#allocation85_spill] sm:$0xff] }
 0x502   : > { %17025 = vst [vmem:[#allocation215_spill] sm:$0xff] %v15053_v54  ;;  %v15059_v11 = vadd.f32 %v5535_v16, %v5397_v55  ;;  %v17032_v55 = vld [vmem:[#allocation44_spill] sm:$0xff]  ;;  %v15075_v16 = vpop.f32.mrf.mxu0  ;;  %v5404_v36 = vadd.f32 %v17036_v51, %v14751_v45  ;;  %v17041_v51 = vld [vmem:[#allocation62_spill] sm:$0xff] }
 0x503   : > { %v11216_v59 = vpop.f32.mrf.mxu1 }
 0x504   : > { %v15065_v25 = vadd.f32 %v11216_v59, %v5400_v40  ;;  %v17035_v40 = vld [vmem:[#allocation83_spill] sm:$0xff]  ;;  %v15087_v12 = vpop.f32.mrf.mxu0 }
 0x505   : > { %v5538_v5 = vpop.f32.mrf.mxu1  ;;  %v5401_v0 = vadd.f32 %v17035_v40, %v14746_v29 }
 0x506   : > { %v15069_v54 = vadd.f32 %v5538_v5, %v5398_v39 }
 0x507   : > { %v11219_v13 = vpop.f32.mrf.mxu1  ;;  %11386 = vmatmul.mubr.msk.bf16.gmra.mxu1 %vm1158_vm0, %v17032_v55 }
 0x508   : > { %17030 = vst [vmem:[#allocation138_spill] sm:$0xff] %v15069_v54  ;;  %v15077_v49 = vadd.f32 %v11219_v13, %v5403_v22  ;;  %11389 = vmatprep.mubr.msk.bf16.mxu1 %vm1158_vm0, %v17034_v50  ;;  %v17037_v22 = vld [vmem:[#allocation86_spill] sm:$0xff]  ;;  %v17038_v50 = vld [vmem:[#allocation88_spill] sm:$0xff] }
 0x509   : > { %v5551_v59 = vpop.f32.mrf.mxu1  ;;  %v5402_v13 = vadd.f32 %v17037_v22, %v14754_v34  ;;  %v5407_v29 = vadd.f32 %v17038_v50, %v14761_v6  ;;  %v17043_v22 = vld [vmem:[#allocation93_spill] sm:$0xff] }
 0x50a   : > { %17033 = vst [vmem:[#allocation216_spill] sm:$0xff] %v15077_v49  ;;  %v15083_v5 = vadd.f32 %v5551_v59, %v5401_v0  ;;  %v17039_v0 = vld [vmem:[#allocation58_spill] sm:$0xff]  ;;  %v15099_v59 = vpop.f32.mrf.mxu0 }
 0x50b   : > { %v11220_v39 = vpop.f32.mrf.mxu1 }
 0x50c   : > { %v15089_v55 = vadd.f32 %v11220_v39, %v5404_v36  ;;  %v17042_v36 = vld [vmem:[#allocation90_spill] sm:$0xff] }
 0x50d   : > { %v5554_v49 = vpop.f32.mrf.mxu1  ;;  %v5405_v34 = vadd.f32 %v17042_v36, %v14766_v47 }
 0x50e   : > { %v15093_v54 = vadd.f32 %v5554_v49, %v5402_v13  ;;  %v11921_v49 = vld [vmem:[%s16462_s3 + $0xa0] sm:$0xff]   ;;  %v5408_v13 = vadd.f32 %v17043_v22, %v14771_v63  ;;  %v11922_v63 = vld [vmem:[%s16462_s3 + $0xd8] sm:$0xff]  }
 0x50f   : > { %v11223_v40 = vpop.f32.mrf.mxu1  ;;  %11390 = vmatmul.mubr.msk.bf16.gmra.mxu1 %vm1158_vm0, %v17039_v0  ;;  %11475 = vmatprep.subr.bf16.mxu1 %v11921_v49  ;;  %v17044_v0 = vld [vmem:[#allocation95_spill] sm:$0xff]  ;;  %v17047_v22 = vld [vmem:[#allocation69_spill] sm:$0xff] }
 0x510   : > { %v15101_v45 = vadd.f32 %v11223_v40, %v5407_v29  ;;  %11393 = vmatprep.mubr.msk.bf16.mxu1 %vm1158_vm0, %v17041_v51  ;;  %11476 = vmatpush3.bf16.msra.mxu1 %v11921_v49  ;;  %v15114_v29 = vpop.f32.mrf.mxu0  ;;  %v5406_v47 = vadd.f32 %v17044_v0, %v14774_v24  ;;  %v17049_v24 = vld [vmem:[#allocation99_spill] sm:$0xff]  ;;  %v17050_v0 = vmov 0.0|0.0  }
 0x511   : > { %v5567_v39 = vpop.f32.mrf.mxu1  ;;  %11553 = vmatprep.subr.bf16.mxu0 %v11922_v63 }
 0x512   : > { %17040 = vst [vmem:[#allocation21_spill] sm:$0xff] %v15101_v45  ;;  %v15110_v6 = vadd.f32 %v5567_v39, %v5405_v34  ;;  %v17046_v45 = vld [vmem:[#allocation97_spill] sm:$0xff]  ;;  %v15129_v49 = vpop.f32.mrf.mxu0  ;;  %11554 = vmatpush3.bf16.msra.mxu0 %v11922_v63 }
 0x513   : > { %v11224_v50 = vpop.f32.mrf.mxu1  ;;  %v5411_v34 = vadd.f32 %v17046_v45, %v14781_v56  ;;  %v17052_v45 = vld [vmem:[#allocation101_spill] sm:$0xff] }
 0x514   : > { %v15116_v40 = vadd.f32 %v11224_v50, %v5408_v13  ;;  %v5409_v50 = vadd.f32 %v17049_v24, %v14786_v33  ;;  %v17055_v63 = vld [vmem:[#allocation105_spill] sm:$0xff] }
 0x515   : > { %v5570_v51 = vpop.f32.mrf.mxu1  ;;  %v5415_v24 = vadd.f32 %v17055_v63, %v14801_v9 }
 0x516   : > { %v15120_v36 = vadd.f32 %v5570_v51, %v5406_v47  ;;  %v5412_v51 = vadd.f32 %v17052_v45, %v14791_v41  ;;  %v17057_v45 = vld [vmem:[#allocation108_spill] sm:$0xff] }
 0x517   : > { %v11227_v39 = vpop.f32.mrf.mxu1  ;;  %11394 = vmatmul.mubr.msk.bf16.gmra.mxu1 %vm1158_vm0, %v17047_v22  ;;  %v11923_v22 = vld [vmem:[%s16462_s3 + $0xd0] sm:$0xff]  }
 0x518   : > { %17045 = vst [vmem:[#allocation140_spill] sm:$0xff] %v15120_v36  ;;  %v15131_v13 = vadd.f32 %v11227_v39, %v5411_v34  ;;  %11397 = vmatprep.mubr.bf16.mxu1 %v17050_v0  ;;  %v15143_v34 = vpop.f32.mrf.mxu0  ;;  %11555 = vmatprep.subr.bf16.mxu0 %v11923_v22 }
 0x519   : > { %v5583_v47 = vpop.f32.mrf.mxu1  ;;  %11556 = vmatpush3.bf16.msra.mxu0 %v11923_v22  ;;  %v17059_v22 = vld [vmem:[#allocation110_spill] sm:$0xff] }
 0x51a   : > { %17048 = vst [vmem:[#allocation218_spill] sm:$0xff] %v15131_v13  ;;  %v15136_v56 = vadd.f32 %v5583_v47, %v5409_v50  ;;  %v15152_v41 = vpop.f32.mrf.mxu0 }
 0x51b   : > { %v11228_v36 = vpop.f32.mrf.mxu1 }
 0x51c   : > { %17051 = vst [vmem:[#allocation24_spill] sm:$0xff] %v15136_v56  ;;  %v15145_v39 = vadd.f32 %v11228_v36, %v5412_v51  ;;  %v5413_v56 = vadd.f32 %v17057_v45, %v14806_v4  ;;  %v15163_v9 = vpop.f32.mrf.mxu0  ;;  %v17063_v45 = vld [vmem:[#allocation116_spill] sm:$0xff] }
 0x51d   : > { %v15147_v33 = vpop.f32.mrf.mxu1 }
 0x51e   : > { %17053 = vst [vmem:[#allocation142_spill] sm:$0xff] %v15145_v39  ;;  %17054 = vst [vmem:[#allocation219_spill] sm:$0xff] %v15147_v33  ;;  %v5416_v39 = vadd.f32 %v17059_v22, %v14811_v42  ;;  %v15172_v4 = vpop.f32.mrf.mxu0  ;;  %v5417_v42 = vadd.f32 %v17063_v45, %v14826_v53 }
 0x51f   : > { %v11231_v50 = vpop.f32.mrf.mxu1  ;;  %11398 = vmatmul.mubr.bf16.gmra.mxu1 %v17050_v0 }
 0x520   : > { %v15154_v47 = vadd.f32 %v11231_v50, %v5415_v24  ;;  %11401 = vmatprep.mubr.bf16.mxu1 %v17050_v0  ;;  %v17061_v24 = vld [vmem:[#allocation114_spill] sm:$0xff] }
 0x521   : > { %v5599_v36 = vpop.f32.mrf.mxu1  ;;  %v5419_v50 = vadd.f32 %v17061_v24, %v14821_v23  ;;  %v15183_v23 = vpop.f32.mrf.mxu0 }
 0x522   : > { %17056 = vst [vmem:[#allocation144_spill] sm:$0xff] %v15154_v47  ;;  %v15159_v51 = vadd.f32 %v5599_v36, %v5413_v56 }
 0x523   : > { %v11232_v13 = vpop.f32.mrf.mxu1  ;;  %v15192_v53 = vpop.f32.mrf.mxu0 }
 0x524   : > { %17058 = vst [vmem:[#allocation221_spill] sm:$0xff] %v15159_v51  ;;  %v15165_v63 = vadd.f32 %v11232_v13, %v5416_v39  ;;  %v17065_v39 = vld [vmem:[#allocation118_spill] sm:$0xff] }
 0x525   : > { %v15167_v33 = vpop.f32.mrf.mxu1  ;;  %v5420_v22 = vadd.f32 %v17065_v39, %v14831_v58 }
 0x526   : > { %17060 = vst [vmem:[#allocation146_spill] sm:$0xff] %v15165_v63 }
 0x527   : > { %v11235_v47 = vpop.f32.mrf.mxu1  ;;  %11402 = vmatmul.mubr.bf16.gmra.mxu1 %v17050_v0 }
 0x528   : > { %v15174_v56 = vadd.f32 %v11235_v47, %v5419_v50  ;;  %11477 = vmatprep.mubr.bf16.mxu1 %v17050_v0  ;;  %v17067_v47 = vld [vmem:[#allocation123_spill] sm:$0xff] }
 0x529   : > { %v5615_v36 = vpop.f32.mrf.mxu1  ;;  %v5423_v50 = vadd.f32 %v17067_v47, %v14841_v46 }
 0x52a   : > { %17062 = vst [vmem:[#allocation222_spill] sm:$0xff] %v15174_v56  ;;  %v15179_v13 = vadd.f32 %v5615_v36, %v5417_v42  ;;  %v17069_v42 = vld [vmem:[#allocation125_spill] sm:$0xff] }
 0x52b   : > { %v11236_v63 = vpop.f32.mrf.mxu1  ;;  %v5421_v58 = vadd.f32 %v17069_v42, %v14846_v37  ;;  %v17075_v42 = vld [vmem:[#allocation134_spill] sm:$0xff] }
 0x52c   : > { %17064 = vst [vmem:[#allocation23_spill] sm:$0xff] %v15179_v13  ;;  %v15185_v24 = vadd.f32 %v11236_v63, %v5420_v22  ;;  %v17070_v63 = vld [vmem:[#allocation128_spill] sm:$0xff]  ;;  %v15202_v13 = vpop.f32.mrf.mxu0 }
 0x52d   : > { %v15187_v51 = vpop.f32.mrf.mxu1  ;;  %v5424_v22 = vadd.f32 %v17070_v63, %v14851_v61  ;;  %v17077_v63 = vld [vmem:[#allocation136_spill] sm:$0xff] }
 0x52e   : > { %17066 = vst [vmem:[#allocation147_spill] sm:$0xff] %v15185_v24 }
 0x52f   : > { %v11239_v56 = vpop.f32.mrf.mxu1  ;;  %11478 = vmatmul.mubr.bf16.vlgmr.msra.gmra.mxu1 %v17050_v0  ;;  %v17073_v0 = vld [vmem:[#allocation132_spill] sm:$0xff] }
 0x530   : > { %v15194_v45 = vadd.f32 %v11239_v56, %v5423_v50  ;;  %v5427_v56 = vadd.f32 %v17073_v0, %v14861_v18  ;;  %v17080_v0 = vld [vmem:[#allocation141_spill] sm:$0xff] }
 0x531   : > { %v5631_v36 = vpop.f32.mrf.mxu1 }
 0x532   : > { %17068 = vst [vmem:[#allocation224_spill] sm:$0xff] %v15194_v45  ;;  %v15198_v39 = vadd.f32 %v5631_v36, %v5421_v58  ;;  %v15210_v45 = vpop.f32.mrf.mxu0  ;;  %v5425_v58 = vadd.f32 %v17075_v42, %v14866_v20  ;;  %v17082_v42 = vld [vmem:[#allocation143_spill] sm:$0xff] }
 0x533   : > { %v11240_v24 = vpop.f32.mrf.mxu1 }
 0x534   : > { %v15204_v46 = vadd.f32 %v11240_v24, %v5424_v22  ;;  %v5428_v24 = vadd.f32 %v17077_v63, %v14871_v31  ;;  %v17084_v63 = vld [vmem:[#allocation145_spill] sm:$0xff] }
 0x535   : > { %v15206_v47 = vpop.f32.mrf.mxu1 }
 0x536   : > { %17071 = vst [vmem:[#allocation27_spill] sm:$0xff] %v15204_v46  ;;  %17072 = vst [vmem:[#allocation149_spill] sm:$0xff] %v15206_v47  ;;  %v15220_v46 = vpop.f32.mrf.mxu0 }
 0x537   : > { %v11243_v50 = vpop.f32.mrf.mxu1 }
 0x538   : > { %v15212_v37 = vadd.f32 %v11243_v50, %v5427_v56  ;;  %v5431_v56 = vadd.f32 %v17080_v0, %v14881_v26  ;;  %v17087_v0 = vld [vmem:[#allocation151_spill] sm:$0xff] }
 0x539   : > { %v5647_v36 = vpop.f32.mrf.mxu1 }
 0x53a   : > { %17074 = vst [vmem:[#allocation225_spill] sm:$0xff] %v15212_v37  ;;  %v15216_v61 = vadd.f32 %v5647_v36, %v5425_v58  ;;  %v15228_v37 = vpop.f32.mrf.mxu0  ;;  %v5429_v58 = vadd.f32 %v17082_v42, %v14886_v60  ;;  %v17089_v42 = vld [vmem:[#allocation152_spill] sm:$0xff] }
 0x53b   : > { %v11244_v22 = vpop.f32.mrf.mxu1 }
 0x53c   : > { %17076 = vst [vmem:[#allocation150_spill] sm:$0xff] %v15216_v61  ;;  %v15222_v47 = vadd.f32 %v11244_v22, %v5428_v24  ;;  %v5432_v24 = vadd.f32 %v17084_v63, %v14891_v38  ;;  %v17091_v63 = vld [vmem:[#allocation153_spill] sm:$0xff] }
 0x53d   : > { %v15224_v18 = vpop.f32.mrf.mxu1 }
 0x53e   : > { %17078 = vst [vmem:[#allocation226_spill] sm:$0xff] %v15222_v47  ;;  %17079 = vst [vmem:[#allocation158_spill] sm:$0xff] %v15224_v18  ;;  %v15238_v47 = vpop.f32.mrf.mxu0  ;;  %v17137_v18 = vld [vmem:[#allocation196_spill] sm:$0xff] }
 0x53f   : > { %v11247_v50 = vpop.f32.mrf.mxu1 }
 0x540   : > { %v15230_v20 = vadd.f32 %v11247_v50, %v5431_v56  ;;  %v5435_v56 = vadd.f32 %v17087_v0, %v14901_v27  ;;  %v17094_v0 = vld [vmem:[#allocation155_spill] sm:$0xff] }
 0x541   : > { %v5663_v36 = vpop.f32.mrf.mxu1 }
 0x542   : > { %17081 = vst [vmem:[#allocation164_spill] sm:$0xff] %v15230_v20  ;;  %v15234_v31 = vadd.f32 %v5663_v36, %v5429_v58  ;;  %v15246_v20 = vpop.f32.mrf.mxu0  ;;  %v5433_v58 = vadd.f32 %v17089_v42, %v14906_v62  ;;  %v17096_v42 = vld [vmem:[#allocation156_spill] sm:$0xff] }
 0x543   : > { %v11248_v22 = vpop.f32.mrf.mxu1 }
 0x544   : > { %17083 = vst [vmem:[#allocation36_spill] sm:$0xff] %v15234_v31  ;;  %v15240_v61 = vadd.f32 %v11248_v22, %v5432_v24  ;;  %v5436_v24 = vadd.f32 %v17091_v63, %v14911_v14  ;;  %v17098_v63 = vld [vmem:[#allocation157_spill] sm:$0xff] }
 0x545   : > { %v15242_v26 = vpop.f32.mrf.mxu1 }
 0x546   : > { %17085 = vst [vmem:[#allocation37_spill] sm:$0xff] %v15240_v61  ;;  %17086 = vst [vmem:[#allocation39_spill] sm:$0xff] %v15242_v26  ;;  %v15256_v61 = vpop.f32.mrf.mxu0  ;;  %v17132_v26 = vld [vmem:[#allocation191_spill] sm:$0xff] }
 0x547   : > { %v11251_v50 = vpop.f32.mrf.mxu1 }
 0x548   : > { %v15248_v60 = vadd.f32 %v11251_v50, %v5435_v56  ;;  %v5439_v56 = vadd.f32 %v17094_v0, %v14924_v32  ;;  %v17101_v0 = vld [vmem:[#allocation205_spill] sm:$0xff] }
 0x549   : > { %v5679_v36 = vpop.f32.mrf.mxu1 }
 0x54a   : > { %17088 = vst [vmem:[#allocation178_spill] sm:$0xff] %v15248_v60  ;;  %v15252_v38 = vadd.f32 %v5679_v36, %v5433_v58  ;;  %v15264_v60 = vpop.f32.mrf.mxu0  ;;  %v5437_v58 = vadd.f32 %v17096_v42, %v14929_v44  ;;  %v17104_v42 = vld [vmem:[#allocation161_spill] sm:$0xff] }
 0x54b   : > { %v11252_v22 = vpop.f32.mrf.mxu1 }
 0x54c   : > { %17090 = vst [vmem:[#allocation40_spill] sm:$0xff] %v15252_v38  ;;  %v15258_v31 = vadd.f32 %v11252_v22, %v5436_v24  ;;  %v5440_v24 = vadd.f32 %v17098_v63, %v14934_v17  ;;  %v11924_v17 = vld [vmem:[%s16462_s3 + $0x98] sm:$0xff]  }
 0x54d   : > { %v15260_v27 = vpop.f32.mrf.mxu1  ;;  %11493 = vmatprep.subr.bf16.mxu1 %v11924_v17 }
 0x54e   : > { %17092 = vst [vmem:[#allocation42_spill] sm:$0xff] %v15258_v31  ;;  %17093 = vst [vmem:[#allocation43_spill] sm:$0xff] %v15260_v27  ;;  %v15274_v31 = vpop.f32.mrf.mxu0  ;;  %v17102_v27 = vld [vmem:[#allocation160_spill] sm:$0xff]  ;;  %11494 = vmatpush3.bf16.msra.mxu1 %v11924_v17  ;;  %v17114_v17 = vld [vmem:[#allocation174_spill] sm:$0xff] }
 0x54f   : > { %v11255_v50 = vpop.f32.mrf.mxu1 }
 0x550   : > { %v15266_v62 = vadd.f32 %v11255_v50, %v5439_v56  ;;  %v5443_v56 = vadd.f32 %v17102_v27, %v17101_v0 }
 0x551   : > { %v5695_v36 = vpop.f32.mrf.mxu1 }
 0x552   : > { %17095 = vst [vmem:[#allocation45_spill] sm:$0xff] %v15266_v62  ;;  %v15270_v14 = vadd.f32 %v5695_v36, %v5437_v58  ;;  %v15282_v62 = vpop.f32.mrf.mxu0  ;;  %v5441_v58 = vadd.f32 %v17104_v42, %v14949_v8  ;;  %v17110_v8 = vld [vmem:[#allocation168_spill] sm:$0xff] }
 0x553   : > { %v11256_v22 = vpop.f32.mrf.mxu1  ;;  %v5447_v42 = vadd.f32 %v17110_v8, %v14964_v1 }
 0x554   : > { %17097 = vst [vmem:[#allocation46_spill] sm:$0xff] %v15270_v14  ;;  %v15276_v38 = vadd.f32 %v11256_v22, %v5440_v24  ;;  %v17106_v24 = vld [vmem:[#allocation124_spill] sm:$0xff]  ;;  %v17107_v22 = vld [vmem:[#allocation162_spill] sm:$0xff]  ;;  %v15295_v0 = vpop.f32.mrf.mxu0 }
 0x555   : > { %v15278_v32 = vpop.f32.mrf.mxu1 }
 0x556   : > { %17099 = vst [vmem:[#allocation208_spill] sm:$0xff] %v15276_v38  ;;  %17100 = vst [vmem:[#allocation47_spill] sm:$0xff] %v15278_v32  ;;  %v5444_v38 = vadd.f32 %v17107_v22, %v17106_v24  ;;  %v15303_v32 = vpop.f32.mrf.mxu0 }
 0x557   : > { %v11259_v50 = vpop.f32.mrf.mxu1 }
 0x558   : > { %v15284_v44 = vadd.f32 %v11259_v50, %v5443_v56  ;;  %v15316_v1 = vpop.f32.mrf.mxu0 }
 0x559   : > { %v5711_v36 = vpop.f32.mrf.mxu1 }
 0x55a   : > { %17103 = vst [vmem:[#allocation7_spill] sm:$0xff] %v15284_v44  ;;  %v15291_v63 = vadd.f32 %v5711_v36, %v5441_v58  ;;  %v17112_v36 = vld [vmem:[#allocation171_spill] sm:$0xff] }
 0x55b   : > { %v11260_v27 = vpop.f32.mrf.mxu1  ;;  %v5445_v24 = vadd.f32 %v17112_v36, %v14969_v3  ;;  %v17117_v3 = vld [vmem:[#allocation181_spill] sm:$0xff] }
 0x55c   : > { %17105 = vst [vmem:[#allocation8_spill] sm:$0xff] %v15291_v63  ;;  %v15297_v56 = vadd.f32 %v11260_v27, %v5444_v38  ;;  %v5448_v38 = vadd.f32 %v17114_v17, %v14974_v21  ;;  %v11925_v27 = vld [vmem:[%s16462_s3 + $0x90] sm:$0xff]  }
 0x55d   : > { %v15299_v50 = vpop.f32.mrf.mxu1  ;;  %11495 = vmatprep.subr.bf16.mxu1 %v11925_v27 }
 0x55e   : > { %17108 = vst [vmem:[#allocation9_spill] sm:$0xff] %v15297_v56  ;;  %17109 = vst [vmem:[#allocation11_spill] sm:$0xff] %v15299_v50  ;;  %11496 = vmatpush3.bf16.msra.mxu1 %v11925_v27 }
 0x55f   : > { %v11263_v44 = vpop.f32.mrf.mxu1 }
 0x560   : > { %v15305_v58 = vadd.f32 %v11263_v44, %v5447_v42  ;;  %v5451_v42 = vadd.f32 %v17117_v3, %v14984_v2 }
 0x561   : > { %v5727_v22 = vpop.f32.mrf.mxu1 }
 0x562   : > { %17111 = vst [vmem:[#allocation50_spill] sm:$0xff] %v15305_v58  ;;  %v15309_v63 = vadd.f32 %v5727_v22, %v5445_v24  ;;  %v15324_v24 = vpop.f32.mrf.mxu0  ;;  %v17120_v22 = vld [vmem:[#allocation182_spill] sm:$0xff] }
 0x563   : > { %v11264_v56 = vpop.f32.mrf.mxu1  ;;  %17118 = vst [vmem:[#allocation13_spill] sm:$0xff] %v15324_v24  ;;  %v5449_v17 = vadd.f32 %v17120_v22, %v14989_v43 }
 0x564   : > { %17113 = vst [vmem:[#allocation12_spill] sm:$0xff] %v15309_v63  ;;  %v15318_v8 = vadd.f32 %v11264_v56, %v5448_v38  ;;  %v17122_v56 = vld [vmem:[#allocation183_spill] sm:$0xff] }
 0x565   : > { %v15320_v44 = vpop.f32.mrf.mxu1  ;;  %v5452_v38 = vadd.f32 %v17122_v56, %v14994_v52  ;;  %v17131_v56 = vld [vmem:[#allocation189_spill] sm:$0xff] }
 0x566   : > { %17115 = vst [vmem:[#allocation52_spill] sm:$0xff] %v15318_v8  ;;  %17116 = vst [vmem:[#allocation53_spill] sm:$0xff] %v15320_v44  ;;  %v15334_v44 = vpop.f32.mrf.mxu0 }
 0x567   : > { %v11267_v36 = vpop.f32.mrf.mxu1  ;;  %17123 = vst [vmem:[#allocation17_spill] sm:$0xff] %v15334_v44 }
 0x568   : > { %v15326_v21 = vadd.f32 %v11267_v36, %v5451_v42  ;;  %v15340_v50 = vpop.f32.mrf.mxu0  ;;  %v17127_v36 = vld [vmem:[#allocation19_spill] sm:$0xff] }
 0x569   : > { %v5743_v63 = vpop.f32.mrf.mxu1  ;;  %17126 = vst [vmem:[#allocation20_spill] sm:$0xff] %v15340_v50 }
 0x56a   : > { %17119 = vst [vmem:[#allocation55_spill] sm:$0xff] %v15326_v21  ;;  %v15330_v58 = vadd.f32 %v5743_v63, %v5449_v17  ;;  %v17128_v21 = vld [vmem:[#allocation187_spill] sm:$0xff]  ;;  %v17129_v63 = vld [vmem:[#allocation188_spill] sm:$0xff] }
 0x56b   : > { %v11268_v8 = vpop.f32.mrf.mxu1  ;;  %v6125_v43 = vadd.f32 %v17128_v21, %v17127_v36  ;;  %v6123_v22 = vadd.f32 %v17129_v63, %v15011_v10  ;;  %v6124_v21 = vadd.f32 %v17132_v26, %v15021_v30 }
 0x56c   : > { %17121 = vst [vmem:[#allocation15_spill] sm:$0xff] %v15330_v58  ;;  %v15336_v27 = vadd.f32 %v11268_v8, %v5452_v38  ;;  %v15346_v58 = vpop.f32.mrf.mxu0  ;;  %v6126_v8 = vadd.f32 %v17131_v56, %v15017_v19  ;;  %v15361_v19 = vld [vmem:[%s16463_s4 + $0x1] ss:$0 sm:$0xff] }
 0x56d   : > { %v15338_v2 = vpop.f32.mrf.mxu1  ;;  %17130 = vst [vmem:[#allocation167_spill] sm:$0xff] %v15346_v58  ;;  %v17145_v58 = vld [vmem:[#allocation137_spill] sm:$0xff] }
 0x56e   : > { %17124 = vst [vmem:[#allocation59_spill] sm:$0xff] %v15336_v27  ;;  %17125 = vst [vmem:[#allocation18_spill] sm:$0xff] %v15338_v2  ;;  %v11926_v2 = vld [vmem:[%s16462_s3 + $0xb8] sm:$0xff]   ;;  %v15355_v10 = vpop.f32.mrf.mxu0 }
 0x56f   : > { %v11343_v3 = vpop.f32.mrf.mxu1  ;;  %11513 = vmatprep.subr.bf16.mxu1 %v11926_v2  ;;  %17133 = vst [vmem:[#allocation22_spill] sm:$0xff] %v15355_v10 }
 0x570   : > { %v6490_v52 = vadd.f32 %v11343_v3, %v6125_v43  ;;  %v17134_v43 = vld [vmem:[#allocation213_spill] sm:$0xff] }
 0x571   : > { %v6233_v42 = vpop.f32.mrf.mxu1 }
 0x572   : > { %v6488_v38 = vadd.f32 %v6233_v42, %v6123_v22  ;;  %v6855_v63 = vadd.f32 %v15027_v57, %v6490_v52  ;;  %v17135_v22 = vld [vmem:[#allocation193_spill] sm:$0xff] }
 0x573   : > { %v11344_v17 = vpop.f32.mrf.mxu1 }
 0x574   : > { %v6491_v14 = vadd.f32 %v11344_v17, %v6126_v8  ;;  %v6853_v3 = vadd.f32 %v15039_v48, %v6488_v38  ;;  %v6129_v17 = vadd.f32 %v17135_v22, %v17134_v43  ;;  %v15367_v8 = vpop.f32.mrf.mxu0  ;;  %v6924_v57 = vadd.f32 %v15361_v19, %v6855_v63  ;;  %v17139_v43 = vld [vmem:[#allocation190_spill] sm:$0xff]  ;;  %v17140_v22 = vld [vmem:[#allocation103_spill] sm:$0xff] }
 0x575   : > { %v6236_v27 = vpop.f32.mrf.mxu1  ;;  %17136 = vst [vmem:[#allocation64_spill] sm:$0xff] %v15367_v8  ;;  %v6127_v48 = vadd.f32 %v17137_v18, %v15035_v15  ;;  %v17144_v8 = vld [vmem:[#allocation203_spill] sm:$0xff] }
 0x576   : > { %v6489_v42 = vadd.f32 %v6236_v27, %v6124_v21  ;;  %v6856_v30 = vadd.f32 %v15051_v35, %v6491_v14  ;;  %v6922_v52 = vadd.f32 %v15361_v19, %v6853_v3  ;;  %v17138_v27 = vld [vmem:[#allocation199_spill] sm:$0xff]  ;;  %v15378_v35 = vadd.f32 %v17140_v22, %v17139_v43  ;;  %v17141_v14 = vld [vmem:[#allocation104_spill] sm:$0xff]  ;;  %v15390_v44 = vpop.f32.mrf.mxu0 }
 0x577   : > { %v11347_v36 = vpop.f32.mrf.mxu1  ;;  %v6130_v38 = vadd.f32 %v17138_v27, %v15041_v7  ;;  %v17143_v3 = vld [vmem:[#allocation215_spill] sm:$0xff]  ;;  %v17146_v7 = vld [vmem:[#allocation202_spill] sm:$0xff]  ;;  %v6988_v43 = vmax.f32 %v6924_v57, 0.0  ;;  %v17151_v57 = vld [vmem:[#allocation216_spill] sm:$0xff] }
 0x578   : > { %v6494_v26 = vadd.f32 %v11347_v36, %v6129_v17  ;;  %v6854_v10 = vadd.f32 %v15063_v28, %v6489_v42  ;;  %v17142_v36 = vld [vmem:[#allocation112_spill] sm:$0xff]  ;;  %v6925_v63 = vadd.f32 %v15361_v19, %v6856_v30  ;;  %v6133_v28 = vadd.f32 %v17144_v8, %v17143_v3  ;;  %v17148_v30 = vld [vmem:[#allocation209_spill] sm:$0xff]  ;;  %v17150_v8 = vld [vmem:[#allocation211_spill] sm:$0xff] }
 0x579   : > { %v6249_v56 = vpop.f32.mrf.mxu1  ;;  %v15382_v17 = vadd.f32 %v17142_v36, %v17141_v14  ;;  %v6128_v27 = vadd.f32 %v17146_v7, %v17145_v58  ;;  %v17147_v14 = vld [vmem:[#allocation206_spill] sm:$0xff]  ;;  %v6134_v24 = vadd.f32 %v17148_v30, %v15065_v25  ;;  %v17153_v25 = vld [vmem:[#allocation217_spill] sm:$0xff]  ;;  %v17154_v7 = vld [vmem:[#allocation220_spill] sm:$0xff] }
 0x57a   : > { %v6859_v42 = vadd.f32 %v15075_v16, %v6494_v26  ;;  %v6492_v15 = vadd.f32 %v6249_v56, %v6127_v48  ;;  %v6131_v36 = vadd.f32 %v17147_v14, %v15059_v11  ;;  %v15399_v16 = vld [vmem:[%s16462_s3 + $0xf8] sm:$0xff]   ;;  %v6986_v56 = vmax.f32 %v6922_v52, 0.0 }
 0x57b   : > { %v11348_v2 = vpop.f32.mrf.mxu1  ;;  %v6923_v26 = vadd.f32 %v15361_v19, %v6854_v10  ;;  %v6989_v3 = vmax.f32 %v6925_v63, 0.0  ;;  %v6138_v14 = vadd.f32 %v17154_v7, %v15089_v55  ;;  %11593 = vmatprep.subr.bf16.mxu0 %v15399_v16 }
 0x57c   : > { %v6495_v18 = vadd.f32 %v11348_v2, %v6130_v38  ;;  %v17149_v2 = vld [vmem:[#allocation138_spill] sm:$0xff]  ;;  %v6928_v10 = vadd.f32 %v15361_v19, %v6859_v42  ;;  %v6857_v52 = vadd.f32 %v15087_v12, %v6492_v15 }
 0x57d   : > { %v6252_v21 = vpop.f32.mrf.mxu1  ;;  %v6132_v48 = vadd.f32 %v17150_v8, %v17149_v2 }
 0x57e   : > { %v6860_v30 = vadd.f32 %v15099_v59, %v6495_v18  ;;  %v6493_v42 = vadd.f32 %v6252_v21, %v6128_v27  ;;  %v7059_v59 = vsel %vm1158_vm0, %v6989_v3, -inf }
 0x57f   : > { %v11351_v50 = vpop.f32.mrf.mxu1 }
 0x580   : > { %v6498_v22 = vadd.f32 %v11351_v50, %v6133_v28  ;;  %v17152_v50 = vld [vmem:[#allocation214_spill] sm:$0xff]  ;;  %v6135_v28 = vadd.f32 %v17153_v25, %v15083_v5  ;;  %v6987_v25 = vmax.f32 %v6923_v26, 0.0 }
 0x581   : > { %v6265_v58 = vpop.f32.mrf.mxu1  ;;  %v6137_v38 = vadd.f32 %v17152_v50, %v17151_v57  ;;  %v15415_v57 = vpop.f32.mrf.mxu0  ;;  %v7050_v50 = vsel %vm1158_vm0, %v6986_v56, -inf }
 0x582   : > { %v6863_v11 = vadd.f32 %v15129_v49, %v6498_v22  ;;  %v6496_v2 = vadd.f32 %v6265_v58, %v6131_v36  ;;  %v7056_v49 = vsel %vm1158_vm0, %v6988_v43, -inf  ;;  %v17155_v22 = vld [vmem:[#allocation223_spill] sm:$0xff]  ;;  %v6992_v43 = vmax.f32 %v6928_v10, 0.0 }
 0x583   : > { %v11352_v8 = vpop.f32.mrf.mxu1  ;;  %v6136_v55 = vadd.f32 %v17155_v22, %v15093_v54  ;;  %v15430_v26 = vpop.f32.mrf.mxu0 }
 0x584   : > { %v6932_v63 = vadd.f32 %v15361_v19, %v6863_v11  ;;  %v6499_v5 = vadd.f32 %v11352_v8, %v6134_v24  ;;  %v6861_v12 = vadd.f32 %v15143_v34, %v6496_v2  ;;  %v6926_v11 = vadd.f32 %v15361_v19, %v6857_v52 }
 0x585   : > { %v6268_v15 = vpop.f32.mrf.mxu1  ;;  %v15427_v24 = vadd.f32 %v15361_v19, %v6860_v30 }
 0x586   : > { %v6996_v18 = vmax.f32 %v6932_v63, 0.0  ;;  %v6864_v36 = vadd.f32 %v15152_v41, %v6499_v5  ;;  %v6497_v58 = vadd.f32 %v6268_v15, %v6132_v48  ;;  %v6930_v54 = vadd.f32 %v15361_v19, %v6861_v12  ;;  %v15444_v12 = vpop.f32.mrf.mxu0 }
 0x587   : > { %v11355_v56 = vpop.f32.mrf.mxu1  ;;  %v7053_v41 = vsel %vm1158_vm0, %v6987_v25, -inf  ;;  %v6858_v48 = vadd.f32 %v15114_v29, %v6493_v42  ;;  %v15440_v5 = vsel %vm1158_vm0, %v6992_v43, -inf  ;;  %v6990_v22 = vmax.f32 %v6926_v11, 0.0 }
 0x588   : > { %v7057_v34 = vsel %vm1158_vm0, %v6996_v18, -inf  ;;  %v6933_v21 = vadd.f32 %v15361_v19, %v6864_v36  ;;  %v6862_v27 = vadd.f32 %v15163_v9, %v6497_v58  ;;  %v6502_v3 = vadd.f32 %v11355_v56, %v6137_v38 }
 0x589   : > { %v7058_v7 = vmax.f32 %v7056_v49, %v7057_v34  ;;  %v6994_v10 = vmax.f32 %v6930_v54, 0.0  ;;  %v6281_v52 = vpop.f32.mrf.mxu1  ;;  %v6993_v9 = vmax.f32 %v15427_v24, 0.0 }
 0x58a   : > { %v6997_v30 = vmax.f32 %v6933_v21, 0.0  ;;  %v6931_v2 = vadd.f32 %v15361_v19, %v6862_v27  ;;  %v6867_v8 = vadd.f32 %v15172_v4, %v6502_v3  ;;  %v6500_v63 = vadd.f32 %v6281_v52, %v6135_v28  ;;  %v15455_v3 = vpop.f32.mrf.mxu0 }
 0x58b   : > { %v7051_v38 = vsel %vm1158_vm0, %v6994_v10, -inf  ;;  %v11356_v25 = vpop.f32.mrf.mxu1  ;;  %v6927_v4 = vadd.f32 %v15361_v19, %v6858_v48  ;;  %v7149_v43 = vsel %vm1158_vm0, %v7058_v7, -inf }
 0x58c   : > { %v7052_v29 = vmax.f32 %v7050_v50, %v7051_v38  ;;  %v7060_v49 = vsel %vm1158_vm0, %v6997_v30, -inf  ;;  %v6995_v42 = vmax.f32 %v6931_v2, 0.0  ;;  %v6936_v15 = vadd.f32 %v15361_v19, %v6867_v8  ;;  %v17156_v2 = vld [vmem:[#allocation21_spill] sm:$0xff]  ;;  %v17157_v8 = vld [vmem:[#allocation48_spill] sm:$0xff] }
 0x58d   : > { %v7061_v28 = vmax.f32 %v7059_v59, %v7060_v49  ;;  %v6865_v18 = vadd.f32 %v15183_v23, %v6500_v63  ;;  %v6503_v36 = vadd.f32 %v11356_v25, %v6138_v14  ;;  %v6284_v58 = vpop.f32.mrf.mxu1  ;;  %v6991_v30 = vmax.f32 %v6927_v4, 0.0 }
 0x58e   : > { %v7054_v11 = vsel %vm1158_vm0, %v6995_v42, -inf  ;;  %v7000_v24 = vmax.f32 %v6936_v15, 0.0  ;;  %v6501_v54 = vadd.f32 %v6284_v58, %v6136_v55  ;;  %v7146_v23 = vsel %vm1158_vm0, %v7052_v29, -inf  ;;  %v15472_v15 = vpop.f32.mrf.mxu0 }
 0x58f   : > { %v7150_v50 = vsel %vm1158_vm0, %v7061_v28, -inf  ;;  %v7055_v56 = vmax.f32 %v7053_v41, %v7054_v11  ;;  %v6934_v34 = vadd.f32 %v15361_v19, %v6865_v18  ;;  %v6868_v21 = vadd.f32 %v15192_v53, %v6503_v36  ;;  %v11359_v27 = vpop.f32.mrf.mxu1  ;;  %v17159_v36 = vld [vmem:[#allocation54_spill] sm:$0xff] }
 0x590   : > { %v7069_v14 = vsel %vm1158_vm0, %v7000_v24, -inf  ;;  %v6866_v59 = vadd.f32 %v15202_v13, %v6501_v54  ;;  %v7151_v48 = vmax.f32 %v7149_v43, %v7150_v50  ;;  %v6141_v63 = vadd.f32 %v17157_v8, %v17156_v2  ;;  %v17161_v24 = vld [vmem:[#allocation57_spill] sm:$0xff] }
 0x591   : > { %v7070_v7 = vmax.f32 %v15440_v5, %v7069_v14  ;;  %v6998_v55 = vmax.f32 %v6934_v34, 0.0  ;;  %v6937_v10 = vadd.f32 %v15361_v19, %v6868_v21  ;;  %v6297_v41 = vpop.f32.mrf.mxu1  ;;  %v7147_v52 = vsel %vm1158_vm0, %v7055_v56, -inf  ;;  %v17158_v5 = vld [vmem:[#allocation51_spill] sm:$0xff] }
 0x592   : > { %v6935_v53 = vadd.f32 %v15361_v19, %v6866_v59  ;;  %v15466_v38 = vmax.f32 %v7146_v23, %v7147_v52  ;;  %v7062_v25 = vsel %vm1158_vm0, %v6990_v22, -inf  ;;  %v6139_v49 = vadd.f32 %v17158_v5, %v15110_v6  ;;  %v17160_v22 = vld [vmem:[#allocation140_spill] sm:$0xff]  ;;  %v17165_v5 = vld [vmem:[#allocation194_spill] sm:$0xff] }
 0x593   : > { %v7063_v13 = vsel %vm1158_vm0, %v6998_v55, -inf  ;;  %v7001_v29 = vmax.f32 %v6937_v10, 0.0  ;;  %v11360_v42 = vpop.f32.mrf.mxu1  ;;  %v6506_v18 = vadd.f32 %v11359_v27, %v6141_v63  ;;  %v6142_v58 = vadd.f32 %v17159_v36, %v15116_v40  ;;  %v17162_v27 = vld [vmem:[#allocation219_spill] sm:$0xff] }
 0x594   : > { %v7064_v28 = vmax.f32 %v7062_v25, %v7063_v13  ;;  %v6999_v4 = vmax.f32 %v6935_v53, 0.0  ;;  %v7071_v43 = vsel %vm1158_vm0, %v6993_v9, -inf  ;;  %v6140_v54 = vadd.f32 %v17161_v24, %v17160_v22  ;;  %v17163_v9 = vld [vmem:[#allocation218_spill] sm:$0xff]  ;;  %v17164_v55 = vld [vmem:[#allocation163_spill] sm:$0xff]  ;;  %v15488_v53 = vpop.f32.mrf.mxu0  ;;  %v17171_v24 = vld [vmem:[#allocation24_spill] sm:$0xff] }
 0x595   : > { %v7072_v11 = vsel %vm1158_vm0, %v7001_v29, -inf  ;;  %v6300_v50 = vpop.f32.mrf.mxu1  ;;  %v7237_v56 = vpack.c.bf16 %v7151_v48, %v15466_v38  ;;  %v7065_v6 = vsel %vm1158_vm0, %v6991_v30, -inf  ;;  %v6504_v23 = vadd.f32 %v6297_v41, %v6139_v49  ;;  %v17166_v49 = vld [vmem:[#allocation120_spill] sm:$0xff] }
 0x596   : > { %v7073_v34 = vmax.f32 %v7071_v43, %v7072_v11  ;;  %v7066_v21 = vsel %vm1158_vm0, %v6999_v4, -inf  ;;  %v5779_v14 = vadd.f32 %v17162_v27, %v15378_v35  ;;  %v6507_v59 = vadd.f32 %v11360_v42, %v6142_v58  ;;  %v17167_v4 = vld [vmem:[#allocation109_spill] sm:$0xff]  ;;  %v17170_v43 = vld [vmem:[#allocation139_spill] sm:$0xff] }
 0x597   : > { %v7067_v40 = vmax.f32 %v7065_v6, %v7066_v21  ;;  %11481 = vmatprep.mubr.msk.bf16.mxu1 %vm1158_vm0, %v7237_v56  ;;  %v6145_v10 = vadd.f32 %v17164_v55, %v17163_v9  ;;  %v11363_v52 = vpop.f32.mrf.mxu1  ;;  %v7155_v2 = vsel %vm1158_vm0, %v7070_v7, -inf  ;;  %v7152_v30 = vsel %vm1158_vm0, %v7064_v28, -inf  ;;  %11557 = vmatprep.mubr.msk.bf16.mxu0 %vm1158_vm0, %v7237_v56  ;;  %v17168_v7 = vld [vmem:[#allocation130_spill] sm:$0xff]  ;;  %v15512_v6 = vpop.f32.mrf.mxu0 }
 0x598   : > { %v7156_v8 = vsel %vm1158_vm0, %v7073_v34, -inf  ;;  %v6871_v41 = vadd.f32 %v15210_v45, %v6506_v18  ;;  %v6505_v25 = vadd.f32 %v6300_v50, %v6140_v54  ;;  %v5418_v42 = vadd.f32 %v17166_v49, %v17165_v5  ;;  %v17169_v18 = vld [vmem:[#allocation198_spill] sm:$0xff]  ;;  %v17172_v54 = vld [vmem:[#allocation165_spill] sm:$0xff]  ;;  %v17182_v5 = vld [vmem:[#allocation176_spill] sm:$0xff] }
 0x599   : > { %v15495_v35 = vmax.f32 %v7155_v2, %v7156_v8  ;;  %v7153_v63 = vsel %vm1158_vm0, %v7067_v40, -inf  ;;  %v6510_v13 = vadd.f32 %v11363_v52, %v6145_v10  ;;  %v6313_v29 = vpop.f32.mrf.mxu1  ;;  %v5422_v36 = vadd.f32 %v17168_v7, %v17167_v4  ;;  %v11929_v10 = vld [vmem:[%s16462_s3 + $0xf0] sm:$0xff]   ;;  %v17176_v52 = vld [vmem:[#allocation144_spill] sm:$0xff]  ;;  %v17178_v8 = vld [vmem:[#allocation221_spill] sm:$0xff] }
 0x59a   : > { %v7154_v28 = vmax.f32 %v7152_v30, %v7153_v63  ;;  %v6869_v58 = vadd.f32 %v15220_v46, %v6504_v23  ;;  %v5783_v45 = vadd.f32 %v15167_v33, %v15382_v17  ;;  %v15507_v11 = vadd.f32 %v17170_v43, %v17169_v18  ;;  %v17173_v46 = vld [vmem:[#allocation142_spill] sm:$0xff]  ;;  %v17174_v23 = vld [vmem:[#allocation60_spill] sm:$0xff]  ;;  %v17175_v33 = vld [vmem:[#allocation169_spill] sm:$0xff] }
 0x59b   : > { %v6872_v22 = vadd.f32 %v15228_v37, %v6507_v59  ;;  %v6143_v50 = vadd.f32 %v17172_v54, %v17171_v24  ;;  %v11364_v56 = vpop.f32.mrf.mxu1  ;;  %v6940_v34 = vadd.f32 %v15361_v19, %v6871_v41  ;;  %v6146_v27 = vadd.f32 %v17174_v23, %v17173_v46  ;;  %v17177_v2 = vld [vmem:[#allocation170_spill] sm:$0xff]  ;;  %v17181_v63 = vld [vmem:[#allocation175_spill] sm:$0xff]  ;;  %v17186_v43 = vld [vmem:[#allocation180_spill] sm:$0xff] }
 0x59c   : > { %v15515_v21 = vpack.c.bf16 %v7154_v28, %v7151_v48  ;;  %v6144_v17 = vadd.f32 %v17175_v33, %v5779_v14  ;;  %v5787_v40 = vadd.f32 %v15187_v51, %v5418_v42  ;;  %v6870_v9 = vadd.f32 %v15238_v47, %v6505_v25  ;;  %v17179_v14 = vld [vmem:[#allocation73_spill] sm:$0xff]  ;;  %v17180_v51 = vld [vmem:[#allocation146_spill] sm:$0xff]  ;;  %v15538_v42 = vpop.f32.mrf.mxu0  ;;  %v17185_v18 = vld [vmem:[#allocation23_spill] sm:$0xff] }
 0x59d   : > { %v6875_v37 = vadd.f32 %v15246_v20, %v6510_v13  ;;  %v6316_v59 = vpop.f32.mrf.mxu1  ;;  %v7238_v55 = vpack.c.bf16 %v15495_v35, %v7154_v28  ;;  %v6938_v48 = vadd.f32 %v15361_v19, %v6869_v58  ;;  %v6149_v30 = vadd.f32 %v17177_v2, %v17176_v52  ;;  %v17183_v7 = vld [vmem:[#allocation222_spill] sm:$0xff]  ;;  %v17184_v28 = vld [vmem:[#allocation84_spill] sm:$0xff]  ;;  %v17187_v54 = vld [vmem:[#allocation147_spill] sm:$0xff] }
 0x59e   : > { %v6147_v41 = vadd.f32 %v17179_v14, %v17178_v8  ;;  %v6150_v47 = vadd.f32 %v17181_v63, %v17180_v51  ;;  %v6941_v20 = vadd.f32 %v15361_v19, %v6872_v22  ;;  %v6508_v25 = vadd.f32 %v6313_v29, %v6143_v50  ;;  %v17188_v46 = vld [vmem:[#allocation87_spill] sm:$0xff]  ;;  %v17189_v33 = vld [vmem:[#allocation49_spill] sm:$0xff]  ;;  %v17190_v8 = vld [vmem:[#allocation224_spill] sm:$0xff] }
 0x59f   : > { %11482 = vmatmul.mubr.msk.bf16.gmra.mxu1 %vm1158_vm0, %v7238_v55  ;;  %11558 = vmatmul.mubr.msk.bf16.vlgmr.msra.gmra.mxu0 %vm1158_vm0, %v7238_v55  ;;  %v11367_v13 = vpop.f32.mrf.mxu1  ;;  %v6148_v49 = vadd.f32 %v17182_v5, %v5783_v45  ;;  %v7004_v4 = vmax.f32 %v6940_v34, 0.0  ;;  %v6153_v58 = vadd.f32 %v17184_v28, %v17183_v7  ;;  %v6151_v24 = vadd.f32 %v17186_v43, %v17185_v18  ;;  %v15555_v34 = vld [vmem:[%s16462_s3 + $0x118] sm:$0xff]   ;;  %v17191_v14 = vld [vmem:[#allocation89_spill] sm:$0xff]  ;;  %v15567_v5 = vpop.f32.mrf.mxu0 }
 0x5a0   : > { %v6154_v22 = vadd.f32 %v17188_v46, %v17187_v54  ;;  %11594 = vmatpush3.bf16.msra.mxu0 %v15399_v16  ;;  %v6939_v29 = vadd.f32 %v15361_v19, %v6870_v9  ;;  %v6944_v50 = vadd.f32 %v15361_v19, %v6875_v37  ;;  %v6514_v23 = vadd.f32 %v11367_v13, %v6149_v30  ;;  %v17192_v9 = vld [vmem:[#allocation91_spill] sm:$0xff]  ;;  %v17193_v7 = vld [vmem:[#allocation149_spill] sm:$0xff] }
 0x5a1   : > { %v6329_v45 = vpop.f32.mrf.mxu1  ;;  %v15550_v55 = vadd.f32 %v17189_v33, %v5787_v40  ;;  %11595 = vmatprep.subr.bf16.mxu0 %v11929_v10  ;;  %v7002_v52 = vmax.f32 %v6938_v48, 0.0  ;;  %v15559_v16 = vadd.f32 %v17191_v14, %v17190_v8  ;;  %v15563_v37 = vadd.f32 %v17192_v9, %v15198_v39 }
 0x5a2   : > { %v6512_v2 = vadd.f32 %v6329_v45, %v6147_v41  ;;  %v7005_v30 = vmax.f32 %v6941_v20, 0.0  ;;  %v6873_v40 = vadd.f32 %v15256_v61, %v6508_v25  ;;  %v6511_v51 = vadd.f32 %v11364_v56, %v6146_v27 }
 0x5a3   : > { %v6879_v63 = vadd.f32 %v15282_v62, %v6514_v23  ;;  %v11368_v13 = vpop.f32.mrf.mxu1  ;;  %v15570_v48 = vadd.f32 %v17193_v7, %v5422_v36  ;;  %v7080_v41 = vsel %vm1158_vm0, %v7004_v4, -inf  ;;  %v7003_v39 = vmax.f32 %v6939_v29, 0.0 }
 0x5a4   : > { %v6877_v28 = vadd.f32 %v15295_v0, %v6512_v2  ;;  %v6515_v18 = vadd.f32 %v11368_v13, %v6150_v47  ;;  %11596 = vmatpush3.bf16.msra.mxu0 %v11929_v10  ;;  %v7008_v43 = vmax.f32 %v6944_v50, 0.0  ;;  %v6509_v20 = vadd.f32 %v6316_v59, %v6144_v17  ;;  %v15582_v59 = vpop.f32.mrf.mxu0 }
 0x5a5   : > { %v6948_v61 = vadd.f32 %v15361_v19, %v6879_v63  ;;  %v6332_v56 = vpop.f32.mrf.mxu1  ;;  %11633 = vmatprep.subr.bf16.mxu0 %v15555_v34  ;;  %v7074_v62 = vsel %vm1158_vm0, %v7002_v52, -inf  ;;  %v7083_v4 = vsel %vm1158_vm0, %v7005_v30, -inf  ;;  %v6942_v0 = vadd.f32 %v15361_v19, %v6873_v40 }
 0x5a6   : > { %v6946_v27 = vadd.f32 %v15361_v19, %v6877_v28  ;;  %v6880_v36 = vadd.f32 %v15303_v32, %v6515_v18  ;;  %v6513_v25 = vadd.f32 %v6332_v56, %v6148_v49  ;;  %v6876_v10 = vadd.f32 %v15264_v60, %v6511_v51  ;;  %v15595_v51 = vpop.f32.mrf.mxu0  ;;  %v17196_v56 = vld [vmem:[#allocation20_spill] sm:$0xff] }
 0x5a7   : > { %v7012_v47 = vmax.f32 %v6948_v61, 0.0  ;;  %v11371_v17 = vpop.f32.mrf.mxu1  ;;  %v7077_v23 = vsel %vm1158_vm0, %v7003_v39, -inf  ;;  %v15588_v32 = vsel %vm1158_vm0, %v7008_v43, -inf  ;;  %v6874_v49 = vadd.f32 %v15274_v31, %v6509_v20  ;;  %v17195_v39 = vld [vmem:[#allocation17_spill] sm:$0xff] }
 0x5a8   : > { %v7010_v54 = vmax.f32 %v6946_v27, 0.0  ;;  %v6949_v46 = vadd.f32 %v15361_v19, %v6880_v36  ;;  %v6878_v29 = vadd.f32 %v15316_v1, %v6513_v25  ;;  %v6518_v50 = vadd.f32 %v11371_v17, %v6153_v58  ;;  %v17194_v1 = vld [vmem:[#allocation13_spill] sm:$0xff] }
 0x5a9   : > { %v7081_v45 = vsel %vm1158_vm0, %v7012_v47, -inf  ;;  %v6345_v60 = vpop.f32.mrf.mxu1  ;;  %v7006_v14 = vmax.f32 %v6942_v0, 0.0  ;;  %v6945_v63 = vadd.f32 %v15361_v19, %v6876_v10  ;;  %v15608_v10 = vpop.f32.mrf.mxu0 }
 0x5aa   : > { %v7082_v33 = vmax.f32 %v7080_v41, %v7081_v45  ;;  %v7075_v52 = vsel %vm1158_vm0, %v7010_v54, -inf  ;;  %v7013_v2 = vmax.f32 %v6949_v46, 0.0  ;;  %v6947_v8 = vadd.f32 %v15361_v19, %v6878_v29  ;;  %v17197_v54 = vld [vmem:[#allocation167_spill] sm:$0xff] }
 0x5ab   : > { %v7076_v9 = vmax.f32 %v7074_v62, %v7075_v52  ;;  %v6883_v58 = vadd.f32 %v17194_v1, %v6518_v50  ;;  %v6516_v30 = vadd.f32 %v6345_v60, %v6151_v24  ;;  %v11372_v40 = vpop.f32.mrf.mxu1  ;;  %v6943_v41 = vadd.f32 %v15361_v19, %v6874_v49 }
 0x5ac   : > { %v7084_v31 = vsel %vm1158_vm0, %v7013_v2, -inf  ;;  %v7011_v13 = vmax.f32 %v6947_v8, 0.0  ;;  %v6519_v7 = vadd.f32 %v11372_v40, %v6154_v22  ;;  %v7161_v61 = vsel %vm1158_vm0, %v7082_v33, -inf }
 0x5ad   : > { %v7085_v28 = vmax.f32 %v7083_v4, %v7084_v31  ;;  %v6952_v18 = vadd.f32 %v15361_v19, %v6883_v58  ;;  %v6881_v43 = vadd.f32 %v17195_v39, %v6516_v30  ;;  %v6348_v20 = vpop.f32.mrf.mxu1  ;;  %v7009_v47 = vmax.f32 %v6945_v63, 0.0  ;;  %v17198_v58 = vld [vmem:[#allocation27_spill] sm:$0xff]  ;;  %v17199_v30 = vld [vmem:[#allocation184_spill] sm:$0xff] }
 0x5ae   : > { %v7078_v24 = vsel %vm1158_vm0, %v7011_v13, -inf  ;;  %v6884_v62 = vadd.f32 %v17196_v56, %v6519_v7  ;;  %v6517_v27 = vadd.f32 %v6348_v20, %v15550_v55  ;;  %v7007_v50 = vmax.f32 %v6943_v41, 0.0  ;;  %v15623_v13 = vpop.f32.mrf.mxu0  ;;  %v17200_v39 = vld [vmem:[#allocation92_spill] sm:$0xff] }
 0x5af   : > { %v7162_v36 = vsel %vm1158_vm0, %v7085_v28, -inf  ;;  %v7079_v25 = vmax.f32 %v7077_v23, %v7078_v24  ;;  %v7016_v22 = vmax.f32 %v6952_v18, 0.0  ;;  %v6950_v0 = vadd.f32 %v15361_v19, %v6881_v43  ;;  %v11375_v4 = vpop.f32.mrf.mxu1 }
 0x5b0   : > { %v6953_v17 = vadd.f32 %v15361_v19, %v6884_v62  ;;  %v6882_v46 = vadd.f32 %v17197_v54, %v6517_v27  ;;  %v7163_v29 = vmax.f32 %v7161_v61, %v7162_v36  ;;  %v7158_v23 = vsel %vm1158_vm0, %v7076_v9, -inf  ;;  %v15631_v61 = vpop.f32.mrf.mxu0 }
 0x5b1   : > { %v7093_v49 = vsel %vm1158_vm0, %v7016_v22, -inf  ;;  %v7014_v45 = vmax.f32 %v6950_v0, 0.0  ;;  %v6361_v55 = vpop.f32.mrf.mxu1  ;;  %v7159_v60 = vsel %vm1158_vm0, %v7079_v25, -inf  ;;  %v7086_v8 = vsel %vm1158_vm0, %v7006_v14, -inf }
 0x5b2   : > { %v7094_v33 = vmax.f32 %v15588_v32, %v7093_v49  ;;  %v7017_v52 = vmax.f32 %v6953_v17, 0.0  ;;  %v6951_v2 = vadd.f32 %v15361_v19, %v6882_v46  ;;  %v6158_v40 = vadd.f32 %v17199_v30, %v17198_v58  ;;  %v17204_v49 = vld [vmem:[#allocation22_spill] sm:$0xff] }
 0x5b3   : > { %v7087_v1 = vsel %vm1158_vm0, %v7014_v45, -inf  ;;  %v11376_v63 = vpop.f32.mrf.mxu1  ;;  %v15621_v31 = vmax.f32 %v7158_v23, %v7159_v60  ;;  %v7095_v7 = vsel %vm1158_vm0, %v7009_v47, -inf  ;;  %v6522_v18 = vadd.f32 %v11375_v4, %v15559_v16  ;;  %v17202_v4 = vld [vmem:[#allocation115_spill] sm:$0xff]  ;;  %v17203_v47 = vld [vmem:[#allocation148_spill] sm:$0xff]  ;;  %v15654_v23 = vpop.f32.mrf.mxu0 }
 0x5b4   : > { %v7088_v9 = vmax.f32 %v7086_v8, %v7087_v1  ;;  %v7096_v32 = vsel %vm1158_vm0, %v7017_v52, -inf  ;;  %v7015_v41 = vmax.f32 %v6951_v2, 0.0  ;;  %v6520_v14 = vadd.f32 %v6361_v55, %v15563_v37  ;;  %v17205_v55 = vld [vmem:[#allocation64_spill] sm:$0xff]  ;;  %v17207_v52 = vld [vmem:[#allocation154_spill] sm:$0xff]  ;;  %v17209_v1 = vld [vmem:[#allocation159_spill] sm:$0xff] }
 0x5b5   : > { %v7097_v28 = vmax.f32 %v7095_v7, %v7096_v32  ;;  %v6156_v43 = vadd.f32 %v17200_v39, %v15570_v48  ;;  %v6364_v20 = vpop.f32.mrf.mxu1  ;;  %v7089_v24 = vsel %vm1158_vm0, %v7007_v50, -inf  ;;  %v6523_v62 = vadd.f32 %v11376_v63, %v6158_v40  ;;  %v17201_v48 = vld [vmem:[#allocation158_spill] sm:$0xff]  ;;  %v17208_v8 = vld [vmem:[#allocation204_spill] sm:$0xff]  ;;  %v17210_v63 = vld [vmem:[#allocation39_spill] sm:$0xff] }
 0x5b6   : > { %v7090_v56 = vsel %vm1158_vm0, %v7015_v41, -inf  ;;  %v15636_v27 = vpack.c.bf16 %v7163_v29, %v15621_v31  ;;  %v7167_v36 = vsel %vm1158_vm0, %v7094_v33, -inf  ;;  %v5795_v0 = vadd.f32 %v17201_v48, %v15507_v11  ;;  %v17206_v33 = vld [vmem:[#allocation117_spill] sm:$0xff]  ;;  %v17212_v41 = vld [vmem:[#allocation186_spill] sm:$0xff]  ;;  %v17218_v48 = vld [vmem:[#allocation96_spill] sm:$0xff] }
 0x5b7   : > { %v7168_v16 = vsel %vm1158_vm0, %v7097_v28, -inf  ;;  %v7091_v25 = vmax.f32 %v7089_v24, %v7090_v56  ;;  %v6521_v37 = vadd.f32 %v6364_v20, %v6156_v43  ;;  %v11379_v22 = vpop.f32.mrf.mxu1  ;;  %v5430_v17 = vadd.f32 %v17203_v47, %v17202_v4  ;;  %v17211_v32 = vld [vmem:[#allocation225_spill] sm:$0xff]  ;;  %v17215_v20 = vld [vmem:[#allocation43_spill] sm:$0xff] }
 0x5b8   : > { %v15644_v54 = vmax.f32 %v7167_v36, %v7168_v16  ;;  %11485 = vmatprep.mubr.msk.bf16.mxu1 %vm1158_vm0, %v15636_v27  ;;  %11561 = vmatprep.mubr.msk.bf16.mxu0 %vm1158_vm0, %v15636_v27  ;;  %v7164_v46 = vsel %vm1158_vm0, %v7088_v9, -inf  ;;  %v6887_v45 = vadd.f32 %v17204_v49, %v6522_v18  ;;  %v6885_v60 = vadd.f32 %v17205_v55, %v6520_v14  ;;  %v17213_v18 = vld [vmem:[#allocation150_spill] sm:$0xff]  ;;  %v17214_v14 = vld [vmem:[#allocation5_spill] sm:$0xff]  ;;  %v17221_v55 = vld [vmem:[#allocation36_spill] sm:$0xff] }
 0x5b9   : > { %v7165_v50 = vsel %vm1158_vm0, %v7091_v25, -inf  ;;  %v6377_v11 = vpop.f32.mrf.mxu1  ;;  %v5434_v2 = vadd.f32 %v17207_v52, %v17206_v33  ;;  %v5438_v58 = vadd.f32 %v17209_v1, %v17208_v8  ;;  %v6888_v40 = vadd.f32 %v15390_v44, %v6523_v62  ;;  %v17216_v36 = vld [vmem:[#allocation226_spill] sm:$0xff]  ;;  %v17222_v33 = vld [vmem:[#allocation100_spill] sm:$0xff] }
 0x5ba   : > { %v7166_v30 = vmax.f32 %v7164_v46, %v7165_v50  ;;  %v5799_v7 = vadd.f32 %v17210_v63, %v5430_v17  ;;  %v6886_v9 = vadd.f32 %v15415_v57, %v6521_v37  ;;  %v6161_v28 = vadd.f32 %v17212_v41, %v17211_v32  ;;  %v17217_v16 = vld [vmem:[#allocation94_spill] sm:$0xff]  ;;  %v15678_v17 = vpop.f32.mrf.mxu0  ;;  %v17227_v32 = vld [vmem:[#allocation192_spill] sm:$0xff] }
 0x5bb   : > { %v6159_v39 = vadd.f32 %v17214_v14, %v17213_v18  ;;  %v11380_v43 = vpop.f32.mrf.mxu1  ;;  %v5803_v24 = vadd.f32 %v17215_v20, %v5434_v2  ;;  %v6162_v25 = vadd.f32 %v17217_v16, %v17216_v36  ;;  %v6160_v44 = vadd.f32 %v17218_v48, %v5795_v0  ;;  %v17220_v50 = vld [vmem:[#allocation98_spill] sm:$0xff]  ;;  %v17223_v0 = vld [vmem:[#allocation37_spill] sm:$0xff]  ;;  %v17231_v36 = vld [vmem:[#allocation107_spill] sm:$0xff] }
 0x5bc   : > { %v15668_v56 = vpack.c.bf16 %v7166_v30, %v7163_v29  ;;  %v6956_v62 = vadd.f32 %v15361_v19, %v6887_v45  ;;  %v6954_v57 = vadd.f32 %v15361_v19, %v6885_v60  ;;  %v6526_v37 = vadd.f32 %v11379_v22, %v6161_v28  ;;  %v17219_v29 = vld [vmem:[#allocation164_spill] sm:$0xff]  ;;  %v17224_v2 = vld [vmem:[#allocation6_spill] sm:$0xff] }
 0x5bd   : > { %v6380_v4 = vpop.f32.mrf.mxu1  ;;  %v15676_v47 = vpack.c.bf16 %v15644_v54, %v7166_v30  ;;  %v6957_v46 = vadd.f32 %v15361_v19, %v6888_v40  ;;  %v6165_v49 = vadd.f32 %v17220_v50, %v17219_v29  ;;  %v6163_v52 = vadd.f32 %v17222_v33, %v17221_v55  ;;  %v17225_v1 = vld [vmem:[#allocation102_spill] sm:$0xff]  ;;  %v17228_v28 = vld [vmem:[#allocation40_spill] sm:$0xff]  ;;  %v17232_v29 = vld [vmem:[#allocation195_spill] sm:$0xff]  ;;  %v15701_v55 = vpop.f32.mrf.mxu0 }
 0x5be   : > { %v6166_v45 = vadd.f32 %v17224_v2, %v17223_v0  ;;  %v6955_v60 = vadd.f32 %v15361_v19, %v6886_v9  ;;  %v6524_v22 = vadd.f32 %v6377_v11, %v6159_v39  ;;  %v6164_v30 = vadd.f32 %v17225_v1, %v5799_v7  ;;  %v17226_v63 = vld [vmem:[#allocation178_spill] sm:$0xff]  ;;  %v17233_v0 = vld [vmem:[#allocation45_spill] sm:$0xff] }
 0x5bf   : > { %11486 = vmatmul.mubr.msk.bf16.gmra.mxu1 %vm1158_vm0, %v15676_v47  ;;  %11562 = vmatmul.mubr.msk.bf16.gmra.mxu0 %vm1158_vm0, %v15676_v47  ;;  %v11383_v8 = vpop.f32.mrf.mxu1  ;;  %v6169_v41 = vadd.f32 %v17227_v32, %v17226_v63  ;;  %v17229_v18 = vld [vmem:[#allocation106_spill] sm:$0xff]  ;;  %v7020_v11 = vmax.f32 %v6956_v62, 0.0  ;;  %v7018_v39 = vmax.f32 %v6954_v57, 0.0  ;;  %v6891_v16 = vadd.f32 %v15430_v26, %v6526_v37  ;;  %v17234_v2 = vld [vmem:[#allocation197_spill] sm:$0xff]  ;;  %v17236_v26 = vld [vmem:[#allocation111_spill] sm:$0xff] }
 0x5c0   : > { %v6530_v40 = vadd.f32 %v11383_v8, %v6165_v49  ;;  %v6167_v14 = vadd.f32 %v17229_v18, %v17228_v28  ;;  %v17230_v20 = vld [vmem:[#allocation42_spill] sm:$0xff]  ;;  %v6168_v50 = vadd.f32 %v17232_v29, %v5803_v24  ;;  %v7021_v7 = vmax.f32 %v6957_v46, 0.0  ;;  %v15713_v24 = vpop.f32.mrf.mxu0  ;;  %v17237_v28 = vld [vmem:[#allocation47_spill] sm:$0xff] }
 0x5c1   : > { %v6170_v9 = vadd.f32 %v17231_v36, %v17230_v20  ;;  %v6393_v48 = vpop.f32.mrf.mxu1  ;;  %v15706_v8 = vadd.f32 %v17234_v2, %v17233_v0  ;;  %v7019_v1 = vmax.f32 %v6955_v60, 0.0  ;;  %v6889_v63 = vadd.f32 %v15444_v12, %v6524_v22  ;;  %v17235_v32 = vld [vmem:[#allocation46_spill] sm:$0xff] }
 0x5c2   : > { %v6895_v49 = vadd.f32 %v15488_v53, %v6530_v40  ;;  %v6528_v33 = vadd.f32 %v6393_v48, %v6163_v52  ;;  %v6527_v62 = vadd.f32 %v11380_v43, %v6162_v25  ;;  %v15711_v37 = vadd.f32 %v17236_v26, %v17235_v32  ;;  %v15731_v29 = vpop.f32.mrf.mxu0 }
 0x5c3   : > { %v11384_v57 = vpop.f32.mrf.mxu1  ;;  %v15716_v46 = vadd.f32 %v17237_v28, %v5438_v58  ;;  %v7104_v60 = vsel %vm1158_vm0, %v7020_v11, -inf  ;;  %v15722_v12 = vsel %vm1158_vm0, %v7018_v39, -inf  ;;  %v6960_v43 = vadd.f32 %v15361_v19, %v6891_v16 }
 0x5c4   : > { %v6964_v53 = vadd.f32 %v15361_v19, %v6895_v49  ;;  %v6893_v52 = vadd.f32 %v15512_v6, %v6528_v33  ;;  %v6531_v40 = vadd.f32 %v11384_v57, %v6166_v45  ;;  %v6525_v25 = vadd.f32 %v6380_v4, %v6160_v44  ;;  %v15742_v28 = vpop.f32.mrf.mxu0 }
 0x5c5   : > { %v6396_v22 = vpop.f32.mrf.mxu1  ;;  %v7107_v18 = vsel %vm1158_vm0, %v7021_v7, -inf  ;;  %v7101_v48 = vsel %vm1158_vm0, %v7019_v1, -inf  ;;  %v6958_v6 = vadd.f32 %v15361_v19, %v6889_v63  ;;  %v6892_v45 = vadd.f32 %v15455_v3, %v6527_v62 }
 0x5c6   : > { %v7028_v20 = vmax.f32 %v6964_v53, 0.0  ;;  %v6962_v58 = vadd.f32 %v15361_v19, %v6893_v52  ;;  %v6896_v36 = vadd.f32 %v15538_v42, %v6531_v40  ;;  %v6529_v11 = vadd.f32 %v6396_v22, %v6164_v30 }
 0x5c7   : > { %v11387_v39 = vpop.f32.mrf.mxu1  ;;  %v7024_v49 = vmax.f32 %v6960_v43, 0.0  ;;  %v6890_v33 = vadd.f32 %v15472_v15, %v6525_v25  ;;  %v7022_v62 = vmax.f32 %v6958_v6, 0.0  ;;  %v6961_v57 = vadd.f32 %v15361_v19, %v6892_v45  ;;  %v15754_v45 = vpop.f32.mrf.mxu0 }
 0x5c8   : > { %v7105_v44 = vsel %vm1158_vm0, %v7028_v20, -inf  ;;  %v7026_v4 = vmax.f32 %v6962_v58, 0.0  ;;  %v6965_v16 = vadd.f32 %v15361_v19, %v6896_v36  ;;  %v6534_v7 = vadd.f32 %v11387_v39, %v6169_v41 }
 0x5c9   : > { %v7106_v42 = vmax.f32 %v7104_v60, %v7105_v44  ;;  %v6894_v0 = vadd.f32 %v15567_v5, %v6529_v11  ;;  %v6409_v2 = vpop.f32.mrf.mxu1  ;;  %v7025_v58 = vmax.f32 %v6961_v57, 0.0 }
 0x5ca   : > { %v7099_v1 = vsel %vm1158_vm0, %v7026_v4, -inf  ;;  %v7029_v3 = vmax.f32 %v6965_v16, 0.0  ;;  %v6899_v30 = vadd.f32 %v15582_v59, %v6534_v7  ;;  %v6532_v63 = vadd.f32 %v6409_v2, %v6167_v14  ;;  %v15762_v2 = vpop.f32.mrf.mxu0 }
 0x5cb   : > { %v7100_v32 = vmax.f32 %v15722_v12, %v7099_v1  ;;  %v6963_v41 = vadd.f32 %v15361_v19, %v6894_v0  ;;  %v11388_v26 = vpop.f32.mrf.mxu1  ;;  %v7116_v59 = vsel %vm1158_vm0, %v7024_v49, -inf  ;;  %v6959_v14 = vadd.f32 %v15361_v19, %v6890_v33 }
 0x5cc   : > { %v7108_v15 = vsel %vm1158_vm0, %v7029_v3, -inf  ;;  %v6968_v5 = vadd.f32 %v15361_v19, %v6899_v30  ;;  %v6897_v53 = vadd.f32 %v15595_v51, %v6532_v63  ;;  %v6535_v52 = vadd.f32 %v11388_v26, %v6170_v9  ;;  %v17238_v26 = vld [vmem:[#allocation126_spill] sm:$0xff] }
 0x5cd   : > { %v7109_v40 = vmax.f32 %v7107_v18, %v7108_v15  ;;  %v7027_v60 = vmax.f32 %v6963_v41, 0.0  ;;  %v6412_v43 = vpop.f32.mrf.mxu1  ;;  %v7173_v36 = vsel %vm1158_vm0, %v7106_v42, -inf  ;;  %v7110_v4 = vsel %vm1158_vm0, %v7022_v62, -inf  ;;  %v17239_v15 = vld [vmem:[#allocation166_spill] sm:$0xff] }
 0x5ce   : > { %v7032_v12 = vmax.f32 %v6968_v5, 0.0  ;;  %v6966_v25 = vadd.f32 %v15361_v19, %v6897_v53  ;;  %v6900_v22 = vadd.f32 %v15608_v10, %v6535_v52  ;;  %v6533_v20 = vadd.f32 %v6412_v43, %v6168_v50  ;;  %v17242_v43 = vld [vmem:[#allocation200_spill] sm:$0xff] }
 0x5cf   : > { %v7174_v6 = vsel %vm1158_vm0, %v7109_v40, -inf  ;;  %v7102_v51 = vsel %vm1158_vm0, %v7027_v60, -inf  ;;  %v11391_v9 = vpop.f32.mrf.mxu1  ;;  %v7023_v49 = vmax.f32 %v6959_v14, 0.0  ;;  %v5442_v5 = vadd.f32 %v17239_v15, %v17238_v26  ;;  %v17252_v15 = vld [vmem:[#allocation53_spill] sm:$0xff] }
 0x5d0   : > { %v7103_v11 = vmax.f32 %v7101_v48, %v7102_v51  ;;  %v7117_v18 = vsel %vm1158_vm0, %v7032_v12, -inf  ;;  %v7030_v39 = vmax.f32 %v6966_v25, 0.0  ;;  %v6969_v44 = vadd.f32 %v15361_v19, %v6900_v22  ;;  %v15783_v25 = vpop.f32.mrf.mxu0 }
 0x5d1   : > { %v7118_v10 = vmax.f32 %v7116_v59, %v7117_v18  ;;  %v6898_v50 = vadd.f32 %v15623_v13, %v6533_v20  ;;  %v6425_v16 = vpop.f32.mrf.mxu1  ;;  %v7175_v7 = vmax.f32 %v7173_v36, %v7174_v6  ;;  %v7170_v48 = vsel %vm1158_vm0, %v7100_v32, -inf  ;;  %v17240_v32 = vld [vmem:[#allocation208_spill] sm:$0xff]  ;;  %v17241_v59 = vld [vmem:[#allocation113_spill] sm:$0xff] }
 0x5d2   : > { %v7111_v33 = vsel %vm1158_vm0, %v7030_v39, -inf  ;;  %v7033_v42 = vmax.f32 %v6969_v44, 0.0  ;;  %v7171_v0 = vsel %vm1158_vm0, %v7103_v11, -inf  ;;  %v6538_v30 = vadd.f32 %v11391_v9, %v15706_v8  ;;  %v17244_v18 = vld [vmem:[#allocation177_spill] sm:$0xff] }
 0x5d3   : > { %v7112_v1 = vmax.f32 %v7110_v4, %v7111_v33  ;;  %v6967_v3 = vadd.f32 %v15361_v19, %v6898_v50  ;;  %v11392_v63 = vpop.f32.mrf.mxu1  ;;  %v7119_v13 = vsel %vm1158_vm0, %v7025_v58, -inf  ;;  %v6536_v57 = vadd.f32 %v6425_v16, %v15711_v37  ;;  %v17246_v50 = vld [vmem:[#allocation133_spill] sm:$0xff] }
 0x5d4   : > { %v7120_v62 = vsel %vm1158_vm0, %v7033_v42, -inf  ;;  %v15770_v41 = vmax.f32 %v7170_v48, %v7171_v0  ;;  %v6174_v14 = vadd.f32 %v17241_v59, %v17240_v32  ;;  %v7113_v8 = vsel %vm1158_vm0, %v7023_v49, -inf  ;;  %v17247_v16 = vld [vmem:[#allocation185_spill] sm:$0xff]  ;;  %v11468_v42 = vpop.f32.mrf.mxu0  ;;  %v17254_v32 = vld [vmem:[#allocation119_spill] sm:$0xff] }
 0x5d5   : > { %v7121_v53 = vmax.f32 %v7119_v13, %v7120_v62  ;;  %v7031_v52 = vmax.f32 %v6967_v3, 0.0  ;;  %v6428_v40 = vpop.f32.mrf.mxu1  ;;  %v7179_v60 = vsel %vm1158_vm0, %v7118_v10, -inf  ;;  %v6172_v12 = vadd.f32 %v17242_v43, %v15716_v46  ;;  %v17243_v46 = vld [vmem:[#allocation131_spill] sm:$0xff]  ;;  %v17250_v13 = vld [vmem:[#allocation8_spill] sm:$0xff]  ;;  %v17251_v62 = vld [vmem:[#allocation10_spill] sm:$0xff] }
 0x5d6   : > { %v15781_v37 = vpack.c.bf16 %v7175_v7, %v15770_v41  ;;  %v6903_v58 = vadd.f32 %v15631_v61, %v6538_v30  ;;  %v6539_v36 = vadd.f32 %v11392_v63, %v6174_v14  ;;  %v6901_v11 = vadd.f32 %v15654_v23, %v6536_v57  ;;  %v17245_v10 = vld [vmem:[#allocation11_spill] sm:$0xff]  ;;  %v17249_v30 = vld [vmem:[#allocation201_spill] sm:$0xff]  ;;  %v17255_v43 = vld [vmem:[#allocation18_spill] sm:$0xff] }
 0x5d7   : > { %v7180_v22 = vsel %vm1158_vm0, %v7121_v53, -inf  ;;  %v7114_v20 = vsel %vm1158_vm0, %v7031_v52, -inf  ;;  %v11395_v6 = vpop.f32.mrf.mxu1  ;;  %v5446_v39 = vadd.f32 %v17244_v18, %v17243_v46  ;;  %v6537_v44 = vadd.f32 %v6428_v40, %v6172_v12  ;;  %v17248_v3 = vld [vmem:[#allocation7_spill] sm:$0xff]  ;;  %v17260_v46 = vld [vmem:[#allocation14_spill] sm:$0xff] }
 0x5d8   : > { %v15788_v51 = vmax.f32 %v7179_v60, %v7180_v22  ;;  %v7115_v9 = vmax.f32 %v7113_v8, %v7114_v20  ;;  %11489 = vmatprep.mubr.msk.bf16.mxu1 %vm1158_vm0, %v15781_v37  ;;  %11565 = vmatprep.mubr.msk.bf16.mxu0 %vm1158_vm0, %v15781_v37  ;;  %v5811_v61 = vadd.f32 %v17245_v10, %v5442_v5  ;;  %v7176_v33 = vsel %vm1158_vm0, %v7112_v1, -inf  ;;  %v17253_v1 = vld [vmem:[#allocation9_spill] sm:$0xff]  ;;  %v17262_v10 = vld [vmem:[#allocation207_spill] sm:$0xff] }
 0x5d9   : > { %v6441_v4 = vpop.f32.mrf.mxu1  ;;  %v5450_v49 = vadd.f32 %v17247_v16, %v17246_v50  ;;  %v6904_v48 = vadd.f32 %v15678_v17, %v6539_v36  ;;  %v6177_v63 = vadd.f32 %v17249_v30, %v17248_v3  ;;  %v6175_v57 = vadd.f32 %v17251_v62, %v17250_v13  ;;  %v17256_v22 = vld [vmem:[#allocation121_spill] sm:$0xff]  ;;  %v17257_v36 = vld [vmem:[#allocation50_spill] sm:$0xff] }
 0x5da   : > { %v7177_v23 = vsel %vm1158_vm0, %v7115_v9, -inf  ;;  %v5815_v5 = vadd.f32 %v17252_v15, %v5446_v39  ;;  %v6972_v53 = vadd.f32 %v15361_v19, %v6903_v58  ;;  %v6970_v52 = vadd.f32 %v15361_v19, %v6901_v11  ;;  %v17258_v58 = vld [vmem:[#allocation122_spill] sm:$0xff]  ;;  %v17259_v11 = vld [vmem:[#allocation12_spill] sm:$0xff]  ;;  %v6825_v39 = vpop.f32.mrf.mxu0  ;;  %v17263_v16 = vld [vmem:[#allocation129_spill] sm:$0xff] }
 0x5db   : > { %v7178_v0 = vmax.f32 %v7176_v33, %v7177_v23  ;;  %v11396_v26 = vpop.f32.mrf.mxu1  ;;  %v6178_v59 = vadd.f32 %v17254_v32, %v17253_v1  ;;  %v6902_v14 = vadd.f32 %v15701_v55, %v6537_v44  ;;  %v6542_v17 = vadd.f32 %v11395_v6, %v6177_v63  ;;  %v17261_v44 = vld [vmem:[#allocation52_spill] sm:$0xff]  ;;  %v17265_v23 = vld [vmem:[#allocation55_spill] sm:$0xff] }
 0x5dc   : > { %v5819_v12 = vadd.f32 %v17255_v43, %v5450_v49  ;;  %v6176_v20 = vadd.f32 %v17256_v22, %v5811_v61  ;;  %v6181_v9 = vadd.f32 %v17258_v58, %v17257_v36  ;;  %v6179_v18 = vadd.f32 %v17260_v46, %v17259_v11  ;;  %v11471_v43 = vpop.f32.mrf.mxu0  ;;  %v17270_v22 = vld [vmem:[#allocation212_spill] sm:$0xff]  ;;  %v17271_v58 = vld [vmem:[#allocation135_spill] sm:$0xff] }
 0x5dd   : > { %v15813_v40 = vpack.c.bf16 %v7178_v0, %v7175_v7  ;;  %v6444_v8 = vpop.f32.mrf.mxu1  ;;  %v15816_v60 = vpack.c.bf16 %v15788_v51, %v7178_v0  ;;  %v6973_v55 = vadd.f32 %v15361_v19, %v6904_v48  ;;  %v6540_v7 = vadd.f32 %v6441_v4, %v6175_v57  ;;  %v17266_v0 = vld [vmem:[#allocation210_spill] sm:$0xff]  ;;  %v17267_v48 = vld [vmem:[#allocation15_spill] sm:$0xff]  ;;  %v17268_v4 = vld [vmem:[#allocation16_spill] sm:$0xff] }
 0x5de   : > { %v6182_v61 = vadd.f32 %v17262_v10, %v17261_v44  ;;  %v6180_v49 = vadd.f32 %v17263_v16, %v5815_v5  ;;  %v17264_v33 = vmov 0.0|0.0   ;;  %v6185_v3 = vadd.f32 %v17266_v0, %v17265_v23  ;;  %v17269_v5 = vld [vmem:[#allocation59_spill] sm:$0xff] }
 0x5df   : > { %11490 = vmatmul.mubr.msk.bf16.gmra.mxu1 %vm1158_vm0, %v15816_v60  ;;  %11566 = vmatmul.mubr.msk.bf16.gmra.mxu0 %vm1158_vm0, %v15816_v60  ;;  %v11399_v6 = vpop.f32.mrf.mxu1  ;;  %v6183_v30 = vadd.f32 %v17268_v4, %v17267_v48  ;;  %v7036_v63 = vmax.f32 %v6972_v53, 0.0  ;;  %v7034_v13 = vmax.f32 %v6970_v52, 0.0  ;;  %v6971_v62 = vadd.f32 %v15361_v19, %v6902_v14 }
 0x5e0   : > { %v6546_v50 = vadd.f32 %v11399_v6, %v6181_v9  ;;  %11497 = vmatprep.mubr.bf16.mxu1 %v17264_v33  ;;  %v6907_v57 = vadd.f32 %v15713_v24, %v6542_v17  ;;  %v6186_v36 = vadd.f32 %v17270_v22, %v17269_v5  ;;  %v15843_v9 = vadd.f32 %v17271_v58, %v5819_v12  ;;  %v15853_v24 = vld [vmem:[%s16463_s4 + $0x1] ss:$0 sm:$0xff] }
 0x5e1   : > { %v6457_v15 = vpop.f32.mrf.mxu1  ;;  %v7037_v11 = vmax.f32 %v6973_v55, 0.0  ;;  %v6905_v46 = vadd.f32 %v15731_v29, %v6540_v7  ;;  %v6543_v53 = vadd.f32 %v11396_v26, %v6178_v59  ;;  %v17272_v6 = vmov 0.0   ;;  %v11927_v55 = vld [vmem:[%s16462_s3 + $0xb0] sm:$0xff]  }
 0x5e2   : > { %v6544_v1 = vadd.f32 %v6457_v15, %v6179_v18  ;;  %v6911_v32 = vadd.f32 %v15762_v2, %v6546_v50  ;;  %v15848_v19 = vpack.c.bf16 %v15466_v38, %v17272_v6  ;;  %v15859_v12 = vpack.c.bf16 %v15621_v31, %v17272_v6  ;;  %v6838_v31 = vpop.f32.mrf.mxu0 }
 0x5e3   : > { %v11400_v52 = vpop.f32.mrf.mxu1  ;;  %v7035_v29 = vmax.f32 %v6971_v62, 0.0  ;;  %v6976_v26 = vadd.f32 %v15853_v24, %v6907_v57  ;;  %v7128_v38 = vsel %vm1158_vm0, %v7036_v63, -inf  ;;  %v15864_v59 = vsel %vm1158_vm0, %v7034_v13, -inf  ;;  %v15887_v57 = vld [vmem:[%s16462_s3 + $0xc8] sm:$0xff]  }
 0x5e4   : > { %v6980_v2 = vadd.f32 %v15853_v24, %v6911_v32  ;;  %v6547_v14 = vadd.f32 %v11400_v52, %v6182_v61  ;;  %v6909_v17 = vadd.f32 %v15783_v25, %v6544_v1  ;;  %v15871_v61 = vadd.f32 %v15853_v24, %v6905_v46  ;;  %v11472_v5 = vpop.f32.mrf.mxu0 }
 0x5e5   : > { %v6460_v18 = vpop.f32.mrf.mxu1  ;;  %v6908_v50 = vadd.f32 %v15742_v28, %v6543_v53  ;;  %v6541_v16 = vadd.f32 %v6444_v8, %v6176_v20  ;;  %v7131_v23 = vsel %vm1158_vm0, %v7037_v11, -inf  ;;  %v7040_v28 = vmax.f32 %v6976_v26, 0.0 }
 0x5e6   : > { %v7044_v7 = vmax.f32 %v6980_v2, 0.0  ;;  %v6978_v25 = vadd.f32 %v15853_v24, %v6909_v17  ;;  %v6545_v44 = vadd.f32 %v6460_v18, %v6180_v49  ;;  %v6912_v10 = vadd.f32 %v11468_v42, %v6547_v14  ;;  %v11960_v42 = vld [vmem:[%s16462_s3 + $0xb8] sm:$0xff]  }
 0x5e7   : > { %11498 = vmatmul.mubr.bf16.vlgmr.msra.gmra.mxu1 %v17264_v33  ;;  %v11403_v0 = vpop.f32.mrf.mxu1  ;;  %v7125_v49 = vsel %vm1158_vm0, %v7035_v29, -inf  ;;  %v7038_v22 = vmax.f32 %v15871_v61, 0.0  ;;  %v6906_v58 = vadd.f32 %v15754_v45, %v6541_v16  ;;  %v7140_v29 = vsel %vm1158_vm0, %v7040_v28, -inf }
 0x5e8   : > { %v7129_v48 = vsel %vm1158_vm0, %v7044_v7, -inf  ;;  %v7042_v4 = vmax.f32 %v6978_v25, 0.0  ;;  %v6981_v63 = vadd.f32 %v15853_v24, %v6912_v10  ;;  %v6550_v13 = vadd.f32 %v11403_v0, %v6185_v3  ;;  %11501 = vmatprep.mubr.msk.bf16.mxu1 %vm1158_vm0, %v15848_v19  ;;  %11514 = vmatpush3.bf16.msra.mxu1 %v11960_v42  ;;  %v6841_v7 = vpop.f32.mrf.mxu0 }
 0x5e9   : > { %v7130_v8 = vmax.f32 %v7128_v38, %v7129_v48  ;;  %v6910_v20 = vadd.f32 %v6825_v39, %v6545_v44  ;;  %v6473_v62 = vpop.f32.mrf.mxu1  ;;  %11515 = vmatprep.subr.bf16.mxu1 %v11927_v55 }
 0x5ea   : > { %v7123_v3 = vsel %vm1158_vm0, %v7042_v4, -inf  ;;  %v7045_v15 = vmax.f32 %v6981_v63, 0.0  ;;  %v6548_v1 = vadd.f32 %v6473_v62, %v6183_v30  ;;  %v6915_v32 = vadd.f32 %v11471_v43, %v6550_v13 }
 0x5eb   : > { %v7124_v39 = vmax.f32 %v15864_v59, %v7123_v3  ;;  %v6979_v11 = vadd.f32 %v15853_v24, %v6910_v20  ;;  %v11404_v46 = vpop.f32.mrf.mxu1  ;;  %v6977_v30 = vadd.f32 %v15853_v24, %v6908_v50  ;;  %v7134_v63 = vsel %vm1158_vm0, %v7038_v22, -inf }
 0x5ec   : > { %v7132_v53 = vsel %vm1158_vm0, %v7045_v15, -inf  ;;  %v6984_v52 = vadd.f32 %v15853_v24, %v6915_v32  ;;  %v6551_v2 = vadd.f32 %v11404_v46, %v6186_v36  ;;  %v6913_v14 = vadd.f32 %v6838_v31, %v6548_v1  ;;  %11516 = vmatpush3.bf16.msra.mxu1 %v11927_v55 }
 0x5ed   : > { %v7133_v43 = vmax.f32 %v7131_v23, %v7132_v53  ;;  %v7043_v17 = vmax.f32 %v6979_v11, 0.0  ;;  %v6476_v26 = vpop.f32.mrf.mxu1  ;;  %11533 = vmatprep.subr.bf16.mxu1 %v15887_v57  ;;  %v6975_v36 = vadd.f32 %v15853_v24, %v6906_v58  ;;  %v7185_v55 = vsel %vm1158_vm0, %v7130_v8, -inf }
 0x5ee   : > { %v7048_v45 = vmax.f32 %v6984_v52, 0.0  ;;  %v6982_v38 = vadd.f32 %v15853_v24, %v6913_v14  ;;  %v6549_v59 = vadd.f32 %v6476_v26, %v15843_v9  ;;  %v6916_v18 = vadd.f32 %v11472_v5, %v6551_v2 }
 0x5ef   : > { %v7186_v25 = vsel %vm1158_vm0, %v7133_v43, -inf  ;;  %v7126_v44 = vsel %vm1158_vm0, %v7043_v17, -inf  ;;  %11502 = vmatmul.mubr.msk.bf16.gmra.mxu1 %vm1158_vm0, %v15515_v21  ;;  %v7041_v9 = vmax.f32 %v6977_v30, 0.0  ;;  %v7182_v48 = vsel %vm1158_vm0, %v7124_v39, -inf  ;;  %v11931_v30 = vld [vmem:[%s16462_s3 + $0xc0] sm:$0xff]   ;;  %v11933_v43 = vld [vmem:[%s16462_s3 + $0x110] sm:$0xff]  }
 0x5f0   : > { %v7187_v10 = vmax.f32 %v7185_v55, %v7186_v25  ;;  %v7127_v31 = vmax.f32 %v7125_v49, %v7126_v44  ;;  %v7141_v61 = vsel %vm1158_vm0, %v7048_v45, -inf  ;;  %v7046_v50 = vmax.f32 %v6982_v38, 0.0  ;;  %11505 = vmatprep.mubr.msk.bf16.mxu1 %vm1158_vm0, %v15859_v12  ;;  %v11934_v17 = vld [vmem:[%s16462_s3 + $0xe8] sm:$0xff]  }
 0x5f1   : > { %v7142_v16 = vmax.f32 %v7140_v29, %v7141_v61  ;;  %v6985_v23 = vadd.f32 %v15853_v24, %v6916_v18  ;;  %v6914_v0 = vadd.f32 %v6841_v7, %v6549_v59  ;;  %v7039_v20 = vmax.f32 %v6975_v36, 0.0 }
 0x5f2   : > { %v7183_v4 = vsel %vm1158_vm0, %v7127_v31, -inf  ;;  %v7135_v13 = vsel %vm1158_vm0, %v7046_v50, -inf  ;;  %v7143_v62 = vsel %vm1158_vm0, %v7041_v9, -inf  ;;  %v7235_v5 = vpack.c.bf16 %v15770_v41, %v17272_v6 }
 0x5f3   : > { %v7184_v42 = vmax.f32 %v7182_v48, %v7183_v4  ;;  %v7136_v28 = vmax.f32 %v7134_v63, %v7135_v13  ;;  %v7049_v8 = vmax.f32 %v6985_v23, 0.0  ;;  %v6983_v49 = vadd.f32 %v15853_v24, %v6914_v0 }
 0x5f4   : > { %v7191_v22 = vsel %vm1158_vm0, %v7142_v16, -inf  ;;  %v7137_v58 = vsel %vm1158_vm0, %v7039_v20, -inf  ;;  %v7497_v29 = vpack.c.bf16 %v17272_v6, %v15495_v35  ;;  %v7499_v35 = vpack.c.bf16 %v17272_v6, %v15788_v51  ;;  %v11936_v51 = vld [vmem:[%s16462_s3 + $0x108] sm:$0xff]   ;;  %v11938_v20 = vld [vmem:[%s16462_s3 + $0x138] sm:$0xff]  }
 0x5f5   : > { %v7144_v3 = vsel %vm1158_vm0, %v7049_v8, -inf  ;;  %v15918_v15 = vpack.c.bf16 %v7187_v10, %v7184_v42  ;;  %v7047_v32 = vmax.f32 %v6983_v49, 0.0  ;;  %v7188_v41 = vsel %vm1158_vm0, %v7136_v28, -inf }
 0x5f6   : > { %v7145_v1 = vmax.f32 %v7143_v62, %v7144_v3  ;;  %v7634_v26 = vpack.c.bf16 %v7184_v42, %v17272_v6 }
 0x5f7   : > { %11506 = vmatmul.mubr.msk.bf16.gmra.mxu1 %vm1158_vm0, %v15668_v56  ;;  %11569 = vmatprep.mubr.msk.bf16.mxu0 %vm1158_vm0, %v15918_v15  ;;  %v7138_v39 = vsel %vm1158_vm0, %v7047_v32, -inf }
 0x5f8   : > { %v7192_v24 = vsel %vm1158_vm0, %v7145_v1, -inf  ;;  %11509 = vmatprep.mubr.msk.bf16.mxu1 %vm1158_vm0, %v7235_v5  ;;  %v7139_v46 = vmax.f32 %v7137_v58, %v7138_v39 }
 0x5f9   : > { %v7193_v11 = vmax.f32 %v7191_v22, %v7192_v24 }
 0x5fa   : > { %v7189_v53 = vsel %vm1158_vm0, %v7139_v46, -inf }
 0x5fb   : > { %v7190_v52 = vmax.f32 %v7188_v41, %v7189_v53 }
 0x5fd   : > { %v15933_v2 = vpack.c.bf16 %v7190_v52, %v7187_v10  ;;  %v15935_v14 = vpack.c.bf16 %v7193_v11, %v7190_v52 }
 0x5ff   : > { %11510 = vmatmul.mubr.msk.bf16.gmra.mxu1 %vm1158_vm0, %v15813_v40  ;;  %11570 = vmatmul.mubr.msk.bf16.gmra.mxu0 %vm1158_vm0, %v15935_v14 }
 0x600   : > { %11517 = vmatprep.mubr.bf16.mxu1 %v17264_v33  ;;  %11597 = vmatprep.mubr.msk.bf16.mxu0 %vm1158_vm0, %v15859_v12 }
 0x607   : > { %11518 = vmatmul.mubr.bf16.vlgmr.msra.gmra.mxu1 %v17264_v33  ;;  %11598 = vmatmul.mubr.msk.bf16.vlgmr.msra.gmra.mxu0 %vm1158_vm0, %v15668_v56 }
 0x608   : > { %11521 = vmatprep.mubr.msk.bf16.mxu1 %vm1158_vm0, %v15515_v21  ;;  %11601 = vmatprep.mubr.msk.bf16.mxu0 %vm1158_vm0, %v7235_v5 }
 0x609   : > { %11534 = vmatpush3.bf16.msra.mxu1 %v15887_v57  ;;  %11634 = vmatpush3.bf16.msra.mxu0 %v15555_v34  ;;  %v7498_v34 = vpack.c.bf16 %v17272_v6, %v15644_v54  ;;  %v11935_v54 = vld [vmem:[%s16462_s3 + $0xe0] sm:$0xff]  }
 0x60a   : > { %11535 = vmatprep.subr.bf16.mxu1 %v11931_v30  ;;  %11635 = vmatprep.subr.bf16.mxu0 %v11933_v43 }
 0x60d   : > { %11536 = vmatpush3.bf16.msra.mxu1 %v11931_v30  ;;  %11636 = vmatpush3.bf16.msra.mxu0 %v11933_v43 }
 0x60e   : > { %11573 = vmatprep.subr.bf16.mxu1 %v11934_v17 }
 0x60f   : > { %11522 = vmatmul.mubr.msk.bf16.gmra.mxu1 %vm1158_vm0, %v7497_v29  ;;  %11602 = vmatmul.mubr.msk.bf16.gmra.mxu0 %vm1158_vm0, %v15813_v40 }
 0x610   : > { %11525 = vmatprep.mubr.msk.bf16.mxu1 %vm1158_vm0, %v15668_v56  ;;  %11605 = vmatprep.mubr.msk.bf16.mxu0 %vm1158_vm0, %v7634_v26 }
 0x617   : > { %11526 = vmatmul.mubr.msk.bf16.gmra.mxu1 %vm1158_vm0, %v7498_v34  ;;  %11606 = vmatmul.mubr.msk.bf16.gmra.mxu0 %vm1158_vm0, %v15933_v2 }
 0x618   : > { %11529 = vmatprep.mubr.msk.bf16.mxu1 %vm1158_vm0, %v15813_v40  ;;  %11609 = vmatprep.mubr.bf16.mxu0 %v17264_v33 }
 0x61f   : > { %11530 = vmatmul.mubr.msk.bf16.gmra.mxu1 %vm1158_vm0, %v7499_v35  ;;  %11610 = vmatmul.mubr.bf16.gmra.mxu0 %v17264_v33 }
 0x620   : > { %11537 = vmatprep.mubr.msk.bf16.mxu1 %vm1158_vm0, %v15848_v19  ;;  %11637 = vmatprep.mubr.msk.bf16.mxu0 %vm1158_vm0, %v15668_v56  ;;  %v7900_v19 = vpack.c.bf16 %v17272_v6, %v7193_v11 }
 0x627   : > { %11538 = vmatmul.mubr.msk.bf16.vlgmr.msra.gmra.mxu1 %vm1158_vm0, %v15515_v21  ;;  %11638 = vmatmul.mubr.msk.bf16.vlgmr.msra.gmra.mxu0 %vm1158_vm0, %v7498_v34 }
 0x628   : > { %11541 = vmatprep.mubr.msk.bf16.mxu1 %vm1158_vm0, %v15859_v12  ;;  %11641 = vmatprep.mubr.msk.bf16.mxu0 %vm1158_vm0, %v15813_v40  ;;  %v11937_v12 = vld [vmem:[%s16462_s3 + $0x100] sm:$0xff]  }
 0x629   : > { %11574 = vmatpush3.bf16.msra.mxu1 %v11934_v17  ;;  %v11939_v17 = vld [vmem:[%s16462_s3 + $0x130] sm:$0xff]  }
 0x62a   : > { %11575 = vmatprep.subr.bf16.mxu1 %v11935_v54 }
 0x62d   : > { %11576 = vmatpush3.bf16.msra.mxu1 %v11935_v54 }
 0x62e   : > { %11613 = vmatprep.subr.bf16.mxu1 %v11936_v51 }
 0x62f   : > { %11542 = vmatmul.mubr.msk.bf16.gmra.mxu1 %vm1158_vm0, %v15668_v56  ;;  %11642 = vmatmul.mubr.msk.bf16.gmra.mxu0 %vm1158_vm0, %v7499_v35 }
 0x630   : > { %11545 = vmatprep.mubr.msk.bf16.mxu1 %vm1158_vm0, %v7235_v5  ;;  %11645 = vmatprep.mubr.msk.bf16.mxu0 %vm1158_vm0, %v15933_v2 }
 0x637   : > { %11546 = vmatmul.mubr.msk.bf16.gmra.mxu1 %vm1158_vm0, %v15813_v40  ;;  %11646 = vmatmul.mubr.msk.bf16.gmra.mxu0 %vm1158_vm0, %v7900_v19 }
 0x638   : > { %11549 = vmatprep.mubr.msk.bf16.mxu1 %vm1158_vm0, %v7634_v26  ;;  %11649 = vmatprep.mubr.bf16.mxu0 %v17264_v33 }
 0x63f   : > { %11550 = vmatmul.mubr.msk.bf16.gmra.mxu1 %vm1158_vm0, %v15933_v2  ;;  %11650 = vmatmul.mubr.bf16.gmra.mxu0 %v17264_v33 }
 0x640   : > { %11577 = vmatprep.mubr.msk.bf16.mxu1 %vm1158_vm0, %v15515_v21  ;;  %v11479_v21 = vpop.f32.mrf.mxu1 }
 0x647   : > { %11578 = vmatmul.mubr.msk.bf16.vlgmr.msra.gmra.mxu1 %vm1158_vm0, %v7497_v29 }
 0x648   : > { %11581 = vmatprep.mubr.msk.bf16.mxu1 %vm1158_vm0, %v15668_v56  ;;  %11614 = vmatpush3.bf16.msra.mxu1 %v11936_v51  ;;  %v16039_v56 = vpop.f32.mrf.mxu1 }
 0x649   : > { %11615 = vmatprep.subr.bf16.mxu1 %v11937_v12 }
 0x64c   : > { %11616 = vmatpush3.bf16.msra.mxu1 %v11937_v12 }
 0x64d   : > { %11653 = vmatprep.subr.bf16.mxu1 %v11938_v20 }
 0x64f   : > { %11582 = vmatmul.mubr.msk.bf16.gmra.mxu1 %vm1158_vm0, %v7498_v34 }
 0x650   : > { %11585 = vmatprep.mubr.msk.bf16.mxu1 %vm1158_vm0, %v15813_v40 }
 0x657   : > { %11586 = vmatmul.mubr.msk.bf16.gmra.mxu1 %vm1158_vm0, %v7499_v35 }
 0x658   : > { %11589 = vmatprep.mubr.msk.bf16.mxu1 %vm1158_vm0, %v15933_v2 }
 0x65f   : > { %11590 = vmatmul.mubr.msk.bf16.gmra.mxu1 %vm1158_vm0, %v7900_v19  ;;  %v16060_v59 = vpop.f32.mrf.mxu0 }
 0x660   : > { %11617 = vmatprep.mubr.msk.bf16.mxu1 %vm1158_vm0, %v15636_v27  ;;  %v16044_v27 = vpop.f32.mrf.mxu1 }
 0x661   : > { %v16062_v7 = vpop.f32.mrf.mxu0 }
 0x663   : > { %v16064_v55 = vpop.f32.mrf.mxu0 }
 0x665   : > { %v16066_v10 = vpop.f32.mrf.mxu0 }
 0x667   : > { %11618 = vmatmul.mubr.msk.bf16.vlgmr.msra.gmra.mxu1 %vm1158_vm0, %v15676_v47  ;;  %v16046_v47 = vpop.f32.mrf.mxu1 }
 0x668   : > { %11621 = vmatprep.mubr.msk.bf16.mxu1 %vm1158_vm0, %v15781_v37  ;;  %11654 = vmatpush3.bf16.msra.mxu1 %v11938_v20 }
 0x669   : > { %v16050_v37 = vpop.f32.mrf.mxu1  ;;  %11655 = vmatprep.subr.bf16.mxu1 %v11939_v17 }
 0x66b   : > { %v16052_v40 = vpop.f32.mrf.mxu1 }
 0x66c   : > { %11656 = vmatpush3.bf16.msra.mxu1 %v11939_v17 }
 0x66f   : > { %11622 = vmatmul.mubr.msk.bf16.gmra.mxu1 %vm1158_vm0, %v15816_v60  ;;  %v16054_v60 = vpop.f32.mrf.mxu1 }
 0x670   : > { %11625 = vmatprep.mubr.msk.bf16.mxu1 %vm1158_vm0, %v15918_v15 }
 0x671   : > { %v16056_v57 = vpop.f32.mrf.mxu1 }
 0x677   : > { %11626 = vmatmul.mubr.msk.bf16.gmra.mxu1 %vm1158_vm0, %v15935_v14 }
 0x678   : > { %11629 = vmatprep.mubr.bf16.mxu1 %v17264_v33 }
 0x67f   : > { %11630 = vmatmul.mubr.bf16.gmra.mxu1 %v17264_v33  ;;  %v11487_v45 = vpop.f32.mrf.mxu1  ;;  %v16068_v61 = vpop.f32.mrf.mxu0 }
 0x680   : > { %11657 = vmatprep.mubr.bf16.mxu1 %v17264_v33 }
 0x681   : > { %v16058_v38 = vpop.f32.mrf.mxu1  ;;  %v16070_v16 = vpop.f32.mrf.mxu0 }
 0x683   : > { %v11488_v18 = vpop.f32.mrf.mxu1  ;;  %v16072_v48 = vpop.f32.mrf.mxu0 }
 0x685   : > { %v7342_v36 = vpop.f32.mrf.mxu1  ;;  %v16074_v13 = vpop.f32.mrf.mxu0 }
 0x69f   : > { %v11491_v25 = vpop.f32.mrf.mxu1  ;;  %v16076_v28 = vpop.f32.mrf.mxu0 }
 0x6a1   : > { %v7355_v44 = vpop.f32.mrf.mxu1  ;;  %v16081_v62 = vpop.f32.mrf.mxu0 }
 0x6a3   : > { %v11492_v31 = vpop.f32.mrf.mxu1  ;;  %v16083_v32 = vpop.f32.mrf.mxu0 }
 0x6a5   : > { %v7358_v50 = vpop.f32.mrf.mxu1  ;;  %v16087_v58 = vpop.f32.mrf.mxu0 }
 0x6a7   : > { %v11499_v9 = vpop.f32.mrf.mxu1 }
 0x6a8   : > { %v7443_v26 = vadd.f32 %v11499_v9, %v11479_v21 }
 0x6a9   : > { %v7434_v23 = vpop.f32.mrf.mxu1 }
 0x6aa   : > { %v7435_v51 = vadd.f32 %v7434_v23, %v16039_v56 }
 0x6ab   : > { %v11500_v0 = vpop.f32.mrf.mxu1 }
 0x6ad   : > { %v7437_v4 = vpop.f32.mrf.mxu1 }
 0x6af   : > { %v11503_v63 = vpop.f32.mrf.mxu1 }
 0x6b0   : > { %v7459_v56 = vadd.f32 %v11503_v63, %v16050_v37 }
 0x6b1   : > { %v7450_v42 = vpop.f32.mrf.mxu1 }
 0x6b3   : > { %v11504_v8 = vpop.f32.mrf.mxu1 }
 0x6b5   : > { %v7453_v49 = vpop.f32.mrf.mxu1 }
 0x6b6   : > { %v7454_v63 = vadd.f32 %v7453_v49, %v16056_v57 }
 0x6b7   : > { %v11507_v3 = vpop.f32.mrf.mxu1 }
 0x6b8   : > { %v7475_v15 = vadd.f32 %v11507_v3, %v11487_v45  ;;  %v7446_v45 = vadd.f32 %v11500_v0, %v16044_v27  ;;  %v7451_v0 = vadd.f32 %v7450_v42, %v16052_v40  ;;  %v11941_v3 = vld [vmem:[%s16462_s3 + $0x168] sm:$0xff]   ;;  %v11945_v40 = vld [vmem:[%s16462_s3 + $0x160] sm:$0xff]  }
 0x6b9   : > { %v7466_v1 = vpop.f32.mrf.mxu1  ;;  %11685 = vmatprep.subr.bf16.mxu0 %v11941_v3 }
 0x6ba   : > { %11686 = vmatpush3.bf16.msra.mxu0 %v11941_v3  ;;  %v7467_v57 = vadd.f32 %v7466_v1, %v16058_v38 }
 0x6bb   : > { %v11508_v5 = vpop.f32.mrf.mxu1  ;;  %11687 = vmatprep.subr.bf16.mxu0 %v11945_v40 }
 0x6bc   : > { %v16085_v22 = vadd.f32 %v11508_v5, %v11488_v18 }
 0x6bd   : > { %v7469_v24 = vpop.f32.mrf.mxu1 }
 0x6be   : > { %v16089_v39 = vadd.f32 %v7469_v24, %v7342_v36  ;;  %v16113_v36 = vld [vmem:[%s16462_s3 + $0x128] sm:$0xff]   ;;  %11688 = vmatpush3.bf16.msra.mxu0 %v11945_v40 }
 0x6bf   : > { %v11511_v11 = vpop.f32.mrf.mxu1  ;;  %v16093_v41 = vpop.f32.mrf.mxu0  ;;  %17275 = vst [vmem:[#allocation25_spill] sm:$0xff] %v16113_v36  ;;  %11661 = vmatprep.subr.bf16.mxu1 %v16113_v36 }
 0x6c0   : > { %v16091_v46 = vadd.f32 %v11511_v11, %v11491_v25 }
 0x6c1   : > { %v7482_v53 = vpop.f32.mrf.mxu1  ;;  %v16097_v2 = vpop.f32.mrf.mxu0 }
 0x6c2   : > { %v16095_v52 = vadd.f32 %v7482_v53, %v7355_v44  ;;  %v7438_v44 = vadd.f32 %v7437_v4, %v16046_v47  ;;  %v7462_v47 = vadd.f32 %v11504_v8, %v16054_v60  ;;  %v16144_v60 = vld [vmem:[%s16462_s3 + $0x188] sm:$0xff]  }
 0x6c3   : > { %v11512_v14 = vpop.f32.mrf.mxu1  ;;  %v16101_v43 = vpop.f32.mrf.mxu0  ;;  %17276 = vst [vmem:[#allocation71_spill] sm:$0xff] %v16144_v60  ;;  %11701 = vmatprep.subr.bf16.mxu0 %v16144_v60 }
 0x6c4   : > { %v16099_v30 = vadd.f32 %v11512_v14, %v11492_v31  ;;  %17273 = vst [vmem:[#allocation127_spill] sm:$0xff] %v16101_v43 }
 0x6c5   : > { %v7485_v29 = vpop.f32.mrf.mxu1  ;;  %v16106_v35 = vpop.f32.mrf.mxu0 }
 0x6c6   : > { %v7486_v34 = vadd.f32 %v7485_v29, %v7358_v50  ;;  %17274 = vst [vmem:[#allocation67_spill] sm:$0xff] %v16106_v35 }
 0x6c7   : > { %v11519_v54 = vpop.f32.mrf.mxu1  ;;  %v16115_v25 = vpop.f32.mrf.mxu0 }
 0x6c8   : > { %v7620_v19 = vadd.f32 %v11519_v54, %v7443_v26 }
 0x6c9   : > { %v7555_v12 = vpop.f32.mrf.mxu1  ;;  %v16120_v23 = vpop.f32.mrf.mxu0 }
 0x6ca   : > { %v7618_v18 = vadd.f32 %v7555_v12, %v7435_v51 }
 0x6cb   : > { %v11520_v21 = vpop.f32.mrf.mxu1  ;;  %v16131_v24 = vpop.f32.mrf.mxu0 }
 0x6cc   : > { %v7621_v31 = vadd.f32 %v11520_v21, %v7446_v45 }
 0x6cd   : > { %v7558_v50 = vpop.f32.mrf.mxu1  ;;  %v16146_v8 = vpop.f32.mrf.mxu0 }
 0x6ce   : > { %v7619_v9 = vadd.f32 %v7558_v50, %v7438_v44 }
 0x6cf   : > { %v11523_v27 = vpop.f32.mrf.mxu1  ;;  %v16150_v26 = vpop.f32.mrf.mxu0 }
 0x6d0   : > { %v16123_v20 = vadd.f32 %v11523_v27, %v7459_v56 }
 0x6d1   : > { %v7571_v5 = vpop.f32.mrf.mxu1  ;;  %v16154_v21 = vpop.f32.mrf.mxu0 }
 0x6d2   : > { %v16129_v4 = vadd.f32 %v7571_v5, %v7451_v0 }
 0x6d3   : > { %v11524_v37 = vpop.f32.mrf.mxu1  ;;  %v16162_v1 = vpop.f32.mrf.mxu0 }
 0x6d4   : > { %v16134_v11 = vadd.f32 %v11524_v37, %v7462_v47  ;;  %17277 = vst [vmem:[#allocation26_spill] sm:$0xff] %v16162_v1 }
 0x6d5   : > { %v7574_v42 = vpop.f32.mrf.mxu1 }
 0x6d6   : > { %v16139_v53 = vadd.f32 %v7574_v42, %v7454_v63 }
 0x6d7   : > { %v11527_v14 = vpop.f32.mrf.mxu1 }
 0x6d8   : > { %v7628_v49 = vadd.f32 %v11527_v14, %v7475_v15 }
 0x6d9   : > { %v7587_v17 = vpop.f32.mrf.mxu1 }
 0x6da   : > { %v7626_v29 = vadd.f32 %v7587_v17, %v7467_v57 }
 0x6db   : > { %v11528_v54 = vpop.f32.mrf.mxu1 }
 0x6dc   : > { %v7629_v51 = vadd.f32 %v11528_v54, %v16085_v22 }
 0x6dd   : > { %v7590_v12 = vpop.f32.mrf.mxu1 }
 0x6de   : > { %v7627_v45 = vadd.f32 %v7590_v12, %v16089_v39  ;;  %v16169_v39 = vpop.f32.mrf.mxu0 }
 0x6df   : > { %v11531_v44 = vpop.f32.mrf.mxu1  ;;  %17279 = vst [vmem:[#allocation173_spill] sm:$0xff] %v16169_v39 }
 0x6e0   : > { %v16157_v50 = vadd.f32 %v11531_v44, %v16091_v46  ;;  %v16171_v37 = vpop.f32.mrf.mxu0 }
 0x6e1   : > { %v7603_v38 = vpop.f32.mrf.mxu1  ;;  %17280 = vst [vmem:[#allocation76_spill] sm:$0xff] %v16171_v37 }
 0x6e2   : > { %v16160_v15 = vadd.f32 %v7603_v38, %v16095_v52  ;;  %v16173_v14 = vpop.f32.mrf.mxu0 }
 0x6e3   : > { %v11532_v56 = vpop.f32.mrf.mxu1  ;;  %17281 = vst [vmem:[#allocation28_spill] sm:$0xff] %v16173_v14 }
 0x6e4   : > { %v16165_v27 = vadd.f32 %v11532_v56, %v16099_v30 }
 0x6e5   : > { %v7606_v22 = vpop.f32.mrf.mxu1 }
 0x6e6   : > { %v16167_v0 = vadd.f32 %v7606_v22, %v7486_v34  ;;  %v16176_v34 = vpop.f32.mrf.mxu0 }
 0x6e7   : > { %v11539_v3 = vpop.f32.mrf.mxu1  ;;  %17282 = vst [vmem:[#allocation79_spill] sm:$0xff] %v16176_v34 }
 0x6e8   : > { %17278 = vst [vmem:[#allocation172_spill] sm:$0xff] %v16167_v0  ;;  %v7753_v5 = vadd.f32 %v11539_v3, %v7620_v19  ;;  %v16178_v44 = vpop.f32.mrf.mxu0 }
 0x6e9   : > { %v7688_v47 = vpop.f32.mrf.mxu1  ;;  %17283 = vst [vmem:[#allocation29_spill] sm:$0xff] %v16178_v44 }
 0x6ea   : > { %v7751_v46 = vadd.f32 %v7688_v47, %v7618_v18  ;;  %v7886_v37 = vadd.f32 %v16060_v59, %v7753_v5 }
 0x6eb   : > { %v11540_v63 = vpop.f32.mrf.mxu1 }
 0x6ec   : > { %v7754_v52 = vadd.f32 %v11540_v63, %v7621_v31  ;;  %v16184_v31 = vpop.f32.mrf.mxu0  ;;  %v7884_v43 = vadd.f32 %v16062_v7, %v7751_v46 }
 0x6ed   : > { %v7691_v40 = vpop.f32.mrf.mxu1  ;;  %17284 = vst [vmem:[#allocation82_spill] sm:$0xff] %v16184_v31 }
 0x6ee   : > { %v7752_v42 = vadd.f32 %v7691_v40, %v7619_v9  ;;  %v16188_v47 = vpop.f32.mrf.mxu0 }
 0x6ef   : > { %v11543_v57 = vpop.f32.mrf.mxu1  ;;  %17285 = vst [vmem:[#allocation179_spill] sm:$0xff] %v16188_v47 }
 0x6f0   : > { %v7885_v30 = vadd.f32 %v16066_v10, %v7752_v42  ;;  %v16193_v60 = vpop.f32.mrf.mxu0 }
 0x6f1   : > { %v7704_v17 = vpop.f32.mrf.mxu1  ;;  %17287 = vst [vmem:[#allocation31_spill] sm:$0xff] %v16193_v60 }
 0x6f3   : > { %v11544_v54 = vpop.f32.mrf.mxu1 }
 0x6f4   : > { %v7758_v5 = vadd.f32 %v11544_v54, %v16134_v11 }
 0x6f5   : > { %v7707_v12 = vpop.f32.mrf.mxu1 }
 0x6f7   : > { %v11547_v19 = vpop.f32.mrf.mxu1 }
 0x6f8   : > { %v16180_v18 = vadd.f32 %v11547_v19, %v7628_v49  ;;  %v16199_v19 = vpop.f32.mrf.mxu0 }
 0x6f9   : > { %v7720_v38 = vpop.f32.mrf.mxu1  ;;  %17289 = vst [vmem:[#allocation32_spill] sm:$0xff] %v16199_v19 }
 0x6fa   : > { %v16182_v56 = vadd.f32 %v7720_v38, %v7626_v29 }
 0x6fb   : > { %v11548_v9 = vpop.f32.mrf.mxu1 }
 0x6fc   : > { %v16186_v22 = vadd.f32 %v11548_v9, %v7629_v51  ;;  %v11639_v9 = vpop.f32.mrf.mxu0 }
 0x6fd   : > { %v7723_v3 = vpop.f32.mrf.mxu1 }
 0x6fe   : > { %v7760_v10 = vadd.f32 %v7723_v3, %v7627_v45  ;;  %v8325_v3 = vpop.f32.mrf.mxu0  ;;  %v7895_v54 = vadd.f32 %v16083_v32, %v16186_v22 }
 0x6ff   : > { %v11551_v63 = vpop.f32.mrf.mxu1 }
 0x700   : > { %v16191_v40 = vadd.f32 %v16087_v58, %v7760_v10  ;;  %v16201_v47 = vpop.f32.mrf.mxu0  ;;  %v7765_v11 = vadd.f32 %v11551_v63, %v16157_v50 }
 0x701   : > { %v7736_v42 = vpop.f32.mrf.mxu1 }
 0x702   : > { %17286 = vst [vmem:[#allocation30_spill] sm:$0xff] %v16191_v40  ;;  %v16203_v31 = vpop.f32.mrf.mxu0 }
 0x703   : > { %v16195_v49 = vpop.f32.mrf.mxu1  ;;  %17290 = vst [vmem:[#allocation33_spill] sm:$0xff] %v16203_v31 }
 0x704   : > { %v16205_v35 = vpop.f32.mrf.mxu0 }
 0x705   : > { %v16197_v29 = vpop.f32.mrf.mxu1  ;;  %17291 = vst [vmem:[#allocation63_spill] sm:$0xff] %v16205_v35 }
 0x706   : > { %17288 = vst [vmem:[#allocation61_spill] sm:$0xff] %v16197_v29  ;;  %v16211_v40 = vpop.f32.mrf.mxu0 }
 0x707   : > { %v11579_v38 = vpop.f32.mrf.mxu1  ;;  %17294 = vst [vmem:[#allocation68_spill] sm:$0xff] %v16211_v40 }
 0x708   : > { %v8015_v1 = vadd.f32 %v11579_v38, %v7886_v37  ;;  %v16219_v29 = vpop.f32.mrf.mxu0 }
 0x709   : > { %v7950_v51 = vpop.f32.mrf.mxu1 }
 0x70a   : > { %v8013_v35 = vadd.f32 %v7950_v51, %v7884_v43  ;;  %v8140_v59 = vadd.f32 %v16115_v25, %v8015_v1  ;;  %v16230_v37 = vpop.f32.mrf.mxu0  ;;  %v17296_v22 = vld [vmem:[#allocation33_spill] sm:$0xff] }
 0x70b   : > { %v11580_v6 = vpop.f32.mrf.mxu1 }
 0x70c   : > { %v8138_v43 = vadd.f32 %v16120_v23, %v8013_v35  ;;  %v16237_v25 = vpop.f32.mrf.mxu0  ;;  %v7763_v35 = vadd.f32 %v7736_v42, %v16160_v15 }
 0x70d   : > { %v7953_v45 = vpop.f32.mrf.mxu1 }
 0x70e   : > { %v8014_v46 = vadd.f32 %v7953_v45, %v7885_v30  ;;  %v7891_v30 = vadd.f32 %v16072_v48, %v7758_v5  ;;  %v7892_v48 = vadd.f32 %v16081_v62, %v16182_v56  ;;  %v16257_v63 = vpop.f32.mrf.mxu0  ;;  %v17298_v45 = vld [vmem:[#allocation61_spill] sm:$0xff] }
 0x70f   : > { %v11583_v33 = vpop.f32.mrf.mxu1 }
 0x711   : > { %v7966_v36 = vpop.f32.mrf.mxu1 }
 0x713   : > { %v11584_v58 = vpop.f32.mrf.mxu1 }
 0x714   : > { %v8020_v15 = vadd.f32 %v11584_v58, %v7891_v30  ;;  %v17299_v58 = vld [vmem:[#allocation127_spill] sm:$0xff] }
 0x715   : > { %v7969_v10 = vpop.f32.mrf.mxu1 }
 0x717   : > { %v11587_v60 = vpop.f32.mrf.mxu1 }
 0x719   : > { %v7982_v44 = vpop.f32.mrf.mxu1 }
 0x71b   : > { %v16207_v34 = vpop.f32.mrf.mxu1 }
 0x71c   : > { %17292 = vst [vmem:[#allocation65_spill] sm:$0xff] %v16207_v34  ;;  %v7887_v34 = vadd.f32 %v16064_v55, %v7754_v52  ;;  %v7756_v55 = vadd.f32 %v7707_v12, %v16139_v53 }
 0x71d   : > { %v16209_v19 = vpop.f32.mrf.mxu1 }
 0x71e   : > { %17293 = vst [vmem:[#allocation66_spill] sm:$0xff] %v16209_v19  ;;  %v7757_v19 = vadd.f32 %v11543_v57, %v16123_v20  ;;  %v8016_v40 = vadd.f32 %v11580_v6, %v7887_v34  ;;  %v7889_v53 = vadd.f32 %v16074_v13, %v7756_v55  ;;  %v7898_v13 = vadd.f32 %v16093_v41, %v7765_v11  ;;  %v17297_v41 = vld [vmem:[#allocation172_spill] sm:$0xff] }
 0x71f   : > { %v16213_v14 = vpop.f32.mrf.mxu1 }
 0x720   : > { %17295 = vst [vmem:[#allocation34_spill] sm:$0xff] %v16213_v14  ;;  %v7755_v14 = vadd.f32 %v7704_v17, %v16129_v4  ;;  %v7890_v20 = vadd.f32 %v16068_v61, %v7757_v19  ;;  %v8141_v6 = vadd.f32 %v16131_v24, %v8016_v40  ;;  %v16245_v61 = vld [vmem:[%s16463_s4 + $0x2] ss:$0 sm:$0xff]  ;;  %v8139_v24 = vadd.f32 %v16146_v8, %v8014_v46 }
 0x721   : > { %v16216_v39 = vpop.f32.mrf.mxu1  ;;  %v8018_v8 = vadd.f32 %v7969_v10, %v7889_v53  ;;  %v7896_v40 = vadd.f32 %v16097_v2, %v7763_v35  ;;  %v16271_v2 = vpop.f32.mrf.mxu0 }
 0x722   : > { %v7888_v57 = vadd.f32 %v16070_v16, %v7755_v14  ;;  %v8019_v1 = vadd.f32 %v11583_v33, %v7890_v20  ;;  %v7894_v33 = vadd.f32 %v16076_v28, %v16180_v18  ;;  %v17304_v20 = vld [vmem:[#allocation68_spill] sm:$0xff] }
 0x723   : > { %v16221_v0 = vpop.f32.mrf.mxu1 }
 0x724   : > { %v8017_v23 = vadd.f32 %v7966_v36, %v7888_v57  ;;  %v7766_v36 = vadd.f32 %v16195_v49, %v16165_v27  ;;  %v8144_v18 = vadd.f32 %v16150_v26, %v8019_v1  ;;  %v8023_v56 = vadd.f32 %v11587_v60, %v7894_v33  ;;  %v17300_v60 = vld [vmem:[#allocation26_spill] sm:$0xff] }
 0x725   : > { %v16225_v31 = vpop.f32.mrf.mxu1  ;;  %v8021_v49 = vadd.f32 %v7982_v44, %v7892_v48  ;;  %v17302_v44 = vld [vmem:[#allocation63_spill] sm:$0xff] }
 0x726   : > { %v8142_v42 = vadd.f32 %v16154_v21, %v8017_v23  ;;  %v7899_v26 = vadd.f32 %v17299_v58, %v7766_v36  ;;  %v17307_v23 = vld [vmem:[#allocation30_spill] sm:$0xff] }
 0x727   : > { %v11619_v7 = vpop.f32.mrf.mxu1 }
 0x728   : > { %v8265_v38 = vadd.f32 %v11619_v7, %v8140_v59  ;;  %v8145_v59 = vadd.f32 %v17300_v60, %v8020_v15 }
 0x729   : > { %v8200_v52 = vpop.f32.mrf.mxu1 }
 0x72a   : > { %v8263_v4 = vadd.f32 %v8200_v52, %v8138_v43  ;;  %v8390_v17 = vadd.f32 %v11639_v9, %v8265_v38  ;;  %v17303_v38 = vld [vmem:[#allocation173_spill] sm:$0xff] }
 0x72b   : > { %v11620_v34 = vpop.f32.mrf.mxu1  ;;  %v8143_v43 = vadd.f32 %v17303_v38, %v8018_v8  ;;  %v17310_v8 = vld [vmem:[#allocation79_spill] sm:$0xff] }
 0x72c   : > { %v8266_v16 = vadd.f32 %v11620_v34, %v8141_v6  ;;  %v8388_v50 = vadd.f32 %v8325_v3, %v8263_v4  ;;  %v8411_v28 = vadd.f32 %v16245_v61, %v8390_v17  ;;  %v7764_v3 = vadd.f32 %v17298_v45, %v17297_v41  ;;  %v17305_v4 = vld [vmem:[#allocation76_spill] sm:$0xff]  ;;  %v17311_v45 = vld [vmem:[#allocation67_spill] sm:$0xff] }
 0x72d   : > { %v8203_v14 = vpop.f32.mrf.mxu1  ;;  %v8148_v6 = vadd.f32 %v17305_v4, %v8023_v56  ;;  %v17306_v34 = vld [vmem:[#allocation28_spill] sm:$0xff] }
 0x72e   : > { %v8264_v12 = vadd.f32 %v8203_v14, %v8139_v24  ;;  %v8391_v27 = vadd.f32 %v16201_v47, %v8266_v16  ;;  %v8409_v32 = vadd.f32 %v16245_v61, %v8388_v50  ;;  %v17301_v47 = vld [vmem:[#allocation65_spill] sm:$0xff]  ;;  %v8427_v21 = vmax.f32 %v8411_v28, 0.0  ;;  %v17308_v16 = vld [vmem:[#allocation66_spill] sm:$0xff]  ;;  %v8360_v50 = vpop.f32.mrf.mxu0 }
 0x72f   : > { %v11623_v62 = vpop.f32.mrf.mxu1  ;;  %v8024_v5 = vadd.f32 %v17301_v47, %v7895_v54  ;;  %v8146_v35 = vadd.f32 %v17306_v34, %v8021_v49  ;;  %v8022_v24 = vadd.f32 %v17308_v16, %v17307_v23  ;;  %v17309_v14 = vld [vmem:[#allocation34_spill] sm:$0xff]  ;;  %v7897_v58 = vadd.f32 %v17311_v45, %v7764_v3  ;;  %v17317_v45 = vld [vmem:[#allocation25_spill] sm:$0xff] }
 0x730   : > { %v8389_v19 = vadd.f32 %v17296_v22, %v8264_v12  ;;  %v8269_v51 = vadd.f32 %v11623_v62, %v8144_v18  ;;  %v8412_v55 = vadd.f32 %v16245_v61, %v8391_v27  ;;  %v8425_v11 = vmax.f32 %v8409_v32, 0.0 }
 0x731   : > { %v8216_v9 = vpop.f32.mrf.mxu1  ;;  %v8027_v36 = vadd.f32 %v17309_v14, %v7898_v13  ;;  %v8447_v15 = vsel %vm1158_vm0, %v8427_v21, -inf  ;;  %v8149_v28 = vadd.f32 %v17310_v8, %v8024_v5  ;;  %v11651_v13 = vpop.f32.mrf.mxu0 }
 0x732   : > { %v8267_v10 = vadd.f32 %v8216_v9, %v8142_v42  ;;  %v8394_v7 = vadd.f32 %v17302_v44, %v8269_v51  ;;  %v8410_v1 = vadd.f32 %v16245_v61, %v8389_v19  ;;  %v8428_v18 = vmax.f32 %v8412_v55, 0.0 }
 0x733   : > { %v11624_v46 = vpop.f32.mrf.mxu1  ;;  %v8441_v42 = vsel %vm1158_vm0, %v8425_v11, -inf  ;;  %v8373_v3 = vpop.f32.mrf.mxu0 }
 0x734   : > { %v8392_v52 = vadd.f32 %v17304_v20, %v8267_v10  ;;  %v8270_v57 = vadd.f32 %v11624_v46, %v8145_v59  ;;  %v8415_v30 = vadd.f32 %v16245_v61, %v8394_v7  ;;  %v8426_v49 = vmax.f32 %v8410_v1, 0.0  ;;  %v17313_v20 = vld [vmem:[#allocation82_spill] sm:$0xff] }
 0x735   : > { %v8219_v17 = vpop.f32.mrf.mxu1  ;;  %v8450_v5 = vsel %vm1158_vm0, %v8428_v18, -inf  ;;  %v8025_v46 = vadd.f32 %v16216_v39, %v7896_v40 }
 0x736   : > { %v8413_v53 = vadd.f32 %v16245_v61, %v8392_v52  ;;  %v8395_v33 = vadd.f32 %v16219_v29, %v8270_v57  ;;  %v8268_v48 = vadd.f32 %v8219_v17, %v8143_v43  ;;  %v8431_v54 = vmax.f32 %v8415_v30, 0.0 }
 0x737   : > { %v11627_v12 = vpop.f32.mrf.mxu1  ;;  %v8152_v52 = vadd.f32 %v17313_v20, %v8027_v36  ;;  %v8028_v57 = vadd.f32 %v16221_v0, %v7899_v26  ;;  %v8444_v4 = vsel %vm1158_vm0, %v8426_v49, -inf  ;;  %v17315_v36 = vld [vmem:[#allocation31_spill] sm:$0xff] }
 0x738   : > { %v8429_v62 = vmax.f32 %v8413_v53, 0.0  ;;  %v8416_v56 = vadd.f32 %v16245_v61, %v8395_v33  ;;  %v8393_v27 = vadd.f32 %v16230_v37, %v8268_v48  ;;  %v8448_v29 = vsel %vm1158_vm0, %v8431_v54, -inf  ;;  %v17312_v37 = vld [vmem:[#allocation29_spill] sm:$0xff]  ;;  %v11652_v48 = vpop.f32.mrf.mxu0 }
 0x739   : > { %v8273_v32 = vadd.f32 %v11627_v12, %v8148_v6  ;;  %v8232_v22 = vpop.f32.mrf.mxu1  ;;  %v8449_v19 = vmax.f32 %v8447_v15, %v8448_v29  ;;  %v8147_v47 = vadd.f32 %v17312_v37, %v8022_v24  ;;  %v17314_v24 = vld [vmem:[#allocation179_spill] sm:$0xff]  ;;  %v8153_v15 = vadd.f32 %v17315_v36, %v8028_v57  ;;  %v11943_v37 = vld [vmem:[%s16462_s3 + $0x148] sm:$0xff]  }
 0x73a   : > { %v8442_v51 = vsel %vm1158_vm0, %v8429_v62, -inf  ;;  %v8432_v9 = vmax.f32 %v8416_v56, 0.0  ;;  %v8414_v41 = vadd.f32 %v16245_v61, %v8393_v27  ;;  %v8271_v60 = vadd.f32 %v8232_v22, %v8146_v35  ;;  %v17316_v62 = vld [vmem:[#allocation32_spill] sm:$0xff]  ;;  %v11951_v36 = vld [vmem:[%s16462_s3 + $0x170] sm:$0xff]  }
 0x73b   : > { %v8443_v10 = vmax.f32 %v8441_v42, %v8442_v51  ;;  %v11628_v59 = vpop.f32.mrf.mxu1  ;;  %v8398_v43 = vadd.f32 %v16237_v25, %v8273_v32  ;;  %v8468_v1 = vsel %vm1158_vm0, %v8449_v19, -inf  ;;  %v8026_v25 = vadd.f32 %v16225_v31, %v7897_v58  ;;  %v11942_v27 = vld [vmem:[%s16462_s3 + $0x120] sm:$0xff]   ;;  %v8376_v32 = vpop.f32.mrf.mxu0 }
 0x73c   : > { %v8451_v21 = vsel %vm1158_vm0, %v8432_v9, -inf  ;;  %v8430_v44 = vmax.f32 %v8414_v41, 0.0  ;;  %v8274_v7 = vadd.f32 %v11628_v59, %v8149_v28  ;;  %v8396_v39 = vadd.f32 %v16257_v63, %v8271_v60 }
 0x73d   : > { %v8452_v38 = vmax.f32 %v8450_v5, %v8451_v21  ;;  %v8235_v55 = vpop.f32.mrf.mxu1  ;;  %v8465_v26 = vsel %vm1158_vm0, %v8443_v10, -inf  ;;  %v8419_v16 = vadd.f32 %v16245_v61, %v8398_v43  ;;  %v8150_v53 = vadd.f32 %v17314_v24, %v8025_v46 }
 0x73e   : > { %v8445_v6 = vsel %vm1158_vm0, %v8430_v44, -inf  ;;  %v8272_v11 = vadd.f32 %v8235_v55, %v8147_v47  ;;  %v8399_v35 = vadd.f32 %v16271_v2, %v8274_v7  ;;  %v8417_v31 = vadd.f32 %v16245_v61, %v8396_v39 }
 0x73f   : > { %v8469_v30 = vsel %vm1158_vm0, %v8452_v38, -inf  ;;  %v8446_v17 = vmax.f32 %v8444_v4, %v8445_v6  ;;  %v11631_v40 = vpop.f32.mrf.mxu1  ;;  %v8151_v56 = vadd.f32 %v17316_v62, %v8026_v25  ;;  %v8435_v42 = vmax.f32 %v8419_v16, 0.0 }
 0x740   : > { %v16309_v34 = vmax.f32 %v8468_v1, %v8469_v30  ;;  %v8277_v0 = vadd.f32 %v11631_v40, %v8152_v52  ;;  %v8397_v63 = vadd.f32 %v8360_v50, %v8272_v11  ;;  %v8420_v28 = vadd.f32 %v16245_v61, %v8399_v35  ;;  %v11944_v11 = vld [vmem:[%s16462_s3 + $0x140] sm:$0xff]   ;;  %v11946_v35 = vld [vmem:[%s16462_s3 + $0x158] sm:$0xff]  }
 0x741   : > { %v8466_v23 = vsel %vm1158_vm0, %v8446_v17, -inf  ;;  %v8248_v33 = vpop.f32.mrf.mxu1  ;;  %v8433_v51 = vmax.f32 %v8417_v31, 0.0  ;;  %v17318_v58 = vmov 0.0|0.0   ;;  %v8459_v47 = vsel %vm1158_vm0, %v8435_v42, -inf  ;;  %v11954_v31 = vld [vmem:[%s16462_s3 + $0x1a0] sm:$0xff]  }
 0x742   : > { %v8467_v14 = vmax.f32 %v8465_v26, %v8466_v23  ;;  %v8275_v54 = vadd.f32 %v8248_v33, %v8150_v53  ;;  %v8402_v12 = vadd.f32 %v11651_v13, %v8277_v0  ;;  %v8418_v22 = vadd.f32 %v16245_v61, %v8397_v63  ;;  %v11948_v33 = vld [vmem:[%s16462_s3 + $0x150] sm:$0xff]   ;;  %v11952_v63 = vld [vmem:[%s16462_s3 + $0x1a8] sm:$0xff]  }
 0x743   : > { %v11632_v2 = vpop.f32.mrf.mxu1  ;;  %v8436_v10 = vmax.f32 %v8420_v28, 0.0  ;;  %v17319_v43 = vmov 0.0   ;;  %v8453_v20 = vsel %vm1158_vm0, %v8433_v51, -inf }
 0x744   : > { %v8515_v8 = vpack.c.bf16 %v16309_v34, %v8467_v14  ;;  %v8278_v18 = vadd.f32 %v11632_v2, %v8153_v15  ;;  %v8423_v50 = vadd.f32 %v16245_v61, %v8402_v12  ;;  %v8400_v49 = vadd.f32 %v8373_v3, %v8275_v54  ;;  %v11953_v54 = vld [vmem:[%s16462_s3 + $0x198] sm:$0xff]   ;;  %v11955_v12 = vld [vmem:[%s16462_s3 + $0x190] sm:$0xff]  }
 0x745   : > { %v8251_v29 = vpop.f32.mrf.mxu1  ;;  %v8434_v44 = vmax.f32 %v8418_v22, 0.0  ;;  %v8514_v55 = vpack.c.bf16 %v8467_v14, %v17319_v43  ;;  %v8462_v57 = vsel %vm1158_vm0, %v8436_v10, -inf  ;;  %v8644_v16 = vpack.c.bf16 %v17319_v43, %v16309_v34  ;;  %v17320_v34 = vld [vmem:[#allocation71_spill] sm:$0xff] }
 0x746   : > { %v8276_v13 = vadd.f32 %v8251_v29, %v8151_v56  ;;  %v8403_v19 = vadd.f32 %v11652_v48, %v8278_v18  ;;  %11658 = vmatmul.mubr.msk.bf16.vlgmr.msra.gmra.mxu1 %vm1158_vm0, %v8515_v8  ;;  %11689 = vmatprep.mubr.msk.bf16.mxu0 %vm1158_vm0, %v8515_v8  ;;  %v8439_v9 = vmax.f32 %v8423_v50, 0.0  ;;  %v8421_v41 = vadd.f32 %v16245_v61, %v8400_v49  ;;  %v11949_v48 = vld [vmem:[%s16462_s3 + $0x180] sm:$0xff]   ;;  %v11950_v14 = vld [vmem:[%s16462_s3 + $0x178] sm:$0xff]  }
 0x747   : > { %11662 = vmatpush3.bf16.msra.mxu1 %v17317_v45  ;;  %11665 = vmatprep.mubr.bf16.mxu1 %v17318_v58 }
 0x748   : > { %v8424_v60 = vadd.f32 %v16245_v61, %v8403_v19  ;;  %v8401_v59 = vadd.f32 %v8376_v32, %v8276_v13  ;;  %11663 = vmatprep.subr.bf16.mxu1 %v11942_v27  ;;  %v8460_v5 = vsel %vm1158_vm0, %v8439_v9, -inf  ;;  %v8437_v21 = vmax.f32 %v8421_v41, 0.0 }
 0x749   : > { %v8461_v7 = vmax.f32 %v8459_v47, %v8460_v5 }
 0x74a   : > { %v8440_v46 = vmax.f32 %v8424_v60, 0.0  ;;  %v8422_v38 = vadd.f32 %v16245_v61, %v8401_v59  ;;  %v8454_v52 = vsel %vm1158_vm0, %v8437_v21, -inf  ;;  %v8456_v61 = vsel %vm1158_vm0, %v8434_v44, -inf }
 0x74b   : > { %11664 = vmatpush3.bf16.msra.mxu1 %v11942_v27  ;;  %v8455_v3 = vmax.f32 %v8453_v20, %v8454_v52  ;;  %v8474_v17 = vsel %vm1158_vm0, %v8461_v7, -inf }
 0x74c   : > { %v8463_v4 = vsel %vm1158_vm0, %v8440_v46, -inf  ;;  %v8438_v6 = vmax.f32 %v8422_v38, 0.0  ;;  %11669 = vmatprep.subr.bf16.mxu1 %v11943_v37 }
 0x74d   : > { %v8464_v1 = vmax.f32 %v8462_v57, %v8463_v4  ;;  %v8471_v0 = vsel %vm1158_vm0, %v8455_v3, -inf }
 0x74e   : > { %v8457_v30 = vsel %vm1158_vm0, %v8438_v6, -inf  ;;  %11666 = vmatmul.mubr.msk.bf16.vlgmr.msra.gmra.mxu1 %vm1158_vm0, %v8514_v55 }
 0x74f   : > { %v8475_v39 = vsel %vm1158_vm0, %v8464_v1, -inf  ;;  %v8458_v40 = vmax.f32 %v8456_v61, %v8457_v30  ;;  %11670 = vmatpush3.bf16.msra.mxu1 %v11943_v37  ;;  %11673 = vmatprep.mubr.bf16.mxu1 %v17318_v58 }
 0x750   : > { %v8476_v25 = vmax.f32 %v8474_v17, %v8475_v39  ;;  %11671 = vmatprep.subr.bf16.mxu1 %v11944_v11 }
 0x751   : > { %v8472_v26 = vsel %vm1158_vm0, %v8458_v40, -inf }
 0x752   : > { %v8473_v23 = vmax.f32 %v8471_v0, %v8472_v26  ;;  %v8851_v15 = vpack.c.bf16 %v17319_v43, %v8476_v25 }
 0x753   : > { %11672 = vmatpush3.bf16.msra.mxu1 %v11944_v11 }
 0x754   : > { %v8782_v24 = vpack.c.bf16 %v8476_v25, %v8473_v23  ;;  %11677 = vmatprep.subr.bf16.mxu1 %v11946_v35  ;;  %v8713_v53 = vpack.c.bf16 %v8473_v23, %v17319_v43 }
 0x756   : > { %11674 = vmatmul.mubr.msk.bf16.vlgmr.msra.gmra.mxu1 %vm1158_vm0, %v8644_v16  ;;  %11690 = vmatmul.mubr.msk.bf16.vlgmr.msra.gmra.mxu0 %vm1158_vm0, %v8782_v24 }
 0x757   : > { %11678 = vmatpush3.bf16.msra.mxu1 %v11946_v35  ;;  %11681 = vmatprep.mubr.msk.bf16.mxu1 %vm1158_vm0, %v8514_v55 }
 0x758   : > { %11702 = vmatpush3.bf16.msra.mxu0 %v17320_v34  ;;  %11705 = vmatprep.mubr.msk.bf16.mxu0 %vm1158_vm0, %v8713_v53 }
 0x759   : > { %11679 = vmatprep.subr.bf16.mxu1 %v11948_v33  ;;  %11703 = vmatprep.subr.bf16.mxu0 %v11949_v48 }
 0x75b   : > { %11680 = vmatpush3.bf16.msra.mxu1 %v11948_v33  ;;  %v10030_v33 = vld [vmem:[%s16463_s4 + $0x3] ss:$0 sm:$0xff] }
 0x75c   : > { %11704 = vmatpush3.bf16.msra.mxu0 %v11949_v48  ;;  %11693 = vmatprep.subr.bf16.mxu1 %v11950_v14 }
 0x75d   : > { %11717 = vmatprep.subr.bf16.mxu0 %v11952_v63 }
 0x75e   : > { %11682 = vmatmul.mubr.msk.bf16.vlgmr.msra.gmra.mxu1 %vm1158_vm0, %v8713_v53 }
 0x75f   : > { %11706 = vmatmul.mubr.bf16.vlgmr.msra.gmra.mxu0 %v17318_v58  ;;  %11694 = vmatpush3.bf16.msra.mxu1 %v11950_v14 }
 0x760   : > { %11697 = vmatprep.mubr.msk.bf16.mxu1 %vm1158_vm0, %v8644_v16  ;;  %11721 = vmatprep.mubr.msk.bf16.mxu0 %vm1158_vm0, %v8851_v15 }
 0x761   : > { %11695 = vmatprep.subr.bf16.mxu1 %v11951_v36  ;;  %11718 = vmatpush3.bf16.msra.mxu0 %v11952_v63 }
 0x762   : > { %11719 = vmatprep.subr.bf16.mxu0 %v11954_v31 }
 0x763   : > { %11696 = vmatpush3.bf16.msra.mxu1 %v11951_v36 }
 0x764   : > { %11709 = vmatprep.subr.bf16.mxu1 %v11953_v54 }
 0x765   : > { %11720 = vmatpush3.bf16.msra.mxu0 %v11954_v31 }
 0x766   : > { %11698 = vmatmul.mubr.msk.bf16.vlgmr.msra.gmra.mxu1 %vm1158_vm0, %v8851_v15 }
 0x767   : > { %11710 = vmatpush3.bf16.msra.mxu1 %v11953_v54  ;;  %11713 = vmatprep.mubr.msk.bf16.mxu1 %vm1158_vm0, %v8782_v24 }
 0x768   : > { %11711 = vmatprep.subr.bf16.mxu1 %v11955_v12  ;;  %11722 = vmatmul.mubr.bf16.vlgmr.msra.gmra.mxu0 %v17318_v58 }
 0x76b   : > { %11712 = vmatpush3.bf16.msra.mxu1 %v11955_v12 }
 0x76c   : > { %11725 = vmatprep.subr.mxu1 %v17319_v43 }
 0x76e   : > { %11714 = vmatmul.mubr.bf16.vlgmr.msra.gmra.mxu1 %v17318_v58 }
 0x76f   : > { %11727 = vmatprep.mubr.msk.f32.mxu1 %vm12025_vm1, %v17319_v43 }
 0x806   : > { %v11659_v2 = vpop.f32.mrf.mxu1 }
 0x808   : > { %v8565_v8 = vpop.f32.mrf.mxu1 }
 0x80a   : > { %v11660_v28 = vpop.f32.mrf.mxu1 }
 0x80c   : > { %v8568_v18 = vpop.f32.mrf.mxu1 }
 0x80e   : > { %v11667_v62 = vpop.f32.mrf.mxu1 }
 0x80f   : > { %v8638_v41 = vadd.f32 %v11667_v62, %v11659_v2 }
 0x810   : > { %v8629_v56 = vpop.f32.mrf.mxu1 }
 0x811   : > { %v8630_v10 = vadd.f32 %v8629_v56, %v8565_v8 }
 0x812   : > { %v11668_v27 = vpop.f32.mrf.mxu1 }
 0x813   : > { %v8641_v47 = vadd.f32 %v11668_v27, %v11660_v28 }
 0x814   : > { %v8632_v42 = vpop.f32.mrf.mxu1 }
 0x815   : > { %v8633_v46 = vadd.f32 %v8632_v42, %v8568_v18 }
 0x816   : > { %v11675_v50 = vpop.f32.mrf.mxu1  ;;  %v11691_v49 = vpop.f32.mrf.mxu0 }
 0x817   : > { %v8711_v60 = vadd.f32 %v11675_v50, %v8638_v41 }
 0x818   : > { %v8694_v29 = vpop.f32.mrf.mxu1  ;;  %v8832_v32 = vpop.f32.mrf.mxu0 }
 0x819   : > { %v8709_v5 = vadd.f32 %v8694_v29, %v8630_v10 }
 0x81a   : > { %v11676_v22 = vpop.f32.mrf.mxu1  ;;  %v11692_v13 = vpop.f32.mrf.mxu0 }
 0x81b   : > { %v8712_v38 = vadd.f32 %v11676_v22, %v8641_v47 }
 0x81c   : > { %v8697_v19 = vpop.f32.mrf.mxu1  ;;  %v8835_v51 = vpop.f32.mrf.mxu0 }
 0x81d   : > { %v8710_v52 = vadd.f32 %v8697_v19, %v8633_v46 }
 0x81e   : > { %v11683_v9 = vpop.f32.mrf.mxu1 }
 0x81f   : > { %v11707_v45 = vpop.f32.mrf.mxu0  ;;  %v8780_v21 = vadd.f32 %v11683_v9, %v8711_v60 }
 0x820   : > { %v8763_v58 = vpop.f32.mrf.mxu1 }
 0x821   : > { %v8966_v59 = vpop.f32.mrf.mxu0  ;;  %v8778_v43 = vadd.f32 %v8763_v58, %v8709_v5  ;;  %v8849_v57 = vadd.f32 %v11691_v49, %v8780_v21 }
 0x822   : > { %v11684_v37 = vpop.f32.mrf.mxu1 }
 0x823   : > { %v11708_v44 = vpop.f32.mrf.mxu0  ;;  %v8781_v3 = vadd.f32 %v11684_v37, %v8712_v38  ;;  %v8847_v1 = vadd.f32 %v8832_v32, %v8778_v43 }
 0x824   : > { %v8766_v7 = vpop.f32.mrf.mxu1 }
 0x825   : > { %v8969_v20 = vpop.f32.mrf.mxu0  ;;  %v8779_v6 = vadd.f32 %v8766_v7, %v8710_v52  ;;  %v8850_v39 = vadd.f32 %v11692_v13, %v8781_v3 }
 0x826   : > { %v11699_v55 = vpop.f32.mrf.mxu1 }
 0x827   : > { %v8918_v11 = vadd.f32 %v11699_v55, %v8849_v57  ;;  %v8848_v35 = vadd.f32 %v8835_v51, %v8779_v6 }
 0x828   : > { %v8901_v4 = vpop.f32.mrf.mxu1  ;;  %v11723_v30 = vpop.f32.mrf.mxu0 }
 0x829   : > { %v8916_v17 = vadd.f32 %v8901_v4, %v8847_v1  ;;  %v8983_v0 = vadd.f32 %v11707_v45, %v8918_v11 }
 0x82a   : > { %v11700_v61 = vpop.f32.mrf.mxu1  ;;  %v9096_v26 = vpop.f32.mrf.mxu0 }
 0x82b   : > { %v8919_v25 = vadd.f32 %v11700_v61, %v8850_v39  ;;  %v8981_v53 = vadd.f32 %v8966_v59, %v8916_v17  ;;  %v9137_v59 = vld [vmem:[%s239_s7] sm:$0x3] }
 0x82c   : > { %v8904_v40 = vpop.f32.mrf.mxu1  ;;  %v11724_v36 = vpop.f32.mrf.mxu0 }
 0x82d   : > { %v8917_v16 = vadd.f32 %v8904_v40, %v8848_v35  ;;  %v8984_v63 = vadd.f32 %v11708_v44, %v8919_v25 }
 0x82e   : > { %v11715_v23 = vpop.f32.mrf.mxu1  ;;  %v9099_v56 = vpop.f32.mrf.mxu0 }
 0x82f   : > { %v9048_v24 = vadd.f32 %v11715_v23, %v8983_v0  ;;  %v8982_v2 = vadd.f32 %v8969_v20, %v8917_v16 }
 0x830   : > { %v9031_v48 = vpop.f32.mrf.mxu1 }
 0x831   : > { %v9113_v34 = vadd.f32 %v11723_v30, %v9048_v24  ;;  %v9046_v14 = vadd.f32 %v9031_v48, %v8981_v53 }
 0x832   : > { %v11716_v15 = vpop.f32.mrf.mxu1 }
 0x833   : > { %v9122_v31 = vadd.f32 %v10030_v33, %v9113_v34  ;;  %v9111_v54 = vadd.f32 %v9096_v26, %v9046_v14  ;;  %v9049_v12 = vadd.f32 %v11716_v15, %v8984_v63 }
 0x834   : > { %v9034_v8 = vpop.f32.mrf.mxu1 }
 0x835   : > { %v9120_v28 = vadd.f32 %v10030_v33, %v9111_v54  ;;  %v9114_v18 = vadd.f32 %v11724_v36, %v9049_v12  ;;  %v9047_v62 = vadd.f32 %v9034_v8, %v8982_v2  ;;  %v9126_v27 = vmax.f32 %v9122_v31, 0.0 }
 0x837   : > { %v9124_v42 = vmax.f32 %v9120_v28, 0.0  ;;  %v9123_v50 = vadd.f32 %v10030_v33, %v9114_v18  ;;  %v9112_v49 = vadd.f32 %v9099_v56, %v9047_v62  ;;  %v9129_v13 = vsel %vm1158_vm0, %v9126_v27, -inf }
 0x839   : > { %v9128_v29 = vsel %vm1158_vm0, %v9124_v42, -inf  ;;  %v9127_v32 = vmax.f32 %v9123_v50, 0.0  ;;  %v9121_v22 = vadd.f32 %v10030_v33, %v9112_v49 }
 0x83a   : > { %v9130_v51 = vmax.f32 %v9128_v29, %v9129_v13 }
 0x83b   : > { %v9125_v19 = vmax.f32 %v9121_v22, 0.0  ;;  %v9132_v9 = vsel %vm1158_vm0, %v9127_v32, -inf }
 0x83c   : > { %v9134_v58 = vsel %vm1158_vm0, %v9130_v51, -inf }
 0x83d   : > { %v9131_v41 = vsel %vm1158_vm0, %v9125_v19, -inf }
 0x83e   : > { %v9133_v45 = vmax.f32 %v9131_v41, %v9132_v9 }
 0x840   : > { %v9135_v10 = vsel %vm1158_vm0, %v9133_v45, -inf }
 0x841   : > { %v9136_v60 = vmax.f32 %v9134_v58, %v9135_v10 }
 0x843   : > { %11726 = vmatpush3.msra.mxu1 %v9136_v60 }
 0x844   : > { %11728 = vmatmul.mubr.msk.f32.vlgmr.msra.gmra.mxu1 %vm9138_vm2, %v9137_v59 }
 0x904   : > { %v9208_v37 = vpop.f32.mrf.mxu1 }
 0x905   : > { %9213 = vst.msk [vmem:[%s230_s11] sm:$0x3] %vm9212_vm3, %v9208_v37 }
 0x906   : > { %v11729_v47 = vpop.f32.mrf.mxu1 }
 0x907   : > { %11974 = shalt.err (!%p11971_p3)
}
 0x908   : > { %s11975_s26 = scalar_lea.hbm %s16418_s13, 32  ;;  %s11979_s7 = scalar_lea.hbm %s16464_s5, 64 }
 0x909   : > { %p11976_p4 = scmp.ne.s32.totalorder %s16418_s13, %s11975_s26  ;;  %p11980_p9 = scmp.lt.s32.totalorder %s16418_s13, %s16464_s5 }
 0x90a   : > { %p11981_p10 = scmp.lt.s32.totalorder %s11979_s7, %s11975_s26 }
 0x90b   : > { %p11977_p7 = pnand %p11976_p4, %p12095_p5 }
 0x90c   : > { %p11982_p11 = por %p11981_p10, %p11980_p9 }
 0x90d   : > { %p11978_p8 = pneg %p11977_p7 }
 0x90f   : > { %p11983_p12 = pnand %p11982_p11, %p11978_p8 }
 0x911   : > { %11986 = shalt.err (!%p11983_p12)
}
 0x912   : > { %11730 = dma.vmem_to_hbm [thread:$0]  (%p12095_p5), %s16420_s12, 32, %s16418_s13, %s9215_s16  }
 0x913 PF: > { %p11736_p13 = scmp.ge.s32.totalorder %s12021_s21, 2  ;;  %s9240_s10 = sand.u32 1, %s12009_s18  }
 0x914   : > { %s9241_s11 = scalar_lea.sflag [#allocation3], %s9240_s10 }
 0x915   : > { %p11733_p0 = pnand %p11736_p13, %p12099_p6 }
 0x917   : > { %p11734_p1 = pneg %p11733_p0 }
 0x919   : > { %12004 = dma.done.wait (%p11734_p1), %s9241_s11, 32  }
 0x91a   : > { %12006 = vsyncadd (%p11734_p1), %s9241_s11, 4294967264  ;;  %p15_p2 = scmp.ge.s32.totalorder %s12082_s24, 4   ;;  %s17321_s18 = smov %s12013_s19 }
 0x91b   : > { %s17322_s19 = smov %s12017_s20  ;;  %s17323_s20 = smov %s12093_s27 }
 0x91c   : > { %s17324_s21 = smov %s12082_s24  ;;  %17 = sbr.rel (!%p15_p2) target bundleno = 3 (0x3), region = 80 }
 0x921   :  { %9246 = vsyncpa [#allocation3], 1 }
 0x922   :  { %9248 = vsyncpa [#allocation3 + $0x1], 1 }

</bundles_post_ra>
